<compile_context>
chip_gen: v7x
topology: tpu7x:2x2x1
jax: 0.10.0
libtpu: 0.0.40
codegen_flags: <defaults>
</compile_context>

<pallas_src>
import jax
import jax.numpy as jnp
from jax.experimental import pallas as pl
from jax.experimental.pallas import tpu as pltpu

# Samples per grid step. 32 is the cross-chip compromise: fits comfortably under
# v5e's 16 MiB default scoped VMEM with the split conv2, and keeps the grid >= 2
# steps on typical batches for v7x's two TensorCores. (64 is fine on v6e/v7x.)
B_T = 32


# ---------------------------------------------------------------------------
# Fused forward kernel (one batch tile per grid step)
# ---------------------------------------------------------------------------
def _disc_fused_kernel(p1_ref, w1d_ref, b1m_ref, w2a_ref, w2b_ref, b2_ref,
                       w3_ref, b3_ref, out_ref):
    bt = out_ref.shape[0]          # samples in this tile
    R = bt * 64                    # rows = bt x (8x8 stride-parity grid)

    # ---- Conv1: all 4 stride-parity classes via one block-diagonal K=64 matmul.
    # Invalid (spatial-padding) positions have zero patches and zero (masked)
    # bias, so they come out exactly 0 after the LeakyReLU.
    patches = p1_ref[...]                                             # (R, 64) bf16
    h = jnp.dot(patches, w1d_ref[...],
                preferred_element_type=jnp.float32)                   # (R, 256)
    h = h.reshape(bt, 64, 256) + b1m_ref[...]                         # masked f32 bias
    h = jnp.maximum(h, 0.2 * h)                                       # LeakyReLU(0.2)
    y1 = h.reshape(R, 256).astype(jnp.bfloat16)

    # ---- Conv2: two K=256 / N=256 matmuls (shift groups a=0 then a=1), with the
    # four shifted slices accumulated incrementally into y2 so the large f32
    # intermediate is only ever (bt, 8, 8, 256).
    pA = jnp.dot(y1, w2a_ref[...], preferred_element_type=jnp.float32)  # (R, 256)
    pA = pA.reshape(bt, 8, 8, 256)
    y2 = pA[:, 0:7, 0:7, 0:128] + pA[:, 0:7, 1:8, 128:256]              # (bt,7,7,128)

    pB = jnp.dot(y1, w2b_ref[...], preferred_element_type=jnp.float32)  # (R, 256)
    pB = pB.reshape(bt, 8, 8, 256)
    y2 = y2 + pB[:, 1:8, 0:7, 0:128] + pB[:, 1:8, 1:8, 128:256]

    y2 = y2 + b2_ref[...]
    y2 = jnp.maximum(y2, 0.2 * y2)                                     # LeakyReLU(0.2)

    # ---- Flatten (folded into w3's (7,7,128) layout) + Linear(6272->1) + Sigmoid.
    # Reduce spatial axes first so lanes stay 128-dense; one cross-lane reduce last.
    t = y2 * w3_ref[...]                                               # (bt,7,7,128)
    t = jnp.sum(t, axis=1)                                             # (bt,7,128)
    t = jnp.sum(t, axis=1)                                             # (bt,128)
    z = jnp.sum(t, axis=1, keepdims=True) + b3_ref[...]                # (bt,1)
    sig = 1.0 / (1.0 + jnp.exp(-z))                                    # exact sigmoid
    out_ref[...] = jnp.broadcast_to(sig, out_ref.shape).astype(out_ref.dtype)


def _pallas_forward(p1c, w1d, b1m, w2a, w2b, b2, w3k, b3, npad):
    grid = (npad // B_T,)
    rows = npad * 64
    weight_bytes = sum(a.size * a.dtype.itemsize
                       for a in (w1d, b1m, w2a, w2b, b2, w3k, b3))
    cost = pl.CostEstimate(
        flops=2 * rows * (64 * 256 + 256 * 512) + 2 * npad * 7 * 7 * 128,
        transcendentals=npad,
        bytes_accessed=rows * 64 * 2 + npad * 128 * 4 + int(weight_bytes),
    )
    return pl.pallas_call(
        _disc_fused_kernel,
        out_shape=jax.ShapeDtypeStruct((npad, 128), jnp.float32),
        grid_spec=pltpu.PrefetchScalarGridSpec(
            num_scalar_prefetch=0,
            grid=grid,
            in_specs=[
                pl.BlockSpec((B_T * 64, 64), lambda i: (i, 0)),        # patches
                pl.BlockSpec((64, 256), lambda i: (0, 0)),             # w1 (blockdiag)
                pl.BlockSpec((64, 256), lambda i: (0, 0)),             # masked bias1
                pl.BlockSpec((256, 256), lambda i: (0, 0)),            # w2 groups a=0
                pl.BlockSpec((256, 256), lambda i: (0, 0)),            # w2 groups a=1
                pl.BlockSpec((1, 128), lambda i: (0, 0)),              # bias2
                pl.BlockSpec((7, 7, 128), lambda i: (0, 0, 0)),        # w3 (permuted)
                pl.BlockSpec((1, 1), lambda i: (0, 0)),                # bias3
            ],
            out_specs=pl.BlockSpec((B_T, 128), lambda i: (i, 0)),
        ),
        compiler_params=pltpu.CompilerParams(
            dimension_semantics=("parallel",),
            vmem_limit_bytes=32 * 1024 * 1024),
        cost_estimate=cost,
    )(p1c, w1d, b1m, w2a, w2b, b2, w3k, b3)


# ---------------------------------------------------------------------------
# Parameters (torch layouts) and one-time conversion to kernel layouts
# ---------------------------------------------------------------------------
def init_params(key):
    ks = jax.random.split(key, 6)

    def u(k, shape, fan_in):
        bound = 1.0 / float(fan_in) ** 0.5
        return jax.random.uniform(k, shape, jnp.float32, -bound, bound)

    return dict(
        w1=u(ks[0], (64, 1, 4, 4), 16),      b1=u(ks[1], (64,), 16),
        w2=u(ks[2], (128, 64, 4, 4), 1024),  b2=u(ks[3], (128,), 1024),
        w3=u(ks[4], (1, 6272), 6272),        b3=u(ks[5], (1,), 6272),
    )


def prepare_params(params):
    """Convert torch-layout weights to the fused-kernel layouts (done once)."""
    # Conv1 weight: (64,1,4,4) -> (16,64); block-diagonal over 4 parity classes.
    w1 = params["w1"].reshape(64, 16).T
    w1d = jnp.kron(jnp.eye(4, dtype=jnp.float32), w1)                 # (64, 256)

    # Spatial validity mask on the padded 8x8 parity grid, folded into bias1.
    rb = jnp.arange(8)
    pr = jnp.arange(2)
    h_idx = 2 * rb[:, None] + pr[None, :] - 1                         # (8,2)
    vr = (h_idx >= 0) & (h_idx <= 13)
    mask = (vr[:, None, :, None] & vr[None, :, None, :])              # (8,8,2,2)
    mask = mask.reshape(64, 4).astype(jnp.float32)                    # [s, cls]
    b1m = (mask[:, :, None] * params["b1"][None, None, :]).reshape(64, 256)

    # Conv2 weight: rows = (parity class, ci), cols = (shift group, co); split by
    # the row-shift bit `a` into the two N=256 matmul operands.
    w2 = params["w2"].reshape(128, 64, 2, 2, 2, 2)                    # [co,ci,a,pr,c,pc]
    w2 = jnp.transpose(w2, (3, 5, 1, 2, 4, 0)).reshape(256, 512)
    w2a, w2b = w2[:, :256], w2[:, 256:]

    # Linear weight permuted to the kernel's (oh, ow, c) layout (folds the
    # PyTorch NCHW flatten into the weight).
    w3 = jnp.transpose(params["w3"].reshape(128, 7, 7), (1, 2, 0))    # (7,7,128)

    return dict(
        w1d=w1d.astype(jnp.bfloat16),
        b1m=b1m.astype(jnp.float32),
        w2a=w2a.astype(jnp.bfloat16),
        w2b=w2b.astype(jnp.bfloat16),
        b2=params["b2"].reshape(1, 128).astype(jnp.float32),
        w3k=w3.astype(jnp.float32),
        b3=params["b3"].reshape(1, 1).astype(jnp.float32),
    )


# ---------------------------------------------------------------------------
# Forward pass (wrapper does only layout glue, in bf16; hot path is the kernel)
# ---------------------------------------------------------------------------
def discriminator_forward(prepped, img_nchw):
    n = img_nchw.shape[0]
    # Cast to bf16 up-front: halves the wrapper-side layout traffic and the size
    # of the kernel's only streaming input (the conv1 patches).
    x = img_nchw.reshape(n, 28, 28).astype(jnp.bfloat16)
    xp = jnp.pad(x, ((0, 0), (1, 1), (1, 1)))                         # (n,30,30)

    # Conv1 im2col patches (k = kh*4 + kw), then regroup by stride parity so the
    # kernel can run conv1/conv2 as dense matmuls.
    cols = []
    for kh in range(4):
        for kw in range(4):
            cols.append(xp[:, kh:kh + 28:2, kw:kw + 28:2])            # (n,14,14)
    p1 = jnp.stack(cols, axis=-1)                                      # (n,14,14,16)
    p1 = jnp.pad(p1, ((0, 0), (1, 1), (1, 1), (0, 0)))                 # (n,16,16,16)
    p1 = p1.reshape(n, 8, 2, 8, 2, 16)                                 # [n,rb,pr,cb,pc,k]
    p1 = jnp.transpose(p1, (0, 1, 3, 2, 4, 5)).reshape(n, 64, 64)      # [n, s, cls*16+k]

    npad = ((n + B_T - 1) // B_T) * B_T
    if npad != n:
        p1 = jnp.pad(p1, ((0, npad - n), (0, 0), (0, 0)))
    p1 = p1.reshape(npad * 64, 64)                                     # bf16 already

    out = _pallas_forward(p1, prepped["w1d"], prepped["b1m"], prepped["w2a"],
                          prepped["w2b"], prepped["b2"], prepped["w3k"],
                          prepped["b3"], npad)
    # Only column 0 of the first n rows is meaningful (lane-dense output slab).
    return out[:n, :1]                                                 # (n, 1) f32


if __name__ == "__main__":
    key = jax.random.PRNGKey(0)
    k_img, k_par = jax.random.split(key)

    # Linear(128*7*7) implies 28x28 single-channel input.
    img = jax.random.normal(k_img, (2, 1, 28, 28), dtype=jnp.float32)
    params = init_params(k_par)
    prepped = prepare_params(params)

    fwd = jax.jit(discriminator_forward)
    out = jax.block_until_ready(fwd(prepped, img))

    assert out.shape == (2, 1), out.shape
    assert out.dtype == jnp.float32
    assert bool(jnp.all(jnp.isfinite(out)))
    assert bool(jnp.all((out >= 0.0) & (out <= 1.0)))   # exact sigmoid -> [0,1]
    print("KERNEL_OK")
</pallas_src>

<mosaic_0001>
module attributes {stable_mosaic.version = 11 : i64} {
  func.func @_disc_fused_kernel(%arg0: i32, %arg1: memref<2048x64xbf16, #tpu.memory_space<vmem>>, %arg2: memref<64x256xbf16, #tpu.memory_space<vmem>>, %arg3: memref<64x256xf32, #tpu.memory_space<vmem>>, %arg4: memref<256x256xbf16, #tpu.memory_space<vmem>>, %arg5: memref<256x256xbf16, #tpu.memory_space<vmem>>, %arg6: memref<1x128xf32, #tpu.memory_space<vmem>>, %arg7: memref<7x7x128xf32, #tpu.memory_space<vmem>>, %arg8: memref<1x1xf32, #tpu.memory_space<vmem>>, %arg9: memref<32x128xf32, #tpu.memory_space<vmem>>) attributes {dimension_semantics = [#tpu.dimension_semantics<parallel>], iteration_bounds = array<i64: 1>, scalar_prefetch = 0 : i64, scratch_operands = 0 : i64, tpu.core_type = #tpu.core_type<tc>, window_params = [{transform_indices = @transform_0, window_bounds = array<i64: 2048, 64>}, {pipeline_mode = #tpu.pipeline_mode<synchronous>, transform_indices = @transform_1, window_bounds = array<i64: 64, 256>}, {pipeline_mode = #tpu.pipeline_mode<synchronous>, transform_indices = @transform_2, window_bounds = array<i64: 64, 256>}, {pipeline_mode = #tpu.pipeline_mode<synchronous>, transform_indices = @transform_3, window_bounds = array<i64: 256, 256>}, {pipeline_mode = #tpu.pipeline_mode<synchronous>, transform_indices = @transform_4, window_bounds = array<i64: 256, 256>}, {pipeline_mode = #tpu.pipeline_mode<synchronous>, transform_indices = @transform_5, window_bounds = array<i64: 1, 128>}, {pipeline_mode = #tpu.pipeline_mode<synchronous>, transform_indices = @transform_6, window_bounds = array<i64: 7, 7, 128>}, {pipeline_mode = #tpu.pipeline_mode<synchronous>, transform_indices = @transform_7, window_bounds = array<i64: 1, 1>}, {transform_indices = @transform_8, window_bounds = array<i64: 32, 128>}]} {
    %c0 = arith.constant 0 : index
    %c0_0 = arith.constant 0 : index
    %0 = vector.load %arg1[%c0, %c0_0] : memref<2048x64xbf16, #tpu.memory_space<vmem>>, vector<2048x64xbf16>
    %c0_1 = arith.constant 0 : index
    %c0_2 = arith.constant 0 : index
    %1 = vector.load %arg2[%c0_1, %c0_2] : memref<64x256xbf16, #tpu.memory_space<vmem>>, vector<64x256xbf16>
    %cst = arith.constant dense<0.000000e+00> : vector<2048x256xf32>
    %2 = tpu.matmul %0, %1, %cst {dimension_numbers = #tpu.dot_dimension_numbers<[1], [0], [0], [1], [0, 0, 1, 1], [], []>} : vector<2048x64xbf16>, vector<64x256xbf16>, vector<2048x256xf32> -> vector<2048x256xf32>
    %3 = vector.shape_cast %2 : vector<2048x256xf32> to vector<32x64x256xf32>
    %c0_3 = arith.constant 0 : index
    %c0_4 = arith.constant 0 : index
    %4 = vector.load %arg3[%c0_3, %c0_4] : memref<64x256xf32, #tpu.memory_space<vmem>>, vector<64x256xf32>
    %5 = vector.shape_cast %4 : vector<64x256xf32> to vector<1x64x256xf32>
    %6 = vector.broadcast %5 : vector<1x64x256xf32> to vector<32x64x256xf32>
    %7 = arith.addf %3, %6 : vector<32x64x256xf32>
    %cst_5 = arith.constant 2.000000e-01 : f32
    %8 = vector.broadcast %cst_5 : f32 to vector<32x64x256xf32>
    %9 = arith.mulf %8, %7 : vector<32x64x256xf32>
    %10 = arith.maximumf %7, %9 : vector<32x64x256xf32>
    %11 = vector.shape_cast %10 : vector<32x64x256xf32> to vector<2048x256xf32>
    %12 = arith.truncf %11 : vector<2048x256xf32> to vector<2048x256xbf16>
    %c0_6 = arith.constant 0 : index
    %c0_7 = arith.constant 0 : index
    %13 = vector.load %arg4[%c0_6, %c0_7] : memref<256x256xbf16, #tpu.memory_space<vmem>>, vector<256x256xbf16>
    %cst_8 = arith.constant dense<0.000000e+00> : vector<2048x256xf32>
    %14 = tpu.matmul %12, %13, %cst_8 {dimension_numbers = #tpu.dot_dimension_numbers<[1], [0], [0], [1], [0, 0, 1, 1], [], []>} : vector<2048x256xbf16>, vector<256x256xbf16>, vector<2048x256xf32> -> vector<2048x256xf32>
    %15 = vector.shape_cast %14 : vector<2048x256xf32> to vector<32x8x8x256xf32>
    %16 = vector.extract_strided_slice %15 {offsets = [0, 0, 0, 0], sizes = [32, 7, 7, 128], strides = [1, 1, 1, 1]} : vector<32x8x8x256xf32> to vector<32x7x7x128xf32>
    %17 = vector.extract_strided_slice %15 {offsets = [0, 0, 1, 128], sizes = [32, 7, 7, 128], strides = [1, 1, 1, 1]} : vector<32x8x8x256xf32> to vector<32x7x7x128xf32>
    %18 = arith.addf %16, %17 : vector<32x7x7x128xf32>
    %c0_9 = arith.constant 0 : index
    %c0_10 = arith.constant 0 : index
    %19 = vector.load %arg5[%c0_9, %c0_10] : memref<256x256xbf16, #tpu.memory_space<vmem>>, vector<256x256xbf16>
    %cst_11 = arith.constant dense<0.000000e+00> : vector<2048x256xf32>
    %20 = tpu.matmul %12, %19, %cst_11 {dimension_numbers = #tpu.dot_dimension_numbers<[1], [0], [0], [1], [0, 0, 1, 1], [], []>} : vector<2048x256xbf16>, vector<256x256xbf16>, vector<2048x256xf32> -> vector<2048x256xf32>
    %21 = vector.shape_cast %20 : vector<2048x256xf32> to vector<32x8x8x256xf32>
    %22 = vector.extract_strided_slice %21 {offsets = [0, 1, 0, 0], sizes = [32, 7, 7, 128], strides = [1, 1, 1, 1]} : vector<32x8x8x256xf32> to vector<32x7x7x128xf32>
    %23 = arith.addf %18, %22 : vector<32x7x7x128xf32>
    %24 = vector.extract_strided_slice %21 {offsets = [0, 1, 1, 128], sizes = [32, 7, 7, 128], strides = [1, 1, 1, 1]} : vector<32x8x8x256xf32> to vector<32x7x7x128xf32>
    %25 = arith.addf %23, %24 : vector<32x7x7x128xf32>
    %c0_12 = arith.constant 0 : index
    %c0_13 = arith.constant 0 : index
    %26 = vector.load %arg6[%c0_12, %c0_13] : memref<1x128xf32, #tpu.memory_space<vmem>>, vector<1x128xf32>
    %27 = vector.shape_cast %26 : vector<1x128xf32> to vector<1x1x1x128xf32>
    %28 = vector.broadcast %27 : vector<1x1x1x128xf32> to vector<32x7x7x128xf32>
    %29 = arith.addf %25, %28 : vector<32x7x7x128xf32>
    %cst_14 = arith.constant 2.000000e-01 : f32
    %30 = vector.broadcast %cst_14 : f32 to vector<32x7x7x128xf32>
    %31 = arith.mulf %30, %29 : vector<32x7x7x128xf32>
    %32 = arith.maximumf %29, %31 : vector<32x7x7x128xf32>
    %c0_15 = arith.constant 0 : index
    %c0_16 = arith.constant 0 : index
    %c0_17 = arith.constant 0 : index
    %33 = vector.load %arg7[%c0_15, %c0_16, %c0_17] : memref<7x7x128xf32, #tpu.memory_space<vmem>>, vector<7x7x128xf32>
    %34 = vector.shape_cast %33 : vector<7x7x128xf32> to vector<1x7x7x128xf32>
    %35 = vector.broadcast %34 : vector<1x7x7x128xf32> to vector<32x7x7x128xf32>
    %36 = arith.mulf %32, %35 : vector<32x7x7x128xf32>
    %cst_18 = arith.constant dense<0.000000e+00> : vector<32x7x128xf32>
    %37 = vector.multi_reduction <add>, %36, %cst_18 [1] : vector<32x7x7x128xf32> to vector<32x7x128xf32>
    %cst_19 = arith.constant dense<0.000000e+00> : vector<32x128xf32>
    %38 = vector.multi_reduction <add>, %37, %cst_19 [1] : vector<32x7x128xf32> to vector<32x128xf32>
    %cst_20 = arith.constant dense<0.000000e+00> : vector<32xf32>
    %39 = vector.multi_reduction <add>, %38, %cst_20 [1] : vector<32x128xf32> to vector<32xf32>
    %40 = vector.shape_cast %39 : vector<32xf32> to vector<32x1xf32>
    %c0_21 = arith.constant 0 : index
    %c0_22 = arith.constant 0 : index
    %41 = vector.load %arg8[%c0_21, %c0_22] : memref<1x1xf32, #tpu.memory_space<vmem>>, vector<1x1xf32>
    %42 = vector.broadcast %41 : vector<1x1xf32> to vector<32x1xf32>
    %43 = arith.addf %40, %42 : vector<32x1xf32>
    %cst_23 = arith.constant 0.000000e+00 : f32
    %44 = vector.broadcast %cst_23 : f32 to vector<32x1xf32>
    %45 = arith.subf %44, %43 : vector<32x1xf32>
    %46 = math.exp %45 : vector<32x1xf32>
    %cst_24 = arith.constant 1.000000e+00 : f32
    %47 = vector.broadcast %cst_24 : f32 to vector<32x1xf32>
    %48 = arith.addf %47, %46 : vector<32x1xf32>
    %cst_25 = arith.constant 1.000000e+00 : f32
    %49 = vector.broadcast %cst_25 : f32 to vector<32x1xf32>
    %50 = arith.divf %49, %48 : vector<32x1xf32>
    %51 = vector.shape_cast %50 : vector<32x1xf32> to vector<32x1xf32>
    %52 = vector.broadcast %51 : vector<32x1xf32> to vector<32x128xf32>
    %c0_26 = arith.constant 0 : index
    %c0_27 = arith.constant 0 : index
    %53 = vector.load %arg9[%c0_26, %c0_27] : memref<32x128xf32, #tpu.memory_space<vmem>>, vector<32x128xf32>
    tpu.vector_store %arg9[%c0_26, %c0_27], %52 {strides = array<i32>} : memref<32x128xf32, #tpu.memory_space<vmem>>, vector<32x128xf32>,
    return
  }
  func.func @transform_0(%arg0: i32) -> (i32, i32) {
    %c0_i32 = arith.constant 0 : i32
    %c0_i32_0 = arith.constant 0 : i32
    return %arg0, %c0_i32 : i32, i32
  }
  func.func @transform_1(%arg0: i32) -> (i32, i32) {
    %c0_i32 = arith.constant 0 : i32
    %c0_i32_0 = arith.constant 0 : i32
    %c0_i32_1 = arith.constant 0 : i32
    return %c0_i32, %c0_i32_0 : i32, i32
  }
  func.func @transform_2(%arg0: i32) -> (i32, i32) {
    %c0_i32 = arith.constant 0 : i32
    %c0_i32_0 = arith.constant 0 : i32
    %c0_i32_1 = arith.constant 0 : i32
    return %c0_i32, %c0_i32_0 : i32, i32
  }
  func.func @transform_3(%arg0: i32) -> (i32, i32) {
    %c0_i32 = arith.constant 0 : i32
    %c0_i32_0 = arith.constant 0 : i32
    %c0_i32_1 = arith.constant 0 : i32
    return %c0_i32, %c0_i32_0 : i32, i32
  }
  func.func @transform_4(%arg0: i32) -> (i32, i32) {
    %c0_i32 = arith.constant 0 : i32
    %c0_i32_0 = arith.constant 0 : i32
    %c0_i32_1 = arith.constant 0 : i32
    return %c0_i32, %c0_i32_0 : i32, i32
  }
  func.func @transform_5(%arg0: i32) -> (i32, i32) {
    %c0_i32 = arith.constant 0 : i32
    %c0_i32_0 = arith.constant 0 : i32
    %c0_i32_1 = arith.constant 0 : i32
    return %c0_i32, %c0_i32_0 : i32, i32
  }
  func.func @transform_6(%arg0: i32) -> (i32, i32, i32) {
    %c0_i32 = arith.constant 0 : i32
    %c0_i32_0 = arith.constant 0 : i32
    %c0_i32_1 = arith.constant 0 : i32
    %c0_i32_2 = arith.constant 0 : i32
    return %c0_i32, %c0_i32_0, %c0_i32_1 : i32, i32, i32
  }
  func.func @transform_7(%arg0: i32) -> (i32, i32) {
    %c0_i32 = arith.constant 0 : i32
    %c0_i32_0 = arith.constant 0 : i32
    %c0_i32_1 = arith.constant 0 : i32
    return %c0_i32, %c0_i32_0 : i32, i32
  }
  func.func @transform_8(%arg0: i32) -> (i32, i32) {
    %c0_i32 = arith.constant 0 : i32
    %c0_i32_0 = arith.constant 0 : i32
    return %arg0, %c0_i32 : i32, i32
  }
}

</mosaic_0001>

<bundles_post_ra>
// kernel: discriminator_forward.1
= control target key start
LH: loop header
LB: loop body
LE: loop exit
PB: predicated region body
PF: predicated region fallthrough
CT: control target
= control target key end

     0   :  { %v15787_v1 = vmov 0   ;;  %vm976_vm0 = vcmask 523264   ;;  %vm10290_vm1 = vcmask 1046528   ;;  %vm10963_vm2 = vcmask 1041409   ;;  %s15778_s1 = inlined_call_operand.vmem [shape: bf16[64,256], index: 1, kind: input, shape index: {}]   ;;  %s15779_s0 = inlined_call_operand.vmem [shape: bf16[2048,64], index: 0, kind: input, shape index: {}]   ;;  %s15780_s3 = inlined_call_operand.vmem [shape: bf16[256,256], index: 3, kind: input, shape index: {}]   ;;  %s15781_s4 = inlined_call_operand.vmem [shape: bf16[256,256], index: 4, kind: input, shape index: {}]   ;;  %s15782_s2 = inlined_call_operand.vmem [shape: f32[64,256], index: 2, kind: input, shape index: {}]   ;;  %s15783_s5 = inlined_call_operand.vmem [shape: f32[1,128], index: 5, kind: input, shape index: {}]   ;;  %s15784_s6 = inlined_call_operand.vmem [shape: f32[7,7,128], index: 6, kind: input, shape index: {}]   ;;  %s15785_s7 = inlined_call_operand.<no memory space> [shape: f32[1,1], index: 7, kind: input, shape index: {}]   ;;  %s15786_s8 = inlined_call_operand.vmem [shape: f32[32,128], index: 8, kind: output, shape index: {}]  }
   0x1   :  { %v11414_v0 = vld [vmem:[%s15778_s1 + $0x4] ss:$8 sps:$4 sm:$0xff]   ;;  %1393 = vmatprep.mubr.bf16.mxu0 %v15787_v1  ;;  %2033 = vmatprep.mubr.bf16.mxu1 %v15787_v1  ;;  %v11416_v2 = vld [vmem:[%s15778_s1] ss:$8 sps:$4 sm:$0xff]   ;;  %v11417_v3 = vld [vmem:[%s15778_s1 + $0x14] ss:$8 sps:$4 sm:$0xff]  }
   0x2   :  { %11412 = vset.pattern.permute.xlu0 %v15787_v1  ;;  %11413 = vset.pattern.permute.xlu1 %v15787_v1  ;;  %v11419_v4 = vld [vmem:[%s15778_s1 + $0x10] ss:$8 sps:$4 sm:$0xff]   ;;  %v11420_v5 = vld [vmem:[%s15778_s1 + $0x24] ss:$8 sps:$4 sm:$0xff]   ;;  %v11422_v6 = vld [vmem:[%s15778_s1 + $0x20] ss:$8 sps:$4 sm:$0xff]  }
   0x3   :  { %1361 = vmatprep.subr.bf16.mxu0 %v11414_v0  ;;  %11403 = vmatprep.subr.bf16.mxu1 %v11414_v0  ;;  %v11423_v7 = vld [vmem:[%s15778_s1 + $0x34] ss:$8 sps:$4 sm:$0xff]   ;;  %v11425_v8 = vld [vmem:[%s15778_s1 + $0x30] ss:$8 sps:$4 sm:$0xff]   ;;  %v11430_v9 = vld [vmem:[%s15780_s3 + $0x4] ss:$8 sps:$4 sm:$0xff]  }
   0x4   :  { %1362 = vmatpush1.bf16.msra.mxu0 %v11416_v2  ;;  %11407 = vmatpush1.bf16.msra.mxu1 %v11416_v2  ;;  %v11426_v10 = vld [vmem:[%s15779_s0] sm:$0xff]   ;;  %v11442_v15 = vld [vmem:[%s15780_s3 + $0x10] ss:$8 sps:$4 sm:$0xff]   ;;  %v11444_v16 = vld [vmem:[%s15780_s3 + $0x14] ss:$8 sps:$4 sm:$0xff]   ;;  %vm10965_vm3 = vcmask 1042434  }
   0x5   :  { %1363 = vmatprep.subr.bf16.mxu0 %v11417_v3  ;;  %11404 = vmatprep.subr.bf16.mxu1 %v11417_v3  ;;  %v11433_v11 = vld [vmem:[%s15781_s4 + $0x4] ss:$8 sps:$4 sm:$0xff]   ;;  %v11428_v13 = vld [vmem:[%s15780_s3] ss:$8 sps:$4 sm:$0xff]   ;;  %v11445_v17 = vld [vmem:[%s15781_s4 + $0x10] ss:$8 sps:$4 sm:$0xff]  }
   0x6   :  { %v11427_v12 = vld [vmem:[%s15779_s0 + $0x200] sm:$0xff]   ;;  %v11447_v18 = vld [vmem:[%s15781_s4 + $0x14] ss:$8 sps:$4 sm:$0xff]   ;;  %v11434_v19 = vld [vmem:[%s15779_s0 + $0x8] sm:$0xff]   ;;  %vm10967_vm4 = vcmask 1043459   ;;  %vm10969_vm5 = vcmask 1044484  }
   0x7   :  { %v11431_v14 = vld [vmem:[%s15781_s4] ss:$8 sps:$4 sm:$0xff]   ;;  %v11436_v21 = vld [vmem:[%s15779_s0 + $0x10] sm:$0xff]   ;;  %v11458_v23 = vld [vmem:[%s15780_s3 + $0x24] ss:$8 sps:$4 sm:$0xff]   ;;  %vm10971_vm6 = vcmask 1045509  }
   0x8   :  { %1364 = vmatpush1.bf16.msra.mxu0 %v11419_v4  ;;  %11408 = vmatpush1.bf16.msra.mxu1 %v11419_v4  ;;  %v11435_v20 = vld [vmem:[%s15779_s0 + $0x208] sm:$0xff]   ;;  %v11437_v24 = vld [vmem:[%s15779_s0 + $0x210] sm:$0xff]   ;;  %v11438_v27 = vld [vmem:[%s15779_s0 + $0x18] sm:$0xff]   ;;  %vm10973_vm7 = vcmask 1046534   ;;  %vm10975_vm8 = vcmask 1047559  }
   0x9   :  { %1365 = vmatprep.subr.bf16.mxu0 %v11420_v5  ;;  %11405 = vmatprep.subr.bf16.mxu1 %v11420_v5  ;;  %v11456_v22 = vld [vmem:[%s15780_s3 + $0x20] ss:$8 sps:$4 sm:$0xff]   ;;  %v11461_v25 = vld [vmem:[%s15781_s4 + $0x24] ss:$8 sps:$4 sm:$0xff]   ;;  %v11439_v28 = vld [vmem:[%s15779_s0 + $0x218] sm:$0xff]  }
   0xa   :  { %v11459_v26 = vld [vmem:[%s15781_s4 + $0x20] ss:$8 sps:$4 sm:$0xff]   ;;  %v11470_v29 = vld [vmem:[%s15780_s3 + $0x30] ss:$8 sps:$4 sm:$0xff]   ;;  %v11472_v30 = vld [vmem:[%s15780_s3 + $0x34] ss:$8 sps:$4 sm:$0xff]  }
   0xb   :  { %v11473_v31 = vld [vmem:[%s15781_s4 + $0x30] ss:$8 sps:$4 sm:$0xff]   ;;  %v11475_v32 = vld [vmem:[%s15781_s4 + $0x34] ss:$8 sps:$4 sm:$0xff]   ;;  %v11440_v33 = vld [vmem:[%s15779_s0 + $0x20] sm:$0xff]  }
   0xc   :  { %1366 = vmatpush1.bf16.msra.mxu0 %v11422_v6  ;;  %11409 = vmatpush1.bf16.msra.mxu1 %v11422_v6  ;;  %v11441_v34 = vld [vmem:[%s15779_s0 + $0x220] sm:$0xff]   ;;  %v11448_v39 = vld [vmem:[%s15779_s0 + $0x28] sm:$0xff]   ;;  %v11450_v41 = vld [vmem:[%s15779_s0 + $0x30] sm:$0xff]  }
   0xd   :  { %1367 = vmatprep.subr.bf16.mxu0 %v11423_v7  ;;  %11406 = vmatprep.subr.bf16.mxu1 %v11423_v7  ;;  %v11484_v35 = vld [vmem:[%s15780_s3 + $0x40] ss:$8 sps:$4 sm:$0xff]   ;;  %v11486_v36 = vld [vmem:[%s15780_s3 + $0x44] ss:$8 sps:$4 sm:$0xff]   ;;  %v11498_v42 = vld [vmem:[%s15780_s3 + $0x50] ss:$8 sps:$4 sm:$0xff]  }
   0xe   :  { %v11487_v37 = vld [vmem:[%s15781_s4 + $0x40] ss:$8 sps:$4 sm:$0xff]   ;;  %v11489_v38 = vld [vmem:[%s15781_s4 + $0x44] ss:$8 sps:$4 sm:$0xff]   ;;  %v11500_v43 = vld [vmem:[%s15780_s3 + $0x54] ss:$8 sps:$4 sm:$0xff]  }
   0xf   :  { %v11449_v40 = vld [vmem:[%s15779_s0 + $0x228] sm:$0xff]   ;;  %v11451_v44 = vld [vmem:[%s15779_s0 + $0x230] sm:$0xff]   ;;  %v11452_v47 = vld [vmem:[%s15779_s0 + $0x38] sm:$0xff]  }
  0x10   :  { %1368 = vmatpush1.bf16.msra.mxu0 %v11425_v8  ;;  %11410 = vmatpush1.bf16.msra.mxu1 %v11425_v8  ;;  %v11503_v45 = vld [vmem:[%s15781_s4 + $0x54] ss:$8 sps:$4 sm:$0xff]   ;;  %v11501_v46 = vld [vmem:[%s15781_s4 + $0x50] ss:$8 sps:$4 sm:$0xff]   ;;  %v11454_v49 = vld [vmem:[%s15779_s0 + $0x40] sm:$0xff]  }
  0x11   :  { %4674 = vmatprep.subr.bf16.mxu1 %v11430_v9  ;;  %7011 = vmatprep.subr.bf16.mxu0 %v11433_v11  ;;  %v11453_v48 = vld [vmem:[%s15779_s0 + $0x238] sm:$0xff]   ;;  %v11455_v50 = vld [vmem:[%s15779_s0 + $0x240] sm:$0xff]   ;;  %v11462_v55 = vld [vmem:[%s15779_s0 + $0x48] sm:$0xff]  }
  0x12   :  { %v11512_v51 = vld [vmem:[%s15780_s3 + $0x60] ss:$8 sps:$4 sm:$0xff]   ;;  %v11514_v52 = vld [vmem:[%s15780_s3 + $0x64] ss:$8 sps:$4 sm:$0xff]   ;;  %v11464_v57 = vld [vmem:[%s15779_s0 + $0x50] sm:$0xff]  }
  0x13   :  { %11209 = vmatmul.mubr.msk.bf16.vlgmr.msra.gmra.mrb[0].mxu0 %vm976_vm0, %v11426_v10  ;;  %11273 = vmatmul.mubr.msk.bf16.vlgmr.msra.gmra.mrb[0].mxu1 %vm976_vm0, %v11427_v12  ;;  %v11515_v53 = vld [vmem:[%s15781_s4 + $0x60] ss:$8 sps:$4 sm:$0xff]   ;;  %v11517_v54 = vld [vmem:[%s15781_s4 + $0x64] ss:$8 sps:$4 sm:$0xff]   ;;  %v11465_v58 = vld [vmem:[%s15779_s0 + $0x250] sm:$0xff]  }
  0x14   :  { %4675 = vmatpush1.bf16.msra.mxu1 %v11428_v13  ;;  %7012 = vmatpush1.bf16.msra.mxu0 %v11431_v14  ;;  %v11463_v56 = vld [vmem:[%s15779_s0 + $0x248] sm:$0xff]   ;;  %v11466_v59 = vld [vmem:[%s15779_s0 + $0x58] sm:$0xff]   ;;  %v11468_v61 = vld [vmem:[%s15779_s0 + $0x60] sm:$0xff]  }
  0x15   :  { %1403 = vmatprep.mubr.bf16.mxu0 %v15787_v1  ;;  %2043 = vmatprep.mubr.bf16.mxu1 %v15787_v1  ;;  %v11467_v60 = vld [vmem:[%s15779_s0 + $0x258] sm:$0xff]   ;;  %v11469_v62 = vld [vmem:[%s15779_s0 + $0x260] sm:$0xff]   ;;  %v11476_v63 = vld [vmem:[%s15779_s0 + $0x68] sm:$0xff]  }
  0x16   :  { %4676 = vmatprep.subr.bf16.mxu1 %v11444_v16  ;;  %7013 = vmatprep.subr.bf16.mxu0 %v11447_v18  ;;  %v11477_v0 = vld [vmem:[%s15779_s0 + $0x268] sm:$0xff]   ;;  %v11526_v2 = vld [vmem:[%s15780_s3 + $0x70] ss:$8 sps:$4 sm:$0xff]   ;;  %v11528_v3 = vld [vmem:[%s15780_s3 + $0x74] ss:$8 sps:$4 sm:$0xff]  }
  0x17   :  { %v11531_v4 = vld [vmem:[%s15781_s4 + $0x74] ss:$8 sps:$4 sm:$0xff]   ;;  %v11529_v5 = vld [vmem:[%s15781_s4 + $0x70] ss:$8 sps:$4 sm:$0xff]   ;;  %v11482_v10 = vld [vmem:[%s15779_s0 + $0x80] sm:$0xff]  }
  0x18   :  { %4677 = vmatpush1.bf16.msra.mxu1 %v11442_v15  ;;  %7014 = vmatpush1.bf16.msra.mxu0 %v11445_v17  ;;  %v11478_v6 = vld [vmem:[%s15779_s0 + $0x70] sm:$0xff]   ;;  %v11480_v8 = vld [vmem:[%s15779_s0 + $0x78] sm:$0xff]   ;;  %v11483_v11 = vld [vmem:[%s15779_s0 + $0x280] sm:$0xff]  }
  0x19   :  { %4678 = vmatprep.subr.bf16.mxu1 %v11458_v23  ;;  %7015 = vmatprep.subr.bf16.mxu0 %v11461_v25  ;;  %v11479_v7 = vld [vmem:[%s15779_s0 + $0x270] sm:$0xff]   ;;  %v11481_v9 = vld [vmem:[%s15779_s0 + $0x278] sm:$0xff]   ;;  %v11490_v12 = vld [vmem:[%s15779_s0 + $0x88] sm:$0xff]  }
  0x1a   :  { %v11491_v13 = vld [vmem:[%s15779_s0 + $0x288] sm:$0xff]   ;;  %v11492_v18 = vld [vmem:[%s15779_s0 + $0x90] sm:$0xff]   ;;  %v11497_v23 = vld [vmem:[%s15779_s0 + $0x2a0] sm:$0xff]  }
  0x1b   :  { %11210 = vmatmul.mubr.msk.bf16.gmra.mrb[4].mxu0 %vm976_vm0, %v11434_v19  ;;  %11274 = vmatmul.mubr.msk.bf16.gmra.mrb[4].mxu1 %vm976_vm0, %v11435_v20  ;;  %v11540_v14 = vld [vmem:[%s15780_s3 + $0x80] ss:$8 sps:$4 sm:$0xff]   ;;  %v11542_v15 = vld [vmem:[%s15780_s3 + $0x84] ss:$8 sps:$4 sm:$0xff]   ;;  %v11493_v19 = vld [vmem:[%s15779_s0 + $0x290] sm:$0xff]  }
  0x1c   :  { %1413 = vmatprep.mubr.bf16.mxu0 %v15787_v1  ;;  %2053 = vmatprep.mubr.bf16.mxu1 %v15787_v1  ;;  %v11545_v16 = vld [vmem:[%s15781_s4 + $0x84] ss:$8 sps:$4 sm:$0xff]   ;;  %v11543_v17 = vld [vmem:[%s15781_s4 + $0x80] ss:$8 sps:$4 sm:$0xff]   ;;  %v11494_v20 = vld [vmem:[%s15779_s0 + $0x98] sm:$0xff]  }
  0x1d   :  { %4679 = vmatpush1.bf16.msra.mxu1 %v11456_v22  ;;  %7016 = vmatpush1.bf16.msra.mxu0 %v11459_v26  ;;  %v11496_v22 = vld [vmem:[%s15779_s0 + $0xa0] sm:$0xff]   ;;  %v11505_v25 = vld [vmem:[%s15779_s0 + $0x2a8] sm:$0xff]   ;;  %v11554_v26 = vld [vmem:[%s15780_s3 + $0x90] ss:$8 sps:$4 sm:$0xff]  }
  0x1e   :  { %4680 = vmatprep.subr.bf16.mxu1 %v11472_v30  ;;  %7017 = vmatprep.subr.bf16.mxu0 %v11475_v32  ;;  %v11506_v30 = vld [vmem:[%s15779_s0 + $0xb0] sm:$0xff]   ;;  %v11508_v32 = vld [vmem:[%s15779_s0 + $0xb8] sm:$0xff]  }
  0x21   :  { %4681 = vmatpush1.bf16.msra.mxu1 %v11470_v29  ;;  %7018 = vmatpush1.bf16.msra.mxu0 %v11473_v31  ;;  %v11557_v29 = vld [vmem:[%s15781_s4 + $0x90] ss:$8 sps:$4 sm:$0xff]  }
  0x22   :  { %4682 = vmatprep.subr.bf16.mxu1 %v11486_v36  ;;  %7019 = vmatprep.subr.bf16.mxu0 %v11489_v38  ;;  %v11507_v31 = vld [vmem:[%s15779_s0 + $0x2b0] sm:$0xff]   ;;  %v11518_v36 = vld [vmem:[%s15779_s0 + $0xc8] sm:$0xff]  }
  0x23   :  { %11211 = vmatmul.mubr.msk.bf16.gmra.mrb[8].mxu0 %vm976_vm0, %v11436_v21  ;;  %11275 = vmatmul.mubr.msk.bf16.gmra.mrb[8].mxu1 %vm976_vm0, %v11437_v24  ;;  %v11495_v21 = vld [vmem:[%s15779_s0 + $0x298] sm:$0xff]   ;;  %v11504_v24 = vld [vmem:[%s15779_s0 + $0xa8] sm:$0xff]  }
  0x24   :  { %1423 = vmatprep.mubr.bf16.mxu0 %v15787_v1  ;;  %2063 = vmatprep.mubr.bf16.mxu1 %v15787_v1  ;;  %v11568_v38 = vld [vmem:[%s15780_s3 + $0xa0] ss:$8 sps:$4 sm:$0xff]  }
  0x25   :  { %4683 = vmatpush1.bf16.msra.mxu1 %v11484_v35  ;;  %7020 = vmatpush1.bf16.msra.mxu0 %v11487_v37  ;;  %v11511_v35 = vld [vmem:[%s15779_s0 + $0x2c0] sm:$0xff]   ;;  %v11519_v37 = vld [vmem:[%s15779_s0 + $0x2c8] sm:$0xff]  }
  0x26   :  { %4684 = vmatprep.subr.bf16.mxu1 %v11500_v43  ;;  %7021 = vmatprep.subr.bf16.mxu0 %v11503_v45  ;;  %v11521_v43 = vld [vmem:[%s15779_s0 + $0x2d0] sm:$0xff]   ;;  %v12271_v45 = vld [vmem:[%s15782_s2 + $0x8] sm:$0xff] }
  0x29   :  { %4685 = vmatpush1.bf16.msra.mxu1 %v11498_v42  ;;  %7022 = vmatpush1.bf16.msra.mxu0 %v11501_v46  ;;  %v11520_v42 = vld [vmem:[%s15779_s0 + $0xd0] sm:$0xff]  }
  0x2a   :  { %4686 = vmatprep.subr.bf16.mxu1 %v11514_v52  ;;  %7023 = vmatprep.subr.bf16.mxu0 %v11517_v54  ;;  %v11522_v54 = vld [vmem:[%s15779_s0 + $0xd8] sm:$0xff]  }
  0x2b   :  { %11212 = vmatmul.mubr.msk.bf16.gmra.mrb[12].mxu0 %vm976_vm0, %v11438_v27  ;;  %11276 = vmatmul.mubr.msk.bf16.gmra.mrb[12].mxu1 %vm976_vm0, %v11439_v28  ;;  %v11556_v27 = vld [vmem:[%s15780_s3 + $0x94] ss:$8 sps:$4 sm:$0xff]  }
  0x2c   :  { %1433 = vmatprep.mubr.bf16.mxu0 %v15787_v1  ;;  %2073 = vmatprep.mubr.bf16.mxu1 %v15787_v1  ;;  %v11559_v28 = vld [vmem:[%s15781_s4 + $0x94] ss:$8 sps:$4 sm:$0xff]  }
  0x2d   :  { %4687 = vmatpush1.bf16.msra.mxu1 %v11512_v51  ;;  %7024 = vmatpush1.bf16.msra.mxu0 %v11515_v53  ;;  %v12283_v53 = vld [vmem:[%s15782_s2 + $0x18] sm:$0xff] }
  0x2e   :  { %4688 = vmatprep.subr.bf16.mxu1 %v11528_v3  ;;  %7025 = vmatprep.subr.bf16.mxu0 %v11531_v4 }
  0x31   :  { %4689 = vmatpush1.bf16.msra.mxu1 %v11526_v2  ;;  %7026 = vmatpush1.bf16.msra.mxu0 %v11529_v5 }
  0x32   :  { %4690 = vmatprep.subr.bf16.mxu1 %v11542_v15  ;;  %7027 = vmatprep.subr.bf16.mxu0 %v11545_v16  ;;  %v12309_v16 = vld [vmem:[%s15782_s2 + $0x28] sm:$0xff] }
  0x33   :  { %11213 = vmatmul.mubr.msk.bf16.gmra.mrb[16].mxu0 %vm976_vm0, %v11440_v33  ;;  %11277 = vmatmul.mubr.msk.bf16.gmra.mrb[16].mxu1 %vm976_vm0, %v11441_v34  ;;  %v11509_v33 = vld [vmem:[%s15779_s0 + $0x2b8] sm:$0xff]   ;;  %v11510_v34 = vld [vmem:[%s15779_s0 + $0xc0] sm:$0xff]  }
  0x34   :  { %1443 = vmatprep.mubr.bf16.mxu0 %v15787_v1  ;;  %2083 = vmatprep.mubr.bf16.mxu1 %v15787_v1 }
  0x35   :  { %4691 = vmatpush1.bf16.msra.mxu1 %v11540_v14  ;;  %7028 = vmatpush1.bf16.msra.mxu0 %v11543_v17 }
  0x36   :  { %4692 = vmatprep.subr.bf16.mxu1 %v11556_v27  ;;  %7029 = vmatprep.subr.bf16.mxu0 %v11559_v28 }
  0x39   :  { %4693 = vmatpush1.bf16.msra.mxu1 %v11554_v26  ;;  %7030 = vmatpush1.bf16.msra.mxu0 %v11557_v29 }
  0x3b   :  { %11214 = vmatmul.mubr.msk.bf16.gmra.mrb[20].mxu0 %vm976_vm0, %v11448_v39  ;;  %11278 = vmatmul.mubr.msk.bf16.gmra.mrb[20].mxu1 %vm976_vm0, %v11449_v40  ;;  %v11570_v39 = vld [vmem:[%s15780_s3 + $0xa4] ss:$8 sps:$4 sm:$0xff]  }
  0x3c   :  { %1453 = vmatprep.mubr.bf16.mxu0 %v15787_v1  ;;  %2093 = vmatprep.mubr.bf16.mxu1 %v15787_v1  ;;  %v11573_v40 = vld [vmem:[%s15781_s4 + $0xa4] ss:$8 sps:$4 sm:$0xff]  }
  0x3d   :  { %4694 = vmatprep.subr.bf16.mxu1 %v11570_v39  ;;  %7031 = vmatprep.subr.bf16.mxu0 %v11573_v40 }
  0x3e   :  { %4695 = vmatpush1.bf16.msra.mxu1 %v11568_v38 }
  0x43   :  { %11215 = vmatmul.mubr.msk.bf16.gmra.mrb[24].mxu0 %vm976_vm0, %v11450_v41  ;;  %11279 = vmatmul.mubr.msk.bf16.gmra.mrb[24].mxu1 %vm976_vm0, %v11451_v44  ;;  %v11571_v41 = vld [vmem:[%s15781_s4 + $0xa0] ss:$8 sps:$4 sm:$0xff]  }
  0x44   :  { %1463 = vmatprep.mubr.bf16.mxu0 %v15787_v1  ;;  %2103 = vmatprep.mubr.bf16.mxu1 %v15787_v1  ;;  %v12264_v44 = vld [vmem:[%s15782_s2] sm:$0xff] }
  0x45   :  { %7032 = vmatpush1.bf16.msra.mxu0 %v11571_v41 }
  0x4b   :  { %11216 = vmatmul.mubr.msk.bf16.gmra.mrb[28].mxu0 %vm976_vm0, %v11452_v47  ;;  %11280 = vmatmul.mubr.msk.bf16.gmra.mrb[28].mxu1 %vm976_vm0, %v11453_v48  ;;  %v12276_v48 = vld [vmem:[%s15782_s2 + $0x10] sm:$0xff] }
  0x4c   :  { %1473 = vmatprep.mubr.bf16.mxu0 %v15787_v1  ;;  %2113 = vmatprep.mubr.bf16.mxu1 %v15787_v1 }
  0x53   :  { %11217 = vmatmul.mubr.msk.bf16.gmra.mrb[32].mxu0 %vm976_vm0, %v11454_v49  ;;  %11281 = vmatmul.mubr.msk.bf16.gmra.mrb[32].mxu1 %vm976_vm0, %v11455_v50 }
  0x54   :  { %1483 = vmatprep.mubr.bf16.mxu0 %v15787_v1  ;;  %2123 = vmatprep.mubr.bf16.mxu1 %v15787_v1 }
  0x5b   :  { %11218 = vmatmul.mubr.msk.bf16.gmra.mrb[36].mxu0 %vm976_vm0, %v11462_v55  ;;  %11282 = vmatmul.mubr.msk.bf16.gmra.mrb[36].mxu1 %vm976_vm0, %v11463_v56  ;;  %v11523_v55 = vld [vmem:[%s15779_s0 + $0x2d8] sm:$0xff]  }
  0x5c   :  { %1493 = vmatprep.mubr.bf16.mxu0 %v15787_v1  ;;  %2133 = vmatprep.mubr.bf16.mxu1 %v15787_v1 }
  0x63   :  { %11219 = vmatmul.mubr.msk.bf16.gmra.mrb[40].mxu0 %vm976_vm0, %v11464_v57  ;;  %11283 = vmatmul.mubr.msk.bf16.gmra.mrb[40].mxu1 %vm976_vm0, %v11465_v58 }
  0x64   :  { %1503 = vmatprep.mubr.bf16.mxu0 %v15787_v1  ;;  %2143 = vmatprep.mubr.bf16.mxu1 %v15787_v1 }
  0x6b   :  { %11220 = vmatmul.mubr.msk.bf16.gmra.mrb[44].mxu0 %vm976_vm0, %v11466_v59  ;;  %11284 = vmatmul.mubr.msk.bf16.gmra.mrb[44].mxu1 %vm976_vm0, %v11467_v60 }
  0x6c   :  { %1513 = vmatprep.mubr.bf16.mxu0 %v15787_v1  ;;  %2153 = vmatprep.mubr.bf16.mxu1 %v15787_v1 }
  0x73   :  { %11221 = vmatmul.mubr.msk.bf16.gmra.mrb[48].mxu0 %vm976_vm0, %v11468_v61  ;;  %11285 = vmatmul.mubr.msk.bf16.gmra.mrb[48].mxu1 %vm976_vm0, %v11469_v62 }
  0x74   :  { %1523 = vmatprep.mubr.bf16.mxu0 %v15787_v1  ;;  %2163 = vmatprep.mubr.bf16.mxu1 %v15787_v1 }
  0x7b   :  { %11222 = vmatmul.mubr.msk.bf16.gmra.mrb[52].mxu0 %vm976_vm0, %v11476_v63  ;;  %11286 = vmatmul.mubr.msk.bf16.gmra.mrb[52].mxu1 %vm976_vm0, %v11477_v0 }
  0x7c   :  { %1533 = vmatprep.mubr.bf16.mxu0 %v15787_v1  ;;  %2173 = vmatprep.mubr.bf16.mxu1 %v15787_v1 }
  0x83   :  { %11223 = vmatmul.mubr.msk.bf16.gmra.mrb[56].mxu0 %vm976_vm0, %v11478_v6  ;;  %11287 = vmatmul.mubr.msk.bf16.gmra.mrb[56].mxu1 %vm976_vm0, %v11479_v7 }
  0x84   :  { %1543 = vmatprep.mubr.bf16.mxu0 %v15787_v1  ;;  %2183 = vmatprep.mubr.bf16.mxu1 %v15787_v1 }
  0x8b   :  { %11224 = vmatmul.mubr.msk.bf16.gmra.mrb[60].mxu0 %vm976_vm0, %v11480_v8  ;;  %11288 = vmatmul.mubr.msk.bf16.gmra.mrb[60].mxu1 %vm976_vm0, %v11481_v9 }
  0x8c   :  { %1553 = vmatprep.mubr.bf16.mxu0 %v15787_v1  ;;  %2193 = vmatprep.mubr.bf16.mxu1 %v15787_v1 }
  0x93   :  { %11225 = vmatmul.mubr.msk.bf16.gmra.mrb[64].mxu0 %vm976_vm0, %v11482_v10  ;;  %11289 = vmatmul.mubr.msk.bf16.gmra.mrb[64].mxu1 %vm976_vm0, %v11483_v11  ;;  %v12302_v11 = vld [vmem:[%s15782_s2 + $0x20] sm:$0xff] }
  0x94   :  { %1563 = vmatprep.mubr.bf16.mxu0 %v15787_v1  ;;  %2203 = vmatprep.mubr.bf16.mxu1 %v15787_v1 }
  0x9b   :  { %11226 = vmatmul.mubr.msk.bf16.gmra.mrb[68].mxu0 %vm976_vm0, %v11490_v12  ;;  %11290 = vmatmul.mubr.msk.bf16.gmra.mrb[68].mxu1 %vm976_vm0, %v11491_v13 }
  0x9c   :  { %1573 = vmatprep.mubr.bf16.mxu0 %v15787_v1  ;;  %2213 = vmatprep.mubr.bf16.mxu1 %v15787_v1 }
  0xa3   :  { %11227 = vmatmul.mubr.msk.bf16.gmra.mrb[72].mxu0 %vm976_vm0, %v11492_v18  ;;  %11291 = vmatmul.mubr.msk.bf16.gmra.mrb[72].mxu1 %vm976_vm0, %v11493_v19 }
  0xa4   :  { %1583 = vmatprep.mubr.bf16.mxu0 %v15787_v1  ;;  %2223 = vmatprep.mubr.bf16.mxu1 %v15787_v1 }
  0xab   :  { %11228 = vmatmul.mubr.msk.bf16.gmra.mrb[76].mxu0 %vm976_vm0, %v11494_v20  ;;  %11292 = vmatmul.mubr.msk.bf16.gmra.mrb[76].mxu1 %vm976_vm0, %v11495_v21 }
  0xac   :  { %1593 = vmatprep.mubr.bf16.mxu0 %v15787_v1  ;;  %2233 = vmatprep.mubr.bf16.mxu1 %v15787_v1 }
  0xb3   :  { %11229 = vmatmul.mubr.msk.bf16.gmra.mrb[80].mxu0 %vm976_vm0, %v11496_v22  ;;  %11293 = vmatmul.mubr.msk.bf16.gmra.mrb[80].mxu1 %vm976_vm0, %v11497_v23  ;;  %v12314_v23 = vld [vmem:[%s15782_s2 + $0x30] sm:$0xff] }
  0xb4   :  { %1603 = vmatprep.mubr.bf16.mxu0 %v15787_v1  ;;  %2243 = vmatprep.mubr.bf16.mxu1 %v15787_v1 }
  0xbb   :  { %11230 = vmatmul.mubr.msk.bf16.gmra.mrb[84].mxu0 %vm976_vm0, %v11504_v24  ;;  %11294 = vmatmul.mubr.msk.bf16.gmra.mrb[84].mxu1 %vm976_vm0, %v11505_v25 }
  0xbc   :  { %1613 = vmatprep.mubr.bf16.mxu0 %v15787_v1  ;;  %2253 = vmatprep.mubr.bf16.mxu1 %v15787_v1 }
  0xc3   :  { %11231 = vmatmul.mubr.msk.bf16.gmra.mrb[88].mxu0 %vm976_vm0, %v11506_v30  ;;  %11295 = vmatmul.mubr.msk.bf16.gmra.mrb[88].mxu1 %vm976_vm0, %v11507_v31  ;;  %v12325_v30 = vld [vmem:[%s15782_s2 + $0x38] sm:$0xff]  ;;  %v11524_v31 = vld [vmem:[%s15779_s0 + $0xe0] sm:$0xff]  }
  0xc4   :  { %1623 = vmatprep.mubr.bf16.mxu0 %v15787_v1  ;;  %2263 = vmatprep.mubr.bf16.mxu1 %v15787_v1 }
  0xcb   :  { %11232 = vmatmul.mubr.msk.bf16.gmra.mrb[92].mxu0 %vm976_vm0, %v11508_v32  ;;  %11296 = vmatmul.mubr.msk.bf16.gmra.mrb[92].mxu1 %vm976_vm0, %v11509_v33  ;;  %v11525_v32 = vld [vmem:[%s15779_s0 + $0x2e0] sm:$0xff]  }
  0xcc   :  { %1633 = vmatprep.mubr.bf16.mxu0 %v15787_v1  ;;  %2273 = vmatprep.mubr.bf16.mxu1 %v15787_v1 }
  0xd3   :  { %11233 = vmatmul.mubr.msk.bf16.gmra.mrb[96].mxu0 %vm976_vm0, %v11510_v34  ;;  %11297 = vmatmul.mubr.msk.bf16.gmra.mrb[96].mxu1 %vm976_vm0, %v11511_v35 }
  0xd4   :  { %1643 = vmatprep.mubr.bf16.mxu0 %v15787_v1  ;;  %2283 = vmatprep.mubr.bf16.mxu1 %v15787_v1 }
  0xdb   :  { %11234 = vmatmul.mubr.msk.bf16.gmra.mrb[100].mxu0 %vm976_vm0, %v11518_v36  ;;  %11298 = vmatmul.mubr.msk.bf16.gmra.mrb[100].mxu1 %vm976_vm0, %v11519_v37 }
  0xdc   :  { %1653 = vmatprep.mubr.bf16.mxu0 %v15787_v1  ;;  %2293 = vmatprep.mubr.bf16.mxu1 %v15787_v1 }
  0xe3   :  { %11235 = vmatmul.mubr.msk.bf16.gmra.mrb[104].mxu0 %vm976_vm0, %v11520_v42  ;;  %11299 = vmatmul.mubr.msk.bf16.gmra.mrb[104].mxu1 %vm976_vm0, %v11521_v43 }
  0xe4   :  { %1663 = vmatprep.mubr.bf16.mxu0 %v15787_v1  ;;  %2303 = vmatprep.mubr.bf16.mxu1 %v15787_v1 }
  0xe6   :  { %v1395_v46 = vpop.f32.mrb[0].mxu0  ;;  %v2035_v47 = vpop.f32.mrb[0].mxu1 }
  0xe7   :  { %v2690_v49 = vadd.f32 %v12264_v44, %v1395_v46  ;;  %v2946_v50 = vadd.f32 %v12264_v44, %v2035_v47  ;;  %v1397_v51 = vpop.f32.mrb[1].mxu0  ;;  %v2037_v52 = vpop.f32.mrb[1].mxu1 }
  0xe8   :  { %v2691_v56 = vadd.f32 %v12271_v45, %v1397_v51  ;;  %v2947_v57 = vadd.f32 %v12271_v45, %v2037_v52  ;;  %v1399_v58 = vpop.f32.mrb[2].mxu0  ;;  %v2039_v59 = vpop.f32.mrb[2].mxu1 }
  0xe9   :  { %v3202_v60 = vmul.f32 0.2, %v2690_v49  ;;  %v3458_v61 = vmul.f32 0.2, %v2946_v50  ;;  %v2692_v62 = vadd.f32 %v12276_v48, %v1399_v58  ;;  %v2948_v63 = vadd.f32 %v12276_v48, %v2039_v59  ;;  %v1401_v0 = vpop.f32.mrb[3].mxu0  ;;  %v2041_v2 = vpop.f32.mrb[3].mxu1 }
  0xea   :  { %v3203_v3 = vmul.f32 0.2, %v2691_v56  ;;  %v3459_v4 = vmul.f32 0.2, %v2947_v57  ;;  %v2693_v5 = vadd.f32 %v12283_v53, %v1401_v0  ;;  %v2949_v6 = vadd.f32 %v12283_v53, %v2041_v2 }
  0xeb   :  { %v3204_v7 = vmul.f32 0.2, %v2692_v62  ;;  %v3460_v8 = vmul.f32 0.2, %v2948_v63  ;;  %11236 = vmatmul.mubr.msk.bf16.gmra.mrb[108].mxu0 %vm976_vm0, %v11522_v54  ;;  %11300 = vmatmul.mubr.msk.bf16.gmra.mrb[108].mxu1 %vm976_vm0, %v11523_v55  ;;  %v3714_v12 = vmax.f32 %v2690_v49, %v3202_v60  ;;  %v3970_v13 = vmax.f32 %v2946_v50, %v3458_v61 }
  0xec   :  { %v3205_v9 = vmul.f32 0.2, %v2693_v5  ;;  %v3461_v10 = vmul.f32 0.2, %v2949_v6  ;;  %1673 = vmatprep.mubr.bf16.mxu0 %v15787_v1  ;;  %2313 = vmatprep.mubr.bf16.mxu1 %v15787_v1  ;;  %v3715_v17 = vmax.f32 %v2691_v56, %v3203_v3  ;;  %v3971_v18 = vmax.f32 %v2947_v57, %v3459_v4  ;;  %v12348_v57 = vld [vmem:[%s15782_s2 + $0x40] sm:$0xff] }
  0xed   :  { %v3716_v14 = vmax.f32 %v2692_v62, %v3204_v7  ;;  %v3972_v15 = vmax.f32 %v2948_v63, %v3460_v8  ;;  %v12355_v62 = vld [vmem:[%s15782_s2 + $0x48] sm:$0xff]  ;;  %v12360_v63 = vld [vmem:[%s15782_s2 + $0x50] sm:$0xff]  ;;  %v12365_v7 = vld [vmem:[%s15782_s2 + $0x58] sm:$0xff] }
  0xee   :  { %v3717_v19 = vmax.f32 %v2693_v5, %v3205_v9  ;;  %v3973_v20 = vmax.f32 %v2949_v6, %v3461_v10  ;;  %v1405_v21 = vpop.f32.mrb[4].mxu0  ;;  %v2045_v22 = vpop.f32.mrb[4].mxu1  ;;  %v11532_v8 = vld [vmem:[%s15779_s0 + $0xe8] sm:$0xff]  }
  0xef   :  { %v12316_v24 = vpack.c.bf16 %v3716_v14, %v3714_v12  ;;  %v12318_v25 = vpack.c.bf16 %v3972_v15, %v3970_v13  ;;  %v2694_v26 = vadd.f32 %v12302_v11, %v1405_v21  ;;  %v2950_v27 = vadd.f32 %v12302_v11, %v2045_v22  ;;  %v1407_v28 = vpop.f32.mrb[5].mxu0  ;;  %v2047_v29 = vpop.f32.mrb[5].mxu1  ;;  %v11533_v9 = vld [vmem:[%s15779_s0 + $0x2e8] sm:$0xff]  }
  0xf0   :  { %v2695_v33 = vadd.f32 %v12309_v16, %v1407_v28  ;;  %v2951_v34 = vadd.f32 %v12309_v16, %v2047_v29  ;;  %v1409_v35 = vpop.f32.mrb[6].mxu0  ;;  %v2049_v36 = vpop.f32.mrb[6].mxu1  ;;  %v12335_v37 = vpack.c.bf16 %v3717_v19, %v3715_v17  ;;  %v12337_v38 = vpack.c.bf16 %v3973_v20, %v3971_v18  ;;  %v11582_v18 = vld [vmem:[%s15780_s3 + $0xb0] ss:$8 sps:$4 sm:$0xff]   ;;  %v11584_v19 = vld [vmem:[%s15780_s3 + $0xb4] ss:$8 sps:$4 sm:$0xff]  }
  0xf1   :  { %16000 = vst [vmem:[#allocation3_spill] sm:$0xff] %v12318_v25  ;;  %v3206_v39 = vmul.f32 0.2, %v2694_v26  ;;  %v3462_v40 = vmul.f32 0.2, %v2950_v27  ;;  %v2696_v41 = vadd.f32 %v12314_v23, %v1409_v35  ;;  %v2952_v42 = vadd.f32 %v12314_v23, %v2049_v36  ;;  %v1411_v43 = vpop.f32.mrb[7].mxu0  ;;  %4696 = vmatprep.subr.bf16.mxu1 %v11584_v19 }
  0xf2   :  { %16001 = vst [vmem:[#allocation4_spill] sm:$0xff] %v12337_v38  ;;  %v2051_v46 = vpop.f32.mrb[7].mxu1  ;;  %v3207_v47 = vmul.f32 0.2, %v2695_v33  ;;  %v3463_v49 = vmul.f32 0.2, %v2951_v34  ;;  %v2697_v50 = vadd.f32 %v12325_v30, %v1411_v43  ;;  %4697 = vmatpush1.bf16.msra.mxu1 %v11582_v18 }
  0xf3   :  { %v2953_v51 = vadd.f32 %v12325_v30, %v2051_v46  ;;  %v3208_v52 = vmul.f32 0.2, %v2696_v41  ;;  %v3464_v54 = vmul.f32 0.2, %v2952_v42  ;;  %11237 = vmatmul.mubr.msk.bf16.gmra.mrb[112].mxu0 %vm976_vm0, %v11524_v31  ;;  %11301 = vmatmul.mubr.msk.bf16.gmra.mrb[112].mxu1 %vm976_vm0, %v11525_v32  ;;  %v3718_v58 = vmax.f32 %v2694_v26, %v3206_v39  ;;  %v11587_v28 = vld [vmem:[%s15781_s4 + $0xb4] ss:$8 sps:$4 sm:$0xff]  }
  0xf4   :  { %v3209_v55 = vmul.f32 0.2, %v2697_v50  ;;  %1683 = vmatprep.mubr.bf16.mxu0 %v15787_v1  ;;  %2323 = vmatprep.mubr.bf16.mxu1 %v15787_v1  ;;  %v3974_v59 = vmax.f32 %v2950_v27, %v3462_v40  ;;  %v3719_v0 = vmax.f32 %v2695_v33, %v3207_v47  ;;  %v3975_v2 = vmax.f32 %v2951_v34, %v3463_v49  ;;  %v11585_v27 = vld [vmem:[%s15781_s4 + $0xb0] ss:$8 sps:$4 sm:$0xff]  }
  0xf5   :  { %v3465_v56 = vmul.f32 0.2, %v2953_v51  ;;  %v3720_v60 = vmax.f32 %v2696_v41, %v3208_v52  ;;  %v3976_v61 = vmax.f32 %v2952_v42, %v3464_v54  ;;  %7033 = vmatprep.subr.bf16.mxu0 %v11587_v28  ;;  %v11535_v18 = vld [vmem:[%s15779_s0 + $0x2f0] sm:$0xff]  }
  0xf6   :  { %v3721_v3 = vmax.f32 %v2697_v50, %v3209_v55  ;;  %v1415_v5 = vpop.f32.mrb[8].mxu0  ;;  %v2055_v6 = vpop.f32.mrb[8].mxu1  ;;  %7034 = vmatpush1.bf16.msra.mxu0 %v11585_v27 }
  0xf7   :  { %v3977_v4 = vmax.f32 %v2953_v51, %v3465_v56  ;;  %v12373_v10 = vpack.c.bf16 %v3720_v60, %v3718_v58  ;;  %v12375_v12 = vpack.c.bf16 %v3976_v61, %v3974_v59  ;;  %v2698_v13 = vadd.f32 %v12348_v57, %v1415_v5  ;;  %v1417_v15 = vpop.f32.mrb[9].mxu0  ;;  %v2057_v17 = vpop.f32.mrb[9].mxu1  ;;  %v12406_v51 = vld [vmem:[%s15782_s2 + $0x60] sm:$0xff]  ;;  %v12413_v58 = vld [vmem:[%s15782_s2 + $0x68] sm:$0xff] }
  0xf8   :  { %v2954_v14 = vadd.f32 %v12348_v57, %v2055_v6  ;;  %v2699_v20 = vadd.f32 %v12355_v62, %v1417_v15  ;;  %v2955_v21 = vadd.f32 %v12355_v62, %v2057_v17  ;;  %v1419_v22 = vpop.f32.mrb[10].mxu0  ;;  %v2059_v26 = vpop.f32.mrb[10].mxu1  ;;  %v12393_v29 = vpack.c.bf16 %v3721_v3, %v3719_v0  ;;  %v12429_v15 = vld [vmem:[%s15782_s2 + $0x78] sm:$0xff]  ;;  %v11534_v17 = vld [vmem:[%s15779_s0 + $0xf0] sm:$0xff]  }
  0xf9   :  { %16002 = vst [vmem:[#allocation5_spill] sm:$0xff] %v12375_v12  ;;  %v12395_v31 = vpack.c.bf16 %v3977_v4, %v3975_v2  ;;  %v3210_v32 = vmul.f32 0.2, %v2698_v13  ;;  %v2700_v34 = vadd.f32 %v12360_v63, %v1419_v22  ;;  %v2956_v35 = vadd.f32 %v12360_v63, %v2059_v26  ;;  %v1421_v36 = vpop.f32.mrb[11].mxu0  ;;  %v2061_v39 = vpop.f32.mrb[11].mxu1  ;;  %v12418_v4 = vld [vmem:[%s15782_s2 + $0x70] sm:$0xff] }
  0xfa   :  { %v3466_v33 = vmul.f32 0.2, %v2954_v14  ;;  %v3211_v40 = vmul.f32 0.2, %v2699_v20  ;;  %v3467_v41 = vmul.f32 0.2, %v2955_v21  ;;  %v2701_v42 = vadd.f32 %v12365_v7, %v1421_v36 }
  0xfb   :  { %16003 = vst [vmem:[#allocation6_spill] sm:$0xff] %v12395_v31  ;;  %v2957_v43 = vadd.f32 %v12365_v7, %v2061_v39  ;;  %v3212_v46 = vmul.f32 0.2, %v2700_v34  ;;  %v3468_v47 = vmul.f32 0.2, %v2956_v35  ;;  %11238 = vmatmul.mubr.msk.bf16.gmra.mrb[116].mxu0 %vm976_vm0, %v11532_v8  ;;  %11302 = vmatmul.mubr.msk.bf16.gmra.mrb[116].mxu1 %vm976_vm0, %v11533_v9  ;;  %v3722_v52 = vmax.f32 %v2698_v13, %v3210_v32 }
  0xfc   :  { %v3213_v49 = vmul.f32 0.2, %v2701_v42  ;;  %1693 = vmatprep.mubr.bf16.mxu0 %v15787_v1  ;;  %2333 = vmatprep.mubr.bf16.mxu1 %v15787_v1  ;;  %v3978_v54 = vmax.f32 %v2954_v14, %v3466_v33  ;;  %v3723_v59 = vmax.f32 %v2699_v20, %v3211_v40  ;;  %v3979_v60 = vmax.f32 %v2955_v21, %v3467_v41 }
  0xfd   :  { %v3469_v50 = vmul.f32 0.2, %v2957_v43  ;;  %v3724_v55 = vmax.f32 %v2700_v34, %v3212_v46  ;;  %v3980_v56 = vmax.f32 %v2956_v35, %v3468_v47 }
  0xfe   :  { %v3725_v61 = vmax.f32 %v2701_v42, %v3213_v49  ;;  %v1425_v2 = vpop.f32.mrb[12].mxu0  ;;  %v2065_v3 = vpop.f32.mrb[12].mxu1 }
  0xff   :  { %v3981_v0 = vmax.f32 %v2957_v43, %v3469_v50  ;;  %v12420_v5 = vpack.c.bf16 %v3724_v55, %v3722_v52  ;;  %v12422_v6 = vpack.c.bf16 %v3980_v56, %v3978_v54  ;;  %v2702_v8 = vadd.f32 %v12406_v51, %v1425_v2  ;;  %v1427_v13 = vpop.f32.mrb[13].mxu0  ;;  %v2067_v14 = vpop.f32.mrb[13].mxu1 }
 0x100   :  { %v2958_v9 = vadd.f32 %v12406_v51, %v2065_v3  ;;  %v2703_v19 = vadd.f32 %v12413_v58, %v1427_v13  ;;  %v2959_v20 = vadd.f32 %v12413_v58, %v2067_v14  ;;  %v1429_v21 = vpop.f32.mrb[14].mxu0  ;;  %v2069_v22 = vpop.f32.mrb[14].mxu1  ;;  %v12439_v26 = vpack.c.bf16 %v3725_v61, %v3723_v59 }
 0x101   :  { %16004 = vst [vmem:[#allocation7_spill] sm:$0xff] %v12422_v6  ;;  %v12441_v27 = vpack.c.bf16 %v3981_v0, %v3979_v60  ;;  %v3214_v28 = vmul.f32 0.2, %v2702_v8  ;;  %v2704_v33 = vadd.f32 %v12418_v4, %v1429_v21  ;;  %v2960_v34 = vadd.f32 %v12418_v4, %v2069_v22  ;;  %v1431_v35 = vpop.f32.mrb[15].mxu0  ;;  %v2071_v36 = vpop.f32.mrb[15].mxu1 }
 0x102   :  { %v3470_v32 = vmul.f32 0.2, %v2958_v9  ;;  %v3215_v39 = vmul.f32 0.2, %v2703_v19  ;;  %v3471_v40 = vmul.f32 0.2, %v2959_v20  ;;  %v2705_v41 = vadd.f32 %v12429_v15, %v1431_v35 }
 0x103   :  { %16005 = vst [vmem:[#allocation8_spill] sm:$0xff] %v12441_v27  ;;  %v2961_v42 = vadd.f32 %v12429_v15, %v2071_v36  ;;  %v3216_v43 = vmul.f32 0.2, %v2704_v33  ;;  %v3472_v46 = vmul.f32 0.2, %v2960_v34  ;;  %11239 = vmatmul.mubr.msk.bf16.gmra.mrb[120].mxu0 %vm976_vm0, %v11534_v17  ;;  %11303 = vmatmul.mubr.msk.bf16.gmra.mrb[120].mxu1 %vm976_vm0, %v11535_v18  ;;  %v3726_v50 = vmax.f32 %v2702_v8, %v3214_v28  ;;  %v11536_v8 = vld [vmem:[%s15779_s0 + $0xf8] sm:$0xff]  }
 0x104   :  { %v3217_v47 = vmul.f32 0.2, %v2705_v41  ;;  %1703 = vmatprep.mubr.bf16.mxu0 %v15787_v1  ;;  %2343 = vmatprep.mubr.bf16.mxu1 %v15787_v1  ;;  %v3982_v52 = vmax.f32 %v2958_v9, %v3470_v32  ;;  %v3727_v56 = vmax.f32 %v2703_v19, %v3215_v39  ;;  %v3983_v59 = vmax.f32 %v2959_v20, %v3471_v40  ;;  %v11537_v9 = vld [vmem:[%s15779_s0 + $0x2f8] sm:$0xff]  }
 0x105   :  { %v3473_v49 = vmul.f32 0.2, %v2961_v42  ;;  %v3728_v54 = vmax.f32 %v2704_v33, %v3216_v43  ;;  %v3984_v55 = vmax.f32 %v2960_v34, %v3472_v46 }
 0x106   :  { %v3729_v60 = vmax.f32 %v2705_v41, %v3217_v47  ;;  %v1435_v0 = vpop.f32.mrb[16].mxu0  ;;  %v2075_v2 = vpop.f32.mrb[16].mxu1 }
 0x107   :  { %v3985_v61 = vmax.f32 %v2961_v42, %v3473_v49  ;;  %v12451_v3 = vpack.c.bf16 %v3728_v54, %v3726_v50  ;;  %v12453_v13 = vpack.c.bf16 %v3984_v55, %v3982_v52  ;;  %v2706_v14 = vadd.f32 %v12264_v44, %v1435_v0  ;;  %v1437_v18 = vpop.f32.mrb[17].mxu0  ;;  %v2077_v21 = vpop.f32.mrb[17].mxu1 }
 0x108   :  { %v2962_v17 = vadd.f32 %v12264_v44, %v2075_v2  ;;  %v2707_v19 = vadd.f32 %v12271_v45, %v1437_v18  ;;  %v2963_v20 = vadd.f32 %v12271_v45, %v2077_v21  ;;  %v1439_v22 = vpop.f32.mrb[18].mxu0  ;;  %v2079_v28 = vpop.f32.mrb[18].mxu1  ;;  %v12465_v32 = vpack.c.bf16 %v3729_v60, %v3727_v56 }
 0x109   :  { %16006 = vst [vmem:[#allocation9_spill] sm:$0xff] %v12453_v13  ;;  %v12467_v33 = vpack.c.bf16 %v3985_v61, %v3983_v59  ;;  %v3218_v34 = vmul.f32 0.2, %v2706_v14  ;;  %v2708_v36 = vadd.f32 %v12276_v48, %v1439_v22  ;;  %v2964_v39 = vadd.f32 %v12276_v48, %v2079_v28  ;;  %v1441_v40 = vpop.f32.mrb[19].mxu0  ;;  %v2081_v41 = vpop.f32.mrb[19].mxu1 }
 0x10a   :  { %v3474_v35 = vmul.f32 0.2, %v2962_v17  ;;  %v3219_v42 = vmul.f32 0.2, %v2707_v19  ;;  %v3475_v43 = vmul.f32 0.2, %v2963_v20  ;;  %v2709_v46 = vadd.f32 %v12283_v53, %v1441_v40 }
 0x10b   :  { %16007 = vst [vmem:[#allocation10_spill] sm:$0xff] %v12467_v33  ;;  %v2965_v47 = vadd.f32 %v12283_v53, %v2081_v41  ;;  %v3220_v49 = vmul.f32 0.2, %v2708_v36  ;;  %v3476_v50 = vmul.f32 0.2, %v2964_v39  ;;  %11240 = vmatmul.mubr.msk.bf16.gmra.mrb[124].mxu0 %vm976_vm0, %v11536_v8  ;;  %11304 = vmatmul.mubr.msk.bf16.gmra.mrb[124].mxu1 %vm976_vm0, %v11537_v9  ;;  %v3730_v55 = vmax.f32 %v2706_v14, %v3218_v34  ;;  %v11538_v14 = vld [vmem:[%s15779_s0 + $0x100] sm:$0xff]  }
 0x10c   :  { %v3221_v52 = vmul.f32 0.2, %v2709_v46  ;;  %1713 = vmatprep.mubr.bf16.mxu0 %v15787_v1  ;;  %2353 = vmatprep.mubr.bf16.mxu1 %v15787_v1  ;;  %v3986_v56 = vmax.f32 %v2962_v17, %v3474_v35  ;;  %v3731_v61 = vmax.f32 %v2707_v19, %v3219_v42  ;;  %v3987_v0 = vmax.f32 %v2963_v20, %v3475_v43  ;;  %v11539_v17 = vld [vmem:[%s15779_s0 + $0x300] sm:$0xff]  }
 0x10d   :  { %v3477_v54 = vmul.f32 0.2, %v2965_v47  ;;  %v3732_v59 = vmax.f32 %v2708_v36, %v3220_v49  ;;  %v3988_v60 = vmax.f32 %v2964_v39, %v3476_v50 }
 0x10e   :  { %v3733_v2 = vmax.f32 %v2709_v46, %v3221_v52  ;;  %v1445_v21 = vpop.f32.mrb[20].mxu0  ;;  %v2085_v22 = vpop.f32.mrb[20].mxu1 }
 0x10f   :  { %v3989_v18 = vmax.f32 %v2965_v47, %v3477_v54  ;;  %v12477_v28 = vpack.c.bf16 %v3732_v59, %v3730_v55  ;;  %v12479_v8 = vpack.c.bf16 %v3988_v60, %v3986_v56  ;;  %v2710_v9 = vadd.f32 %v12302_v11, %v1445_v21  ;;  %v1447_v41 = vpop.f32.mrb[21].mxu0  ;;  %v2087_v1 = vpop.f32.mrb[21].mxu1 }
 0x110   :  { %v2966_v40 = vadd.f32 %v12302_v11, %v2085_v22  ;;  %v2711_v19 = vadd.f32 %v12309_v16, %v1447_v41  ;;  %v2967_v20 = vadd.f32 %v12309_v16, %v2087_v1  ;;  %v1449_v34 = vpop.f32.mrb[22].mxu0  ;;  %v2089_v35 = vpop.f32.mrb[22].mxu1  ;;  %v12491_v36 = vpack.c.bf16 %v3733_v2, %v3731_v61 }
 0x111   :  { %16008 = vst [vmem:[#allocation11_spill] sm:$0xff] %v12479_v8  ;;  %v12493_v39 = vpack.c.bf16 %v3989_v18, %v3987_v0  ;;  %v3222_v42 = vmul.f32 0.2, %v2710_v9  ;;  %v2712_v46 = vadd.f32 %v12314_v23, %v1449_v34  ;;  %v2968_v47 = vadd.f32 %v12314_v23, %v2089_v35  ;;  %v1451_v49 = vpop.f32.mrb[23].mxu0  ;;  %v2091_v50 = vpop.f32.mrb[23].mxu1 }
 0x112   :  { %v3478_v43 = vmul.f32 0.2, %v2966_v40  ;;  %v3223_v52 = vmul.f32 0.2, %v2711_v19  ;;  %v3479_v54 = vmul.f32 0.2, %v2967_v20  ;;  %v2713_v55 = vadd.f32 %v12325_v30, %v1451_v49 }
 0x113   :  { %16009 = vst [vmem:[#allocation12_spill] sm:$0xff] %v12493_v39  ;;  %v2969_v1 = vadd.f32 %v12325_v30, %v2091_v50  ;;  %v3224_v56 = vmul.f32 0.2, %v2712_v46  ;;  %v3480_v59 = vmul.f32 0.2, %v2968_v47  ;;  %11241 = vmatmul.mubr.msk.bf16.gmra.mrb[128].mxu0 %vm976_vm0, %v11538_v14  ;;  %11305 = vmatmul.mubr.msk.bf16.gmra.mrb[128].mxu1 %vm976_vm0, %v11539_v17  ;;  %v16010_v0 = vmov 0  }
 0x114   :  { %v3225_v60 = vmul.f32 0.2, %v2713_v55  ;;  %1723 = vmatprep.mubr.bf16.mxu0 %v16010_v0  ;;  %2363 = vmatprep.mubr.bf16.mxu1 %v16010_v0  ;;  %v3734_v2 = vmax.f32 %v2710_v9, %v3222_v42  ;;  %v3990_v18 = vmax.f32 %v2966_v40, %v3478_v43  ;;  %v3735_v41 = vmax.f32 %v2711_v19, %v3223_v52  ;;  %v11546_v14 = vld [vmem:[%s15779_s0 + $0x108] sm:$0xff]  }
 0x115   :  { %v3481_v61 = vmul.f32 0.2, %v2969_v1  ;;  %v3736_v21 = vmax.f32 %v2712_v46, %v3224_v56  ;;  %v3992_v22 = vmax.f32 %v2968_v47, %v3480_v59  ;;  %v3991_v34 = vmax.f32 %v2967_v20, %v3479_v54  ;;  %v11547_v17 = vld [vmem:[%s15779_s0 + $0x308] sm:$0xff]  }
 0x116   :  { %v3737_v35 = vmax.f32 %v2713_v55, %v3225_v60  ;;  %v1455_v50 = vpop.f32.mrb[24].mxu0  ;;  %v2095_v8 = vpop.f32.mrb[24].mxu1  ;;  %v11596_v43 = vld [vmem:[%s15780_s3 + $0xc0] ss:$8 sps:$4 sm:$0xff]   ;;  %v11598_v46 = vld [vmem:[%s15780_s3 + $0xc4] ss:$8 sps:$4 sm:$0xff]  }
 0x117   :  { %v3993_v49 = vmax.f32 %v2969_v1, %v3481_v61  ;;  %v12509_v39 = vpack.c.bf16 %v3736_v21, %v3734_v2  ;;  %v12511_v9 = vpack.c.bf16 %v3992_v22, %v3990_v18  ;;  %v2714_v40 = vadd.f32 %v12348_v57, %v1455_v50  ;;  %v1457_v20 = vpop.f32.mrb[25].mxu0  ;;  %v2097_v42 = vpop.f32.mrb[25].mxu1  ;;  %v11601_v1 = vld [vmem:[%s15781_s4 + $0xc4] ss:$8 sps:$4 sm:$0xff]   ;;  %4698 = vmatprep.subr.bf16.mxu1 %v11598_v46 }
 0x118   :  { %v2970_v19 = vadd.f32 %v12348_v57, %v2095_v8  ;;  %v2715_v47 = vadd.f32 %v12355_v62, %v1457_v20  ;;  %v2971_v52 = vadd.f32 %v12355_v62, %v2097_v42  ;;  %v1459_v54 = vpop.f32.mrb[26].mxu0  ;;  %v2099_v55 = vpop.f32.mrb[26].mxu1  ;;  %v11599_v8 = vld [vmem:[%s15781_s4 + $0xc0] ss:$8 sps:$4 sm:$0xff]   ;;  %v12529_v56 = vpack.c.bf16 %v3737_v35, %v3735_v41  ;;  %4699 = vmatpush1.bf16.msra.mxu1 %v11596_v43 }
 0x119   :  { %16011 = vst [vmem:[#allocation13_spill] sm:$0xff] %v12511_v9  ;;  %v12531_v59 = vpack.c.bf16 %v3993_v49, %v3991_v34  ;;  %v3226_v60 = vmul.f32 0.2, %v2714_v40  ;;  %v2716_v2 = vadd.f32 %v12360_v63, %v1459_v54  ;;  %v2972_v18 = vadd.f32 %v12360_v63, %v2099_v55  ;;  %v1461_v21 = vpop.f32.mrb[27].mxu0  ;;  %v2101_v22 = vpop.f32.mrb[27].mxu1  ;;  %7035 = vmatprep.subr.bf16.mxu0 %v11601_v1 }
 0x11a   :  { %v3482_v61 = vmul.f32 0.2, %v2970_v19  ;;  %v3227_v50 = vmul.f32 0.2, %v2715_v47  ;;  %v3483_v20 = vmul.f32 0.2, %v2971_v52  ;;  %v2717_v42 = vadd.f32 %v12365_v7, %v1461_v21  ;;  %7036 = vmatpush1.bf16.msra.mxu0 %v11599_v8 }
 0x11b   :  { %16012 = vst [vmem:[#allocation14_spill] sm:$0xff] %v12531_v59  ;;  %v2973_v9 = vadd.f32 %v12365_v7, %v2101_v22  ;;  %v3228_v41 = vmul.f32 0.2, %v2716_v2  ;;  %v3484_v34 = vmul.f32 0.2, %v2972_v18  ;;  %11242 = vmatmul.mubr.msk.bf16.gmra.mrb[132].mxu0 %vm976_vm0, %v11546_v14  ;;  %11306 = vmatmul.mubr.msk.bf16.gmra.mrb[132].mxu1 %vm976_vm0, %v11547_v17  ;;  %v3738_v46 = vmax.f32 %v2714_v40, %v3226_v60 }
 0x11c   :  { %v3229_v35 = vmul.f32 0.2, %v2717_v42  ;;  %1733 = vmatprep.mubr.bf16.mxu0 %v16010_v0  ;;  %2373 = vmatprep.mubr.bf16.mxu1 %v16010_v0  ;;  %v3994_v54 = vmax.f32 %v2970_v19, %v3482_v61  ;;  %v3739_v22 = vmax.f32 %v2715_v47, %v3227_v50  ;;  %v3995_v43 = vmax.f32 %v2971_v52, %v3483_v20  ;;  %v11548_v19 = vld [vmem:[%s15779_s0 + $0x110] sm:$0xff]  }
 0x11d   :  { %v3485_v49 = vmul.f32 0.2, %v2973_v9  ;;  %v3740_v55 = vmax.f32 %v2716_v2, %v3228_v41  ;;  %v3996_v21 = vmax.f32 %v2972_v18, %v3484_v34 }
 0x11e   :  { %v3741_v1 = vmax.f32 %v2717_v42, %v3229_v35  ;;  %v1465_v13 = vpop.f32.mrb[28].mxu0  ;;  %v2105_v33 = vpop.f32.mrb[28].mxu1 }
 0x11f   :  { %v3997_v59 = vmax.f32 %v2973_v9, %v3485_v49  ;;  %v12541_v14 = vpack.c.bf16 %v3740_v55, %v3738_v46  ;;  %v12543_v17 = vpack.c.bf16 %v3996_v21, %v3994_v54  ;;  %v2718_v6 = vadd.f32 %v12406_v51, %v1465_v13  ;;  %v1467_v12 = vpop.f32.mrb[29].mxu0  ;;  %v2107_v40 = vpop.f32.mrb[29].mxu1  ;;  %v11549_v9 = vld [vmem:[%s15779_s0 + $0x310] sm:$0xff]  }
 0x120   :  { %v2974_v27 = vadd.f32 %v12406_v51, %v2105_v33  ;;  %v2719_v47 = vadd.f32 %v12413_v58, %v1467_v12  ;;  %v2975_v52 = vadd.f32 %v12413_v58, %v2107_v40  ;;  %v1469_v8 = vpop.f32.mrb[30].mxu0  ;;  %v2109_v60 = vpop.f32.mrb[30].mxu1  ;;  %v12555_v61 = vpack.c.bf16 %v3741_v1, %v3739_v22 }
 0x121   :  { %16013 = vst [vmem:[#allocation15_spill] sm:$0xff] %v12543_v17  ;;  %v12557_v13 = vpack.c.bf16 %v3997_v59, %v3995_v43  ;;  %v3230_v33 = vmul.f32 0.2, %v2718_v6  ;;  %v2720_v18 = vadd.f32 %v12418_v4, %v1469_v8  ;;  %v2976_v50 = vadd.f32 %v12418_v4, %v2109_v60  ;;  %v1471_v20 = vpop.f32.mrb[31].mxu0  ;;  %v2111_v42 = vpop.f32.mrb[31].mxu1 }
 0x122   :  { %v3486_v2 = vmul.f32 0.2, %v2974_v27  ;;  %v3231_v41 = vmul.f32 0.2, %v2719_v47  ;;  %v3487_v34 = vmul.f32 0.2, %v2975_v52  ;;  %v2721_v12 = vadd.f32 %v12429_v15, %v1471_v20 }
 0x123   :  { %16014 = vst [vmem:[#allocation16_spill] sm:$0xff] %v12557_v13  ;;  %v2977_v35 = vadd.f32 %v12429_v15, %v2111_v42  ;;  %v3232_v49 = vmul.f32 0.2, %v2720_v18  ;;  %v3488_v46 = vmul.f32 0.2, %v2976_v50  ;;  %11243 = vmatmul.mubr.msk.bf16.gmra.mrb[136].mxu0 %vm976_vm0, %v11548_v19  ;;  %11307 = vmatmul.mubr.msk.bf16.gmra.mrb[136].mxu1 %vm976_vm0, %v11549_v9  ;;  %v3742_v55 = vmax.f32 %v2718_v6, %v3230_v33  ;;  %v11550_v6 = vld [vmem:[%s15779_s0 + $0x118] sm:$0xff]  }
 0x124   :  { %v3233_v59 = vmul.f32 0.2, %v2721_v12  ;;  %1743 = vmatprep.mubr.bf16.mxu0 %v16010_v0  ;;  %2383 = vmatprep.mubr.bf16.mxu1 %v16010_v0  ;;  %v3998_v21 = vmax.f32 %v2974_v27, %v3486_v2  ;;  %v3743_v1 = vmax.f32 %v2719_v47, %v3231_v41  ;;  %v3999_v40 = vmax.f32 %v2975_v52, %v3487_v34  ;;  %v11551_v27 = vld [vmem:[%s15779_s0 + $0x318] sm:$0xff]  }
 0x125   :  { %v3489_v54 = vmul.f32 0.2, %v2977_v35  ;;  %v3744_v22 = vmax.f32 %v2720_v18, %v3232_v49  ;;  %v4000_v43 = vmax.f32 %v2976_v50, %v3488_v46 }
 0x126   :  { %v3745_v8 = vmax.f32 %v2721_v12, %v3233_v59  ;;  %v1475_v20 = vpop.f32.mrb[32].mxu0  ;;  %v2115_v42 = vpop.f32.mrb[32].mxu1 }
 0x127   :  { %v4001_v60 = vmax.f32 %v2977_v35, %v3489_v54  ;;  %v12567_v17 = vpack.c.bf16 %v3744_v22, %v3742_v55  ;;  %v12569_v19 = vpack.c.bf16 %v4000_v43, %v3998_v21  ;;  %v2722_v9 = vadd.f32 %v12264_v44, %v1475_v20  ;;  %v1477_v31 = vpop.f32.mrb[33].mxu0  ;;  %v2117_v25 = vpop.f32.mrb[33].mxu1 }
 0x128   :  { %v2978_v13 = vadd.f32 %v12264_v44, %v2115_v42  ;;  %v2723_v47 = vadd.f32 %v12271_v45, %v1477_v31  ;;  %v2979_v52 = vadd.f32 %v12271_v45, %v2117_v25  ;;  %v1479_v33 = vpop.f32.mrb[34].mxu0  ;;  %v2119_v2 = vpop.f32.mrb[34].mxu1  ;;  %v12581_v18 = vpack.c.bf16 %v3745_v8, %v3743_v1 }
 0x129   :  { %16015 = vst [vmem:[#allocation17_spill] sm:$0xff] %v12567_v17  ;;  %16016 = vst [vmem:[#allocation18_spill] sm:$0xff] %v12569_v19  ;;  %v12583_v50 = vpack.c.bf16 %v4001_v60, %v3999_v40  ;;  %v3234_v44 = vmul.f32 0.2, %v2722_v9  ;;  %v2724_v34 = vadd.f32 %v12276_v48, %v1479_v33  ;;  %v2980_v12 = vadd.f32 %v12276_v48, %v2119_v2  ;;  %v1481_v35 = vpop.f32.mrb[35].mxu0  ;;  %v2121_v49 = vpop.f32.mrb[35].mxu1 }
 0x12a   :  { %v3490_v41 = vmul.f32 0.2, %v2978_v13  ;;  %v3235_v46 = vmul.f32 0.2, %v2723_v47  ;;  %v3491_v59 = vmul.f32 0.2, %v2979_v52  ;;  %v2725_v31 = vadd.f32 %v12283_v53, %v1481_v35 }
 0x12b   :  { %16017 = vst [vmem:[#allocation19_spill] sm:$0xff] %v12583_v50  ;;  %v2981_v45 = vadd.f32 %v12283_v53, %v2121_v49  ;;  %v3236_v25 = vmul.f32 0.2, %v2724_v34  ;;  %v3492_v54 = vmul.f32 0.2, %v2980_v12  ;;  %11244 = vmatmul.mubr.msk.bf16.gmra.mrb[140].mxu0 %vm976_vm0, %v11550_v6  ;;  %11308 = vmatmul.mubr.msk.bf16.gmra.mrb[140].mxu1 %vm976_vm0, %v11551_v27  ;;  %v3746_v48 = vmax.f32 %v2722_v9, %v3234_v44  ;;  %v11553_v9 = vld [vmem:[%s15779_s0 + $0x320] sm:$0xff]  }
 0x12c   :  { %v3237_v55 = vmul.f32 0.2, %v2725_v31  ;;  %1753 = vmatprep.mubr.bf16.mxu0 %v16010_v0  ;;  %2393 = vmatprep.mubr.bf16.mxu1 %v16010_v0  ;;  %v4002_v22 = vmax.f32 %v2978_v13, %v3490_v41  ;;  %v3747_v40 = vmax.f32 %v2723_v47, %v3235_v46  ;;  %v4003_v8 = vmax.f32 %v2979_v52, %v3491_v59  ;;  %v11552_v13 = vld [vmem:[%s15779_s0 + $0x120] sm:$0xff]  }
 0x12d   :  { %v3493_v21 = vmul.f32 0.2, %v2981_v45  ;;  %v3748_v43 = vmax.f32 %v2724_v34, %v3236_v25  ;;  %v4004_v1 = vmax.f32 %v2980_v12, %v3492_v54 }
 0x12e   :  { %v3749_v60 = vmax.f32 %v2725_v31, %v3237_v55  ;;  %v1485_v20 = vpop.f32.mrb[36].mxu0  ;;  %v2125_v42 = vpop.f32.mrb[36].mxu1 }
 0x12f   :  { %v4005_v53 = vmax.f32 %v2981_v45, %v3493_v21  ;;  %v12593_v33 = vpack.c.bf16 %v3748_v43, %v3746_v48  ;;  %v12595_v6 = vpack.c.bf16 %v4004_v1, %v4002_v22  ;;  %v2726_v27 = vadd.f32 %v12302_v11, %v1485_v20  ;;  %v1487_v35 = vpop.f32.mrb[37].mxu0  ;;  %v2127_v49 = vpop.f32.mrb[37].mxu1 }
 0x130   :  { %v2982_v2 = vadd.f32 %v12302_v11, %v2125_v42  ;;  %v2727_v47 = vadd.f32 %v12309_v16, %v1487_v35  ;;  %v2983_v52 = vadd.f32 %v12309_v16, %v2127_v49  ;;  %v1489_v44 = vpop.f32.mrb[38].mxu0  ;;  %v2129_v41 = vpop.f32.mrb[38].mxu1  ;;  %v12607_v34 = vpack.c.bf16 %v3749_v60, %v3747_v40 }
 0x131   :  { %16018 = vst [vmem:[#allocation20_spill] sm:$0xff] %v12593_v33  ;;  %16019 = vst [vmem:[#allocation21_spill] sm:$0xff] %v12595_v6  ;;  %v12609_v12 = vpack.c.bf16 %v4005_v53, %v4003_v8  ;;  %v3238_v11 = vmul.f32 0.2, %v2726_v27  ;;  %v2728_v59 = vadd.f32 %v12314_v23, %v1489_v44  ;;  %v2984_v31 = vadd.f32 %v12314_v23, %v2129_v41  ;;  %v1491_v45 = vpop.f32.mrb[39].mxu0  ;;  %v2131_v25 = vpop.f32.mrb[39].mxu1 }
 0x132   :  { %16020 = vst [vmem:[#allocation22_spill] sm:$0xff] %v12607_v34  ;;  %v3494_v46 = vmul.f32 0.2, %v2982_v2  ;;  %v3239_v54 = vmul.f32 0.2, %v2727_v47  ;;  %v2729_v21 = vadd.f32 %v12325_v30, %v1491_v45  ;;  %v2985_v16 = vadd.f32 %v12325_v30, %v2131_v25 }
 0x133   :  { %16021 = vst [vmem:[#allocation23_spill] sm:$0xff] %v12609_v12  ;;  %v3495_v55 = vmul.f32 0.2, %v2983_v52  ;;  %v3240_v48 = vmul.f32 0.2, %v2728_v59  ;;  %11245 = vmatmul.mubr.msk.bf16.gmra.mrb[144].mxu0 %vm976_vm0, %v11552_v13  ;;  %11309 = vmatmul.mubr.msk.bf16.gmra.mrb[144].mxu1 %vm976_vm0, %v11553_v9  ;;  %v3750_v23 = vmax.f32 %v2726_v27, %v3238_v11  ;;  %v11560_v13 = vld [vmem:[%s15779_s0 + $0x128] sm:$0xff]  }
 0x134   :  { %v3496_v22 = vmul.f32 0.2, %v2984_v31  ;;  %v3241_v43 = vmul.f32 0.2, %v2729_v21  ;;  %v3497_v1 = vmul.f32 0.2, %v2985_v16  ;;  %1763 = vmatprep.mubr.bf16.mxu0 %v16010_v0  ;;  %2403 = vmatprep.mubr.bf16.mxu1 %v16010_v0  ;;  %v4006_v40 = vmax.f32 %v2982_v2, %v3494_v46 }
 0x135   :  { %v3752_v8 = vmax.f32 %v2728_v59, %v3240_v48  ;;  %v3751_v53 = vmax.f32 %v2727_v47, %v3239_v54  ;;  %v4007_v20 = vmax.f32 %v2983_v52, %v3495_v55  ;;  %v11561_v9 = vld [vmem:[%s15779_s0 + $0x328] sm:$0xff]   ;;  %v11610_v11 = vld [vmem:[%s15780_s3 + $0xd0] ss:$8 sps:$4 sm:$0xff]   ;;  %v11612_v46 = vld [vmem:[%s15780_s3 + $0xd4] ss:$8 sps:$4 sm:$0xff]  }
 0x136   :  { %v4008_v60 = vmax.f32 %v2984_v31, %v3496_v22  ;;  %v3753_v42 = vmax.f32 %v2729_v21, %v3241_v43  ;;  %v4009_v30 = vmax.f32 %v2985_v16, %v3497_v1  ;;  %v1495_v35 = vpop.f32.mrb[40].mxu0  ;;  %v2135_v49 = vpop.f32.mrb[40].mxu1  ;;  %v11615_v54 = vld [vmem:[%s15781_s4 + $0xd4] ss:$8 sps:$4 sm:$0xff]   ;;  %4700 = vmatprep.subr.bf16.mxu1 %v11612_v46 }
 0x137   :  { %v12625_v44 = vpack.c.bf16 %v3752_v8, %v3750_v23  ;;  %v2730_v2 = vadd.f32 %v12348_v57, %v1495_v35  ;;  %v2986_v47 = vadd.f32 %v12348_v57, %v2135_v49  ;;  %v1497_v52 = vpop.f32.mrb[41].mxu0  ;;  %v2137_v41 = vpop.f32.mrb[41].mxu1  ;;  %v11613_v57 = vld [vmem:[%s15781_s4 + $0xd0] ss:$8 sps:$4 sm:$0xff]   ;;  %4701 = vmatpush1.bf16.msra.mxu1 %v11610_v11  ;;  %7037 = vmatprep.subr.bf16.mxu0 %v11615_v54 }
 0x138   :  { %v12627_v27 = vpack.c.bf16 %v4008_v60, %v4006_v40  ;;  %v2731_v59 = vadd.f32 %v12355_v62, %v1497_v52  ;;  %v2987_v31 = vadd.f32 %v12355_v62, %v2137_v41  ;;  %v1499_v45 = vpop.f32.mrb[42].mxu0  ;;  %v2139_v25 = vpop.f32.mrb[42].mxu1  ;;  %v12645_v55 = vpack.c.bf16 %v3753_v42, %v3751_v53  ;;  %7038 = vmatpush1.bf16.msra.mxu0 %v11613_v57 }
 0x139   :  { %16022 = vst [vmem:[#allocation24_spill] sm:$0xff] %v12625_v44  ;;  %v12647_v21 = vpack.c.bf16 %v4009_v30, %v4007_v20  ;;  %v3242_v16 = vmul.f32 0.2, %v2730_v2  ;;  %v3498_v48 = vmul.f32 0.2, %v2986_v47  ;;  %v2732_v22 = vadd.f32 %v12360_v63, %v1499_v45  ;;  %v1501_v43 = vpop.f32.mrb[43].mxu0 }
 0x13a   :  { %16023 = vst [vmem:[#allocation25_spill] sm:$0xff] %v12627_v27  ;;  %16024 = vst [vmem:[#allocation26_spill] sm:$0xff] %v12645_v55  ;;  %v2988_v62 = vadd.f32 %v12360_v63, %v2139_v25  ;;  %v2141_v1 = vpop.f32.mrb[43].mxu1  ;;  %v3243_v23 = vmul.f32 0.2, %v2731_v59  ;;  %v2733_v8 = vadd.f32 %v12365_v7, %v1501_v43 }
 0x13b   :  { %16025 = vst [vmem:[#allocation27_spill] sm:$0xff] %v12647_v21  ;;  %v3499_v40 = vmul.f32 0.2, %v2987_v31  ;;  %v2989_v60 = vadd.f32 %v12365_v7, %v2141_v1  ;;  %v3244_v53 = vmul.f32 0.2, %v2732_v22  ;;  %11246 = vmatmul.mubr.msk.bf16.gmra.mrb[148].mxu0 %vm976_vm0, %v11560_v13  ;;  %11310 = vmatmul.mubr.msk.bf16.gmra.mrb[148].mxu1 %vm976_vm0, %v11561_v9  ;;  %v3754_v63 = vmax.f32 %v2730_v2, %v3242_v16 }
 0x13c   :  { %v3500_v20 = vmul.f32 0.2, %v2988_v62  ;;  %v3245_v42 = vmul.f32 0.2, %v2733_v8  ;;  %1773 = vmatprep.mubr.bf16.mxu0 %v16010_v0  ;;  %2413 = vmatprep.mubr.bf16.mxu1 %v16010_v0  ;;  %v4010_v35 = vmax.f32 %v2986_v47, %v3498_v48  ;;  %v3755_v7 = vmax.f32 %v2731_v59, %v3243_v23  ;;  %v11562_v47 = vld [vmem:[%s15779_s0 + $0x130] sm:$0xff]  }
 0x13d   :  { %v3501_v30 = vmul.f32 0.2, %v2989_v60  ;;  %v3756_v49 = vmax.f32 %v2732_v22, %v3244_v53  ;;  %v4011_v41 = vmax.f32 %v2987_v31, %v3499_v40  ;;  %v11563_v59 = vld [vmem:[%s15779_s0 + $0x330] sm:$0xff]  }
 0x13e   :  { %v4012_v52 = vmax.f32 %v2988_v62, %v3500_v20  ;;  %v3757_v11 = vmax.f32 %v2733_v8, %v3245_v42  ;;  %v1505_v45 = vpop.f32.mrb[44].mxu0  ;;  %v2145_v25 = vpop.f32.mrb[44].mxu1 }
 0x13f   :  { %v4013_v46 = vmax.f32 %v2989_v60, %v3501_v30  ;;  %v12657_v13 = vpack.c.bf16 %v3756_v49, %v3754_v63  ;;  %v2734_v54 = vadd.f32 %v12406_v51, %v1505_v45  ;;  %v2990_v43 = vadd.f32 %v12406_v51, %v2145_v25  ;;  %v1507_v1 = vpop.f32.mrb[45].mxu0  ;;  %v2147_v2 = vpop.f32.mrb[45].mxu1 }
 0x140   :  { %v12659_v9 = vpack.c.bf16 %v4012_v52, %v4010_v35  ;;  %v2735_v31 = vadd.f32 %v12413_v58, %v1507_v1  ;;  %v2991_v57 = vadd.f32 %v12413_v58, %v2147_v2  ;;  %v1509_v16 = vpop.f32.mrb[46].mxu0  ;;  %v2149_v48 = vpop.f32.mrb[46].mxu1  ;;  %v12671_v22 = vpack.c.bf16 %v3757_v11, %v3755_v7 }
 0x141   :  { %16026 = vst [vmem:[#allocation28_spill] sm:$0xff] %v12657_v13  ;;  %v12673_v62 = vpack.c.bf16 %v4013_v46, %v4011_v41  ;;  %v3246_v51 = vmul.f32 0.2, %v2734_v54  ;;  %v3502_v23 = vmul.f32 0.2, %v2990_v43  ;;  %v2736_v40 = vadd.f32 %v12418_v4, %v1509_v16  ;;  %v1511_v60 = vpop.f32.mrb[47].mxu0 }
 0x142   :  { %16027 = vst [vmem:[#allocation29_spill] sm:$0xff] %v12659_v9  ;;  %16028 = vst [vmem:[#allocation30_spill] sm:$0xff] %v12671_v22  ;;  %v2992_v8 = vadd.f32 %v12418_v4, %v2149_v48  ;;  %v2151_v53 = vpop.f32.mrb[47].mxu1  ;;  %v3247_v20 = vmul.f32 0.2, %v2735_v31  ;;  %v2737_v30 = vadd.f32 %v12429_v15, %v1511_v60  ;;  %v12840_v13 = vld [vmem:[%s15782_s2 + $0x60] sm:$0xff] }
 0x143   :  { %16029 = vst [vmem:[#allocation31_spill] sm:$0xff] %v12673_v62  ;;  %v3503_v42 = vmul.f32 0.2, %v2991_v57  ;;  %v2993_v58 = vadd.f32 %v12429_v15, %v2151_v53  ;;  %v3248_v63 = vmul.f32 0.2, %v2736_v40  ;;  %11247 = vmatmul.mubr.msk.bf16.gmra.mrb[152].mxu0 %vm976_vm0, %v11562_v47  ;;  %11311 = vmatmul.mubr.msk.bf16.gmra.mrb[152].mxu1 %vm976_vm0, %v11563_v59  ;;  %v3758_v4 = vmax.f32 %v2734_v54, %v3246_v51  ;;  %v12690_v59 = vld [vmem:[%s15782_s2] sm:$0xff] }
 0x144   :  { %v3504_v35 = vmul.f32 0.2, %v2992_v8  ;;  %v3249_v49 = vmul.f32 0.2, %v2737_v30  ;;  %1783 = vmatprep.mubr.bf16.mxu0 %v16010_v0  ;;  %2423 = vmatprep.mubr.bf16.mxu1 %v16010_v0  ;;  %v4014_v7 = vmax.f32 %v2990_v43, %v3502_v23  ;;  %v3759_v46 = vmax.f32 %v2735_v31, %v3247_v20  ;;  %v11565_v51 = vld [vmem:[%s15779_s0 + $0x338] sm:$0xff]   ;;  %v12703_v23 = vld [vmem:[%s15782_s2 + $0x8] sm:$0xff] }
 0x145   :  { %v3505_v52 = vmul.f32 0.2, %v2993_v58  ;;  %v3760_v41 = vmax.f32 %v2736_v40, %v3248_v63  ;;  %v4015_v45 = vmax.f32 %v2991_v57, %v3503_v42  ;;  %v11564_v57 = vld [vmem:[%s15779_s0 + $0x138] sm:$0xff]   ;;  %v12714_v63 = vld [vmem:[%s15782_s2 + $0x10] sm:$0xff] }
 0x146   :  { %v4016_v11 = vmax.f32 %v2992_v8, %v3504_v35  ;;  %v3761_v25 = vmax.f32 %v2737_v30, %v3249_v49  ;;  %v1515_v1 = vpop.f32.mrb[48].mxu0  ;;  %v2155_v2 = vpop.f32.mrb[48].mxu1 }
 0x147   :  { %v4017_v15 = vmax.f32 %v2993_v58, %v3505_v52  ;;  %v12683_v16 = vpack.c.bf16 %v3760_v41, %v3758_v4  ;;  %v2738_v54 = vadd.f32 %v12690_v59, %v1515_v1  ;;  %v2994_v43 = vadd.f32 %v12690_v59, %v2155_v2  ;;  %v1517_v48 = vpop.f32.mrb[49].mxu0  ;;  %v2157_v31 = vpop.f32.mrb[49].mxu1 }
 0x148   :  { %v12685_v47 = vpack.c.bf16 %v4016_v11, %v4014_v7  ;;  %v2739_v40 = vadd.f32 %v12703_v23, %v1517_v48  ;;  %v2995_v8 = vadd.f32 %v12703_v23, %v2157_v31  ;;  %v1519_v60 = vpop.f32.mrb[50].mxu0  ;;  %v2159_v53 = vpop.f32.mrb[50].mxu1  ;;  %v12707_v20 = vpack.c.bf16 %v3761_v25, %v3759_v46  ;;  %v12721_v11 = vld [vmem:[%s15782_s2 + $0x18] sm:$0xff] }
 0x149   :  { %16030 = vst [vmem:[#allocation32_spill] sm:$0xff] %v12683_v16  ;;  %v12709_v42 = vpack.c.bf16 %v4017_v15, %v4015_v45  ;;  %v3250_v30 = vmul.f32 0.2, %v2738_v54  ;;  %v3506_v58 = vmul.f32 0.2, %v2994_v43  ;;  %v2740_v35 = vadd.f32 %v12714_v63, %v1519_v60  ;;  %v1521_v52 = vpop.f32.mrb[51].mxu0 }
 0x14a   :  { %16031 = vst [vmem:[#allocation33_spill] sm:$0xff] %v12685_v47  ;;  %16032 = vst [vmem:[#allocation34_spill] sm:$0xff] %v12707_v20  ;;  %v2996_v49 = vadd.f32 %v12714_v63, %v2159_v53  ;;  %v2161_v4 = vpop.f32.mrb[51].mxu1  ;;  %v3251_v7 = vmul.f32 0.2, %v2739_v40  ;;  %v2741_v46 = vadd.f32 %v12721_v11, %v1521_v52 }
 0x14b   :  { %16033 = vst [vmem:[#allocation35_spill] sm:$0xff] %v12709_v42  ;;  %v3507_v41 = vmul.f32 0.2, %v2995_v8  ;;  %v2997_v45 = vadd.f32 %v12721_v11, %v2161_v4  ;;  %v3252_v25 = vmul.f32 0.2, %v2740_v35  ;;  %11248 = vmatmul.mubr.msk.bf16.gmra.mrb[156].mxu0 %vm976_vm0, %v11564_v57  ;;  %11312 = vmatmul.mubr.msk.bf16.gmra.mrb[156].mxu1 %vm976_vm0, %v11565_v51  ;;  %v3762_v48 = vmax.f32 %v2738_v54, %v3250_v30  ;;  %v12736_v51 = vld [vmem:[%s15782_s2 + $0x20] sm:$0xff] }
 0x14c   :  { %v3508_v15 = vmul.f32 0.2, %v2996_v49  ;;  %v3253_v1 = vmul.f32 0.2, %v2741_v46  ;;  %1793 = vmatprep.mubr.bf16.mxu0 %v16010_v0  ;;  %2433 = vmatprep.mubr.bf16.mxu1 %v16010_v0  ;;  %v4018_v31 = vmax.f32 %v2994_v43, %v3506_v58  ;;  %v3763_v47 = vmax.f32 %v2739_v40, %v3251_v7  ;;  %v11567_v58 = vld [vmem:[%s15779_s0 + $0x340] sm:$0xff]  }
 0x14d   :  { %v3509_v2 = vmul.f32 0.2, %v2997_v45  ;;  %v3764_v60 = vmax.f32 %v2740_v35, %v3252_v25  ;;  %v4019_v52 = vmax.f32 %v2995_v8, %v3507_v41  ;;  %v11566_v8 = vld [vmem:[%s15779_s0 + $0x140] sm:$0xff]   ;;  %v12749_v35 = vld [vmem:[%s15782_s2 + $0x28] sm:$0xff] }
 0x14e   :  { %v4020_v53 = vmax.f32 %v2996_v49, %v3508_v15  ;;  %v3765_v42 = vmax.f32 %v2741_v46, %v3253_v1  ;;  %v1525_v9 = vpop.f32.mrb[52].mxu0  ;;  %v2165_v62 = vpop.f32.mrb[52].mxu1  ;;  %v12760_v15 = vld [vmem:[%s15782_s2 + $0x30] sm:$0xff] }
 0x14f   :  { %v4021_v4 = vmax.f32 %v2997_v45, %v3509_v2  ;;  %v12729_v27 = vpack.c.bf16 %v3764_v60, %v3762_v48  ;;  %v2742_v54 = vadd.f32 %v12736_v51, %v1525_v9  ;;  %v2998_v43 = vadd.f32 %v12736_v51, %v2165_v62  ;;  %v1527_v30 = vpop.f32.mrb[53].mxu0  ;;  %v2167_v40 = vpop.f32.mrb[53].mxu1 }
 0x150   :  { %v12731_v57 = vpack.c.bf16 %v4020_v53, %v4018_v31  ;;  %v2743_v49 = vadd.f32 %v12749_v35, %v1527_v30  ;;  %v2999_v9 = vadd.f32 %v12749_v35, %v2167_v40  ;;  %v1529_v62 = vpop.f32.mrb[54].mxu0  ;;  %v2169_v7 = vpop.f32.mrb[54].mxu1  ;;  %v12753_v41 = vpack.c.bf16 %v3765_v42, %v3763_v47  ;;  %v12767_v47 = vld [vmem:[%s15782_s2 + $0x38] sm:$0xff] }
 0x151   :  { %16034 = vst [vmem:[#allocation36_spill] sm:$0xff] %v12729_v27  ;;  %v12755_v46 = vpack.c.bf16 %v4021_v4, %v4019_v52  ;;  %v3254_v45 = vmul.f32 0.2, %v2742_v54  ;;  %v3510_v25 = vmul.f32 0.2, %v2998_v43  ;;  %v2744_v1 = vadd.f32 %v12760_v15, %v1529_v62  ;;  %v1531_v48 = vpop.f32.mrb[55].mxu0 }
 0x152   :  { %16035 = vst [vmem:[#allocation37_spill] sm:$0xff] %v12731_v57  ;;  %16036 = vst [vmem:[#allocation38_spill] sm:$0xff] %v12753_v41  ;;  %v3000_v2 = vadd.f32 %v12760_v15, %v2169_v7  ;;  %v2171_v31 = vpop.f32.mrb[55].mxu1  ;;  %v3255_v60 = vmul.f32 0.2, %v2743_v49  ;;  %v2745_v42 = vadd.f32 %v12767_v47, %v1531_v48 }
 0x153   :  { %16037 = vst [vmem:[#allocation39_spill] sm:$0xff] %v12755_v46  ;;  %v3511_v53 = vmul.f32 0.2, %v2999_v9  ;;  %v3001_v52 = vadd.f32 %v12767_v47, %v2171_v31  ;;  %v3256_v4 = vmul.f32 0.2, %v2744_v1  ;;  %11249 = vmatmul.mubr.msk.bf16.gmra.mrb[160].mxu0 %vm976_vm0, %v11566_v8  ;;  %11313 = vmatmul.mubr.msk.bf16.gmra.mrb[160].mxu1 %vm976_vm0, %v11567_v58  ;;  %v3766_v7 = vmax.f32 %v2742_v54, %v3254_v45  ;;  %v11574_v8 = vld [vmem:[%s15779_s0 + $0x148] sm:$0xff]  }
 0x154   :  { %v3512_v30 = vmul.f32 0.2, %v3000_v2  ;;  %v3257_v40 = vmul.f32 0.2, %v2745_v42  ;;  %1803 = vmatprep.mubr.bf16.mxu0 %v16010_v0  ;;  %2443 = vmatprep.mubr.bf16.mxu1 %v16010_v0  ;;  %v4022_v57 = vmax.f32 %v2998_v43, %v3510_v25  ;;  %v3767_v6 = vmax.f32 %v2743_v49, %v3255_v60  ;;  %v11575_v58 = vld [vmem:[%s15779_s0 + $0x348] sm:$0xff]   ;;  %v12788_v43 = vld [vmem:[%s15782_s2 + $0x40] sm:$0xff] }
 0x155   :  { %v3513_v62 = vmul.f32 0.2, %v3001_v52  ;;  %v3768_v46 = vmax.f32 %v2744_v1, %v3256_v4  ;;  %v4023_v48 = vmax.f32 %v2999_v9, %v3511_v53  ;;  %v11624_v1 = vld [vmem:[%s15780_s3 + $0xe0] ss:$8 sps:$4 sm:$0xff]   ;;  %v11629_v53 = vld [vmem:[%s15781_s4 + $0xe4] ss:$8 sps:$4 sm:$0xff]  }
 0x156   :  { %v4024_v21 = vmax.f32 %v3000_v2, %v3512_v30  ;;  %v3769_v12 = vmax.f32 %v2745_v42, %v3257_v40  ;;  %v1535_v19 = vpop.f32.mrb[56].mxu0  ;;  %v2175_v50 = vpop.f32.mrb[56].mxu1  ;;  %v11627_v60 = vld [vmem:[%s15781_s4 + $0xe0] ss:$8 sps:$4 sm:$0xff]   ;;  %v12818_v40 = vld [vmem:[%s15782_s2 + $0x50] sm:$0xff]  ;;  %7039 = vmatprep.subr.bf16.mxu0 %v11629_v53 }
 0x157   :  { %v4025_v31 = vmax.f32 %v3001_v52, %v3513_v62  ;;  %v12781_v38 = vpack.c.bf16 %v3768_v46, %v3766_v7  ;;  %v2746_v49 = vadd.f32 %v12788_v43, %v1535_v19  ;;  %v3002_v9 = vadd.f32 %v12788_v43, %v2175_v50  ;;  %v1537_v45 = vpop.f32.mrb[57].mxu0  ;;  %v2177_v25 = vpop.f32.mrb[57].mxu1  ;;  %7040 = vmatpush1.bf16.msra.mxu0 %v11627_v60 }
 0x158   :  { %v12783_v54 = vpack.c.bf16 %v4024_v21, %v4022_v57  ;;  %v11626_v21 = vld [vmem:[%s15780_s3 + $0xe4] ss:$8 sps:$4 sm:$0xff]   ;;  %v1539_v50 = vpop.f32.mrb[58].mxu0  ;;  %v2179_v2 = vpop.f32.mrb[58].mxu1  ;;  %v12811_v42 = vpack.c.bf16 %v3769_v12, %v3767_v6  ;;  %v12825_v6 = vld [vmem:[%s15782_s2 + $0x58] sm:$0xff] }
 0x159   :  { %16038 = vst [vmem:[#allocation40_spill] sm:$0xff] %v12781_v38  ;;  %v12801_v57 = vld [vmem:[%s15782_s2 + $0x48] sm:$0xff]  ;;  %v12813_v52 = vpack.c.bf16 %v4025_v31, %v4023_v48  ;;  %v3258_v4 = vmul.f32 0.2, %v2746_v49  ;;  %v3514_v30 = vmul.f32 0.2, %v3002_v9  ;;  %v2748_v62 = vadd.f32 %v12818_v40, %v1539_v50  ;;  %4702 = vmatprep.subr.bf16.mxu1 %v11626_v21 }
 0x15a   :  { %16039 = vst [vmem:[#allocation41_spill] sm:$0xff] %v12783_v54  ;;  %v2747_v46 = vadd.f32 %v12801_v57, %v1537_v45  ;;  %v3003_v19 = vadd.f32 %v12801_v57, %v2177_v25  ;;  %16040 = vst [vmem:[#allocation42_spill] sm:$0xff] %v12811_v42  ;;  %v3004_v7 = vadd.f32 %v12818_v40, %v2179_v2  ;;  %v1541_v45 = vpop.f32.mrb[59].mxu0  ;;  %v2181_v25 = vpop.f32.mrb[59].mxu1  ;;  %4703 = vmatpush1.bf16.msra.mxu1 %v11624_v1 }
 0x15b   :  { %16041 = vst [vmem:[#allocation43_spill] sm:$0xff] %v12813_v52  ;;  %v2749_v12 = vadd.f32 %v12825_v6, %v1541_v45  ;;  %v3005_v48 = vadd.f32 %v12825_v6, %v2181_v25  ;;  %v3260_v31 = vmul.f32 0.2, %v2748_v62  ;;  %11250 = vmatmul.mubr.msk.bf16.gmra.mrb[164].mxu0 %vm976_vm0, %v11574_v8  ;;  %11314 = vmatmul.mubr.msk.bf16.gmra.mrb[164].mxu1 %vm976_vm0, %v11575_v58 }
 0x15c   :  { %v3259_v54 = vmul.f32 0.2, %v2747_v46  ;;  %v3515_v38 = vmul.f32 0.2, %v3003_v19  ;;  %v3516_v50 = vmul.f32 0.2, %v3004_v7  ;;  %1813 = vmatprep.mubr.bf16.mxu0 %v16010_v0  ;;  %2453 = vmatprep.mubr.bf16.mxu1 %v16010_v0  ;;  %v3770_v52 = vmax.f32 %v2746_v49, %v3258_v4 }
 0x15d   :  { %v3261_v21 = vmul.f32 0.2, %v2749_v12  ;;  %v3517_v2 = vmul.f32 0.2, %v3005_v48  ;;  %v4026_v42 = vmax.f32 %v3002_v9, %v3514_v30  ;;  %v3772_v27 = vmax.f32 %v2748_v62, %v3260_v31 }
 0x15e   :  { %v4028_v45 = vmax.f32 %v3004_v7, %v3516_v50  ;;  %v3771_v25 = vmax.f32 %v2747_v46, %v3259_v54  ;;  %v4027_v1 = vmax.f32 %v3003_v19, %v3515_v38  ;;  %v1545_v16 = vpop.f32.mrb[60].mxu0  ;;  %v2185_v20 = vpop.f32.mrb[60].mxu1  ;;  %v11576_v38 = vld [vmem:[%s15779_s0 + $0x150] sm:$0xff]   ;;  %v12853_v46 = vld [vmem:[%s15782_s2 + $0x68] sm:$0xff] }
 0x15f   :  { %v3773_v53 = vmax.f32 %v2749_v12, %v3261_v21  ;;  %v4029_v41 = vmax.f32 %v3005_v48, %v3517_v2  ;;  %v12833_v8 = vpack.c.bf16 %v3772_v27, %v3770_v52  ;;  %v2750_v49 = vadd.f32 %v12840_v13, %v1545_v16  ;;  %v1547_v60 = vpop.f32.mrb[61].mxu0  ;;  %v2187_v54 = vpop.f32.mrb[61].mxu1  ;;  %v11577_v27 = vld [vmem:[%s15779_s0 + $0x350] sm:$0xff]  }
 0x160   :  { %v12835_v58 = vpack.c.bf16 %v4028_v45, %v4026_v42  ;;  %v3006_v9 = vadd.f32 %v12840_v13, %v2185_v20  ;;  %v2751_v19 = vadd.f32 %v12853_v46, %v1547_v60  ;;  %v3007_v16 = vadd.f32 %v12853_v46, %v2187_v54  ;;  %v1549_v20 = vpop.f32.mrb[62].mxu0  ;;  %v2189_v42 = vpop.f32.mrb[62].mxu1  ;;  %v12864_v7 = vld [vmem:[%s15782_s2 + $0x70] sm:$0xff] }
 0x161   :  { %16042 = vst [vmem:[#allocation44_spill] sm:$0xff] %v12833_v8  ;;  %v12857_v52 = vpack.c.bf16 %v3773_v53, %v3771_v25  ;;  %v12859_v4 = vpack.c.bf16 %v4029_v41, %v4027_v1  ;;  %v3262_v30 = vmul.f32 0.2, %v2750_v49  ;;  %v2752_v12 = vadd.f32 %v12864_v7, %v1549_v20  ;;  %v1551_v31 = vpop.f32.mrb[63].mxu0  ;;  %v2191_v50 = vpop.f32.mrb[63].mxu1  ;;  %v12871_v41 = vld [vmem:[%s15782_s2 + $0x78] sm:$0xff] }
 0x162   :  { %16043 = vst [vmem:[#allocation45_spill] sm:$0xff] %v12835_v58  ;;  %v3518_v62 = vmul.f32 0.2, %v3006_v9  ;;  %v3008_v48 = vadd.f32 %v12864_v7, %v2189_v42  ;;  %v3263_v21 = vmul.f32 0.2, %v2751_v19  ;;  %v2753_v45 = vadd.f32 %v12871_v41, %v1551_v31 }
 0x163   :  { %16044 = vst [vmem:[#allocation46_spill] sm:$0xff] %v12857_v52  ;;  %16045 = vst [vmem:[#allocation47_spill] sm:$0xff] %v12859_v4  ;;  %v3519_v2 = vmul.f32 0.2, %v3007_v16  ;;  %v3009_v25 = vadd.f32 %v12871_v41, %v2191_v50  ;;  %v3264_v1 = vmul.f32 0.2, %v2752_v12  ;;  %11251 = vmatmul.mubr.msk.bf16.gmra.mrb[168].mxu0 %vm976_vm0, %v11576_v38  ;;  %11315 = vmatmul.mubr.msk.bf16.gmra.mrb[168].mxu1 %vm976_vm0, %v11577_v27 }
 0x164   :  { %v3520_v53 = vmul.f32 0.2, %v3008_v48  ;;  %v3265_v60 = vmul.f32 0.2, %v2753_v45  ;;  %1823 = vmatprep.mubr.bf16.mxu0 %v16010_v0  ;;  %2463 = vmatprep.mubr.bf16.mxu1 %v16010_v0  ;;  %v3774_v20 = vmax.f32 %v2750_v49, %v3262_v30  ;;  %v4030_v42 = vmax.f32 %v3006_v9, %v3518_v62  ;;  %v11578_v49 = vld [vmem:[%s15779_s0 + $0x158] sm:$0xff]  }
 0x165   :  { %v3521_v54 = vmul.f32 0.2, %v3009_v25  ;;  %v3776_v58 = vmax.f32 %v2752_v12, %v3264_v1  ;;  %v3775_v8 = vmax.f32 %v2751_v19, %v3263_v21  ;;  %v4031_v31 = vmax.f32 %v3007_v16, %v3519_v2  ;;  %v11579_v9 = vld [vmem:[%s15779_s0 + $0x358] sm:$0xff]  }
 0x166   :  { %v4032_v4 = vmax.f32 %v3008_v48, %v3520_v53  ;;  %v3777_v52 = vmax.f32 %v2753_v45, %v3265_v60  ;;  %v1555_v22 = vpop.f32.mrb[64].mxu0  ;;  %v2195_v44 = vpop.f32.mrb[64].mxu1 }
 0x167   :  { %v4033_v50 = vmax.f32 %v3009_v25, %v3521_v54  ;;  %v12879_v55 = vpack.c.bf16 %v3776_v58, %v3774_v20  ;;  %v2754_v27 = vadd.f32 %v12690_v59, %v1555_v22  ;;  %v3010_v33 = vadd.f32 %v12690_v59, %v2195_v44  ;;  %v1557_v34 = vpop.f32.mrb[65].mxu0  ;;  %v2197_v17 = vpop.f32.mrb[65].mxu1 }
 0x168   :  { %v12881_v38 = vpack.c.bf16 %v4032_v4, %v4030_v42  ;;  %v2755_v19 = vadd.f32 %v12703_v23, %v1557_v34  ;;  %v3011_v58 = vadd.f32 %v12703_v23, %v2197_v17  ;;  %v1559_v16 = vpop.f32.mrb[66].mxu0  ;;  %v2199_v4 = vpop.f32.mrb[66].mxu1  ;;  %v12893_v30 = vpack.c.bf16 %v3777_v52, %v3775_v8 }
 0x169   :  { %16046 = vst [vmem:[#allocation48_spill] sm:$0xff] %v12879_v55  ;;  %v12895_v22 = vpack.c.bf16 %v4033_v50, %v4031_v31  ;;  %v3266_v44 = vmul.f32 0.2, %v2754_v27  ;;  %v3522_v62 = vmul.f32 0.2, %v3010_v33  ;;  %v2756_v12 = vadd.f32 %v12714_v63, %v1559_v16  ;;  %v1561_v21 = vpop.f32.mrb[67].mxu0 }
 0x16a   :  { %16047 = vst [vmem:[#allocation49_spill] sm:$0xff] %v12881_v38  ;;  %16048 = vst [vmem:[#allocation50_spill] sm:$0xff] %v12893_v30  ;;  %v3012_v48 = vadd.f32 %v12714_v63, %v2199_v4  ;;  %v2201_v2 = vpop.f32.mrb[67].mxu1  ;;  %v3267_v45 = vmul.f32 0.2, %v2755_v19  ;;  %v2757_v34 = vadd.f32 %v12721_v11, %v1561_v21 }
 0x16b   :  { %16049 = vst [vmem:[#allocation51_spill] sm:$0xff] %v12895_v22  ;;  %v3523_v25 = vmul.f32 0.2, %v3011_v58  ;;  %v3013_v17 = vadd.f32 %v12721_v11, %v2201_v2  ;;  %v3268_v1 = vmul.f32 0.2, %v2756_v12  ;;  %11252 = vmatmul.mubr.msk.bf16.gmra.mrb[172].mxu0 %vm976_vm0, %v11578_v49  ;;  %11316 = vmatmul.mubr.msk.bf16.gmra.mrb[172].mxu1 %vm976_vm0, %v11579_v9  ;;  %v3778_v60 = vmax.f32 %v2754_v27, %v3266_v44  ;;  %v11581_v27 = vld [vmem:[%s15779_s0 + $0x360] sm:$0xff]  }
 0x16c   :  { %v3524_v53 = vmul.f32 0.2, %v3012_v48  ;;  %v3269_v8 = vmul.f32 0.2, %v2757_v34  ;;  %1833 = vmatprep.mubr.bf16.mxu0 %v16010_v0  ;;  %2473 = vmatprep.mubr.bf16.mxu1 %v16010_v0  ;;  %v4034_v54 = vmax.f32 %v3010_v33, %v3522_v62  ;;  %v3779_v31 = vmax.f32 %v2755_v19, %v3267_v45  ;;  %v11580_v33 = vld [vmem:[%s15779_s0 + $0x160] sm:$0xff]  }
 0x16d   :  { %v3525_v52 = vmul.f32 0.2, %v3013_v17  ;;  %v3780_v20 = vmax.f32 %v2756_v12, %v3268_v1  ;;  %v4035_v50 = vmax.f32 %v3011_v58, %v3523_v25 }
 0x16e   :  { %v4036_v42 = vmax.f32 %v3012_v48, %v3524_v53  ;;  %v3781_v16 = vmax.f32 %v2757_v34, %v3269_v8  ;;  %v1565_v21 = vpop.f32.mrb[68].mxu0  ;;  %v2205_v2 = vpop.f32.mrb[68].mxu1 }
 0x16f   :  { %v4037_v4 = vmax.f32 %v3013_v17, %v3525_v52  ;;  %v12905_v38 = vpack.c.bf16 %v3780_v20, %v3778_v60  ;;  %v2758_v9 = vadd.f32 %v12736_v51, %v1565_v21  ;;  %v3014_v22 = vadd.f32 %v12736_v51, %v2205_v2  ;;  %v1567_v55 = vpop.f32.mrb[69].mxu0  ;;  %v2207_v30 = vpop.f32.mrb[69].mxu1 }
 0x170   :  { %v12907_v49 = vpack.c.bf16 %v4036_v42, %v4034_v54  ;;  %v2759_v19 = vadd.f32 %v12749_v35, %v1567_v55  ;;  %v3015_v58 = vadd.f32 %v12749_v35, %v2207_v30  ;;  %v1569_v44 = vpop.f32.mrb[70].mxu0  ;;  %v2209_v62 = vpop.f32.mrb[70].mxu1  ;;  %v12919_v12 = vpack.c.bf16 %v3781_v16, %v3779_v31 }
 0x171   :  { %16050 = vst [vmem:[#allocation52_spill] sm:$0xff] %v12905_v38  ;;  %v12921_v48 = vpack.c.bf16 %v4037_v4, %v4035_v50  ;;  %v3270_v45 = vmul.f32 0.2, %v2758_v9  ;;  %v3526_v25 = vmul.f32 0.2, %v3014_v22  ;;  %v2760_v34 = vadd.f32 %v12760_v15, %v1569_v44  ;;  %v1571_v1 = vpop.f32.mrb[71].mxu0 }
 0x172   :  { %16051 = vst [vmem:[#allocation53_spill] sm:$0xff] %v12907_v49  ;;  %16052 = vst [vmem:[#allocation54_spill] sm:$0xff] %v12919_v12  ;;  %v3016_v17 = vadd.f32 %v12760_v15, %v2209_v62  ;;  %v2211_v53 = vpop.f32.mrb[71].mxu1  ;;  %v3271_v8 = vmul.f32 0.2, %v2759_v19  ;;  %v2761_v55 = vadd.f32 %v12767_v47, %v1571_v1 }
 0x173   :  { %16053 = vst [vmem:[#allocation55_spill] sm:$0xff] %v12921_v48  ;;  %v3527_v52 = vmul.f32 0.2, %v3015_v58  ;;  %v3017_v30 = vadd.f32 %v12767_v47, %v2211_v53  ;;  %v3272_v60 = vmul.f32 0.2, %v2760_v34  ;;  %11253 = vmatmul.mubr.msk.bf16.gmra.mrb[176].mxu0 %vm976_vm0, %v11580_v33  ;;  %11317 = vmatmul.mubr.msk.bf16.gmra.mrb[176].mxu1 %vm976_vm0, %v11581_v27  ;;  %v3782_v31 = vmax.f32 %v2758_v9, %v3270_v45  ;;  %v11588_v33 = vld [vmem:[%s15779_s0 + $0x168] sm:$0xff]  }
 0x174   :  { %v3528_v54 = vmul.f32 0.2, %v3016_v17  ;;  %v3273_v20 = vmul.f32 0.2, %v2761_v55  ;;  %1843 = vmatprep.mubr.bf16.mxu0 %v16010_v0  ;;  %2483 = vmatprep.mubr.bf16.mxu1 %v16010_v0  ;;  %v4038_v50 = vmax.f32 %v3014_v22, %v3526_v25  ;;  %v3783_v21 = vmax.f32 %v2759_v19, %v3271_v8  ;;  %v11589_v27 = vld [vmem:[%s15779_s0 + $0x368] sm:$0xff]  }
 0x175   :  { %v3529_v42 = vmul.f32 0.2, %v3017_v30  ;;  %v3784_v16 = vmax.f32 %v2760_v34, %v3272_v60  ;;  %v4039_v2 = vmax.f32 %v3015_v58, %v3527_v52  ;;  %v11638_v25 = vld [vmem:[%s15780_s3 + $0xf0] ss:$8 sps:$4 sm:$0xff]   ;;  %v11640_v34 = vld [vmem:[%s15780_s3 + $0xf4] ss:$8 sps:$4 sm:$0xff]  }
 0x176   :  { %v4040_v4 = vmax.f32 %v3016_v17, %v3528_v54  ;;  %v3785_v44 = vmax.f32 %v2761_v55, %v3273_v20  ;;  %v1575_v1 = vpop.f32.mrb[72].mxu0  ;;  %v2215_v53 = vpop.f32.mrb[72].mxu1  ;;  %v11643_v60 = vld [vmem:[%s15781_s4 + $0xf4] ss:$8 sps:$4 sm:$0xff]   ;;  %4704 = vmatprep.subr.bf16.mxu1 %v11640_v34 }
 0x177   :  { %v4041_v62 = vmax.f32 %v3017_v30, %v3529_v42  ;;  %v12937_v49 = vpack.c.bf16 %v3784_v16, %v3782_v31  ;;  %v2762_v22 = vadd.f32 %v12788_v43, %v1575_v1  ;;  %v3018_v19 = vadd.f32 %v12788_v43, %v2215_v53  ;;  %v1577_v58 = vpop.f32.mrb[73].mxu0  ;;  %v2217_v45 = vpop.f32.mrb[73].mxu1  ;;  %v11641_v30 = vld [vmem:[%s15781_s4 + $0xf0] ss:$8 sps:$4 sm:$0xff]   ;;  %4705 = vmatpush1.bf16.msra.mxu1 %v11638_v25 }
 0x178   :  { %v12939_v9 = vpack.c.bf16 %v4040_v4, %v4038_v50  ;;  %v2763_v17 = vadd.f32 %v12801_v57, %v1577_v58  ;;  %v3019_v8 = vadd.f32 %v12801_v57, %v2217_v45  ;;  %v1579_v52 = vpop.f32.mrb[74].mxu0  ;;  %v2219_v55 = vpop.f32.mrb[74].mxu1  ;;  %v12957_v54 = vpack.c.bf16 %v3785_v44, %v3783_v21  ;;  %7041 = vmatprep.subr.bf16.mxu0 %v11643_v60 }
 0x179   :  { %16054 = vst [vmem:[#allocation56_spill] sm:$0xff] %v12937_v49  ;;  %v12959_v20 = vpack.c.bf16 %v4041_v62, %v4039_v2  ;;  %v3274_v42 = vmul.f32 0.2, %v2762_v22  ;;  %v3530_v31 = vmul.f32 0.2, %v3018_v19  ;;  %v2764_v50 = vadd.f32 %v12818_v40, %v1579_v52  ;;  %v1581_v4 = vpop.f32.mrb[75].mxu0  ;;  %7042 = vmatpush1.bf16.msra.mxu0 %v11641_v30 }
 0x17a   :  { %16055 = vst [vmem:[#allocation57_spill] sm:$0xff] %v12939_v9  ;;  %16056 = vst [vmem:[#allocation58_spill] sm:$0xff] %v12957_v54  ;;  %v3020_v16 = vadd.f32 %v12818_v40, %v2219_v55  ;;  %v2221_v1 = vpop.f32.mrb[75].mxu1  ;;  %v3275_v53 = vmul.f32 0.2, %v2763_v17  ;;  %v2765_v45 = vadd.f32 %v12825_v6, %v1581_v4 }
 0x17b   :  { %16057 = vst [vmem:[#allocation59_spill] sm:$0xff] %v12959_v20  ;;  %v3531_v58 = vmul.f32 0.2, %v3019_v8  ;;  %v3021_v9 = vadd.f32 %v12825_v6, %v2221_v1  ;;  %v3276_v21 = vmul.f32 0.2, %v2764_v50  ;;  %11254 = vmatmul.mubr.msk.bf16.gmra.mrb[180].mxu0 %vm976_vm0, %v11588_v33  ;;  %11318 = vmatmul.mubr.msk.bf16.gmra.mrb[180].mxu1 %vm976_vm0, %v11589_v27  ;;  %v3786_v34 = vmax.f32 %v2762_v22, %v3274_v42 }
 0x17c   :  { %v3532_v2 = vmul.f32 0.2, %v3020_v16  ;;  %v3277_v44 = vmul.f32 0.2, %v2765_v45  ;;  %1853 = vmatprep.mubr.bf16.mxu0 %v16010_v0  ;;  %2493 = vmatprep.mubr.bf16.mxu1 %v16010_v0  ;;  %v4042_v52 = vmax.f32 %v3018_v19, %v3530_v31  ;;  %v3787_v1 = vmax.f32 %v2763_v17, %v3275_v53  ;;  %v11590_v19 = vld [vmem:[%s15779_s0 + $0x170] sm:$0xff]  }
 0x17d   :  { %v3533_v62 = vmul.f32 0.2, %v3021_v9  ;;  %v3788_v55 = vmax.f32 %v2764_v50, %v3276_v21  ;;  %v4043_v25 = vmax.f32 %v3019_v8, %v3531_v58 }
 0x17e   :  { %v4044_v4 = vmax.f32 %v3020_v16, %v3532_v2  ;;  %v3789_v60 = vmax.f32 %v2765_v45, %v3277_v44  ;;  %v1585_v48 = vpop.f32.mrb[76].mxu0  ;;  %v2225_v49 = vpop.f32.mrb[76].mxu1 }
 0x17f   :  { %v4045_v20 = vmax.f32 %v3021_v9, %v3533_v62  ;;  %v12969_v33 = vpack.c.bf16 %v3788_v55, %v3786_v34  ;;  %v2766_v54 = vadd.f32 %v12840_v13, %v1585_v48  ;;  %v3022_v38 = vadd.f32 %v12840_v13, %v2225_v49  ;;  %v1587_v12 = vpop.f32.mrb[77].mxu0  ;;  %v2227_v22 = vpop.f32.mrb[77].mxu1  ;;  %v11591_v9 = vld [vmem:[%s15779_s0 + $0x370] sm:$0xff]  }
 0x180   :  { %v12971_v27 = vpack.c.bf16 %v4044_v4, %v4042_v52  ;;  %v2767_v17 = vadd.f32 %v12853_v46, %v1587_v12  ;;  %v3023_v8 = vadd.f32 %v12853_v46, %v2227_v22  ;;  %v1589_v30 = vpop.f32.mrb[78].mxu0  ;;  %v2229_v42 = vpop.f32.mrb[78].mxu1  ;;  %v12983_v31 = vpack.c.bf16 %v3789_v60, %v3787_v1 }
 0x181   :  { %16058 = vst [vmem:[#allocation60_spill] sm:$0xff] %v12969_v33  ;;  %v12985_v48 = vpack.c.bf16 %v4045_v20, %v4043_v25  ;;  %v3278_v49 = vmul.f32 0.2, %v2766_v54  ;;  %v3534_v50 = vmul.f32 0.2, %v3022_v38  ;;  %v2768_v16 = vadd.f32 %v12864_v7, %v1589_v30  ;;  %v1591_v58 = vpop.f32.mrb[79].mxu0 }
 0x182   :  { %16059 = vst [vmem:[#allocation61_spill] sm:$0xff] %v12971_v27  ;;  %16060 = vst [vmem:[#allocation62_spill] sm:$0xff] %v12983_v31  ;;  %v3024_v53 = vadd.f32 %v12864_v7, %v2229_v42  ;;  %v2231_v45 = vpop.f32.mrb[79].mxu1  ;;  %v3279_v21 = vmul.f32 0.2, %v2767_v17  ;;  %v2769_v12 = vadd.f32 %v12871_v41, %v1591_v58 }
 0x183   :  { %16061 = vst [vmem:[#allocation63_spill] sm:$0xff] %v12985_v48  ;;  %v3535_v2 = vmul.f32 0.2, %v3023_v8  ;;  %v3025_v44 = vadd.f32 %v12871_v41, %v2231_v45  ;;  %v3280_v62 = vmul.f32 0.2, %v2768_v16  ;;  %11255 = vmatmul.mubr.msk.bf16.gmra.mrb[184].mxu0 %vm976_vm0, %v11590_v19  ;;  %11319 = vmatmul.mubr.msk.bf16.gmra.mrb[184].mxu1 %vm976_vm0, %v11591_v9  ;;  %v3790_v55 = vmax.f32 %v2766_v54, %v3278_v49  ;;  %v11593_v54 = vld [vmem:[%s15779_s0 + $0x378] sm:$0xff]  }
 0x184   :  { %v3536_v34 = vmul.f32 0.2, %v3024_v53  ;;  %v3281_v20 = vmul.f32 0.2, %v2769_v12  ;;  %1863 = vmatprep.mubr.bf16.mxu0 %v16010_v0  ;;  %2503 = vmatprep.mubr.bf16.mxu1 %v16010_v0  ;;  %v4046_v4 = vmax.f32 %v3022_v38, %v3534_v50  ;;  %v3791_v60 = vmax.f32 %v2767_v17, %v3279_v21  ;;  %v11592_v38 = vld [vmem:[%s15779_s0 + $0x178] sm:$0xff]  }
 0x185   :  { %v3537_v52 = vmul.f32 0.2, %v3025_v44  ;;  %v3792_v1 = vmax.f32 %v2768_v16, %v3280_v62  ;;  %v4047_v22 = vmax.f32 %v3023_v8, %v3535_v2 }
 0x186   :  { %v4048_v25 = vmax.f32 %v3024_v53, %v3536_v34  ;;  %v3793_v30 = vmax.f32 %v2769_v12, %v3281_v20  ;;  %v1595_v58 = vpop.f32.mrb[80].mxu0  ;;  %v2235_v45 = vpop.f32.mrb[80].mxu1 }
 0x187   :  { %v4049_v42 = vmax.f32 %v3025_v44, %v3537_v52  ;;  %v12995_v27 = vpack.c.bf16 %v3792_v1, %v3790_v55  ;;  %v2770_v9 = vadd.f32 %v12690_v59, %v1595_v58  ;;  %v3026_v48 = vadd.f32 %v12690_v59, %v2235_v45  ;;  %v1597_v33 = vpop.f32.mrb[81].mxu0  ;;  %v2237_v31 = vpop.f32.mrb[81].mxu1 }
 0x188   :  { %v12997_v19 = vpack.c.bf16 %v4048_v25, %v4046_v4  ;;  %v2771_v17 = vadd.f32 %v12703_v23, %v1597_v33  ;;  %v3027_v8 = vadd.f32 %v12703_v23, %v2237_v31  ;;  %v1599_v49 = vpop.f32.mrb[82].mxu0  ;;  %v2239_v50 = vpop.f32.mrb[82].mxu1  ;;  %v13009_v16 = vpack.c.bf16 %v3793_v30, %v3791_v60 }
 0x189   :  { %16062 = vst [vmem:[#allocation64_spill] sm:$0xff] %v12995_v27  ;;  %v13011_v53 = vpack.c.bf16 %v4049_v42, %v4047_v22  ;;  %v3282_v59 = vmul.f32 0.2, %v2770_v9  ;;  %v3538_v21 = vmul.f32 0.2, %v3026_v48  ;;  %v2772_v2 = vadd.f32 %v12714_v63, %v1599_v49  ;;  %v1601_v44 = vpop.f32.mrb[83].mxu0 }
 0x18a   :  { %16063 = vst [vmem:[#allocation65_spill] sm:$0xff] %v12997_v19  ;;  %16064 = vst [vmem:[#allocation66_spill] sm:$0xff] %v13009_v16  ;;  %v3028_v12 = vadd.f32 %v12714_v63, %v2239_v50  ;;  %v2241_v62 = vpop.f32.mrb[83].mxu1  ;;  %v3283_v34 = vmul.f32 0.2, %v2771_v17  ;;  %v2773_v33 = vadd.f32 %v12721_v11, %v1601_v44 }
 0x18b   :  { %16065 = vst [vmem:[#allocation67_spill] sm:$0xff] %v13011_v53  ;;  %v3539_v20 = vmul.f32 0.2, %v3027_v8  ;;  %v3029_v23 = vadd.f32 %v12721_v11, %v2241_v62  ;;  %v3284_v31 = vmul.f32 0.2, %v2772_v2  ;;  %11256 = vmatmul.mubr.msk.bf16.gmra.mrb[188].mxu0 %vm976_vm0, %v11592_v38  ;;  %11320 = vmatmul.mubr.msk.bf16.gmra.mrb[188].mxu1 %vm976_vm0, %v11593_v54  ;;  %v3794_v63 = vmax.f32 %v2770_v9, %v3282_v59  ;;  %v11595_v9 = vld [vmem:[%s15779_s0 + $0x380] sm:$0xff]  }
 0x18c   :  { %v3540_v52 = vmul.f32 0.2, %v3028_v12  ;;  %v3285_v55 = vmul.f32 0.2, %v2773_v33  ;;  %1873 = vmatprep.mubr.bf16.mxu0 %v16010_v0  ;;  %2513 = vmatprep.mubr.bf16.mxu1 %v16010_v0  ;;  %v4050_v1 = vmax.f32 %v3026_v48, %v3538_v21  ;;  %v3795_v22 = vmax.f32 %v2771_v17, %v3283_v34  ;;  %v11594_v48 = vld [vmem:[%s15779_s0 + $0x180] sm:$0xff]  }
 0x18d   :  { %v3541_v4 = vmul.f32 0.2, %v3029_v23  ;;  %v3796_v25 = vmax.f32 %v2772_v2, %v3284_v31  ;;  %v4051_v30 = vmax.f32 %v3027_v8, %v3539_v20 }
 0x18e   :  { %v4052_v60 = vmax.f32 %v3028_v12, %v3540_v52  ;;  %v3797_v42 = vmax.f32 %v2773_v33, %v3285_v55  ;;  %v1605_v58 = vpop.f32.mrb[84].mxu0  ;;  %v2245_v45 = vpop.f32.mrb[84].mxu1 }
 0x18f   :  { %v4053_v11 = vmax.f32 %v3029_v23, %v3541_v4  ;;  %v13021_v49 = vpack.c.bf16 %v3796_v25, %v3794_v63  ;;  %v2774_v54 = vadd.f32 %v12736_v51, %v1605_v58  ;;  %v3030_v50 = vadd.f32 %v12736_v51, %v2245_v45  ;;  %v1607_v44 = vpop.f32.mrb[85].mxu0  ;;  %v2247_v62 = vpop.f32.mrb[85].mxu1 }
 0x190   :  { %v13023_v38 = vpack.c.bf16 %v4052_v60, %v4050_v1  ;;  %v2775_v17 = vadd.f32 %v12749_v35, %v1607_v44  ;;  %v3031_v8 = vadd.f32 %v12749_v35, %v2247_v62  ;;  %v1609_v59 = vpop.f32.mrb[86].mxu0  ;;  %v2249_v21 = vpop.f32.mrb[86].mxu1  ;;  %v13035_v2 = vpack.c.bf16 %v3797_v42, %v3795_v22 }
 0x191   :  { %16066 = vst [vmem:[#allocation68_spill] sm:$0xff] %v13021_v49  ;;  %v13037_v12 = vpack.c.bf16 %v4053_v11, %v4051_v30  ;;  %v3286_v51 = vmul.f32 0.2, %v2774_v54  ;;  %v3542_v34 = vmul.f32 0.2, %v3030_v50  ;;  %v2776_v20 = vadd.f32 %v12760_v15, %v1609_v59  ;;  %v1611_v23 = vpop.f32.mrb[87].mxu0 }
 0x192   :  { %16067 = vst [vmem:[#allocation69_spill] sm:$0xff] %v13023_v38  ;;  %16068 = vst [vmem:[#allocation70_spill] sm:$0xff] %v13035_v2  ;;  %v3032_v33 = vadd.f32 %v12760_v15, %v2249_v21  ;;  %v2251_v31 = vpop.f32.mrb[87].mxu1  ;;  %v3287_v52 = vmul.f32 0.2, %v2775_v17  ;;  %v2777_v4 = vadd.f32 %v12767_v47, %v1611_v23 }
 0x193   :  { %16069 = vst [vmem:[#allocation71_spill] sm:$0xff] %v13037_v12  ;;  %v3543_v55 = vmul.f32 0.2, %v3031_v8  ;;  %v3033_v35 = vadd.f32 %v12767_v47, %v2251_v31  ;;  %v3288_v63 = vmul.f32 0.2, %v2776_v20  ;;  %11257 = vmatmul.mubr.msk.bf16.gmra.mrb[192].mxu0 %vm976_vm0, %v11594_v48  ;;  %11321 = vmatmul.mubr.msk.bf16.gmra.mrb[192].mxu1 %vm976_vm0, %v11595_v9  ;;  %v3798_v15 = vmax.f32 %v2774_v54, %v3286_v51  ;;  %v11602_v54 = vld [vmem:[%s15779_s0 + $0x188] sm:$0xff]  }
 0x194   :  { %v3544_v1 = vmul.f32 0.2, %v3032_v33  ;;  %v3289_v25 = vmul.f32 0.2, %v2777_v4  ;;  %1883 = vmatprep.mubr.bf16.mxu0 %v16010_v0  ;;  %2523 = vmatprep.mubr.bf16.mxu1 %v16010_v0  ;;  %v4054_v22 = vmax.f32 %v3030_v50, %v3542_v34  ;;  %v3799_v11 = vmax.f32 %v2775_v17, %v3287_v52  ;;  %v11603_v50 = vld [vmem:[%s15779_s0 + $0x388] sm:$0xff]  }
 0x195   :  { %v3545_v60 = vmul.f32 0.2, %v3033_v35  ;;  %v3800_v30 = vmax.f32 %v2776_v20, %v3288_v63  ;;  %v4055_v58 = vmax.f32 %v3031_v8, %v3543_v55 }
 0x196   :  { %v4056_v42 = vmax.f32 %v3032_v33, %v3544_v1  ;;  %v3801_v45 = vmax.f32 %v2777_v4, %v3289_v25  ;;  %v1615_v44 = vpop.f32.mrb[88].mxu0  ;;  %v2255_v62 = vpop.f32.mrb[88].mxu1 }
 0x197   :  { %v4057_v47 = vmax.f32 %v3033_v35, %v3545_v60  ;;  %v13047_v59 = vpack.c.bf16 %v3800_v30, %v3798_v15  ;;  %v2778_v9 = vadd.f32 %v12788_v43, %v1615_v44  ;;  %v3034_v21 = vadd.f32 %v12788_v43, %v2255_v62  ;;  %v1617_v23 = vpop.f32.mrb[89].mxu0  ;;  %v2257_v31 = vpop.f32.mrb[89].mxu1 }
 0x198   :  { %v13049_v48 = vpack.c.bf16 %v4056_v42, %v4054_v22  ;;  %v2779_v17 = vadd.f32 %v12801_v57, %v1617_v23  ;;  %v3035_v8 = vadd.f32 %v12801_v57, %v2257_v31  ;;  %v1619_v51 = vpop.f32.mrb[90].mxu0  ;;  %v2259_v34 = vpop.f32.mrb[90].mxu1  ;;  %v13061_v20 = vpack.c.bf16 %v3801_v45, %v3799_v11 }
 0x199   :  { %16070 = vst [vmem:[#allocation72_spill] sm:$0xff] %v13047_v59  ;;  %v13063_v33 = vpack.c.bf16 %v4057_v47, %v4055_v58  ;;  %v3290_v43 = vmul.f32 0.2, %v2778_v9  ;;  %v3546_v52 = vmul.f32 0.2, %v3034_v21  ;;  %v2780_v55 = vadd.f32 %v12818_v40, %v1619_v51  ;;  %v1621_v35 = vpop.f32.mrb[91].mxu0 }
 0x19a   :  { %16071 = vst [vmem:[#allocation73_spill] sm:$0xff] %v13049_v48  ;;  %16072 = vst [vmem:[#allocation74_spill] sm:$0xff] %v13061_v20  ;;  %v3036_v4 = vadd.f32 %v12818_v40, %v2259_v34  ;;  %v2261_v63 = vpop.f32.mrb[91].mxu1  ;;  %v3291_v1 = vmul.f32 0.2, %v2779_v17  ;;  %v2781_v60 = vadd.f32 %v12825_v6, %v1621_v35 }
 0x19b   :  { %16073 = vst [vmem:[#allocation75_spill] sm:$0xff] %v13063_v33  ;;  %v3547_v25 = vmul.f32 0.2, %v3035_v8  ;;  %v3037_v57 = vadd.f32 %v12825_v6, %v2261_v63  ;;  %v3292_v15 = vmul.f32 0.2, %v2780_v55  ;;  %11258 = vmatmul.mubr.msk.bf16.gmra.mrb[196].mxu0 %vm976_vm0, %v11602_v54  ;;  %11322 = vmatmul.mubr.msk.bf16.gmra.mrb[196].mxu1 %vm976_vm0, %v11603_v50  ;;  %v3802_v40 = vmax.f32 %v2778_v9, %v3290_v43  ;;  %v11604_v9 = vld [vmem:[%s15779_s0 + $0x190] sm:$0xff]  }
 0x19c   :  { %v3548_v22 = vmul.f32 0.2, %v3036_v4  ;;  %v3293_v30 = vmul.f32 0.2, %v2781_v60  ;;  %1893 = vmatprep.mubr.bf16.mxu0 %v16010_v0  ;;  %2533 = vmatprep.mubr.bf16.mxu1 %v16010_v0  ;;  %v4058_v11 = vmax.f32 %v3034_v21, %v3546_v52  ;;  %v3803_v47 = vmax.f32 %v2779_v17, %v3291_v1  ;;  %v11605_v21 = vld [vmem:[%s15779_s0 + $0x390] sm:$0xff]  }
 0x19d   :  { %v3549_v42 = vmul.f32 0.2, %v3037_v57  ;;  %v3804_v58 = vmax.f32 %v2780_v55, %v3292_v15  ;;  %v4059_v44 = vmax.f32 %v3035_v8, %v3547_v25 }
 0x19e   :  { %v4060_v45 = vmax.f32 %v3036_v4, %v3548_v22  ;;  %v3805_v62 = vmax.f32 %v2781_v60, %v3293_v30  ;;  %v1625_v23 = vpop.f32.mrb[92].mxu0  ;;  %v2265_v31 = vpop.f32.mrb[92].mxu1 }
 0x19f   :  { %v4061_v6 = vmax.f32 %v3037_v57, %v3549_v42  ;;  %v13073_v51 = vpack.c.bf16 %v3804_v58, %v3802_v40  ;;  %v2782_v50 = vadd.f32 %v12840_v13, %v1625_v23  ;;  %v3038_v34 = vadd.f32 %v12840_v13, %v2265_v31  ;;  %v1627_v35 = vpop.f32.mrb[93].mxu0  ;;  %v2267_v63 = vpop.f32.mrb[93].mxu1 }
 0x1a0   :  { %v13075_v54 = vpack.c.bf16 %v4060_v45, %v4058_v11  ;;  %v2783_v17 = vadd.f32 %v12853_v46, %v1627_v35  ;;  %v3039_v8 = vadd.f32 %v12853_v46, %v2267_v63  ;;  %v1629_v43 = vpop.f32.mrb[94].mxu0  ;;  %v2269_v52 = vpop.f32.mrb[94].mxu1  ;;  %v13087_v55 = vpack.c.bf16 %v3805_v62, %v3803_v47 }
 0x1a1   :  { %16074 = vst [vmem:[#allocation76_spill] sm:$0xff] %v13073_v51  ;;  %v13089_v4 = vpack.c.bf16 %v4061_v6, %v4059_v44  ;;  %v3294_v13 = vmul.f32 0.2, %v2782_v50  ;;  %v3550_v1 = vmul.f32 0.2, %v3038_v34  ;;  %v2784_v25 = vadd.f32 %v12864_v7, %v1629_v43  ;;  %v1631_v57 = vpop.f32.mrb[95].mxu0 }
 0x1a2   :  { %16075 = vst [vmem:[#allocation77_spill] sm:$0xff] %v13075_v54  ;;  %16076 = vst [vmem:[#allocation78_spill] sm:$0xff] %v13087_v55  ;;  %v3040_v60 = vadd.f32 %v12864_v7, %v2269_v52  ;;  %v2271_v15 = vpop.f32.mrb[95].mxu1  ;;  %v3295_v22 = vmul.f32 0.2, %v2783_v17  ;;  %v2785_v42 = vadd.f32 %v12871_v41, %v1631_v57 }
 0x1a3   :  { %16077 = vst [vmem:[#allocation79_spill] sm:$0xff] %v13089_v4  ;;  %v3551_v30 = vmul.f32 0.2, %v3039_v8  ;;  %v3041_v46 = vadd.f32 %v12871_v41, %v2271_v15  ;;  %v3296_v40 = vmul.f32 0.2, %v2784_v25  ;;  %11259 = vmatmul.mubr.msk.bf16.gmra.mrb[200].mxu0 %vm976_vm0, %v11604_v9  ;;  %11323 = vmatmul.mubr.msk.bf16.gmra.mrb[200].mxu1 %vm976_vm0, %v11605_v21  ;;  %v3806_v7 = vmax.f32 %v2782_v50, %v3294_v13  ;;  %v13106_v21 = vld [vmem:[%s15782_s2] sm:$0xff] }
 0x1a4   :  { %v3552_v11 = vmul.f32 0.2, %v3040_v60  ;;  %v3297_v58 = vmul.f32 0.2, %v2785_v42  ;;  %1903 = vmatprep.mubr.bf16.mxu0 %v16010_v0  ;;  %2543 = vmatprep.mubr.bf16.mxu1 %v16010_v0  ;;  %v4062_v47 = vmax.f32 %v3038_v34, %v3550_v1  ;;  %v3807_v6 = vmax.f32 %v2783_v17, %v3295_v22  ;;  %v11607_v13 = vld [vmem:[%s15779_s0 + $0x398] sm:$0xff]   ;;  %v13119_v1 = vld [vmem:[%s15782_s2 + $0x8] sm:$0xff] }
 0x1a5   :  { %v3553_v45 = vmul.f32 0.2, %v3041_v46  ;;  %v3808_v44 = vmax.f32 %v2784_v25, %v3296_v40  ;;  %v4063_v23 = vmax.f32 %v3039_v8, %v3551_v30  ;;  %v11606_v8 = vld [vmem:[%s15779_s0 + $0x198] sm:$0xff]   ;;  %v13130_v40 = vld [vmem:[%s15782_s2 + $0x10] sm:$0xff] }
 0x1a6   :  { %v4064_v62 = vmax.f32 %v3040_v60, %v3552_v11  ;;  %v3809_v31 = vmax.f32 %v2785_v42, %v3297_v58  ;;  %v1635_v35 = vpop.f32.mrb[96].mxu0  ;;  %v2275_v63 = vpop.f32.mrb[96].mxu1 }
 0x1a7   :  { %v4065_v41 = vmax.f32 %v3041_v46, %v3553_v45  ;;  %v13099_v43 = vpack.c.bf16 %v3808_v44, %v3806_v7  ;;  %v2786_v50 = vadd.f32 %v13106_v21, %v1635_v35  ;;  %v3042_v34 = vadd.f32 %v13106_v21, %v2275_v63  ;;  %v1637_v52 = vpop.f32.mrb[97].mxu0  ;;  %v2277_v17 = vpop.f32.mrb[97].mxu1 }
 0x1a8   :  { %v13101_v9 = vpack.c.bf16 %v4064_v62, %v4062_v47  ;;  %v2787_v25 = vadd.f32 %v13119_v1, %v1637_v52  ;;  %v3043_v60 = vadd.f32 %v13119_v1, %v2277_v17  ;;  %v1639_v57 = vpop.f32.mrb[98].mxu0  ;;  %v2279_v15 = vpop.f32.mrb[98].mxu1  ;;  %v13123_v22 = vpack.c.bf16 %v3809_v31, %v3807_v6  ;;  %v13137_v62 = vld [vmem:[%s15782_s2 + $0x18] sm:$0xff] }
 0x1a9   :  { %16078 = vst [vmem:[#allocation80_spill] sm:$0xff] %v13099_v43  ;;  %v13125_v30 = vpack.c.bf16 %v4065_v41, %v4063_v23  ;;  %v3298_v42 = vmul.f32 0.2, %v2786_v50  ;;  %v3554_v46 = vmul.f32 0.2, %v3042_v34  ;;  %v2788_v11 = vadd.f32 %v13130_v40, %v1639_v57  ;;  %v1641_v45 = vpop.f32.mrb[99].mxu0 }
 0x1aa   :  { %16079 = vst [vmem:[#allocation81_spill] sm:$0xff] %v13101_v9  ;;  %16080 = vst [vmem:[#allocation82_spill] sm:$0xff] %v13123_v22  ;;  %v3044_v58 = vadd.f32 %v13130_v40, %v2279_v15  ;;  %v2281_v7 = vpop.f32.mrb[99].mxu1  ;;  %v3299_v47 = vmul.f32 0.2, %v2787_v25  ;;  %v2789_v6 = vadd.f32 %v13137_v62, %v1641_v45 }
 0x1ab   :  { %16081 = vst [vmem:[#allocation83_spill] sm:$0xff] %v13125_v30  ;;  %v3555_v44 = vmul.f32 0.2, %v3043_v60  ;;  %v3045_v23 = vadd.f32 %v13137_v62, %v2281_v7  ;;  %v3300_v31 = vmul.f32 0.2, %v2788_v11  ;;  %11260 = vmatmul.mubr.msk.bf16.gmra.mrb[204].mxu0 %vm976_vm0, %v11606_v8  ;;  %11324 = vmatmul.mubr.msk.bf16.gmra.mrb[204].mxu1 %vm976_vm0, %v11607_v13  ;;  %v3810_v52 = vmax.f32 %v2786_v50, %v3298_v42  ;;  %v13152_v13 = vld [vmem:[%s15782_s2 + $0x20] sm:$0xff] }
 0x1ac   :  { %v3556_v41 = vmul.f32 0.2, %v3044_v58  ;;  %v3301_v35 = vmul.f32 0.2, %v2789_v6  ;;  %1913 = vmatprep.mubr.bf16.mxu0 %v16010_v0  ;;  %2553 = vmatprep.mubr.bf16.mxu1 %v16010_v0  ;;  %v4066_v17 = vmax.f32 %v3042_v34, %v3554_v46  ;;  %v3811_v9 = vmax.f32 %v2787_v25, %v3299_v47  ;;  %v11609_v46 = vld [vmem:[%s15779_s0 + $0x3a0] sm:$0xff]  }
 0x1ad   :  { %v3557_v63 = vmul.f32 0.2, %v3045_v23  ;;  %v3812_v57 = vmax.f32 %v2788_v11, %v3300_v31  ;;  %v4067_v45 = vmax.f32 %v3043_v60, %v3555_v44  ;;  %v11608_v60 = vld [vmem:[%s15779_s0 + $0x1a0] sm:$0xff]   ;;  %v13165_v11 = vld [vmem:[%s15782_s2 + $0x28] sm:$0xff] }
 0x1ae   :  { %v4068_v15 = vmax.f32 %v3044_v58, %v3556_v41  ;;  %v3813_v30 = vmax.f32 %v2789_v6, %v3301_v35  ;;  %v1645_v54 = vpop.f32.mrb[100].mxu0  ;;  %v2285_v4 = vpop.f32.mrb[100].mxu1  ;;  %v13176_v41 = vld [vmem:[%s15782_s2 + $0x30] sm:$0xff] }
 0x1af   :  { %v4069_v7 = vmax.f32 %v3045_v23, %v3557_v63  ;;  %v13145_v48 = vpack.c.bf16 %v3812_v57, %v3810_v52  ;;  %v2790_v50 = vadd.f32 %v13152_v13, %v1645_v54  ;;  %v3046_v34 = vadd.f32 %v13152_v13, %v2285_v4  ;;  %v1647_v42 = vpop.f32.mrb[101].mxu0  ;;  %v2287_v25 = vpop.f32.mrb[101].mxu1 }
 0x1b0   :  { %v13147_v8 = vpack.c.bf16 %v4068_v15, %v4066_v17  ;;  %v2791_v58 = vadd.f32 %v13165_v11, %v1647_v42  ;;  %v3047_v54 = vadd.f32 %v13165_v11, %v2287_v25  ;;  %v1649_v4 = vpop.f32.mrb[102].mxu0  ;;  %v2289_v47 = vpop.f32.mrb[102].mxu1  ;;  %v13169_v44 = vpack.c.bf16 %v3813_v30, %v3811_v9  ;;  %v13183_v9 = vld [vmem:[%s15782_s2 + $0x38] sm:$0xff] }
 0x1b1   :  { %16082 = vst [vmem:[#allocation84_spill] sm:$0xff] %v13145_v48  ;;  %v13171_v6 = vpack.c.bf16 %v4069_v7, %v4067_v45  ;;  %v3302_v23 = vmul.f32 0.2, %v2790_v50  ;;  %v3558_v31 = vmul.f32 0.2, %v3046_v34  ;;  %v2792_v35 = vadd.f32 %v13176_v41, %v1649_v4  ;;  %v1651_v52 = vpop.f32.mrb[103].mxu0 }
 0x1b2   :  { %16083 = vst [vmem:[#allocation85_spill] sm:$0xff] %v13147_v8  ;;  %16084 = vst [vmem:[#allocation86_spill] sm:$0xff] %v13169_v44  ;;  %v3048_v63 = vadd.f32 %v13176_v41, %v2289_v47  ;;  %v2291_v17 = vpop.f32.mrb[103].mxu1  ;;  %v3303_v57 = vmul.f32 0.2, %v2791_v58  ;;  %v2793_v30 = vadd.f32 %v13183_v9, %v1651_v52 }
 0x1b3   :  { %16085 = vst [vmem:[#allocation87_spill] sm:$0xff] %v13171_v6  ;;  %v3559_v15 = vmul.f32 0.2, %v3047_v54  ;;  %v3049_v45 = vadd.f32 %v13183_v9, %v2291_v17  ;;  %v3304_v7 = vmul.f32 0.2, %v2792_v35  ;;  %11261 = vmatmul.mubr.msk.bf16.gmra.mrb[208].mxu0 %vm976_vm0, %v11608_v60  ;;  %11325 = vmatmul.mubr.msk.bf16.gmra.mrb[208].mxu1 %vm976_vm0, %v11609_v46  ;;  %v3814_v47 = vmax.f32 %v2790_v50, %v3302_v23  ;;  %v13198_v46 = vld [vmem:[%s15782_s2 + $0x40] sm:$0xff] }
 0x1b4   :  { %v3560_v42 = vmul.f32 0.2, %v3048_v63  ;;  %v3305_v25 = vmul.f32 0.2, %v2793_v30  ;;  %1923 = vmatprep.mubr.bf16.mxu0 %v16010_v0  ;;  %2563 = vmatprep.mubr.bf16.mxu1 %v16010_v0  ;;  %v4070_v8 = vmax.f32 %v3046_v34, %v3558_v31  ;;  %v3815_v38 = vmax.f32 %v2791_v58, %v3303_v57 }
 0x1b5   :  { %v3561_v4 = vmul.f32 0.2, %v3049_v45  ;;  %v3816_v6 = vmax.f32 %v2792_v35, %v3304_v7  ;;  %v4071_v52 = vmax.f32 %v3047_v54, %v3559_v15  ;;  %v11616_v54 = vld [vmem:[%s15779_s0 + $0x1a8] sm:$0xff]  }
 0x1b6   :  { %v4072_v33 = vmax.f32 %v3048_v63, %v3560_v42  ;;  %v3817_v12 = vmax.f32 %v2793_v30, %v3305_v25  ;;  %v1655_v19 = vpop.f32.mrb[104].mxu0  ;;  %v2295_v53 = vpop.f32.mrb[104].mxu1  ;;  %v13222_v30 = vld [vmem:[%s15782_s2 + $0x50] sm:$0xff] }
 0x1b7   :  { %v4073_v17 = vmax.f32 %v3049_v45, %v3561_v4  ;;  %v13191_v48 = vpack.c.bf16 %v3816_v6, %v3814_v47  ;;  %v2794_v50 = vadd.f32 %v13198_v46, %v1655_v19  ;;  %v3050_v34 = vadd.f32 %v13198_v46, %v2295_v53  ;;  %v1657_v23 = vpop.f32.mrb[105].mxu0  ;;  %v2297_v58 = vpop.f32.mrb[105].mxu1 }
 0x1b8   :  { %v13193_v60 = vpack.c.bf16 %v4072_v33, %v4070_v8  ;;  %v11617_v33 = vld [vmem:[%s15779_s0 + $0x3a8] sm:$0xff]   ;;  %v1659_v53 = vpop.f32.mrb[106].mxu0  ;;  %v2299_v31 = vpop.f32.mrb[106].mxu1  ;;  %v13215_v35 = vpack.c.bf16 %v3817_v12, %v3815_v38  ;;  %v13229_v38 = vld [vmem:[%s15782_s2 + $0x58] sm:$0xff] }
 0x1b9   :  { %16086 = vst [vmem:[#allocation88_spill] sm:$0xff] %v13191_v48  ;;  %v13211_v8 = vld [vmem:[%s15782_s2 + $0x48] sm:$0xff]  ;;  %v13217_v63 = vpack.c.bf16 %v4073_v17, %v4071_v52  ;;  %v3306_v57 = vmul.f32 0.2, %v2794_v50  ;;  %v3562_v15 = vmul.f32 0.2, %v3050_v34  ;;  %v2796_v45 = vadd.f32 %v13222_v30, %v1659_v53 }
 0x1ba   :  { %16087 = vst [vmem:[#allocation89_spill] sm:$0xff] %v13193_v60  ;;  %v2795_v6 = vadd.f32 %v13211_v8, %v1657_v23  ;;  %v3051_v19 = vadd.f32 %v13211_v8, %v2297_v58  ;;  %16088 = vst [vmem:[#allocation90_spill] sm:$0xff] %v13215_v35  ;;  %v3052_v7 = vadd.f32 %v13222_v30, %v2299_v31  ;;  %v1661_v42 = vpop.f32.mrb[107].mxu0  ;;  %v2301_v25 = vpop.f32.mrb[107].mxu1 }
 0x1bb   :  { %16089 = vst [vmem:[#allocation91_spill] sm:$0xff] %v13217_v63  ;;  %v2797_v12 = vadd.f32 %v13229_v38, %v1661_v42  ;;  %v3053_v52 = vadd.f32 %v13229_v38, %v2301_v25  ;;  %v3308_v17 = vmul.f32 0.2, %v2796_v45  ;;  %11262 = vmatmul.mubr.msk.bf16.gmra.mrb[212].mxu0 %vm976_vm0, %v11616_v54  ;;  %11326 = vmatmul.mubr.msk.bf16.gmra.mrb[212].mxu1 %vm976_vm0, %v11617_v33  ;;  %v13244_v33 = vld [vmem:[%s15782_s2 + $0x60] sm:$0xff] }
 0x1bc   :  { %v3307_v4 = vmul.f32 0.2, %v2795_v6  ;;  %v3563_v47 = vmul.f32 0.2, %v3051_v19  ;;  %v3564_v23 = vmul.f32 0.2, %v3052_v7  ;;  %1933 = vmatprep.mubr.bf16.mxu0 %v16010_v0  ;;  %2573 = vmatprep.mubr.bf16.mxu1 %v16010_v0  ;;  %v3818_v31 = vmax.f32 %v2794_v50, %v3306_v57 }
 0x1bd   :  { %v3309_v58 = vmul.f32 0.2, %v2797_v12  ;;  %v3565_v53 = vmul.f32 0.2, %v3053_v52  ;;  %v4074_v60 = vmax.f32 %v3050_v34, %v3562_v15  ;;  %v3820_v63 = vmax.f32 %v2796_v45, %v3308_v17 }
 0x1be   :  { %v4076_v48 = vmax.f32 %v3052_v7, %v3564_v23  ;;  %v3819_v35 = vmax.f32 %v2795_v6, %v3307_v4  ;;  %v4075_v42 = vmax.f32 %v3051_v19, %v3563_v47  ;;  %v1665_v43 = vpop.f32.mrb[108].mxu0  ;;  %v2305_v22 = vpop.f32.mrb[108].mxu1  ;;  %v11618_v19 = vld [vmem:[%s15779_s0 + $0x1b0] sm:$0xff]  }
 0x1bf   :  { %v3821_v44 = vmax.f32 %v2797_v12, %v3309_v58  ;;  %v4077_v25 = vmax.f32 %v3053_v52, %v3565_v53  ;;  %v13237_v51 = vpack.c.bf16 %v3820_v63, %v3818_v31  ;;  %v2798_v50 = vadd.f32 %v13244_v33, %v1665_v43  ;;  %v1667_v57 = vpop.f32.mrb[109].mxu0  ;;  %v2307_v6 = vpop.f32.mrb[109].mxu1  ;;  %v13268_v12 = vld [vmem:[%s15782_s2 + $0x70] sm:$0xff] }
 0x1c0   :  { %v13239_v54 = vpack.c.bf16 %v4076_v48, %v4074_v60  ;;  %v3054_v34 = vadd.f32 %v13244_v33, %v2305_v22  ;;  %v11619_v48 = vld [vmem:[%s15779_s0 + $0x3b0] sm:$0xff]   ;;  %v13257_v60 = vld [vmem:[%s15782_s2 + $0x68] sm:$0xff]  ;;  %v1669_v22 = vpop.f32.mrb[110].mxu0  ;;  %v2309_v15 = vpop.f32.mrb[110].mxu1 }
 0x1c1   :  { %16090 = vst [vmem:[#allocation92_spill] sm:$0xff] %v13237_v51  ;;  %v2799_v63 = vadd.f32 %v13257_v60, %v1667_v57  ;;  %v3055_v43 = vadd.f32 %v13257_v60, %v2307_v6  ;;  %v13261_v45 = vpack.c.bf16 %v3821_v44, %v3819_v35  ;;  %v13263_v7 = vpack.c.bf16 %v4077_v25, %v4075_v42  ;;  %v1671_v23 = vpop.f32.mrb[111].mxu0  ;;  %v2311_v58 = vpop.f32.mrb[111].mxu1  ;;  %v13275_v44 = vld [vmem:[%s15782_s2 + $0x78] sm:$0xff] }
 0x1c2   :  { %16091 = vst [vmem:[#allocation93_spill] sm:$0xff] %v13239_v54  ;;  %v3310_v4 = vmul.f32 0.2, %v2798_v50  ;;  %v3566_v47 = vmul.f32 0.2, %v3054_v34  ;;  %v2800_v52 = vadd.f32 %v13268_v12, %v1669_v22  ;;  %v3056_v17 = vadd.f32 %v13268_v12, %v2309_v15 }
 0x1c3   :  { %16092 = vst [vmem:[#allocation94_spill] sm:$0xff] %v13261_v45  ;;  %16093 = vst [vmem:[#allocation95_spill] sm:$0xff] %v13263_v7  ;;  %v3311_v53 = vmul.f32 0.2, %v2799_v63  ;;  %v3567_v31 = vmul.f32 0.2, %v3055_v43  ;;  %v2801_v35 = vadd.f32 %v13275_v44, %v1671_v23  ;;  %v3057_v42 = vadd.f32 %v13275_v44, %v2311_v58  ;;  %11263 = vmatmul.mubr.msk.bf16.gmra.mrb[216].mxu0 %vm976_vm0, %v11618_v19 }
 0x1c4   :  { %v3312_v25 = vmul.f32 0.2, %v2800_v52  ;;  %v3568_v57 = vmul.f32 0.2, %v3056_v17  ;;  %11327 = vmatmul.mubr.msk.bf16.gmra.mrb[216].mxu1 %vm976_vm0, %v11619_v48  ;;  %1943 = vmatprep.mubr.bf16.mxu0 %v16010_v0  ;;  %v3822_v15 = vmax.f32 %v2798_v50, %v3310_v4  ;;  %v4078_v54 = vmax.f32 %v3054_v34, %v3566_v47  ;;  %v11620_v50 = vld [vmem:[%s15779_s0 + $0x1b8] sm:$0xff]  }
 0x1c5   :  { %v3313_v6 = vmul.f32 0.2, %v2801_v35  ;;  %v3569_v22 = vmul.f32 0.2, %v3057_v42  ;;  %2583 = vmatprep.mubr.bf16.mxu1 %v16010_v0  ;;  %v3823_v45 = vmax.f32 %v2799_v63, %v3311_v53  ;;  %v4079_v23 = vmax.f32 %v3055_v43, %v3567_v31  ;;  %v11621_v34 = vld [vmem:[%s15779_s0 + $0x3b8] sm:$0xff]  }
 0x1c6   :  { %v3824_v7 = vmax.f32 %v2800_v52, %v3312_v25  ;;  %v4080_v51 = vmax.f32 %v3056_v17, %v3568_v57  ;;  %v1675_v59 = vpop.f32.mrb[112].mxu0  ;;  %v2315_v20 = vpop.f32.mrb[112].mxu1 }
 0x1c7   :  { %v3825_v55 = vmax.f32 %v2801_v35, %v3313_v6  ;;  %v4081_v58 = vmax.f32 %v3057_v42, %v3569_v22  ;;  %v2802_v48 = vadd.f32 %v13106_v21, %v1675_v59  ;;  %v3058_v2 = vadd.f32 %v13106_v21, %v2315_v20  ;;  %v1677_v27 = vpop.f32.mrb[113].mxu0  ;;  %v2317_v16 = vpop.f32.mrb[113].mxu1 }
 0x1c8   :  { %v13283_v49 = vpack.c.bf16 %v3824_v7, %v3822_v15  ;;  %v13285_v19 = vpack.c.bf16 %v4080_v51, %v4078_v54  ;;  %v2803_v63 = vadd.f32 %v13119_v1, %v1677_v27  ;;  %v3059_v43 = vadd.f32 %v13119_v1, %v2317_v16  ;;  %v1679_v51 = vpop.f32.mrb[114].mxu0  ;;  %v2319_v54 = vpop.f32.mrb[114].mxu1 }
 0x1c9   :  { %v13297_v7 = vpack.c.bf16 %v3825_v55, %v3823_v45  ;;  %v13299_v59 = vpack.c.bf16 %v4081_v58, %v4079_v23  ;;  %v3314_v20 = vmul.f32 0.2, %v2802_v48  ;;  %v3570_v4 = vmul.f32 0.2, %v3058_v2  ;;  %v1681_v17 = vpop.f32.mrb[115].mxu0  ;;  %v2321_v53 = vpop.f32.mrb[115].mxu1 }
 0x1ca   :  { %16094 = vst [vmem:[#allocation96_spill] sm:$0xff] %v13283_v49  ;;  %16095 = vst [vmem:[#allocation97_spill] sm:$0xff] %v13285_v19  ;;  %v2804_v47 = vadd.f32 %v13130_v40, %v1679_v51  ;;  %v3060_v52 = vadd.f32 %v13130_v40, %v2319_v54  ;;  %v3315_v31 = vmul.f32 0.2, %v2803_v63  ;;  %v3571_v35 = vmul.f32 0.2, %v3059_v43 }
 0x1cb   :  { %16096 = vst [vmem:[#allocation98_spill] sm:$0xff] %v13297_v7  ;;  %16097 = vst [vmem:[#allocation99_spill] sm:$0xff] %v13299_v59  ;;  %v2805_v27 = vadd.f32 %v13137_v62, %v1681_v17  ;;  %v3061_v16 = vadd.f32 %v13137_v62, %v2321_v53  ;;  %11264 = vmatmul.mubr.msk.bf16.gmra.mrb[220].mxu0 %vm976_vm0, %v11620_v50  ;;  %v3826_v57 = vmax.f32 %v2802_v48, %v3314_v20  ;;  %v11623_v48 = vld [vmem:[%s15779_s0 + $0x3c0] sm:$0xff]  }
 0x1cc   :  { %v3316_v42 = vmul.f32 0.2, %v2804_v47  ;;  %v3572_v25 = vmul.f32 0.2, %v3060_v52  ;;  %11328 = vmatmul.mubr.msk.bf16.gmra.mrb[220].mxu1 %vm976_vm0, %v11621_v34  ;;  %1953 = vmatprep.mubr.bf16.mxu0 %v16010_v0  ;;  %v4082_v6 = vmax.f32 %v3058_v2, %v3570_v4  ;;  %v3827_v23 = vmax.f32 %v2803_v63, %v3315_v31  ;;  %v11622_v2 = vld [vmem:[%s15779_s0 + $0x1c0] sm:$0xff]  }
 0x1cd   :  { %v3317_v55 = vmul.f32 0.2, %v2805_v27  ;;  %v3573_v45 = vmul.f32 0.2, %v3061_v16  ;;  %2593 = vmatprep.mubr.bf16.mxu1 %v16010_v0  ;;  %v4083_v58 = vmax.f32 %v3059_v43, %v3571_v35 }
 0x1ce   :  { %v3828_v22 = vmax.f32 %v2804_v47, %v3316_v42  ;;  %v4084_v15 = vmax.f32 %v3060_v52, %v3572_v25  ;;  %v1685_v17 = vpop.f32.mrb[116].mxu0  ;;  %v2325_v53 = vpop.f32.mrb[116].mxu1 }
 0x1cf   :  { %v3829_v51 = vmax.f32 %v2805_v27, %v3317_v55  ;;  %v4085_v54 = vmax.f32 %v3061_v16, %v3573_v45  ;;  %v2806_v34 = vadd.f32 %v13152_v13, %v1685_v17  ;;  %v3062_v59 = vadd.f32 %v13152_v13, %v2325_v53  ;;  %v1687_v49 = vpop.f32.mrb[117].mxu0  ;;  %v2327_v7 = vpop.f32.mrb[117].mxu1 }
 0x1d0   :  { %v13309_v19 = vpack.c.bf16 %v3828_v22, %v3826_v57  ;;  %v13311_v50 = vpack.c.bf16 %v4084_v15, %v4082_v6  ;;  %v2807_v63 = vadd.f32 %v13165_v11, %v1687_v49  ;;  %v3063_v43 = vadd.f32 %v13165_v11, %v2327_v7  ;;  %v1689_v20 = vpop.f32.mrb[118].mxu0  ;;  %v2329_v4 = vpop.f32.mrb[118].mxu1 }
 0x1d1   :  { %v13323_v47 = vpack.c.bf16 %v3829_v51, %v3827_v23  ;;  %v13325_v52 = vpack.c.bf16 %v4085_v54, %v4083_v58  ;;  %v3318_v31 = vmul.f32 0.2, %v2806_v34  ;;  %v3574_v35 = vmul.f32 0.2, %v3062_v59  ;;  %v1691_v42 = vpop.f32.mrb[119].mxu0  ;;  %v2331_v25 = vpop.f32.mrb[119].mxu1 }
 0x1d2   :  { %16098 = vst [vmem:[#allocation100_spill] sm:$0xff] %v13309_v19  ;;  %16099 = vst [vmem:[#allocation101_spill] sm:$0xff] %v13311_v50  ;;  %v2808_v27 = vadd.f32 %v13176_v41, %v1689_v20  ;;  %v3064_v16 = vadd.f32 %v13176_v41, %v2329_v4  ;;  %v3319_v55 = vmul.f32 0.2, %v2807_v63  ;;  %v3575_v45 = vmul.f32 0.2, %v3063_v43 }
 0x1d3   :  { %16100 = vst [vmem:[#allocation102_spill] sm:$0xff] %v13323_v47  ;;  %16101 = vst [vmem:[#allocation103_spill] sm:$0xff] %v13325_v52  ;;  %v2809_v49 = vadd.f32 %v13183_v9, %v1691_v42  ;;  %v3065_v7 = vadd.f32 %v13183_v9, %v2331_v25  ;;  %11265 = vmatmul.mubr.msk.bf16.gmra.mrb[224].mxu0 %vm976_vm0, %v11622_v2  ;;  %v3830_v23 = vmax.f32 %v2806_v34, %v3318_v31  ;;  %v11631_v34 = vld [vmem:[%s15779_s0 + $0x3c8] sm:$0xff]  }
 0x1d4   :  { %v3320_v57 = vmul.f32 0.2, %v2808_v27  ;;  %v3576_v6 = vmul.f32 0.2, %v3064_v16  ;;  %11329 = vmatmul.mubr.msk.bf16.gmra.mrb[224].mxu1 %vm976_vm0, %v11623_v48  ;;  %1963 = vmatprep.mubr.bf16.mxu0 %v16010_v0  ;;  %v4086_v58 = vmax.f32 %v3062_v59, %v3574_v35  ;;  %v3831_v17 = vmax.f32 %v2807_v63, %v3319_v55  ;;  %v11630_v59 = vld [vmem:[%s15779_s0 + $0x1c8] sm:$0xff]  }
 0x1d5   :  { %v3321_v22 = vmul.f32 0.2, %v2809_v49  ;;  %v3577_v15 = vmul.f32 0.2, %v3065_v7  ;;  %2603 = vmatprep.mubr.bf16.mxu1 %v16010_v0  ;;  %v4087_v53 = vmax.f32 %v3063_v43, %v3575_v45 }
 0x1d6   :  { %v3832_v51 = vmax.f32 %v2808_v27, %v3320_v57  ;;  %v4088_v54 = vmax.f32 %v3064_v16, %v3576_v6  ;;  %v1695_v42 = vpop.f32.mrb[120].mxu0  ;;  %v2335_v25 = vpop.f32.mrb[120].mxu1 }
 0x1d7   :  { %v3833_v20 = vmax.f32 %v2809_v49, %v3321_v22  ;;  %v4089_v4 = vmax.f32 %v3065_v7, %v3577_v15  ;;  %v2810_v48 = vadd.f32 %v13198_v46, %v1695_v42  ;;  %v3066_v52 = vadd.f32 %v13198_v46, %v2335_v25  ;;  %v1697_v19 = vpop.f32.mrb[121].mxu0  ;;  %v2337_v47 = vpop.f32.mrb[121].mxu1 }
 0x1d8   :  { %v13335_v50 = vpack.c.bf16 %v3832_v51, %v3830_v23  ;;  %v13337_v2 = vpack.c.bf16 %v4088_v54, %v4086_v58  ;;  %v2811_v63 = vadd.f32 %v13211_v8, %v1697_v19  ;;  %v3067_v43 = vadd.f32 %v13211_v8, %v2337_v47  ;;  %v1699_v31 = vpop.f32.mrb[122].mxu0  ;;  %v2339_v35 = vpop.f32.mrb[122].mxu1 }
 0x1d9   :  { %v13349_v27 = vpack.c.bf16 %v3833_v20, %v3831_v17  ;;  %v13351_v16 = vpack.c.bf16 %v4089_v4, %v4087_v53  ;;  %v3322_v55 = vmul.f32 0.2, %v2810_v48  ;;  %v3578_v45 = vmul.f32 0.2, %v3066_v52  ;;  %v1701_v57 = vpop.f32.mrb[123].mxu0  ;;  %v2341_v6 = vpop.f32.mrb[123].mxu1 }
 0x1da   :  { %16102 = vst [vmem:[#allocation104_spill] sm:$0xff] %v13335_v50  ;;  %16103 = vst [vmem:[#allocation105_spill] sm:$0xff] %v13337_v2  ;;  %v2812_v49 = vadd.f32 %v13222_v30, %v1699_v31  ;;  %v3068_v7 = vadd.f32 %v13222_v30, %v2339_v35  ;;  %v3323_v22 = vmul.f32 0.2, %v2811_v63  ;;  %v3579_v15 = vmul.f32 0.2, %v3067_v43 }
 0x1db   :  { %16104 = vst [vmem:[#allocation106_spill] sm:$0xff] %v13349_v27  ;;  %16105 = vst [vmem:[#allocation107_spill] sm:$0xff] %v13351_v16  ;;  %v2813_v19 = vadd.f32 %v13229_v38, %v1701_v57  ;;  %v3069_v47 = vadd.f32 %v13229_v38, %v2341_v6  ;;  %11266 = vmatmul.mubr.msk.bf16.gmra.mrb[228].mxu0 %vm976_vm0, %v11630_v59  ;;  %v3834_v17 = vmax.f32 %v2810_v48, %v3322_v55  ;;  %v11633_v48 = vld [vmem:[%s15779_s0 + $0x3d0] sm:$0xff]  }
 0x1dc   :  { %v3324_v23 = vmul.f32 0.2, %v2812_v49  ;;  %v3580_v58 = vmul.f32 0.2, %v3068_v7  ;;  %11330 = vmatmul.mubr.msk.bf16.gmra.mrb[228].mxu1 %vm976_vm0, %v11631_v34  ;;  %1973 = vmatprep.mubr.bf16.mxu0 %v16010_v0  ;;  %v4090_v53 = vmax.f32 %v3066_v52, %v3578_v45  ;;  %v3835_v42 = vmax.f32 %v2811_v63, %v3323_v22  ;;  %v11632_v52 = vld [vmem:[%s15779_s0 + $0x1d0] sm:$0xff]  }
 0x1dd   :  { %v3325_v51 = vmul.f32 0.2, %v2813_v19  ;;  %v3581_v54 = vmul.f32 0.2, %v3069_v47  ;;  %2613 = vmatprep.mubr.bf16.mxu1 %v16010_v0  ;;  %v4091_v25 = vmax.f32 %v3067_v43, %v3579_v15 }
 0x1de   :  { %v3836_v20 = vmax.f32 %v2812_v49, %v3324_v23  ;;  %v4092_v4 = vmax.f32 %v3068_v7, %v3580_v58  ;;  %v1705_v57 = vpop.f32.mrb[124].mxu0  ;;  %v2345_v6 = vpop.f32.mrb[124].mxu1 }
 0x1df   :  { %v3837_v31 = vmax.f32 %v2813_v19, %v3325_v51  ;;  %v4093_v35 = vmax.f32 %v3069_v47, %v3581_v54  ;;  %v2814_v34 = vadd.f32 %v13244_v33, %v1705_v57  ;;  %v3070_v16 = vadd.f32 %v13244_v33, %v2345_v6  ;;  %v1707_v50 = vpop.f32.mrb[125].mxu0  ;;  %v2347_v27 = vpop.f32.mrb[125].mxu1 }
 0x1e0   :  { %v13361_v2 = vpack.c.bf16 %v3836_v20, %v3834_v17  ;;  %v13363_v59 = vpack.c.bf16 %v4092_v4, %v4090_v53  ;;  %v2815_v63 = vadd.f32 %v13257_v60, %v1707_v50  ;;  %v3071_v43 = vadd.f32 %v13257_v60, %v2347_v27  ;;  %v1709_v55 = vpop.f32.mrb[126].mxu0  ;;  %v2349_v45 = vpop.f32.mrb[126].mxu1 }
 0x1e1   :  { %v13375_v49 = vpack.c.bf16 %v3837_v31, %v3835_v42  ;;  %v13377_v7 = vpack.c.bf16 %v4093_v35, %v4091_v25  ;;  %v3326_v22 = vmul.f32 0.2, %v2814_v34  ;;  %v3582_v15 = vmul.f32 0.2, %v3070_v16  ;;  %v1711_v23 = vpop.f32.mrb[127].mxu0  ;;  %v2351_v58 = vpop.f32.mrb[127].mxu1 }
 0x1e2   :  { %16106 = vst [vmem:[#allocation108_spill] sm:$0xff] %v13361_v2  ;;  %16107 = vst [vmem:[#allocation109_spill] sm:$0xff] %v13363_v59  ;;  %v2816_v19 = vadd.f32 %v13268_v12, %v1709_v55  ;;  %v3072_v47 = vadd.f32 %v13268_v12, %v2349_v45  ;;  %v3327_v51 = vmul.f32 0.2, %v2815_v63  ;;  %v3583_v54 = vmul.f32 0.2, %v3071_v43 }
 0x1e3   :  { %16108 = vst [vmem:[#allocation110_spill] sm:$0xff] %v13375_v49  ;;  %16109 = vst [vmem:[#allocation111_spill] sm:$0xff] %v13377_v7  ;;  %v2817_v50 = vadd.f32 %v13275_v44, %v1711_v23  ;;  %v3073_v27 = vadd.f32 %v13275_v44, %v2351_v58  ;;  %11267 = vmatmul.mubr.msk.bf16.gmra.mrb[232].mxu0 %vm976_vm0, %v11632_v52  ;;  %v3838_v42 = vmax.f32 %v2814_v34, %v3326_v22  ;;  %v11635_v34 = vld [vmem:[%s15779_s0 + $0x3d8] sm:$0xff]  }
 0x1e4   :  { %v3328_v17 = vmul.f32 0.2, %v2816_v19  ;;  %v3584_v53 = vmul.f32 0.2, %v3072_v47  ;;  %11331 = vmatmul.mubr.msk.bf16.gmra.mrb[232].mxu1 %vm976_vm0, %v11633_v48  ;;  %1983 = vmatprep.mubr.bf16.mxu0 %v16010_v0  ;;  %v4094_v25 = vmax.f32 %v3070_v16, %v3582_v15  ;;  %v3839_v57 = vmax.f32 %v2815_v63, %v3327_v51  ;;  %v11634_v16 = vld [vmem:[%s15779_s0 + $0x1d8] sm:$0xff]  }
 0x1e5   :  { %v3329_v20 = vmul.f32 0.2, %v2817_v50  ;;  %v3585_v4 = vmul.f32 0.2, %v3073_v27  ;;  %2623 = vmatprep.mubr.bf16.mxu1 %v16010_v0  ;;  %v4095_v6 = vmax.f32 %v3071_v43, %v3583_v54 }
 0x1e6   :  { %v3840_v31 = vmax.f32 %v2816_v19, %v3328_v17  ;;  %v4096_v35 = vmax.f32 %v3072_v47, %v3584_v53  ;;  %v1715_v23 = vpop.f32.mrb[128].mxu0  ;;  %v2355_v58 = vpop.f32.mrb[128].mxu1 }
 0x1e7   :  { %v3841_v55 = vmax.f32 %v2817_v50, %v3329_v20  ;;  %v4097_v45 = vmax.f32 %v3073_v27, %v3585_v4  ;;  %v2818_v48 = vadd.f32 %v13106_v21, %v1715_v23  ;;  %v3074_v7 = vadd.f32 %v13106_v21, %v2355_v58  ;;  %v1717_v2 = vpop.f32.mrb[129].mxu0  ;;  %v2357_v49 = vpop.f32.mrb[129].mxu1 }
 0x1e8   :  { %v13387_v59 = vpack.c.bf16 %v3840_v31, %v3838_v42  ;;  %v13389_v52 = vpack.c.bf16 %v4096_v35, %v4094_v25  ;;  %v2819_v63 = vadd.f32 %v13119_v1, %v1717_v2  ;;  %v3075_v43 = vadd.f32 %v13119_v1, %v2357_v49  ;;  %v1719_v22 = vpop.f32.mrb[130].mxu0  ;;  %v2359_v15 = vpop.f32.mrb[130].mxu1 }
 0x1e9   :  { %v13401_v19 = vpack.c.bf16 %v3841_v55, %v3839_v57  ;;  %v13403_v47 = vpack.c.bf16 %v4097_v45, %v4095_v6  ;;  %v3330_v51 = vmul.f32 0.2, %v2818_v48  ;;  %v3586_v54 = vmul.f32 0.2, %v3074_v7  ;;  %v1721_v17 = vpop.f32.mrb[131].mxu0  ;;  %v2361_v53 = vpop.f32.mrb[131].mxu1 }
 0x1ea   :  { %16110 = vst [vmem:[#allocation112_spill] sm:$0xff] %v13387_v59  ;;  %16111 = vst [vmem:[#allocation113_spill] sm:$0xff] %v13389_v52  ;;  %v2820_v50 = vadd.f32 %v13130_v40, %v1719_v22  ;;  %v3076_v27 = vadd.f32 %v13130_v40, %v2359_v15  ;;  %v3331_v20 = vmul.f32 0.2, %v2819_v63  ;;  %v3587_v4 = vmul.f32 0.2, %v3075_v43 }
 0x1eb   :  { %16112 = vst [vmem:[#allocation114_spill] sm:$0xff] %v13401_v19  ;;  %16113 = vst [vmem:[#allocation115_spill] sm:$0xff] %v13403_v47  ;;  %v2821_v2 = vadd.f32 %v13137_v62, %v1721_v17  ;;  %v3077_v49 = vadd.f32 %v13137_v62, %v2361_v53  ;;  %11268 = vmatmul.mubr.msk.bf16.gmra.mrb[236].mxu0 %vm976_vm0, %v11634_v16  ;;  %v3842_v57 = vmax.f32 %v2818_v48, %v3330_v51  ;;  %v11637_v48 = vld [vmem:[%s15779_s0 + $0x3e0] sm:$0xff]  }
 0x1ec   :  { %v3332_v42 = vmul.f32 0.2, %v2820_v50  ;;  %v3588_v25 = vmul.f32 0.2, %v3076_v27  ;;  %11332 = vmatmul.mubr.msk.bf16.gmra.mrb[236].mxu1 %vm976_vm0, %v11635_v34  ;;  %1993 = vmatprep.mubr.bf16.mxu0 %v16010_v0  ;;  %v4098_v6 = vmax.f32 %v3074_v7, %v3586_v54  ;;  %v3843_v23 = vmax.f32 %v2819_v63, %v3331_v20  ;;  %v11636_v7 = vld [vmem:[%s15779_s0 + $0x1e0] sm:$0xff]  }
 0x1ed   :  { %v3333_v31 = vmul.f32 0.2, %v2821_v2  ;;  %v3589_v35 = vmul.f32 0.2, %v3077_v49  ;;  %2633 = vmatprep.mubr.bf16.mxu1 %v16010_v0  ;;  %v4099_v58 = vmax.f32 %v3075_v43, %v3587_v4 }
 0x1ee   :  { %v3844_v55 = vmax.f32 %v2820_v50, %v3332_v42  ;;  %v4100_v45 = vmax.f32 %v3076_v27, %v3588_v25  ;;  %v1725_v17 = vpop.f32.mrb[132].mxu0  ;;  %v2365_v53 = vpop.f32.mrb[132].mxu1 }
 0x1ef   :  { %v3845_v22 = vmax.f32 %v2821_v2, %v3333_v31  ;;  %v4101_v15 = vmax.f32 %v3077_v49, %v3589_v35  ;;  %v2822_v34 = vadd.f32 %v13152_v13, %v1725_v17  ;;  %v3078_v47 = vadd.f32 %v13152_v13, %v2365_v53  ;;  %v1727_v59 = vpop.f32.mrb[133].mxu0  ;;  %v2367_v19 = vpop.f32.mrb[133].mxu1 }
 0x1f0   :  { %v13413_v52 = vpack.c.bf16 %v3844_v55, %v3842_v57  ;;  %v13415_v16 = vpack.c.bf16 %v4100_v45, %v4098_v6  ;;  %v2823_v63 = vadd.f32 %v13165_v11, %v1727_v59  ;;  %v3079_v43 = vadd.f32 %v13165_v11, %v2367_v19  ;;  %v1729_v51 = vpop.f32.mrb[134].mxu0  ;;  %v2369_v54 = vpop.f32.mrb[134].mxu1 }
 0x1f1   :  { %v13427_v50 = vpack.c.bf16 %v3845_v22, %v3843_v23  ;;  %v13429_v27 = vpack.c.bf16 %v4101_v15, %v4099_v58  ;;  %v3334_v20 = vmul.f32 0.2, %v2822_v34  ;;  %v3590_v4 = vmul.f32 0.2, %v3078_v47  ;;  %v1731_v42 = vpop.f32.mrb[135].mxu0  ;;  %v2371_v25 = vpop.f32.mrb[135].mxu1 }
 0x1f2   :  { %16114 = vst [vmem:[#allocation116_spill] sm:$0xff] %v13413_v52  ;;  %16115 = vst [vmem:[#allocation117_spill] sm:$0xff] %v13415_v16  ;;  %v2824_v2 = vadd.f32 %v13176_v41, %v1729_v51  ;;  %v3080_v49 = vadd.f32 %v13176_v41, %v2369_v54  ;;  %v3335_v31 = vmul.f32 0.2, %v2823_v63  ;;  %v3591_v35 = vmul.f32 0.2, %v3079_v43 }
 0x1f3   :  { %16116 = vst [vmem:[#allocation118_spill] sm:$0xff] %v13427_v50  ;;  %16117 = vst [vmem:[#allocation119_spill] sm:$0xff] %v13429_v27  ;;  %v2825_v59 = vadd.f32 %v13183_v9, %v1731_v42  ;;  %v3081_v19 = vadd.f32 %v13183_v9, %v2371_v25  ;;  %11269 = vmatmul.mubr.msk.bf16.gmra.mrb[240].mxu0 %vm976_vm0, %v11636_v7  ;;  %v3846_v23 = vmax.f32 %v2822_v34, %v3334_v20  ;;  %v11645_v34 = vld [vmem:[%s15779_s0 + $0x3e8] sm:$0xff]  }
 0x1f4   :  { %v3336_v57 = vmul.f32 0.2, %v2824_v2  ;;  %v3592_v6 = vmul.f32 0.2, %v3080_v49  ;;  %11333 = vmatmul.mubr.msk.bf16.gmra.mrb[240].mxu1 %vm976_vm0, %v11637_v48  ;;  %2003 = vmatprep.mubr.bf16.mxu0 %v16010_v0  ;;  %v4102_v58 = vmax.f32 %v3078_v47, %v3590_v4  ;;  %v3847_v17 = vmax.f32 %v2823_v63, %v3335_v31  ;;  %v11644_v47 = vld [vmem:[%s15779_s0 + $0x1e8] sm:$0xff]  }
 0x1f5   :  { %v3337_v55 = vmul.f32 0.2, %v2825_v59  ;;  %v3593_v45 = vmul.f32 0.2, %v3081_v19  ;;  %2643 = vmatprep.mubr.bf16.mxu1 %v16010_v0  ;;  %v4103_v53 = vmax.f32 %v3079_v43, %v3591_v35 }
 0x1f6   :  { %v3848_v22 = vmax.f32 %v2824_v2, %v3336_v57  ;;  %v4104_v15 = vmax.f32 %v3080_v49, %v3592_v6  ;;  %v1735_v42 = vpop.f32.mrb[136].mxu0  ;;  %v2375_v25 = vpop.f32.mrb[136].mxu1 }
 0x1f7   :  { %v3849_v51 = vmax.f32 %v2825_v59, %v3337_v55  ;;  %v4105_v54 = vmax.f32 %v3081_v19, %v3593_v45  ;;  %v2826_v48 = vadd.f32 %v13198_v46, %v1735_v42  ;;  %v3082_v27 = vadd.f32 %v13198_v46, %v2375_v25  ;;  %v1737_v52 = vpop.f32.mrb[137].mxu0  ;;  %v2377_v50 = vpop.f32.mrb[137].mxu1 }
 0x1f8   :  { %v13439_v16 = vpack.c.bf16 %v3848_v22, %v3846_v23  ;;  %v13441_v7 = vpack.c.bf16 %v4104_v15, %v4102_v58  ;;  %v2827_v63 = vadd.f32 %v13211_v8, %v1737_v52  ;;  %v3083_v43 = vadd.f32 %v13211_v8, %v2377_v50  ;;  %v1739_v20 = vpop.f32.mrb[138].mxu0  ;;  %v2379_v4 = vpop.f32.mrb[138].mxu1 }
 0x1f9   :  { %v13453_v2 = vpack.c.bf16 %v3849_v51, %v3847_v17  ;;  %v13455_v49 = vpack.c.bf16 %v4105_v54, %v4103_v53  ;;  %v3338_v31 = vmul.f32 0.2, %v2826_v48  ;;  %v3594_v35 = vmul.f32 0.2, %v3082_v27  ;;  %v1741_v57 = vpop.f32.mrb[139].mxu0  ;;  %v2381_v6 = vpop.f32.mrb[139].mxu1 }
 0x1fa   :  { %16118 = vst [vmem:[#allocation120_spill] sm:$0xff] %v13439_v16  ;;  %16119 = vst [vmem:[#allocation121_spill] sm:$0xff] %v13441_v7  ;;  %v2828_v59 = vadd.f32 %v13222_v30, %v1739_v20  ;;  %v3084_v19 = vadd.f32 %v13222_v30, %v2379_v4  ;;  %v3339_v55 = vmul.f32 0.2, %v2827_v63  ;;  %v3595_v45 = vmul.f32 0.2, %v3083_v43 }
 0x1fb   :  { %16120 = vst [vmem:[#allocation122_spill] sm:$0xff] %v13453_v2  ;;  %16121 = vst [vmem:[#allocation123_spill] sm:$0xff] %v13455_v49  ;;  %v2829_v52 = vadd.f32 %v13229_v38, %v1741_v57  ;;  %v3085_v50 = vadd.f32 %v13229_v38, %v2381_v6  ;;  %11270 = vmatmul.mubr.msk.bf16.gmra.mrb[244].mxu0 %vm976_vm0, %v11644_v47  ;;  %v3850_v17 = vmax.f32 %v2826_v48, %v3338_v31  ;;  %v11647_v48 = vld [vmem:[%s15779_s0 + $0x3f0] sm:$0xff]  }
 0x1fc   :  { %v3340_v23 = vmul.f32 0.2, %v2828_v59  ;;  %v3596_v58 = vmul.f32 0.2, %v3084_v19  ;;  %11334 = vmatmul.mubr.msk.bf16.gmra.mrb[244].mxu1 %vm976_vm0, %v11645_v34  ;;  %2013 = vmatprep.mubr.bf16.mxu0 %v16010_v0  ;;  %v4106_v53 = vmax.f32 %v3082_v27, %v3594_v35  ;;  %v3851_v42 = vmax.f32 %v2827_v63, %v3339_v55  ;;  %v11646_v27 = vld [vmem:[%s15779_s0 + $0x1f0] sm:$0xff]  }
 0x1fd   :  { %v3341_v22 = vmul.f32 0.2, %v2829_v52  ;;  %v3597_v15 = vmul.f32 0.2, %v3085_v50  ;;  %2653 = vmatprep.mubr.bf16.mxu1 %v16010_v0  ;;  %v4107_v25 = vmax.f32 %v3083_v43, %v3595_v45 }
 0x1fe   :  { %v3852_v51 = vmax.f32 %v2828_v59, %v3340_v23  ;;  %v4108_v54 = vmax.f32 %v3084_v19, %v3596_v58  ;;  %v1745_v57 = vpop.f32.mrb[140].mxu0  ;;  %v2385_v6 = vpop.f32.mrb[140].mxu1 }
 0x1ff   :  { %v3853_v20 = vmax.f32 %v2829_v52, %v3341_v22  ;;  %v4109_v4 = vmax.f32 %v3085_v50, %v3597_v15  ;;  %v2830_v34 = vadd.f32 %v13244_v33, %v1745_v57  ;;  %v3086_v49 = vadd.f32 %v13244_v33, %v2385_v6  ;;  %v1747_v16 = vpop.f32.mrb[141].mxu0  ;;  %v2387_v2 = vpop.f32.mrb[141].mxu1 }
 0x200   :  { %v13465_v7 = vpack.c.bf16 %v3852_v51, %v3850_v17  ;;  %v13467_v47 = vpack.c.bf16 %v4108_v54, %v4106_v53  ;;  %v2831_v63 = vadd.f32 %v13257_v60, %v1747_v16  ;;  %v3087_v43 = vadd.f32 %v13257_v60, %v2387_v2  ;;  %v1749_v31 = vpop.f32.mrb[142].mxu0  ;;  %v2389_v35 = vpop.f32.mrb[142].mxu1 }
 0x201   :  { %v13479_v59 = vpack.c.bf16 %v3853_v20, %v3851_v42  ;;  %v13481_v19 = vpack.c.bf16 %v4109_v4, %v4107_v25  ;;  %v3342_v55 = vmul.f32 0.2, %v2830_v34  ;;  %v3598_v45 = vmul.f32 0.2, %v3086_v49  ;;  %v1751_v23 = vpop.f32.mrb[143].mxu0  ;;  %v2391_v58 = vpop.f32.mrb[143].mxu1 }
 0x202   :  { %16122 = vst [vmem:[#allocation124_spill] sm:$0xff] %v13465_v7  ;;  %16123 = vst [vmem:[#allocation125_spill] sm:$0xff] %v13467_v47  ;;  %v2832_v52 = vadd.f32 %v13268_v12, %v1749_v31  ;;  %v3088_v50 = vadd.f32 %v13268_v12, %v2389_v35  ;;  %v3343_v22 = vmul.f32 0.2, %v2831_v63  ;;  %v3599_v15 = vmul.f32 0.2, %v3087_v43 }
 0x203   :  { %16124 = vst [vmem:[#allocation126_spill] sm:$0xff] %v13481_v19  ;;  %v2833_v16 = vadd.f32 %v13275_v44, %v1751_v23  ;;  %v3089_v2 = vadd.f32 %v13275_v44, %v2391_v58  ;;  %11271 = vmatmul.mubr.msk.bf16.gmra.mrb[248].mxu0 %vm976_vm0, %v11646_v27  ;;  %v3854_v42 = vmax.f32 %v2830_v34, %v3342_v55  ;;  %v11649_v34 = vld [vmem:[%s15779_s0 + $0x3f8] sm:$0xff]  }
 0x204   :  { %v3344_v17 = vmul.f32 0.2, %v2832_v52  ;;  %v3600_v53 = vmul.f32 0.2, %v3088_v50  ;;  %11335 = vmatmul.mubr.msk.bf16.gmra.mrb[248].mxu1 %vm976_vm0, %v11647_v48  ;;  %2023 = vmatprep.mubr.bf16.mxu0 %v16010_v0  ;;  %v4110_v25 = vmax.f32 %v3086_v49, %v3598_v45  ;;  %v3855_v57 = vmax.f32 %v2831_v63, %v3343_v22  ;;  %v11648_v49 = vld [vmem:[%s15779_s0 + $0x1f8] sm:$0xff]  }
 0x205   :  { %v3345_v51 = vmul.f32 0.2, %v2833_v16  ;;  %v3601_v54 = vmul.f32 0.2, %v3089_v2  ;;  %2663 = vmatprep.mubr.bf16.mxu1 %v16010_v0  ;;  %v4111_v6 = vmax.f32 %v3087_v43, %v3599_v15 }
 0x206   :  { %v3856_v20 = vmax.f32 %v2832_v52, %v3344_v17  ;;  %v4112_v4 = vmax.f32 %v3088_v50, %v3600_v53  ;;  %v1755_v23 = vpop.f32.mrb[144].mxu0  ;;  %v2395_v58 = vpop.f32.mrb[144].mxu1 }
 0x207   :  { %v3857_v31 = vmax.f32 %v2833_v16, %v3345_v51  ;;  %v4113_v35 = vmax.f32 %v3089_v2, %v3601_v54  ;;  %v2834_v48 = vadd.f32 %v13106_v21, %v1755_v23  ;;  %v3090_v19 = vadd.f32 %v13106_v21, %v2395_v58  ;;  %v1757_v7 = vpop.f32.mrb[145].mxu0  ;;  %v2397_v0 = vpop.f32.mrb[145].mxu1 }
 0x208   :  { %v13491_v47 = vpack.c.bf16 %v3856_v20, %v3854_v42  ;;  %v13493_v27 = vpack.c.bf16 %v4112_v4, %v4110_v25  ;;  %v2835_v63 = vadd.f32 %v13119_v1, %v1757_v7  ;;  %v3091_v43 = vadd.f32 %v13119_v1, %v2397_v0  ;;  %v1759_v55 = vpop.f32.mrb[146].mxu0  ;;  %v2399_v45 = vpop.f32.mrb[146].mxu1 }
 0x209   :  { %v13505_v52 = vpack.c.bf16 %v3857_v31, %v3855_v57  ;;  %v13507_v50 = vpack.c.bf16 %v4113_v35, %v4111_v6  ;;  %v3346_v21 = vmul.f32 0.2, %v2834_v48  ;;  %v3602_v22 = vmul.f32 0.2, %v3090_v19  ;;  %v1761_v2 = vpop.f32.mrb[147].mxu0  ;;  %v2401_v17 = vpop.f32.mrb[147].mxu1 }
 0x20a   :  { %16125 = vst [vmem:[#allocation127_spill] sm:$0xff] %v13493_v27  ;;  %v2836_v15 = vadd.f32 %v13130_v40, %v1759_v55  ;;  %v3092_v16 = vadd.f32 %v13130_v40, %v2399_v45  ;;  %v3347_v53 = vmul.f32 0.2, %v2835_v63  ;;  %v3603_v51 = vmul.f32 0.2, %v3091_v43 }
 0x20b   :  { %16126 = vst [vmem:[#allocation128_spill] sm:$0xff] %v13507_v50  ;;  %v2837_v7 = vadd.f32 %v13137_v62, %v1761_v2  ;;  %v3093_v1 = vadd.f32 %v13137_v62, %v2401_v17  ;;  %11272 = vmatmul.mubr.msk.bf16.gmra.mrb[252].mxu0 %vm976_vm0, %v11648_v49  ;;  %v3858_v40 = vmax.f32 %v2834_v48, %v3346_v21 }
 0x20c   :  { %v3348_v54 = vmul.f32 0.2, %v2836_v15  ;;  %v3604_v42 = vmul.f32 0.2, %v3092_v16  ;;  %11336 = vmatmul.mubr.msk.bf16.gmra.mrb[252].mxu1 %vm976_vm0, %v11649_v34  ;;  %7043 = vmatprep.mubr.bf16.mxu0 %v12335_v37  ;;  %v4114_v4 = vmax.f32 %v3090_v19, %v3602_v22  ;;  %v3859_v31 = vmax.f32 %v2835_v63, %v3347_v53 }
 0x20d   :  { %v3349_v25 = vmul.f32 0.2, %v2837_v7  ;;  %v3605_v20 = vmul.f32 0.2, %v3093_v1  ;;  %4706 = vmatprep.mubr.bf16.mxu1 %v12335_v37  ;;  %v4115_v35 = vmax.f32 %v3091_v43, %v3603_v51 }
 0x20e   :  { %v3860_v57 = vmax.f32 %v2836_v15, %v3348_v54  ;;  %v4116_v6 = vmax.f32 %v3092_v16, %v3604_v42  ;;  %v1765_v58 = vpop.f32.mrb[148].mxu0  ;;  %v2405_v0 = vpop.f32.mrb[148].mxu1 }
 0x20f   :  { %v3861_v23 = vmax.f32 %v2837_v7, %v3349_v25  ;;  %v4117_v62 = vmax.f32 %v3093_v1, %v3605_v20  ;;  %v2838_v34 = vadd.f32 %v13152_v13, %v1765_v58  ;;  %v3094_v45 = vadd.f32 %v13152_v13, %v2405_v0  ;;  %v1767_v2 = vpop.f32.mrb[149].mxu0  ;;  %v2407_v37 = vpop.f32.mrb[149].mxu1 }
 0x210   :  { %v13517_v55 = vpack.c.bf16 %v3860_v57, %v3858_v40  ;;  %v13519_v49 = vpack.c.bf16 %v4116_v6, %v4114_v4  ;;  %v2839_v19 = vadd.f32 %v13165_v11, %v1767_v2  ;;  %v3095_v48 = vadd.f32 %v13165_v11, %v2407_v37  ;;  %v1769_v63 = vpop.f32.mrb[150].mxu0  ;;  %v2409_v43 = vpop.f32.mrb[150].mxu1 }
 0x211   :  { %v13525_v21 = vpack.c.bf16 %v3861_v23, %v3859_v31  ;;  %v13527_v22 = vpack.c.bf16 %v4117_v62, %v4115_v35  ;;  %v3350_v15 = vmul.f32 0.2, %v2838_v34  ;;  %v3606_v16 = vmul.f32 0.2, %v3094_v45  ;;  %v1771_v51 = vpop.f32.mrb[151].mxu0  ;;  %v2411_v13 = vpop.f32.mrb[151].mxu1 }
 0x212   :  { %16127 = vst [vmem:[#allocation129_spill] sm:$0xff] %v13519_v49  ;;  %v2840_v17 = vadd.f32 %v13176_v41, %v1769_v63  ;;  %v3096_v53 = vadd.f32 %v13176_v41, %v2409_v43  ;;  %v3351_v7 = vmul.f32 0.2, %v2839_v19  ;;  %v3607_v1 = vmul.f32 0.2, %v3095_v48 }
 0x213   :  { %16128 = vst [vmem:[#allocation130_spill] sm:$0xff] %v13527_v22  ;;  %v2841_v54 = vadd.f32 %v13183_v9, %v1771_v51  ;;  %v3097_v11 = vadd.f32 %v13183_v9, %v2411_v13  ;;  %7044 = vmatmul.mubr.bf16.vlgmr.msra.gmra.mrb[0].mxu0 %v12316_v24  ;;  %v3862_v41 = vmax.f32 %v2838_v34, %v3350_v15 }
 0x214   :  { %v3352_v42 = vmul.f32 0.2, %v2840_v17  ;;  %v3608_v25 = vmul.f32 0.2, %v3096_v53  ;;  %4707 = vmatmul.mubr.bf16.vlgmr.msra.gmra.mrb[0].mxu1 %v12316_v24  ;;  %7051 = vmatprep.mubr.bf16.mxu0 %v12393_v29  ;;  %v4118_v4 = vmax.f32 %v3094_v45, %v3606_v16  ;;  %v3863_v31 = vmax.f32 %v2839_v19, %v3351_v7 }
 0x215   :  { %v3353_v20 = vmul.f32 0.2, %v2841_v54  ;;  %v3609_v40 = vmul.f32 0.2, %v3097_v11  ;;  %4716 = vmatprep.mubr.bf16.mxu1 %v12393_v29  ;;  %v4119_v35 = vmax.f32 %v3095_v48, %v3607_v1 }
 0x216   :  { %v3864_v57 = vmax.f32 %v2840_v17, %v3352_v42  ;;  %v4120_v6 = vmax.f32 %v3096_v53, %v3608_v25  ;;  %v1775_v62 = vpop.f32.mrb[152].mxu0  ;;  %v2415_v58 = vpop.f32.mrb[152].mxu1 }
 0x217   :  { %v3865_v23 = vmax.f32 %v2841_v54, %v3353_v20  ;;  %v4121_v9 = vmax.f32 %v3097_v11, %v3609_v40  ;;  %v2842_v24 = vadd.f32 %v13198_v46, %v1775_v62  ;;  %v3098_v37 = vadd.f32 %v13198_v46, %v2415_v58  ;;  %v1777_v63 = vpop.f32.mrb[153].mxu0  ;;  %v2417_v29 = vpop.f32.mrb[153].mxu1 }
 0x218   :  { %v13537_v0 = vpack.c.bf16 %v3864_v57, %v3862_v41  ;;  %v13539_v2 = vpack.c.bf16 %v4120_v6, %v4118_v4  ;;  %v2843_v34 = vadd.f32 %v13211_v8, %v1777_v63  ;;  %v3099_v45 = vadd.f32 %v13211_v8, %v2417_v29  ;;  %v1779_v19 = vpop.f32.mrb[154].mxu0  ;;  %v2419_v48 = vpop.f32.mrb[154].mxu1 }
 0x219   :  { %v13545_v43 = vpack.c.bf16 %v3865_v23, %v3863_v31  ;;  %v13547_v15 = vpack.c.bf16 %v4121_v9, %v4119_v35  ;;  %v3354_v16 = vmul.f32 0.2, %v2842_v24  ;;  %v3610_v17 = vmul.f32 0.2, %v3098_v37  ;;  %v1781_v13 = vpop.f32.mrb[155].mxu0  ;;  %v2421_v46 = vpop.f32.mrb[155].mxu1 }
 0x21a   :  { %16129 = vst [vmem:[#allocation131_spill] sm:$0xff] %v13539_v2  ;;  %v2844_v53 = vadd.f32 %v13222_v30, %v1779_v19  ;;  %v3100_v51 = vadd.f32 %v13222_v30, %v2419_v48  ;;  %v3355_v7 = vmul.f32 0.2, %v2843_v34  ;;  %v3611_v1 = vmul.f32 0.2, %v3099_v45 }
 0x21b   :  { %16130 = vst [vmem:[#allocation132_spill] sm:$0xff] %v13547_v15  ;;  %v2845_v54 = vadd.f32 %v13229_v38, %v1781_v13  ;;  %v3101_v8 = vadd.f32 %v13229_v38, %v2421_v46  ;;  %7052 = vmatmul.mubr.bf16.gmra.mrb[4].mxu0 %v12373_v10  ;;  %v3866_v30 = vmax.f32 %v2842_v24, %v3354_v16 }
 0x21c   :  { %v3356_v11 = vmul.f32 0.2, %v2844_v53  ;;  %v3612_v42 = vmul.f32 0.2, %v3100_v51  ;;  %4717 = vmatmul.mubr.bf16.gmra.mrb[4].mxu1 %v12373_v10  ;;  %7061 = vmatprep.mubr.bf16.mxu0 %v12439_v26  ;;  %v4122_v40 = vmax.f32 %v3098_v37, %v3610_v17  ;;  %v3867_v57 = vmax.f32 %v2843_v34, %v3355_v7 }
 0x21d   :  { %v3357_v25 = vmul.f32 0.2, %v2845_v54  ;;  %v3613_v20 = vmul.f32 0.2, %v3101_v8  ;;  %4726 = vmatprep.mubr.bf16.mxu1 %v12439_v26  ;;  %v4123_v6 = vmax.f32 %v3099_v45, %v3611_v1 }
 0x21e   :  { %v3868_v41 = vmax.f32 %v2844_v53, %v3356_v11  ;;  %v4124_v4 = vmax.f32 %v3100_v51, %v3612_v42  ;;  %v1785_v35 = vpop.f32.mrb[156].mxu0  ;;  %v2425_v23 = vpop.f32.mrb[156].mxu1 }
 0x21f   :  { %v3869_v31 = vmax.f32 %v2845_v54, %v3357_v25  ;;  %v4125_v38 = vmax.f32 %v3101_v8, %v3613_v20  ;;  %v2846_v10 = vadd.f32 %v13244_v33, %v1785_v35  ;;  %v3102_v58 = vadd.f32 %v13244_v33, %v2425_v23  ;;  %v1787_v63 = vpop.f32.mrb[157].mxu0  ;;  %v2427_v26 = vpop.f32.mrb[157].mxu1 }
 0x220   :  { %v13557_v9 = vpack.c.bf16 %v3868_v41, %v3866_v30  ;;  %v13559_v62 = vpack.c.bf16 %v4124_v4, %v4122_v40  ;;  %v2847_v24 = vadd.f32 %v13257_v60, %v1787_v63  ;;  %v3103_v37 = vadd.f32 %v13257_v60, %v2427_v26  ;;  %v1789_v29 = vpop.f32.mrb[158].mxu0  ;;  %v2429_v34 = vpop.f32.mrb[158].mxu1 }
 0x221   :  { %v13565_v45 = vpack.c.bf16 %v3869_v31, %v3867_v57  ;;  %v13567_v19 = vpack.c.bf16 %v4125_v38, %v4123_v6  ;;  %v3358_v48 = vmul.f32 0.2, %v2846_v10  ;;  %v3614_v16 = vmul.f32 0.2, %v3102_v58  ;;  %v1791_v51 = vpop.f32.mrb[159].mxu0  ;;  %v2431_v33 = vpop.f32.mrb[159].mxu1 }
 0x222   :  { %16131 = vst [vmem:[#allocation133_spill] sm:$0xff] %v13559_v62  ;;  %v2848_v17 = vadd.f32 %v13268_v12, %v1789_v29  ;;  %v3104_v53 = vadd.f32 %v13268_v12, %v2429_v34  ;;  %v3359_v13 = vmul.f32 0.2, %v2847_v24  ;;  %v3615_v46 = vmul.f32 0.2, %v3103_v37 }
 0x223   :  { %16132 = vst [vmem:[#allocation134_spill] sm:$0xff] %v13567_v19  ;;  %v2849_v7 = vadd.f32 %v13275_v44, %v1791_v51  ;;  %v3105_v60 = vadd.f32 %v13275_v44, %v2431_v33  ;;  %7062 = vmatmul.mubr.bf16.gmra.mrb[8].mxu0 %v12420_v5  ;;  %v3870_v12 = vmax.f32 %v2846_v10, %v3358_v48  ;;  %v13591_v10 = vld [vmem:[%s15782_s2 + $0x8] sm:$0xff] }
 0x224   :  { %v3360_v1 = vmul.f32 0.2, %v2848_v17  ;;  %v3616_v54 = vmul.f32 0.2, %v3104_v53  ;;  %4727 = vmatmul.mubr.bf16.gmra.mrb[8].mxu1 %v12420_v5  ;;  %7071 = vmatprep.mubr.bf16.mxu0 %v12465_v32  ;;  %v4126_v42 = vmax.f32 %v3102_v58, %v3614_v16  ;;  %v3871_v30 = vmax.f32 %v2847_v24, %v3359_v13  ;;  %v13584_v5 = vld [vmem:[%s15782_s2] sm:$0xff]  ;;  %v13602_v16 = vld [vmem:[%s15782_s2 + $0x10] sm:$0xff] }
 0x225   :  { %v3361_v8 = vmul.f32 0.2, %v2849_v7  ;;  %v3617_v11 = vmul.f32 0.2, %v3105_v60  ;;  %4736 = vmatprep.mubr.bf16.mxu1 %v12465_v32  ;;  %v4127_v40 = vmax.f32 %v3103_v37, %v3615_v46 }
 0x226   :  { %v3872_v25 = vmax.f32 %v2848_v17, %v3360_v1  ;;  %v4128_v20 = vmax.f32 %v3104_v53, %v3616_v54  ;;  %v1795_v4 = vpop.f32.mrb[160].mxu0  ;;  %v2435_v57 = vpop.f32.mrb[160].mxu1 }
 0x227   :  { %v3873_v41 = vmax.f32 %v2849_v7, %v3361_v8  ;;  %v4129_v44 = vmax.f32 %v3105_v60, %v3617_v11  ;;  %v2850_v32 = vadd.f32 %v13584_v5, %v1795_v4  ;;  %v3106_v38 = vadd.f32 %v13584_v5, %v2435_v57  ;;  %v1797_v35 = vpop.f32.mrb[161].mxu0  ;;  %v2437_v23 = vpop.f32.mrb[161].mxu1  ;;  %v13609_v7 = vld [vmem:[%s15782_s2 + $0x18] sm:$0xff] }
 0x228   :  { %v13577_v6 = vpack.c.bf16 %v3872_v25, %v3870_v12  ;;  %v13579_v31 = vpack.c.bf16 %v4128_v20, %v4126_v42  ;;  %v2851_v58 = vadd.f32 %v13591_v10, %v1797_v35  ;;  %v3107_v63 = vadd.f32 %v13591_v10, %v2437_v23  ;;  %v1799_v26 = vpop.f32.mrb[162].mxu0  ;;  %v2439_v24 = vpop.f32.mrb[162].mxu1 }
 0x229   :  { %v13595_v37 = vpack.c.bf16 %v3873_v41, %v3871_v30  ;;  %v13597_v29 = vpack.c.bf16 %v4129_v44, %v4127_v40  ;;  %v3362_v34 = vmul.f32 0.2, %v2850_v32  ;;  %v3618_v48 = vmul.f32 0.2, %v3106_v38  ;;  %v1801_v51 = vpop.f32.mrb[163].mxu0  ;;  %v2441_v33 = vpop.f32.mrb[163].mxu1 }
 0x22a   :  { %16133 = vst [vmem:[#allocation135_spill] sm:$0xff] %v13579_v31  ;;  %v2852_v17 = vadd.f32 %v13602_v16, %v1799_v26  ;;  %v3108_v53 = vadd.f32 %v13602_v16, %v2439_v24  ;;  %v3363_v13 = vmul.f32 0.2, %v2851_v58  ;;  %v3619_v46 = vmul.f32 0.2, %v3107_v63 }
 0x22b   :  { %16134 = vst [vmem:[#allocation136_spill] sm:$0xff] %v13597_v29  ;;  %v2853_v60 = vadd.f32 %v13609_v7, %v1801_v51  ;;  %v3109_v1 = vadd.f32 %v13609_v7, %v2441_v33  ;;  %7072 = vmatmul.mubr.bf16.gmra.mrb[12].mxu0 %v12451_v3  ;;  %v3874_v42 = vmax.f32 %v2850_v32, %v3362_v34 }
 0x22c   :  { %v3364_v54 = vmul.f32 0.2, %v2852_v17  ;;  %v3620_v8 = vmul.f32 0.2, %v3108_v53  ;;  %4737 = vmatmul.mubr.bf16.gmra.mrb[12].mxu1 %v12451_v3  ;;  %7081 = vmatprep.mubr.bf16.mxu0 %v12491_v36  ;;  %v4130_v25 = vmax.f32 %v3106_v38, %v3618_v48  ;;  %v3875_v40 = vmax.f32 %v2851_v58, %v3363_v13  ;;  %v13624_v3 = vld [vmem:[%s15782_s2 + $0x20] sm:$0xff] }
 0x22d   :  { %v3365_v11 = vmul.f32 0.2, %v2853_v60  ;;  %v3621_v12 = vmul.f32 0.2, %v3109_v1  ;;  %4744 = vmatprep.mubr.bf16.mxu1 %v12491_v36  ;;  %v4131_v41 = vmax.f32 %v3107_v63, %v3619_v46  ;;  %v13631_v63 = vld [vmem:[%s15782_s2 + $0x28] sm:$0xff]  ;;  %v13642_v46 = vld [vmem:[%s15782_s2 + $0x30] sm:$0xff] }
 0x22e   :  { %v3876_v20 = vmax.f32 %v2852_v17, %v3364_v54  ;;  %v4132_v30 = vmax.f32 %v3108_v53, %v3620_v8  ;;  %v1805_v57 = vpop.f32.mrb[164].mxu0  ;;  %v2445_v35 = vpop.f32.mrb[164].mxu1 }
 0x22f   :  { %v3877_v44 = vmax.f32 %v2853_v60, %v3365_v11  ;;  %v4133_v4 = vmax.f32 %v3109_v1, %v3621_v12  ;;  %v2854_v36 = vadd.f32 %v13624_v3, %v1805_v57  ;;  %v3110_v32 = vadd.f32 %v13624_v3, %v2445_v35  ;;  %v1807_v38 = vpop.f32.mrb[165].mxu0  ;;  %v2447_v58 = vpop.f32.mrb[165].mxu1 }
 0x230   :  { %v13617_v23 = vpack.c.bf16 %v3876_v20, %v3874_v42  ;;  %v13619_v26 = vpack.c.bf16 %v4132_v30, %v4130_v25  ;;  %v2855_v24 = vadd.f32 %v13631_v63, %v1807_v38  ;;  %v3111_v34 = vadd.f32 %v13631_v63, %v2447_v58  ;;  %v1809_v48 = vpop.f32.mrb[166].mxu0  ;;  %v2449_v17 = vpop.f32.mrb[166].mxu1  ;;  %v13649_v42 = vld [vmem:[%s15782_s2 + $0x38] sm:$0xff] }
 0x231   :  { %v13635_v53 = vpack.c.bf16 %v3877_v44, %v3875_v40  ;;  %v13637_v51 = vpack.c.bf16 %v4133_v4, %v4131_v41  ;;  %v3366_v33 = vmul.f32 0.2, %v2854_v36  ;;  %v3622_v13 = vmul.f32 0.2, %v3110_v32  ;;  %v1811_v54 = vpop.f32.mrb[167].mxu0  ;;  %v2451_v8 = vpop.f32.mrb[167].mxu1 }
 0x232   :  { %16135 = vst [vmem:[#allocation137_spill] sm:$0xff] %v13619_v26  ;;  %v2856_v60 = vadd.f32 %v13642_v46, %v1809_v48  ;;  %v3112_v1 = vadd.f32 %v13642_v46, %v2449_v17  ;;  %v3367_v11 = vmul.f32 0.2, %v2855_v24  ;;  %v3623_v12 = vmul.f32 0.2, %v3111_v34 }
 0x233   :  { %16136 = vst [vmem:[#allocation138_spill] sm:$0xff] %v13637_v51  ;;  %v2857_v25 = vadd.f32 %v13649_v42, %v1811_v54  ;;  %v3113_v20 = vadd.f32 %v13649_v42, %v2451_v8  ;;  %7082 = vmatmul.mubr.bf16.gmra.mrb[16].mxu0 %v12477_v28  ;;  %v3878_v4 = vmax.f32 %v2854_v36, %v3366_v33 }
 0x234   :  { %v3368_v30 = vmul.f32 0.2, %v2856_v60  ;;  %v3624_v40 = vmul.f32 0.2, %v3112_v1  ;;  %4745 = vmatmul.mubr.bf16.gmra.mrb[16].mxu1 %v12477_v28  ;;  %7089 = vmatprep.mubr.bf16.mxu0 %v12529_v56  ;;  %v4134_v57 = vmax.f32 %v3110_v32, %v3622_v13  ;;  %v3879_v58 = vmax.f32 %v2855_v24, %v3367_v11  ;;  %v13664_v28 = vld [vmem:[%s15782_s2 + $0x40] sm:$0xff] }
 0x235   :  { %v3369_v41 = vmul.f32 0.2, %v2857_v25  ;;  %v3625_v44 = vmul.f32 0.2, %v3113_v20  ;;  %4754 = vmatprep.mubr.bf16.mxu1 %v12529_v56  ;;  %v4135_v48 = vmax.f32 %v3111_v34, %v3623_v12  ;;  %v13671_v34 = vld [vmem:[%s15782_s2 + $0x48] sm:$0xff] }
 0x236   :  { %v3880_v35 = vmax.f32 %v2856_v60, %v3368_v30  ;;  %v4136_v38 = vmax.f32 %v3112_v1, %v3624_v40  ;;  %v1815_v8 = vpop.f32.mrb[168].mxu0  ;;  %v2455_v26 = vpop.f32.mrb[168].mxu1 }
 0x237   :  { %v3881_v17 = vmax.f32 %v2857_v25, %v3369_v41  ;;  %v4137_v54 = vmax.f32 %v3113_v20, %v3625_v44  ;;  %v2858_v56 = vadd.f32 %v13664_v28, %v1815_v8  ;;  %v3114_v36 = vadd.f32 %v13664_v28, %v2455_v26  ;;  %v1817_v32 = vpop.f32.mrb[169].mxu0  ;;  %v2457_v24 = vpop.f32.mrb[169].mxu1  ;;  %v13682_v26 = vld [vmem:[%s15782_s2 + $0x50] sm:$0xff] }
 0x238   :  { %v13657_v51 = vpack.c.bf16 %v3880_v35, %v3878_v4  ;;  %v13659_v31 = vpack.c.bf16 %v4136_v38, %v4134_v57  ;;  %v2859_v33 = vadd.f32 %v13671_v34, %v1817_v32  ;;  %v3115_v13 = vadd.f32 %v13671_v34, %v2457_v24  ;;  %v1819_v60 = vpop.f32.mrb[170].mxu0  ;;  %v2459_v1 = vpop.f32.mrb[170].mxu1  ;;  %v13689_v35 = vld [vmem:[%s15782_s2 + $0x58] sm:$0xff] }
 0x239   :  { %v13675_v11 = vpack.c.bf16 %v3881_v17, %v3879_v58  ;;  %v13677_v12 = vpack.c.bf16 %v4137_v54, %v4135_v48  ;;  %v3370_v25 = vmul.f32 0.2, %v2858_v56  ;;  %v3626_v20 = vmul.f32 0.2, %v3114_v36  ;;  %v1821_v41 = vpop.f32.mrb[171].mxu0  ;;  %v2461_v44 = vpop.f32.mrb[171].mxu1 }
 0x23a   :  { %16137 = vst [vmem:[#allocation139_spill] sm:$0xff] %v13659_v31  ;;  %v2860_v30 = vadd.f32 %v13682_v26, %v1819_v60  ;;  %v3116_v40 = vadd.f32 %v13682_v26, %v2459_v1  ;;  %v3371_v4 = vmul.f32 0.2, %v2859_v33  ;;  %v3627_v57 = vmul.f32 0.2, %v3115_v13 }
 0x23b   :  { %16138 = vst [vmem:[#allocation140_spill] sm:$0xff] %v13677_v12  ;;  %v2861_v38 = vadd.f32 %v13689_v35, %v1821_v41  ;;  %v3117_v58 = vadd.f32 %v13689_v35, %v2461_v44  ;;  %7090 = vmatmul.mubr.bf16.gmra.mrb[20].mxu0 %v12509_v39  ;;  %v3882_v32 = vmax.f32 %v2858_v56, %v3370_v25 }
 0x23c   :  { %v3372_v48 = vmul.f32 0.2, %v2860_v30  ;;  %v3628_v17 = vmul.f32 0.2, %v3116_v40  ;;  %4755 = vmatmul.mubr.bf16.gmra.mrb[20].mxu1 %v12509_v39  ;;  %7099 = vmatprep.mubr.bf16.mxu0 %v12555_v61  ;;  %v4138_v24 = vmax.f32 %v3114_v36, %v3626_v20  ;;  %v3883_v31 = vmax.f32 %v2859_v33, %v3371_v4  ;;  %v13704_v39 = vld [vmem:[%s15782_s2 + $0x60] sm:$0xff] }
 0x23d   :  { %v3373_v54 = vmul.f32 0.2, %v2861_v38  ;;  %v3629_v8 = vmul.f32 0.2, %v3117_v58  ;;  %4764 = vmatprep.mubr.bf16.mxu1 %v12555_v61  ;;  %v4139_v41 = vmax.f32 %v3115_v13, %v3627_v57  ;;  %v13711_v13 = vld [vmem:[%s15782_s2 + $0x68] sm:$0xff] }
 0x23e   :  { %v3884_v60 = vmax.f32 %v2860_v30, %v3372_v48  ;;  %v4140_v1 = vmax.f32 %v3116_v40, %v3628_v17  ;;  %v1825_v29 = vpop.f32.mrb[172].mxu0  ;;  %v2465_v62 = vpop.f32.mrb[172].mxu1 }
 0x23f   :  { %v3885_v12 = vmax.f32 %v2861_v38, %v3373_v54  ;;  %v4141_v44 = vmax.f32 %v3117_v58, %v3629_v8  ;;  %v2862_v61 = vadd.f32 %v13704_v39, %v1825_v29  ;;  %v3118_v56 = vadd.f32 %v13704_v39, %v2465_v62  ;;  %v1827_v36 = vpop.f32.mrb[173].mxu0  ;;  %v2467_v33 = vpop.f32.mrb[173].mxu1  ;;  %v13722_v62 = vld [vmem:[%s15782_s2 + $0x70] sm:$0xff] }
 0x240   :  { %v13697_v19 = vpack.c.bf16 %v3884_v60, %v3882_v32  ;;  %v13699_v2 = vpack.c.bf16 %v4140_v1, %v4138_v24  ;;  %v2863_v25 = vadd.f32 %v13711_v13, %v1827_v36  ;;  %v3119_v20 = vadd.f32 %v13711_v13, %v2467_v33  ;;  %v1829_v30 = vpop.f32.mrb[174].mxu0  ;;  %v2469_v40 = vpop.f32.mrb[174].mxu1 }
 0x241   :  { %v13715_v4 = vpack.c.bf16 %v3885_v12, %v3883_v31  ;;  %v13717_v57 = vpack.c.bf16 %v4141_v44, %v4139_v41  ;;  %v3374_v29 = vmul.f32 0.2, %v2862_v61  ;;  %v3630_v38 = vmul.f32 0.2, %v3118_v56  ;;  %v1831_v17 = vpop.f32.mrb[175].mxu0  ;;  %v2471_v54 = vpop.f32.mrb[175].mxu1 }
 0x242   :  { %16139 = vst [vmem:[#allocation141_spill] sm:$0xff] %v13697_v19  ;;  %16140 = vst [vmem:[#allocation142_spill] sm:$0xff] %v13699_v2  ;;  %v2864_v58 = vadd.f32 %v13722_v62, %v1829_v30  ;;  %v3120_v48 = vadd.f32 %v13722_v62, %v2469_v40  ;;  %v3375_v8 = vmul.f32 0.2, %v2863_v25  ;;  %v3631_v32 = vmul.f32 0.2, %v3119_v20 }
 0x243   :  { %16141 = vst [vmem:[#allocation143_spill] sm:$0xff] %v13717_v57  ;;  %v13729_v31 = vld [vmem:[%s15782_s2 + $0x78] sm:$0xff]  ;;  %7100 = vmatmul.mubr.bf16.gmra.mrb[24].mxu0 %v12541_v14  ;;  %v3886_v36 = vmax.f32 %v2862_v61, %v3374_v29  ;;  %v4142_v33 = vmax.f32 %v3118_v56, %v3630_v38 }
 0x244   :  { %v2865_v12 = vadd.f32 %v13729_v31, %v1831_v17  ;;  %v3121_v24 = vadd.f32 %v13729_v31, %v2471_v54  ;;  %v3376_v60 = vmul.f32 0.2, %v2864_v58  ;;  %v3632_v1 = vmul.f32 0.2, %v3120_v48  ;;  %4765 = vmatmul.mubr.bf16.gmra.mrb[24].mxu1 %v12541_v14  ;;  %7109 = vmatprep.mubr.bf16.mxu0 %v12581_v18 }
 0x245   :  { %4774 = vmatprep.mubr.bf16.mxu1 %v12581_v18  ;;  %v3887_v2 = vmax.f32 %v2863_v25, %v3375_v8  ;;  %v4143_v17 = vmax.f32 %v3119_v20, %v3631_v32 }
 0x246   :  { %v3377_v41 = vmul.f32 0.2, %v2865_v12  ;;  %v3633_v44 = vmul.f32 0.2, %v3121_v24  ;;  %v3888_v30 = vmax.f32 %v2864_v58, %v3376_v60  ;;  %v4144_v40 = vmax.f32 %v3120_v48, %v3632_v1  ;;  %v1835_v15 = vpop.f32.mrb[176].mxu0  ;;  %v2475_v49 = vpop.f32.mrb[176].mxu1 }
 0x247   :  { %v2866_v14 = vadd.f32 %v13584_v5, %v1835_v15  ;;  %v3122_v50 = vadd.f32 %v13584_v5, %v2475_v49  ;;  %v1837_v19 = vpop.f32.mrb[177].mxu0  ;;  %v2477_v18 = vpop.f32.mrb[177].mxu1 }
 0x248   :  { %v3889_v57 = vmax.f32 %v2865_v12, %v3377_v41  ;;  %v4145_v54 = vmax.f32 %v3121_v24, %v3633_v44  ;;  %v13737_v22 = vpack.c.bf16 %v3888_v30, %v3886_v36  ;;  %v13739_v27 = vpack.c.bf16 %v4144_v40, %v4142_v33  ;;  %v1839_v25 = vpop.f32.mrb[178].mxu0  ;;  %v2479_v20 = vpop.f32.mrb[178].mxu1  ;;  %v16147_v36 = vld [vmem:[#allocation22_spill] sm:$0xff] }
 0x249   :  { %v2867_v61 = vadd.f32 %v13591_v10, %v1837_v19  ;;  %v3123_v56 = vadd.f32 %v13591_v10, %v2477_v18  ;;  %v3378_v58 = vmul.f32 0.2, %v2866_v14  ;;  %v3634_v48 = vmul.f32 0.2, %v3122_v50  ;;  %v1841_v32 = vpop.f32.mrb[179].mxu0  ;;  %v2481_v49 = vpop.f32.mrb[179].mxu1 }
 0x24a   :  { %16142 = vst [vmem:[#allocation144_spill] sm:$0xff] %v13737_v22  ;;  %16143 = vst [vmem:[#allocation145_spill] sm:$0xff] %v13739_v27  ;;  %v13745_v29 = vpack.c.bf16 %v3889_v57, %v3887_v2  ;;  %v13747_v38 = vpack.c.bf16 %v4145_v54, %v4143_v17  ;;  %v2868_v8 = vadd.f32 %v13602_v16, %v1839_v25  ;;  %v16146_v2 = vld [vmem:[#allocation17_spill] sm:$0xff] }
 0x24b   :  { %v3124_v15 = vadd.f32 %v13602_v16, %v2479_v20  ;;  %v3379_v12 = vmul.f32 0.2, %v2867_v61  ;;  %v3635_v24 = vmul.f32 0.2, %v3123_v56  ;;  %v2869_v19 = vadd.f32 %v13609_v7, %v1841_v32  ;;  %7110 = vmatmul.mubr.bf16.gmra.mrb[28].mxu0 %v16146_v2 }
 0x24c   :  { %16144 = vst [vmem:[#allocation146_spill] sm:$0xff] %v13745_v29  ;;  %16145 = vst [vmem:[#allocation147_spill] sm:$0xff] %v13747_v38  ;;  %v3125_v60 = vadd.f32 %v13609_v7, %v2481_v49  ;;  %v3380_v1 = vmul.f32 0.2, %v2868_v8  ;;  %4775 = vmatmul.mubr.bf16.gmra.mrb[28].mxu1 %v16146_v2  ;;  %7119 = vmatprep.mubr.bf16.mxu0 %v16147_v36  ;;  %v3890_v33 = vmax.f32 %v2866_v14, %v3378_v58 }
 0x24d   :  { %v3636_v41 = vmul.f32 0.2, %v3124_v15  ;;  %v3381_v57 = vmul.f32 0.2, %v2869_v19  ;;  %4782 = vmatprep.mubr.bf16.mxu1 %v16147_v36  ;;  %v4146_v30 = vmax.f32 %v3122_v50, %v3634_v48  ;;  %v3891_v54 = vmax.f32 %v2867_v61, %v3379_v12 }
 0x24e   :  { %v3637_v44 = vmul.f32 0.2, %v3125_v60  ;;  %v3892_v40 = vmax.f32 %v2868_v8, %v3380_v1  ;;  %v4147_v18 = vmax.f32 %v3123_v56, %v3635_v24  ;;  %v1845_v32 = vpop.f32.mrb[180].mxu0  ;;  %v2485_v49 = vpop.f32.mrb[180].mxu1 }
 0x24f   :  { %v4148_v17 = vmax.f32 %v3124_v15, %v3636_v41  ;;  %v3893_v25 = vmax.f32 %v2869_v19, %v3381_v57  ;;  %v2870_v2 = vadd.f32 %v13624_v3, %v1845_v32  ;;  %v3126_v22 = vadd.f32 %v13624_v3, %v2485_v49  ;;  %v1847_v29 = vpop.f32.mrb[181].mxu0  ;;  %v2487_v36 = vpop.f32.mrb[181].mxu1 }
 0x250   :  { %v4149_v20 = vmax.f32 %v3125_v60, %v3637_v44  ;;  %v13757_v27 = vpack.c.bf16 %v3892_v40, %v3890_v33  ;;  %v2871_v50 = vadd.f32 %v13631_v63, %v1847_v29  ;;  %v3127_v14 = vadd.f32 %v13631_v63, %v2487_v36  ;;  %v1849_v61 = vpop.f32.mrb[182].mxu0  ;;  %v2489_v56 = vpop.f32.mrb[182].mxu1 }
 0x251   :  { %v13759_v38 = vpack.c.bf16 %v4148_v17, %v4146_v30  ;;  %v13765_v58 = vpack.c.bf16 %v3893_v25, %v3891_v54  ;;  %v3382_v8 = vmul.f32 0.2, %v2870_v2  ;;  %v3638_v15 = vmul.f32 0.2, %v3126_v22  ;;  %v1851_v19 = vpop.f32.mrb[183].mxu0  ;;  %v2491_v60 = vpop.f32.mrb[183].mxu1 }
 0x252   :  { %16148 = vst [vmem:[#allocation17_spill] sm:$0xff] %v13757_v27  ;;  %v13767_v48 = vpack.c.bf16 %v4149_v20, %v4147_v18  ;;  %v2872_v12 = vadd.f32 %v13642_v46, %v1849_v61  ;;  %v3128_v24 = vadd.f32 %v13642_v46, %v2489_v56  ;;  %v3383_v1 = vmul.f32 0.2, %v2871_v50  ;;  %v16152_v30 = vld [vmem:[#allocation20_spill] sm:$0xff]  ;;  %v16153_v54 = vld [vmem:[#allocation26_spill] sm:$0xff] }
 0x253   :  { %16149 = vst [vmem:[#allocation22_spill] sm:$0xff] %v13759_v38  ;;  %16150 = vst [vmem:[#allocation148_spill] sm:$0xff] %v13765_v58  ;;  %v3639_v41 = vmul.f32 0.2, %v3127_v14  ;;  %v2873_v29 = vadd.f32 %v13649_v42, %v1851_v19  ;;  %v3129_v57 = vadd.f32 %v13649_v42, %v2491_v60  ;;  %7120 = vmatmul.mubr.bf16.gmra.mrb[32].mxu0 %v16152_v30 }
 0x254   :  { %16151 = vst [vmem:[#allocation149_spill] sm:$0xff] %v13767_v48  ;;  %v3384_v44 = vmul.f32 0.2, %v2872_v12  ;;  %v3640_v33 = vmul.f32 0.2, %v3128_v24  ;;  %4783 = vmatmul.mubr.bf16.gmra.mrb[32].mxu1 %v16152_v30  ;;  %7127 = vmatprep.mubr.bf16.mxu0 %v16153_v54  ;;  %v3894_v18 = vmax.f32 %v2870_v2, %v3382_v8  ;;  %v4150_v25 = vmax.f32 %v3126_v22, %v3638_v15 }
 0x255   :  { %v3385_v40 = vmul.f32 0.2, %v2873_v29  ;;  %v3641_v17 = vmul.f32 0.2, %v3129_v57  ;;  %4792 = vmatprep.mubr.bf16.mxu1 %v16153_v54  ;;  %v3895_v49 = vmax.f32 %v2871_v50, %v3383_v1  ;;  %v4151_v36 = vmax.f32 %v3127_v14, %v3639_v41 }
 0x256   :  { %v3896_v20 = vmax.f32 %v2872_v12, %v3384_v44  ;;  %v4152_v32 = vmax.f32 %v3128_v24, %v3640_v33  ;;  %v1855_v19 = vpop.f32.mrb[184].mxu0  ;;  %v2495_v60 = vpop.f32.mrb[184].mxu1 }
 0x257   :  { %v3897_v61 = vmax.f32 %v2873_v29, %v3385_v40  ;;  %v4153_v56 = vmax.f32 %v3129_v57, %v3641_v17  ;;  %v2874_v30 = vadd.f32 %v13664_v28, %v1855_v19  ;;  %v3130_v27 = vadd.f32 %v13664_v28, %v2495_v60  ;;  %v1857_v58 = vpop.f32.mrb[185].mxu0  ;;  %v2497_v54 = vpop.f32.mrb[185].mxu1 }
 0x258   :  { %v13777_v38 = vpack.c.bf16 %v3896_v20, %v3894_v18  ;;  %v13779_v48 = vpack.c.bf16 %v4152_v32, %v4150_v25  ;;  %v2875_v22 = vadd.f32 %v13671_v34, %v1857_v58  ;;  %v3131_v2 = vadd.f32 %v13671_v34, %v2497_v54  ;;  %v1859_v50 = vpop.f32.mrb[186].mxu0  ;;  %v2499_v14 = vpop.f32.mrb[186].mxu1  ;;  %v16158_v25 = vld [vmem:[#allocation24_spill] sm:$0xff] }
 0x259   :  { %v13785_v8 = vpack.c.bf16 %v3897_v61, %v3895_v49  ;;  %v13787_v15 = vpack.c.bf16 %v4153_v56, %v4151_v36  ;;  %v3386_v12 = vmul.f32 0.2, %v2874_v30  ;;  %v3642_v24 = vmul.f32 0.2, %v3130_v27  ;;  %v1861_v29 = vpop.f32.mrb[187].mxu0  ;;  %v2501_v57 = vpop.f32.mrb[187].mxu1 }
 0x25a   :  { %16154 = vst [vmem:[#allocation20_spill] sm:$0xff] %v13777_v38  ;;  %16155 = vst [vmem:[#allocation26_spill] sm:$0xff] %v13779_v48  ;;  %v2876_v1 = vadd.f32 %v13682_v26, %v1859_v50  ;;  %v3132_v41 = vadd.f32 %v13682_v26, %v2499_v14  ;;  %v3387_v44 = vmul.f32 0.2, %v2875_v22  ;;  %v3643_v33 = vmul.f32 0.2, %v3131_v2 }
 0x25b   :  { %16156 = vst [vmem:[#allocation150_spill] sm:$0xff] %v13785_v8  ;;  %16157 = vst [vmem:[#allocation151_spill] sm:$0xff] %v13787_v15  ;;  %v2877_v58 = vadd.f32 %v13689_v35, %v1861_v29  ;;  %v3133_v40 = vadd.f32 %v13689_v35, %v2501_v57  ;;  %7128 = vmatmul.mubr.bf16.gmra.mrb[36].mxu0 %v16158_v25  ;;  %v16159_v49 = vld [vmem:[#allocation30_spill] sm:$0xff]  ;;  %v3898_v36 = vmax.f32 %v2874_v30, %v3386_v12 }
 0x25c   :  { %v3388_v17 = vmul.f32 0.2, %v2876_v1  ;;  %v3644_v18 = vmul.f32 0.2, %v3132_v41  ;;  %4793 = vmatmul.mubr.bf16.gmra.mrb[36].mxu1 %v16158_v25  ;;  %7137 = vmatprep.mubr.bf16.mxu0 %v16159_v49  ;;  %v4154_v61 = vmax.f32 %v3130_v27, %v3642_v24  ;;  %v3899_v60 = vmax.f32 %v2875_v22, %v3387_v44 }
 0x25d   :  { %v3389_v20 = vmul.f32 0.2, %v2877_v58  ;;  %v3645_v32 = vmul.f32 0.2, %v3133_v40  ;;  %4802 = vmatprep.mubr.bf16.mxu1 %v16159_v49  ;;  %v4155_v54 = vmax.f32 %v3131_v2, %v3643_v33 }
 0x25e   :  { %v3900_v56 = vmax.f32 %v2876_v1, %v3388_v17  ;;  %v4156_v19 = vmax.f32 %v3132_v41, %v3644_v18  ;;  %v1865_v29 = vpop.f32.mrb[188].mxu0  ;;  %v2505_v57 = vpop.f32.mrb[188].mxu1 }
 0x25f   :  { %v3901_v50 = vmax.f32 %v2877_v58, %v3389_v20  ;;  %v4157_v14 = vmax.f32 %v3133_v40, %v3645_v32  ;;  %v2878_v25 = vadd.f32 %v13704_v39, %v1865_v29  ;;  %v3134_v38 = vadd.f32 %v13704_v39, %v2505_v57  ;;  %v1867_v8 = vpop.f32.mrb[189].mxu0  ;;  %v2507_v49 = vpop.f32.mrb[189].mxu1 }
 0x260   :  { %v13797_v48 = vpack.c.bf16 %v3900_v56, %v3898_v36  ;;  %v13799_v15 = vpack.c.bf16 %v4156_v19, %v4154_v61  ;;  %v2879_v27 = vadd.f32 %v13711_v13, %v1867_v8  ;;  %v3135_v30 = vadd.f32 %v13711_v13, %v2507_v49  ;;  %v1869_v22 = vpop.f32.mrb[190].mxu0  ;;  %v2509_v2 = vpop.f32.mrb[190].mxu1  ;;  %v16164_v61 = vld [vmem:[#allocation28_spill] sm:$0xff] }
 0x261   :  { %v13805_v12 = vpack.c.bf16 %v3901_v50, %v3899_v60  ;;  %v13807_v24 = vpack.c.bf16 %v4157_v14, %v4155_v54  ;;  %v3390_v1 = vmul.f32 0.2, %v2878_v25  ;;  %v3646_v41 = vmul.f32 0.2, %v3134_v38  ;;  %v1871_v58 = vpop.f32.mrb[191].mxu0  ;;  %v2511_v40 = vpop.f32.mrb[191].mxu1 }
 0x262   :  { %16160 = vst [vmem:[#allocation24_spill] sm:$0xff] %v13797_v48  ;;  %16161 = vst [vmem:[#allocation30_spill] sm:$0xff] %v13799_v15  ;;  %v2880_v44 = vadd.f32 %v13722_v62, %v1869_v22  ;;  %v3136_v33 = vadd.f32 %v13722_v62, %v2509_v2  ;;  %v3391_v17 = vmul.f32 0.2, %v2879_v27  ;;  %v3647_v18 = vmul.f32 0.2, %v3135_v30 }
 0x263   :  { %16162 = vst [vmem:[#allocation152_spill] sm:$0xff] %v13805_v12  ;;  %16163 = vst [vmem:[#allocation153_spill] sm:$0xff] %v13807_v24  ;;  %v2881_v8 = vadd.f32 %v13729_v31, %v1871_v58  ;;  %v3137_v20 = vadd.f32 %v13729_v31, %v2511_v40  ;;  %7138 = vmatmul.mubr.bf16.gmra.mrb[40].mxu0 %v16164_v61  ;;  %v16165_v60 = vld [vmem:[#allocation34_spill] sm:$0xff]  ;;  %v3902_v54 = vmax.f32 %v2878_v25, %v3390_v1 }
 0x264   :  { %v3392_v32 = vmul.f32 0.2, %v2880_v44  ;;  %v3648_v36 = vmul.f32 0.2, %v3136_v33  ;;  %4803 = vmatmul.mubr.bf16.gmra.mrb[40].mxu1 %v16164_v61  ;;  %7147 = vmatprep.mubr.bf16.mxu0 %v16165_v60  ;;  %v4158_v50 = vmax.f32 %v3134_v38, %v3646_v41  ;;  %v3903_v57 = vmax.f32 %v2879_v27, %v3391_v17 }
 0x265   :  { %v3393_v56 = vmul.f32 0.2, %v2881_v8  ;;  %v3649_v19 = vmul.f32 0.2, %v3137_v20  ;;  %4812 = vmatprep.mubr.bf16.mxu1 %v16165_v60  ;;  %v4159_v49 = vmax.f32 %v3135_v30, %v3647_v18 }
 0x266   :  { %v3904_v14 = vmax.f32 %v2880_v44, %v3392_v32  ;;  %v4160_v29 = vmax.f32 %v3136_v33, %v3648_v36  ;;  %v1875_v58 = vpop.f32.mrb[192].mxu0  ;;  %v2515_v40 = vpop.f32.mrb[192].mxu1 }
 0x267   :  { %v3905_v22 = vmax.f32 %v2881_v8, %v3393_v56  ;;  %v4161_v2 = vmax.f32 %v3137_v20, %v3649_v19  ;;  %v2882_v61 = vadd.f32 %v13584_v5, %v1875_v58  ;;  %v3138_v48 = vadd.f32 %v13584_v5, %v2515_v40  ;;  %v1877_v12 = vpop.f32.mrb[193].mxu0  ;;  %v2517_v60 = vpop.f32.mrb[193].mxu1 }
 0x268   :  { %v13817_v15 = vpack.c.bf16 %v3904_v14, %v3902_v54  ;;  %v13819_v24 = vpack.c.bf16 %v4160_v29, %v4158_v50  ;;  %v2883_v38 = vadd.f32 %v13591_v10, %v1877_v12  ;;  %v3139_v25 = vadd.f32 %v13591_v10, %v2517_v60  ;;  %v1879_v27 = vpop.f32.mrb[194].mxu0  ;;  %v2519_v30 = vpop.f32.mrb[194].mxu1  ;;  %v16170_v50 = vld [vmem:[#allocation32_spill] sm:$0xff] }
 0x269   :  { %v13825_v1 = vpack.c.bf16 %v3905_v22, %v3903_v57  ;;  %v13827_v41 = vpack.c.bf16 %v4161_v2, %v4159_v49  ;;  %v3394_v44 = vmul.f32 0.2, %v2882_v61  ;;  %v3650_v33 = vmul.f32 0.2, %v3138_v48  ;;  %v1881_v8 = vpop.f32.mrb[195].mxu0  ;;  %v2521_v20 = vpop.f32.mrb[195].mxu1 }
 0x26a   :  { %16166 = vst [vmem:[#allocation28_spill] sm:$0xff] %v13817_v15  ;;  %16167 = vst [vmem:[#allocation34_spill] sm:$0xff] %v13819_v24  ;;  %v2884_v17 = vadd.f32 %v13602_v16, %v1879_v27  ;;  %v3140_v18 = vadd.f32 %v13602_v16, %v2519_v30  ;;  %v3395_v32 = vmul.f32 0.2, %v2883_v38  ;;  %v3651_v36 = vmul.f32 0.2, %v3139_v25 }
 0x26b   :  { %16168 = vst [vmem:[#allocation154_spill] sm:$0xff] %v13825_v1  ;;  %16169 = vst [vmem:[#allocation155_spill] sm:$0xff] %v13827_v41  ;;  %v2885_v12 = vadd.f32 %v13609_v7, %v1881_v8  ;;  %v3141_v56 = vadd.f32 %v13609_v7, %v2521_v20  ;;  %7148 = vmatmul.mubr.bf16.gmra.mrb[44].mxu0 %v16170_v50  ;;  %v16171_v57 = vld [vmem:[#allocation38_spill] sm:$0xff]  ;;  %v3906_v49 = vmax.f32 %v2882_v61, %v3394_v44 }
 0x26c   :  { %v3396_v19 = vmul.f32 0.2, %v2884_v17  ;;  %v3652_v54 = vmul.f32 0.2, %v3140_v18  ;;  %4813 = vmatmul.mubr.bf16.gmra.mrb[44].mxu1 %v16170_v50  ;;  %7157 = vmatprep.mubr.bf16.mxu0 %v16171_v57  ;;  %v4162_v22 = vmax.f32 %v3138_v48, %v3650_v33  ;;  %v3907_v40 = vmax.f32 %v2883_v38, %v3395_v32 }
 0x26d   :  { %v3397_v14 = vmul.f32 0.2, %v2885_v12  ;;  %v3653_v29 = vmul.f32 0.2, %v3141_v56  ;;  %4820 = vmatprep.mubr.bf16.mxu1 %v16171_v57  ;;  %v4163_v60 = vmax.f32 %v3139_v25, %v3651_v36 }
 0x26e   :  { %v3908_v2 = vmax.f32 %v2884_v17, %v3396_v19  ;;  %v4164_v58 = vmax.f32 %v3140_v18, %v3652_v54  ;;  %v1885_v8 = vpop.f32.mrb[196].mxu0  ;;  %v2525_v20 = vpop.f32.mrb[196].mxu1 }
 0x26f   :  { %v3909_v27 = vmax.f32 %v2885_v12, %v3397_v14  ;;  %v4165_v30 = vmax.f32 %v3141_v56, %v3653_v29  ;;  %v2886_v50 = vadd.f32 %v13624_v3, %v1885_v8  ;;  %v3142_v15 = vadd.f32 %v13624_v3, %v2525_v20  ;;  %v1887_v1 = vpop.f32.mrb[197].mxu0  ;;  %v2527_v57 = vpop.f32.mrb[197].mxu1 }
 0x270   :  { %v13837_v24 = vpack.c.bf16 %v3908_v2, %v3906_v49  ;;  %v13839_v41 = vpack.c.bf16 %v4164_v58, %v4162_v22  ;;  %v2887_v48 = vadd.f32 %v13631_v63, %v1887_v1  ;;  %v3143_v61 = vadd.f32 %v13631_v63, %v2527_v57  ;;  %v1889_v38 = vpop.f32.mrb[198].mxu0  ;;  %v2529_v25 = vpop.f32.mrb[198].mxu1  ;;  %v16176_v22 = vld [vmem:[#allocation36_spill] sm:$0xff] }
 0x271   :  { %v13845_v44 = vpack.c.bf16 %v3909_v27, %v3907_v40  ;;  %v13847_v33 = vpack.c.bf16 %v4165_v30, %v4163_v60  ;;  %v3398_v17 = vmul.f32 0.2, %v2886_v50  ;;  %v3654_v18 = vmul.f32 0.2, %v3142_v15  ;;  %v1891_v12 = vpop.f32.mrb[199].mxu0  ;;  %v2531_v56 = vpop.f32.mrb[199].mxu1 }
 0x272   :  { %16172 = vst [vmem:[#allocation32_spill] sm:$0xff] %v13837_v24  ;;  %16173 = vst [vmem:[#allocation38_spill] sm:$0xff] %v13839_v41  ;;  %v2888_v32 = vadd.f32 %v13642_v46, %v1889_v38  ;;  %v3144_v36 = vadd.f32 %v13642_v46, %v2529_v25  ;;  %v3399_v19 = vmul.f32 0.2, %v2887_v48  ;;  %v3655_v54 = vmul.f32 0.2, %v3143_v61 }
 0x273   :  { %16174 = vst [vmem:[#allocation156_spill] sm:$0xff] %v13845_v44  ;;  %16175 = vst [vmem:[#allocation157_spill] sm:$0xff] %v13847_v33  ;;  %v2889_v1 = vadd.f32 %v13649_v42, %v1891_v12  ;;  %v3145_v14 = vadd.f32 %v13649_v42, %v2531_v56  ;;  %7158 = vmatmul.mubr.bf16.gmra.mrb[48].mxu0 %v16176_v22  ;;  %v16177_v40 = vld [vmem:[#allocation42_spill] sm:$0xff]  ;;  %v3910_v60 = vmax.f32 %v2886_v50, %v3398_v17 }
 0x274   :  { %v3400_v29 = vmul.f32 0.2, %v2888_v32  ;;  %v3656_v49 = vmul.f32 0.2, %v3144_v36  ;;  %4821 = vmatmul.mubr.bf16.gmra.mrb[48].mxu1 %v16176_v22  ;;  %7165 = vmatprep.mubr.bf16.mxu0 %v16177_v40  ;;  %v4166_v27 = vmax.f32 %v3142_v15, %v3654_v18  ;;  %v3911_v20 = vmax.f32 %v2887_v48, %v3399_v19 }
 0x275   :  { %v3401_v2 = vmul.f32 0.2, %v2889_v1  ;;  %v3657_v58 = vmul.f32 0.2, %v3145_v14  ;;  %4830 = vmatprep.mubr.bf16.mxu1 %v16177_v40  ;;  %v4167_v57 = vmax.f32 %v3143_v61, %v3655_v54 }
 0x276   :  { %v3912_v30 = vmax.f32 %v2888_v32, %v3400_v29  ;;  %v4168_v8 = vmax.f32 %v3144_v36, %v3656_v49  ;;  %v1895_v12 = vpop.f32.mrb[200].mxu0  ;;  %v2535_v56 = vpop.f32.mrb[200].mxu1 }
 0x277   :  { %v3913_v38 = vmax.f32 %v2889_v1, %v3401_v2  ;;  %v4169_v25 = vmax.f32 %v3145_v14, %v3657_v58  ;;  %v2890_v22 = vadd.f32 %v13664_v28, %v1895_v12  ;;  %v3146_v24 = vadd.f32 %v13664_v28, %v2535_v56  ;;  %v1897_v44 = vpop.f32.mrb[201].mxu0  ;;  %v2537_v40 = vpop.f32.mrb[201].mxu1 }
 0x278   :  { %v13857_v41 = vpack.c.bf16 %v3912_v30, %v3910_v60  ;;  %v13859_v33 = vpack.c.bf16 %v4168_v8, %v4166_v27  ;;  %v2891_v15 = vadd.f32 %v13671_v34, %v1897_v44  ;;  %v3147_v50 = vadd.f32 %v13671_v34, %v2537_v40  ;;  %v1899_v48 = vpop.f32.mrb[202].mxu0  ;;  %v2539_v61 = vpop.f32.mrb[202].mxu1  ;;  %v16182_v27 = vld [vmem:[#allocation40_spill] sm:$0xff] }
 0x279   :  { %v13865_v17 = vpack.c.bf16 %v3913_v38, %v3911_v20  ;;  %v13867_v18 = vpack.c.bf16 %v4169_v25, %v4167_v57  ;;  %v3402_v32 = vmul.f32 0.2, %v2890_v22  ;;  %v3658_v36 = vmul.f32 0.2, %v3146_v24  ;;  %v1901_v1 = vpop.f32.mrb[203].mxu0  ;;  %v2541_v14 = vpop.f32.mrb[203].mxu1 }
 0x27a   :  { %16178 = vst [vmem:[#allocation36_spill] sm:$0xff] %v13857_v41  ;;  %16179 = vst [vmem:[#allocation42_spill] sm:$0xff] %v13859_v33  ;;  %v2892_v19 = vadd.f32 %v13682_v26, %v1899_v48  ;;  %v3148_v54 = vadd.f32 %v13682_v26, %v2539_v61  ;;  %v3403_v29 = vmul.f32 0.2, %v2891_v15  ;;  %v3659_v49 = vmul.f32 0.2, %v3147_v50 }
 0x27b   :  { %16180 = vst [vmem:[#allocation158_spill] sm:$0xff] %v13865_v17  ;;  %16181 = vst [vmem:[#allocation159_spill] sm:$0xff] %v13867_v18  ;;  %v2893_v44 = vadd.f32 %v13689_v35, %v1901_v1  ;;  %v3149_v2 = vadd.f32 %v13689_v35, %v2541_v14  ;;  %7166 = vmatmul.mubr.bf16.gmra.mrb[52].mxu0 %v16182_v27  ;;  %v16183_v20 = vld [vmem:[#allocation46_spill] sm:$0xff]  ;;  %v3914_v57 = vmax.f32 %v2890_v22, %v3402_v32 }
 0x27c   :  { %v3404_v58 = vmul.f32 0.2, %v2892_v19  ;;  %v3660_v60 = vmul.f32 0.2, %v3148_v54  ;;  %4831 = vmatmul.mubr.bf16.gmra.mrb[52].mxu1 %v16182_v27  ;;  %7175 = vmatprep.mubr.bf16.mxu0 %v16183_v20  ;;  %v4170_v38 = vmax.f32 %v3146_v24, %v3658_v36  ;;  %v3915_v56 = vmax.f32 %v2891_v15, %v3403_v29 }
 0x27d   :  { %v3405_v30 = vmul.f32 0.2, %v2893_v44  ;;  %v3661_v8 = vmul.f32 0.2, %v3149_v2  ;;  %4840 = vmatprep.mubr.bf16.mxu1 %v16183_v20  ;;  %v4171_v40 = vmax.f32 %v3147_v50, %v3659_v49 }
 0x27e   :  { %v3916_v25 = vmax.f32 %v2892_v19, %v3404_v58  ;;  %v4172_v12 = vmax.f32 %v3148_v54, %v3660_v60  ;;  %v1905_v1 = vpop.f32.mrb[204].mxu0  ;;  %v2545_v14 = vpop.f32.mrb[204].mxu1 }
 0x27f   :  { %v3917_v48 = vmax.f32 %v2893_v44, %v3405_v30  ;;  %v4173_v61 = vmax.f32 %v3149_v2, %v3661_v8  ;;  %v2894_v27 = vadd.f32 %v13704_v39, %v1905_v1  ;;  %v3150_v41 = vadd.f32 %v13704_v39, %v2545_v14  ;;  %v1907_v17 = vpop.f32.mrb[205].mxu0  ;;  %v2547_v20 = vpop.f32.mrb[205].mxu1 }
 0x280   :  { %v13877_v33 = vpack.c.bf16 %v3916_v25, %v3914_v57  ;;  %v13879_v18 = vpack.c.bf16 %v4172_v12, %v4170_v38  ;;  %v2895_v24 = vadd.f32 %v13711_v13, %v1907_v17  ;;  %v3151_v22 = vadd.f32 %v13711_v13, %v2547_v20  ;;  %v1909_v15 = vpop.f32.mrb[206].mxu0  ;;  %v2549_v50 = vpop.f32.mrb[206].mxu1  ;;  %v16188_v38 = vld [vmem:[#allocation44_spill] sm:$0xff] }
 0x281   :  { %v13885_v32 = vpack.c.bf16 %v3917_v48, %v3915_v56  ;;  %v13887_v36 = vpack.c.bf16 %v4173_v61, %v4171_v40  ;;  %v3406_v19 = vmul.f32 0.2, %v2894_v27  ;;  %v3662_v54 = vmul.f32 0.2, %v3150_v41  ;;  %v1911_v44 = vpop.f32.mrb[207].mxu0  ;;  %v2551_v2 = vpop.f32.mrb[207].mxu1 }
 0x282   :  { %16184 = vst [vmem:[#allocation40_spill] sm:$0xff] %v13877_v33  ;;  %16185 = vst [vmem:[#allocation46_spill] sm:$0xff] %v13879_v18  ;;  %v2896_v29 = vadd.f32 %v13722_v62, %v1909_v15  ;;  %v3152_v49 = vadd.f32 %v13722_v62, %v2549_v50  ;;  %v3407_v58 = vmul.f32 0.2, %v2895_v24  ;;  %v3663_v60 = vmul.f32 0.2, %v3151_v22 }
 0x283   :  { %16186 = vst [vmem:[#allocation160_spill] sm:$0xff] %v13885_v32  ;;  %16187 = vst [vmem:[#allocation161_spill] sm:$0xff] %v13887_v36  ;;  %v2897_v17 = vadd.f32 %v13729_v31, %v1911_v44  ;;  %v3153_v30 = vadd.f32 %v13729_v31, %v2551_v2  ;;  %7176 = vmatmul.mubr.bf16.gmra.mrb[56].mxu0 %v16188_v38  ;;  %v16189_v56 = vld [vmem:[#allocation50_spill] sm:$0xff]  ;;  %v3918_v40 = vmax.f32 %v2894_v27, %v3406_v19 }
 0x284   :  { %v3408_v8 = vmul.f32 0.2, %v2896_v29  ;;  %v3664_v57 = vmul.f32 0.2, %v3152_v49  ;;  %4841 = vmatmul.mubr.bf16.gmra.mrb[56].mxu1 %v16188_v38  ;;  %7185 = vmatprep.mubr.bf16.mxu0 %v16189_v56  ;;  %v4174_v48 = vmax.f32 %v3150_v41, %v3662_v54  ;;  %v3919_v14 = vmax.f32 %v2895_v24, %v3407_v58 }
 0x285   :  { %v3409_v25 = vmul.f32 0.2, %v2897_v17  ;;  %v3665_v12 = vmul.f32 0.2, %v3153_v30  ;;  %4850 = vmatprep.mubr.bf16.mxu1 %v16189_v56  ;;  %v4175_v20 = vmax.f32 %v3151_v22, %v3663_v60 }
 0x286   :  { %v3920_v61 = vmax.f32 %v2896_v29, %v3408_v8  ;;  %v4176_v1 = vmax.f32 %v3152_v49, %v3664_v57  ;;  %v1915_v44 = vpop.f32.mrb[208].mxu0  ;;  %v2555_v2 = vpop.f32.mrb[208].mxu1 }
 0x287   :  { %v3921_v15 = vmax.f32 %v2897_v17, %v3409_v25  ;;  %v4177_v50 = vmax.f32 %v3153_v30, %v3665_v12  ;;  %v2898_v38 = vadd.f32 %v13584_v5, %v1915_v44  ;;  %v3154_v33 = vadd.f32 %v13584_v5, %v2555_v2  ;;  %v1917_v32 = vpop.f32.mrb[209].mxu0  ;;  %v2557_v56 = vpop.f32.mrb[209].mxu1  ;;  %v16194_v12 = vld [vmem:[#allocation48_spill] sm:$0xff] }
 0x288   :  { %v13897_v18 = vpack.c.bf16 %v3920_v61, %v3918_v40  ;;  %v13899_v36 = vpack.c.bf16 %v4176_v1, %v4174_v48  ;;  %v2899_v41 = vadd.f32 %v13591_v10, %v1917_v32  ;;  %v3155_v27 = vadd.f32 %v13591_v10, %v2557_v56  ;;  %v1919_v24 = vpop.f32.mrb[210].mxu0  ;;  %v2559_v22 = vpop.f32.mrb[210].mxu1  ;;  %v16195_v61 = vld [vmem:[#allocation54_spill] sm:$0xff] }
 0x289   :  { %v13905_v19 = vpack.c.bf16 %v3921_v15, %v3919_v14  ;;  %v13907_v54 = vpack.c.bf16 %v4177_v50, %v4175_v20  ;;  %v3410_v29 = vmul.f32 0.2, %v2898_v38  ;;  %v3666_v49 = vmul.f32 0.2, %v3154_v33  ;;  %v1921_v17 = vpop.f32.mrb[211].mxu0  ;;  %v2561_v5 = vpop.f32.mrb[211].mxu1 }
 0x28a   :  { %16190 = vst [vmem:[#allocation44_spill] sm:$0xff] %v13897_v18  ;;  %16191 = vst [vmem:[#allocation50_spill] sm:$0xff] %v13899_v36  ;;  %v2900_v58 = vadd.f32 %v13602_v16, %v1919_v24  ;;  %v3156_v60 = vadd.f32 %v13602_v16, %v2559_v22  ;;  %v3411_v30 = vmul.f32 0.2, %v2899_v41  ;;  %v3667_v8 = vmul.f32 0.2, %v3155_v27 }
 0x28b   :  { %16192 = vst [vmem:[#allocation162_spill] sm:$0xff] %v13905_v19  ;;  %16193 = vst [vmem:[#allocation163_spill] sm:$0xff] %v13907_v54  ;;  %v2901_v32 = vadd.f32 %v13609_v7, %v1921_v17  ;;  %v3157_v10 = vadd.f32 %v13609_v7, %v2561_v5  ;;  %7186 = vmatmul.mubr.bf16.gmra.mrb[60].mxu0 %v16194_v12  ;;  %v3922_v16 = vmax.f32 %v2898_v38, %v3410_v29 }
 0x28c   :  { %v3412_v57 = vmul.f32 0.2, %v2900_v58  ;;  %v3668_v25 = vmul.f32 0.2, %v3156_v60  ;;  %4851 = vmatmul.mubr.bf16.gmra.mrb[60].mxu1 %v16194_v12  ;;  %7195 = vmatprep.mubr.bf16.mxu0 %v16195_v61  ;;  %v4178_v1 = vmax.f32 %v3154_v33, %v3666_v49  ;;  %v3923_v15 = vmax.f32 %v2899_v41, %v3411_v30 }
 0x28d   :  { %v3413_v40 = vmul.f32 0.2, %v2901_v32  ;;  %v3669_v48 = vmul.f32 0.2, %v3157_v10  ;;  %4858 = vmatprep.mubr.bf16.mxu1 %v16195_v61  ;;  %v4179_v50 = vmax.f32 %v3155_v27, %v3667_v8 }
 0x28e   :  { %v3924_v14 = vmax.f32 %v2900_v58, %v3412_v57  ;;  %v4180_v20 = vmax.f32 %v3156_v60, %v3668_v25  ;;  %v1925_v2 = vpop.f32.mrb[212].mxu0  ;;  %v2565_v56 = vpop.f32.mrb[212].mxu1 }
 0x28f   :  { %v3925_v44 = vmax.f32 %v2901_v32, %v3413_v40  ;;  %v4181_v7 = vmax.f32 %v3157_v10, %v3669_v48  ;;  %v2902_v17 = vadd.f32 %v13624_v3, %v1925_v2  ;;  %v3158_v5 = vadd.f32 %v13624_v3, %v2565_v56  ;;  %v1927_v12 = vpop.f32.mrb[213].mxu0  ;;  %v2567_v61 = vpop.f32.mrb[213].mxu1 }
 0x290   :  { %v13917_v24 = vpack.c.bf16 %v3924_v14, %v3922_v16  ;;  %v13919_v22 = vpack.c.bf16 %v4180_v20, %v4178_v1  ;;  %v2903_v33 = vadd.f32 %v13631_v63, %v1927_v12  ;;  %v3159_v38 = vadd.f32 %v13631_v63, %v2567_v61  ;;  %v1929_v41 = vpop.f32.mrb[214].mxu0  ;;  %v2569_v27 = vpop.f32.mrb[214].mxu1  ;;  %v16200_v16 = vld [vmem:[#allocation52_spill] sm:$0xff]  ;;  %v16201_v20 = vld [vmem:[#allocation58_spill] sm:$0xff] }
 0x291   :  { %v13925_v29 = vpack.c.bf16 %v3925_v44, %v3923_v15  ;;  %v13927_v49 = vpack.c.bf16 %v4181_v7, %v4179_v50  ;;  %v3414_v58 = vmul.f32 0.2, %v2902_v17  ;;  %v3670_v60 = vmul.f32 0.2, %v3158_v5  ;;  %v1931_v32 = vpop.f32.mrb[215].mxu0  ;;  %v2571_v3 = vpop.f32.mrb[215].mxu1 }
 0x292   :  { %16196 = vst [vmem:[#allocation48_spill] sm:$0xff] %v13917_v24  ;;  %16197 = vst [vmem:[#allocation54_spill] sm:$0xff] %v13919_v22  ;;  %v2904_v30 = vadd.f32 %v13642_v46, %v1929_v41  ;;  %v3160_v8 = vadd.f32 %v13642_v46, %v2569_v27  ;;  %v3415_v10 = vmul.f32 0.2, %v2903_v33  ;;  %v3671_v57 = vmul.f32 0.2, %v3159_v38 }
 0x293   :  { %16198 = vst [vmem:[#allocation164_spill] sm:$0xff] %v13925_v29  ;;  %16199 = vst [vmem:[#allocation165_spill] sm:$0xff] %v13927_v49  ;;  %v2905_v25 = vadd.f32 %v13649_v42, %v1931_v32  ;;  %v3161_v63 = vadd.f32 %v13649_v42, %v2571_v3  ;;  %7196 = vmatmul.mubr.bf16.gmra.mrb[64].mxu0 %v16200_v16  ;;  %v3926_v46 = vmax.f32 %v2902_v17, %v3414_v58 }
 0x294   :  { %v3416_v40 = vmul.f32 0.2, %v2904_v30  ;;  %v3672_v48 = vmul.f32 0.2, %v3160_v8  ;;  %4859 = vmatmul.mubr.bf16.gmra.mrb[64].mxu1 %v16200_v16  ;;  %7203 = vmatprep.mubr.bf16.mxu0 %v16201_v20  ;;  %v4182_v15 = vmax.f32 %v3158_v5, %v3670_v60  ;;  %v3927_v7 = vmax.f32 %v2903_v33, %v3415_v10 }
 0x295   :  { %v3417_v1 = vmul.f32 0.2, %v2905_v25  ;;  %v3673_v14 = vmul.f32 0.2, %v3161_v63  ;;  %4868 = vmatprep.mubr.bf16.mxu1 %v16201_v20  ;;  %v4183_v2 = vmax.f32 %v3159_v38, %v3671_v57 }
 0x296   :  { %v3928_v50 = vmax.f32 %v2904_v30, %v3416_v40  ;;  %v4184_v44 = vmax.f32 %v3160_v8, %v3672_v48  ;;  %v1935_v12 = vpop.f32.mrb[216].mxu0 }
 0x297   :  { %v3929_v56 = vmax.f32 %v2905_v25, %v3417_v1  ;;  %v4185_v42 = vmax.f32 %v3161_v63, %v3673_v14  ;;  %v2575_v61 = vpop.f32.mrb[216].mxu1  ;;  %v2906_v32 = vadd.f32 %v13664_v28, %v1935_v12  ;;  %v1937_v16 = vpop.f32.mrb[217].mxu0 }
 0x298   :  { %v13937_v41 = vpack.c.bf16 %v3928_v50, %v3926_v46  ;;  %v13939_v27 = vpack.c.bf16 %v4184_v44, %v4182_v15  ;;  %v3162_v3 = vadd.f32 %v13664_v28, %v2575_v61  ;;  %v2577_v20 = vpop.f32.mrb[217].mxu1  ;;  %v2907_v17 = vadd.f32 %v13671_v34, %v1937_v16  ;;  %v1939_v33 = vpop.f32.mrb[218].mxu0  ;;  %v16206_v46 = vld [vmem:[#allocation56_spill] sm:$0xff]  ;;  %v16207_v44 = vld [vmem:[#allocation62_spill] sm:$0xff] }
 0x299   :  { %v3163_v5 = vadd.f32 %v13671_v34, %v2577_v20  ;;  %v2579_v38 = vpop.f32.mrb[218].mxu1  ;;  %v13945_v58 = vpack.c.bf16 %v3929_v56, %v3927_v7  ;;  %v13947_v60 = vpack.c.bf16 %v4185_v42, %v4183_v2  ;;  %v3418_v30 = vmul.f32 0.2, %v2906_v32  ;;  %v1941_v25 = vpop.f32.mrb[219].mxu0 }
 0x29a   :  { %16202 = vst [vmem:[#allocation52_spill] sm:$0xff] %v13937_v41  ;;  %16203 = vst [vmem:[#allocation58_spill] sm:$0xff] %v13939_v27  ;;  %v3674_v8 = vmul.f32 0.2, %v3162_v3  ;;  %v2908_v10 = vadd.f32 %v13682_v26, %v1939_v33  ;;  %v3164_v57 = vadd.f32 %v13682_v26, %v2579_v38  ;;  %v2581_v28 = vpop.f32.mrb[219].mxu1  ;;  %v2909_v48 = vadd.f32 %v13689_v35, %v1941_v25 }
 0x29b   :  { %16204 = vst [vmem:[#allocation166_spill] sm:$0xff] %v13945_v58  ;;  %16205 = vst [vmem:[#allocation167_spill] sm:$0xff] %v13947_v60  ;;  %v3419_v63 = vmul.f32 0.2, %v2907_v17  ;;  %v3675_v40 = vmul.f32 0.2, %v3163_v5  ;;  %v3165_v34 = vadd.f32 %v13689_v35, %v2581_v28  ;;  %7204 = vmatmul.mubr.bf16.gmra.mrb[68].mxu0 %v16206_v46  ;;  %v3930_v26 = vmax.f32 %v2906_v32, %v3418_v30 }
 0x29c   :  { %v3420_v1 = vmul.f32 0.2, %v2908_v10  ;;  %v3676_v14 = vmul.f32 0.2, %v3164_v57  ;;  %4869 = vmatmul.mubr.bf16.gmra.mrb[68].mxu1 %v16206_v46  ;;  %v3421_v15 = vmul.f32 0.2, %v2909_v48  ;;  %7213 = vmatprep.mubr.bf16.mxu0 %v16207_v44  ;;  %v4186_v7 = vmax.f32 %v3162_v3, %v3674_v8 }
 0x29d   :  { %v3677_v50 = vmul.f32 0.2, %v3165_v34  ;;  %4878 = vmatprep.mubr.bf16.mxu1 %v16207_v44  ;;  %v3931_v42 = vmax.f32 %v2907_v17, %v3419_v63  ;;  %v4187_v12 = vmax.f32 %v3163_v5, %v3675_v40 }
 0x29e   :  { %v3932_v2 = vmax.f32 %v2908_v10, %v3420_v1  ;;  %v4188_v56 = vmax.f32 %v3164_v57, %v3676_v14  ;;  %v3933_v61 = vmax.f32 %v2909_v48, %v3421_v15  ;;  %v1945_v16 = vpop.f32.mrb[220].mxu0 }
 0x29f   :  { %v4189_v35 = vmax.f32 %v3165_v34, %v3677_v50  ;;  %v2585_v20 = vpop.f32.mrb[220].mxu1  ;;  %v2910_v25 = vadd.f32 %v13704_v39, %v1945_v16  ;;  %v1947_v46 = vpop.f32.mrb[221].mxu0 }
 0x2a0   :  { %v13957_v33 = vpack.c.bf16 %v3932_v2, %v3930_v26  ;;  %v13959_v38 = vpack.c.bf16 %v4188_v56, %v4186_v7  ;;  %v3166_v28 = vadd.f32 %v13704_v39, %v2585_v20  ;;  %v2587_v44 = vpop.f32.mrb[221].mxu1  ;;  %v2911_v32 = vadd.f32 %v13711_v13, %v1947_v46  ;;  %v1949_v17 = vpop.f32.mrb[222].mxu0  ;;  %v16212_v26 = vld [vmem:[#allocation60_spill] sm:$0xff]  ;;  %v16213_v56 = vld [vmem:[#allocation66_spill] sm:$0xff] }
 0x2a1   :  { %v3167_v3 = vadd.f32 %v13711_v13, %v2587_v44  ;;  %v2589_v5 = vpop.f32.mrb[222].mxu1  ;;  %v13965_v30 = vpack.c.bf16 %v3933_v61, %v3931_v42  ;;  %v13967_v8 = vpack.c.bf16 %v4189_v35, %v4187_v12  ;;  %v3422_v10 = vmul.f32 0.2, %v2910_v25  ;;  %v1951_v48 = vpop.f32.mrb[223].mxu0 }
 0x2a2   :  { %16208 = vst [vmem:[#allocation56_spill] sm:$0xff] %v13957_v33  ;;  %16209 = vst [vmem:[#allocation62_spill] sm:$0xff] %v13959_v38  ;;  %v3678_v57 = vmul.f32 0.2, %v3166_v28  ;;  %v2912_v63 = vadd.f32 %v13722_v62, %v1949_v17  ;;  %v3168_v40 = vadd.f32 %v13722_v62, %v2589_v5  ;;  %v2591_v39 = vpop.f32.mrb[223].mxu1  ;;  %v2913_v14 = vadd.f32 %v13729_v31, %v1951_v48  ;;  %v13984_v48 = vld [vmem:[%s15782_s2] sm:$0xff] }
 0x2a3   :  { %16210 = vst [vmem:[#allocation168_spill] sm:$0xff] %v13965_v30  ;;  %16211 = vst [vmem:[#allocation169_spill] sm:$0xff] %v13967_v8  ;;  %v3423_v34 = vmul.f32 0.2, %v2911_v32  ;;  %v3679_v1 = vmul.f32 0.2, %v3167_v3  ;;  %v3169_v13 = vadd.f32 %v13729_v31, %v2591_v39  ;;  %7214 = vmatmul.mubr.bf16.gmra.mrb[72].mxu0 %v16212_v26  ;;  %v3934_v62 = vmax.f32 %v2910_v25, %v3422_v10 }
 0x2a4   :  { %v3424_v15 = vmul.f32 0.2, %v2912_v63  ;;  %v3680_v50 = vmul.f32 0.2, %v3168_v40  ;;  %4879 = vmatmul.mubr.bf16.gmra.mrb[72].mxu1 %v16212_v26  ;;  %v3425_v7 = vmul.f32 0.2, %v2913_v14  ;;  %7223 = vmatprep.mubr.bf16.mxu0 %v16213_v56  ;;  %v4190_v42 = vmax.f32 %v3166_v28, %v3678_v57 }
 0x2a5   :  { %v3681_v2 = vmul.f32 0.2, %v3169_v13  ;;  %4888 = vmatprep.mubr.bf16.mxu1 %v16213_v56  ;;  %v3935_v35 = vmax.f32 %v2911_v32, %v3423_v34  ;;  %v4191_v16 = vmax.f32 %v3167_v3, %v3679_v1  ;;  %v13991_v3 = vld [vmem:[%s15782_s2 + $0x8] sm:$0xff]  ;;  %v16236_v33 = vld [vmem:[#allocation82_spill] sm:$0xff] }
 0x2a6   :  { %v3936_v12 = vmax.f32 %v2912_v63, %v3424_v15  ;;  %v4192_v61 = vmax.f32 %v3168_v40, %v3680_v50  ;;  %v3937_v20 = vmax.f32 %v2913_v14, %v3425_v7  ;;  %v1955_v46 = vpop.f32.mrb[224].mxu0  ;;  %v14002_v15 = vld [vmem:[%s15782_s2 + $0x10] sm:$0xff] }
 0x2a7   :  { %v4193_v31 = vmax.f32 %v3169_v13, %v3681_v2  ;;  %v2595_v44 = vpop.f32.mrb[224].mxu1  ;;  %v2914_v25 = vadd.f32 %v13984_v48, %v1955_v46  ;;  %v1957_v10 = vpop.f32.mrb[225].mxu0 }
 0x2a8   :  { %v13977_v17 = vpack.c.bf16 %v3936_v12, %v3934_v62  ;;  %v13979_v5 = vpack.c.bf16 %v4192_v61, %v4190_v42  ;;  %v3170_v28 = vadd.f32 %v13984_v48, %v2595_v44  ;;  %v2597_v32 = vpop.f32.mrb[225].mxu1  ;;  %v2915_v57 = vadd.f32 %v13991_v3, %v1957_v10  ;;  %v1959_v40 = vpop.f32.mrb[226].mxu0  ;;  %v14009_v42 = vld [vmem:[%s15782_s2 + $0x18] sm:$0xff] }
 0x2a9   :  { %v3171_v63 = vadd.f32 %v13991_v3, %v2597_v32  ;;  %v2599_v39 = vpop.f32.mrb[226].mxu1  ;;  %v13995_v34 = vpack.c.bf16 %v3937_v20, %v3935_v35  ;;  %v13997_v1 = vpack.c.bf16 %v4193_v31, %v4191_v16  ;;  %v3426_v14 = vmul.f32 0.2, %v2914_v25  ;;  %v1961_v7 = vpop.f32.mrb[227].mxu0  ;;  %v16218_v20 = vld [vmem:[#allocation64_spill] sm:$0xff]  ;;  %v16219_v44 = vld [vmem:[#allocation70_spill] sm:$0xff] }
 0x2aa   :  { %16214 = vst [vmem:[#allocation60_spill] sm:$0xff] %v13977_v17  ;;  %16215 = vst [vmem:[#allocation66_spill] sm:$0xff] %v13979_v5  ;;  %v3682_v13 = vmul.f32 0.2, %v3170_v28  ;;  %v2916_v50 = vadd.f32 %v14002_v15, %v1959_v40  ;;  %v3172_v26 = vadd.f32 %v14002_v15, %v2599_v39  ;;  %v2601_v2 = vpop.f32.mrb[227].mxu1  ;;  %v2917_v12 = vadd.f32 %v14009_v42, %v1961_v7 }
 0x2ab   :  { %16216 = vst [vmem:[#allocation170_spill] sm:$0xff] %v13995_v34  ;;  %16217 = vst [vmem:[#allocation171_spill] sm:$0xff] %v13997_v1  ;;  %v3427_v56 = vmul.f32 0.2, %v2915_v57  ;;  %v3683_v62 = vmul.f32 0.2, %v3171_v63  ;;  %v3173_v61 = vadd.f32 %v14009_v42, %v2601_v2  ;;  %7224 = vmatmul.mubr.bf16.gmra.mrb[76].mxu0 %v16218_v20  ;;  %v3938_v10 = vmax.f32 %v2914_v25, %v3426_v14 }
 0x2ac   :  { %v3428_v35 = vmul.f32 0.2, %v2916_v50  ;;  %v3684_v16 = vmul.f32 0.2, %v3172_v26  ;;  %4889 = vmatmul.mubr.bf16.gmra.mrb[76].mxu1 %v16218_v20  ;;  %v3429_v31 = vmul.f32 0.2, %v2917_v12  ;;  %7233 = vmatprep.mubr.bf16.mxu0 %v16219_v44  ;;  %v4194_v32 = vmax.f32 %v3170_v28, %v3682_v13 }
 0x2ad   :  { %v3685_v46 = vmul.f32 0.2, %v3173_v61  ;;  %4896 = vmatprep.mubr.bf16.mxu1 %v16219_v44  ;;  %v3939_v5 = vmax.f32 %v2915_v57, %v3427_v56  ;;  %v4195_v7 = vmax.f32 %v3171_v63, %v3683_v62  ;;  %v14024_v20 = vld [vmem:[%s15782_s2 + $0x20] sm:$0xff]  ;;  %v14031_v63 = vld [vmem:[%s15782_s2 + $0x28] sm:$0xff] }
 0x2ae   :  { %v3940_v40 = vmax.f32 %v2916_v50, %v3428_v35  ;;  %v4196_v39 = vmax.f32 %v3172_v26, %v3684_v16  ;;  %v3941_v1 = vmax.f32 %v2917_v12, %v3429_v31  ;;  %v1965_v38 = vpop.f32.mrb[228].mxu0 }
 0x2af   :  { %v4197_v2 = vmax.f32 %v3173_v61, %v3685_v46  ;;  %v2605_v8 = vpop.f32.mrb[228].mxu1  ;;  %v2918_v25 = vadd.f32 %v14024_v20, %v1965_v38  ;;  %v1967_v14 = vpop.f32.mrb[229].mxu0 }
 0x2b0   :  { %v14017_v27 = vpack.c.bf16 %v3940_v40, %v3938_v10  ;;  %v14019_v60 = vpack.c.bf16 %v4196_v39, %v4194_v32  ;;  %v3174_v28 = vadd.f32 %v14024_v20, %v2605_v8  ;;  %v2607_v57 = vpop.f32.mrb[229].mxu1  ;;  %v2919_v13 = vadd.f32 %v14031_v63, %v1967_v14  ;;  %v1969_v26 = vpop.f32.mrb[230].mxu0  ;;  %v14042_v8 = vld [vmem:[%s15782_s2 + $0x30] sm:$0xff] }
 0x2b1   :  { %v3175_v50 = vadd.f32 %v14031_v63, %v2607_v57  ;;  %v2609_v56 = vpop.f32.mrb[230].mxu1  ;;  %v14035_v62 = vpack.c.bf16 %v3941_v1, %v3939_v5  ;;  %v14037_v12 = vpack.c.bf16 %v4197_v2, %v4195_v7  ;;  %v3430_v38 = vmul.f32 0.2, %v2918_v25  ;;  %v1971_v31 = vpop.f32.mrb[231].mxu0  ;;  %v14049_v5 = vld [vmem:[%s15782_s2 + $0x38] sm:$0xff]  ;;  %v16224_v7 = vld [vmem:[#allocation68_spill] sm:$0xff] }
 0x2b2   :  { %16220 = vst [vmem:[#allocation64_spill] sm:$0xff] %v14017_v27  ;;  %16221 = vst [vmem:[#allocation70_spill] sm:$0xff] %v14019_v60  ;;  %v3686_v61 = vmul.f32 0.2, %v3174_v28  ;;  %v2920_v35 = vadd.f32 %v14042_v8, %v1969_v26  ;;  %v3176_v16 = vadd.f32 %v14042_v8, %v2609_v56  ;;  %v2611_v46 = vpop.f32.mrb[231].mxu1  ;;  %v2921_v1 = vadd.f32 %v14049_v5, %v1971_v31  ;;  %v16225_v57 = vld [vmem:[#allocation74_spill] sm:$0xff] }
 0x2b3   :  { %16222 = vst [vmem:[#allocation172_spill] sm:$0xff] %v14035_v62  ;;  %16223 = vst [vmem:[#allocation173_spill] sm:$0xff] %v14037_v12  ;;  %v3431_v44 = vmul.f32 0.2, %v2919_v13  ;;  %v3687_v10 = vmul.f32 0.2, %v3175_v50  ;;  %v3177_v32 = vadd.f32 %v14049_v5, %v2611_v46  ;;  %7234 = vmatmul.mubr.bf16.gmra.mrb[80].mxu0 %v16224_v7  ;;  %v3942_v26 = vmax.f32 %v2918_v25, %v3430_v38 }
 0x2b4   :  { %v3432_v40 = vmul.f32 0.2, %v2920_v35  ;;  %v3688_v39 = vmul.f32 0.2, %v3176_v16  ;;  %4897 = vmatmul.mubr.bf16.gmra.mrb[80].mxu1 %v16224_v7  ;;  %v3433_v2 = vmul.f32 0.2, %v2921_v1  ;;  %7241 = vmatprep.mubr.bf16.mxu0 %v16225_v57  ;;  %v4198_v56 = vmax.f32 %v3174_v28, %v3686_v61 }
 0x2b5   :  { %v3689_v14 = vmul.f32 0.2, %v3177_v32  ;;  %4906 = vmatprep.mubr.bf16.mxu1 %v16225_v57  ;;  %v3943_v22 = vmax.f32 %v2919_v13, %v3431_v44  ;;  %v4199_v31 = vmax.f32 %v3175_v50, %v3687_v10  ;;  %v14064_v7 = vld [vmem:[%s15782_s2 + $0x40] sm:$0xff]  ;;  %v14071_v50 = vld [vmem:[%s15782_s2 + $0x48] sm:$0xff] }
 0x2b6   :  { %v3944_v60 = vmax.f32 %v2920_v35, %v3432_v40  ;;  %v4200_v12 = vmax.f32 %v3176_v16, %v3688_v39  ;;  %v3945_v49 = vmax.f32 %v2921_v1, %v3433_v2  ;;  %v1975_v36 = vpop.f32.mrb[232].mxu0 }
 0x2b7   :  { %v4201_v46 = vmax.f32 %v3177_v32, %v3689_v14  ;;  %v2615_v54 = vpop.f32.mrb[232].mxu1  ;;  %v2922_v25 = vadd.f32 %v14064_v7, %v1975_v36  ;;  %v1977_v38 = vpop.f32.mrb[233].mxu0  ;;  %v14081_v36 = vld [vmem:[%s15782_s2 + $0x50] sm:$0xff] }
 0x2b8   :  { %v14057_v27 = vpack.c.bf16 %v3944_v60, %v3942_v26  ;;  %v14059_v62 = vpack.c.bf16 %v4200_v12, %v4198_v56  ;;  %v3178_v28 = vadd.f32 %v14064_v7, %v2615_v54  ;;  %v2617_v13 = vpop.f32.mrb[233].mxu1  ;;  %v2923_v60 = vadd.f32 %v14071_v50, %v1977_v38  ;;  %v1979_v12 = vpop.f32.mrb[234].mxu0  ;;  %v16230_v56 = vld [vmem:[#allocation72_spill] sm:$0xff]  ;;  %v16231_v38 = vld [vmem:[#allocation78_spill] sm:$0xff] }
 0x2b9   :  { %v2619_v61 = vpop.f32.mrb[234].mxu1  ;;  %v14074_v35 = vpack.c.bf16 %v3945_v49, %v3943_v22  ;;  %v14076_v16 = vpack.c.bf16 %v4201_v46, %v4199_v31  ;;  %v3434_v44 = vmul.f32 0.2, %v2922_v25  ;;  %v2924_v54 = vadd.f32 %v14081_v36, %v1979_v12  ;;  %v1981_v32 = vpop.f32.mrb[235].mxu0  ;;  %v14089_v22 = vld [vmem:[%s15782_s2 + $0x58] sm:$0xff] }
 0x2ba   :  { %16226 = vst [vmem:[#allocation68_spill] sm:$0xff] %v14057_v27  ;;  %16227 = vst [vmem:[#allocation74_spill] sm:$0xff] %v14059_v62  ;;  %v3690_v10 = vmul.f32 0.2, %v3178_v28  ;;  %v3180_v1 = vadd.f32 %v14081_v36, %v2619_v61  ;;  %v2621_v40 = vpop.f32.mrb[235].mxu1  ;;  %v3179_v2 = vadd.f32 %v14071_v50, %v2617_v13  ;;  %v2925_v49 = vadd.f32 %v14089_v22, %v1981_v32 }
 0x2bb   :  { %16228 = vst [vmem:[#allocation174_spill] sm:$0xff] %v14074_v35  ;;  %16229 = vst [vmem:[#allocation175_spill] sm:$0xff] %v14076_v16  ;;  %v3435_v39 = vmul.f32 0.2, %v2923_v60  ;;  %v3181_v14 = vadd.f32 %v14089_v22, %v2621_v40  ;;  %v3436_v57 = vmul.f32 0.2, %v2924_v54  ;;  %7242 = vmatmul.mubr.bf16.gmra.mrb[84].mxu0 %v16230_v56  ;;  %v3946_v13 = vmax.f32 %v2922_v25, %v3434_v44 }
 0x2bc   :  { %v3692_v26 = vmul.f32 0.2, %v3180_v1  ;;  %4907 = vmatmul.mubr.bf16.gmra.mrb[84].mxu1 %v16230_v56  ;;  %v3437_v31 = vmul.f32 0.2, %v2925_v49  ;;  %7251 = vmatprep.mubr.bf16.mxu0 %v16231_v38  ;;  %v4202_v12 = vmax.f32 %v3178_v28, %v3690_v10  ;;  %v3691_v32 = vmul.f32 0.2, %v3179_v2 }
 0x2bd   :  { %v3693_v46 = vmul.f32 0.2, %v3181_v14  ;;  %4916 = vmatprep.mubr.bf16.mxu1 %v16231_v38  ;;  %v3948_v61 = vmax.f32 %v2924_v54, %v3436_v57  ;;  %v3947_v16 = vmax.f32 %v2923_v60, %v3435_v39  ;;  %v14104_v56 = vld [vmem:[%s15782_s2 + $0x60] sm:$0xff]  ;;  %v14111_v10 = vld [vmem:[%s15782_s2 + $0x68] sm:$0xff] }
 0x2be   :  { %v4204_v62 = vmax.f32 %v3180_v1, %v3692_v26  ;;  %v3949_v27 = vmax.f32 %v2925_v49, %v3437_v31  ;;  %v1985_v40 = vpop.f32.mrb[236].mxu0 }
 0x2bf   :  { %v2625_v35 = vpop.f32.mrb[236].mxu1  ;;  %v14097_v17 = vpack.c.bf16 %v3948_v61, %v3946_v13  ;;  %v2926_v38 = vadd.f32 %v14104_v56, %v1985_v40  ;;  %v1987_v28 = vpop.f32.mrb[237].mxu0  ;;  %v4205_v60 = vmax.f32 %v3181_v14, %v3693_v46 }
 0x2c0   :  { %v14099_v34 = vpack.c.bf16 %v4204_v62, %v4202_v12  ;;  %v3182_v25 = vadd.f32 %v14104_v56, %v2625_v35  ;;  %v2627_v44 = vpop.f32.mrb[237].mxu1  ;;  %v2927_v62 = vadd.f32 %v14111_v10, %v1987_v28  ;;  %v1989_v1 = vpop.f32.mrb[238].mxu0  ;;  %v14115_v49 = vpack.c.bf16 %v3949_v27, %v3947_v16  ;;  %v14120_v35 = vld [vmem:[%s15782_s2 + $0x70] sm:$0xff]  ;;  %v14127_v27 = vld [vmem:[%s15782_s2 + $0x78] sm:$0xff] }
 0x2c1   :  { %16232 = vst [vmem:[#allocation72_spill] sm:$0xff] %v14097_v17  ;;  %v3183_v54 = vadd.f32 %v14111_v10, %v2627_v44  ;;  %v2629_v39 = vpop.f32.mrb[238].mxu1  ;;  %v3438_v57 = vmul.f32 0.2, %v2926_v38  ;;  %v2928_v14 = vadd.f32 %v14120_v35, %v1989_v1  ;;  %v1991_v46 = vpop.f32.mrb[239].mxu0  ;;  %v4203_v28 = vmax.f32 %v3179_v2, %v3691_v32  ;;  %v16235_v17 = vld [vmem:[#allocation76_spill] sm:$0xff] }
 0x2c2   :  { %16233 = vst [vmem:[#allocation78_spill] sm:$0xff] %v14099_v34  ;;  %16234 = vst [vmem:[#allocation176_spill] sm:$0xff] %v14115_v49  ;;  %v3694_v26 = vmul.f32 0.2, %v3182_v25  ;;  %v3184_v31 = vadd.f32 %v14120_v35, %v2629_v39  ;;  %v2631_v13 = vpop.f32.mrb[239].mxu1  ;;  %v2929_v16 = vadd.f32 %v14127_v27, %v1991_v46 }
 0x2c3   :  { %v3439_v12 = vmul.f32 0.2, %v2927_v62  ;;  %v3695_v61 = vmul.f32 0.2, %v3183_v54  ;;  %v3185_v40 = vadd.f32 %v14127_v27, %v2631_v13  ;;  %v3440_v44 = vmul.f32 0.2, %v2928_v14  ;;  %7252 = vmatmul.mubr.bf16.gmra.mrb[88].mxu0 %v16235_v17 }
 0x2c4   :  { %v3696_v34 = vmul.f32 0.2, %v3184_v31  ;;  %4917 = vmatmul.mubr.bf16.gmra.mrb[88].mxu1 %v16235_v17  ;;  %v3950_v1 = vmax.f32 %v2926_v38, %v3438_v57  ;;  %v3441_v39 = vmul.f32 0.2, %v2929_v16  ;;  %7261 = vmatprep.mubr.bf16.mxu0 %v16236_v33  ;;  %v4206_v30 = vmax.f32 %v3182_v25, %v3694_v26 }
 0x2c5   :  { %v3697_v49 = vmul.f32 0.2, %v3185_v40  ;;  %4926 = vmatprep.mubr.bf16.mxu1 %v16236_v33  ;;  %v3952_v41 = vmax.f32 %v2928_v14, %v3440_v44  ;;  %v14135_v46 = vpack.c.bf16 %v4205_v60, %v4203_v28  ;;  %v3951_v13 = vmax.f32 %v2927_v62, %v3439_v12  ;;  %v16239_v44 = vld [vmem:[#allocation86_spill] sm:$0xff] }
 0x2c6   :  { %v4208_v58 = vmax.f32 %v3184_v31, %v3696_v34  ;;  %v4207_v2 = vmax.f32 %v3183_v54, %v3695_v61  ;;  %v3953_v32 = vmax.f32 %v2929_v16, %v3441_v39  ;;  %v1995_v29 = vpop.f32.mrb[240].mxu0 }
 0x2c7   :  { %v4209_v24 = vmax.f32 %v3185_v40, %v3697_v49  ;;  %v2635_v18 = vpop.f32.mrb[240].mxu1  ;;  %v14137_v19 = vpack.c.bf16 %v3952_v41, %v3950_v1  ;;  %v2930_v38 = vadd.f32 %v13984_v48, %v1995_v29  ;;  %v1997_v33 = vpop.f32.mrb[241].mxu0  ;;  %v16238_v40 = vld [vmem:[#allocation80_spill] sm:$0xff] }
 0x2c8   :  { %v14139_v17 = vpack.c.bf16 %v4208_v58, %v4206_v30  ;;  %v3186_v57 = vadd.f32 %v13984_v48, %v2635_v18  ;;  %v2637_v25 = vpop.f32.mrb[241].mxu1  ;;  %v2931_v34 = vadd.f32 %v13991_v3, %v1997_v33  ;;  %v1999_v62 = vpop.f32.mrb[242].mxu0  ;;  %v14145_v26 = vpack.c.bf16 %v3953_v32, %v3951_v13 }
 0x2c9   :  { %v3187_v60 = vadd.f32 %v13991_v3, %v2637_v25  ;;  %v2639_v54 = vpop.f32.mrb[242].mxu1  ;;  %v14147_v49 = vpack.c.bf16 %v4209_v24, %v4207_v2  ;;  %v3442_v41 = vmul.f32 0.2, %v2930_v38  ;;  %v2932_v58 = vadd.f32 %v14002_v15, %v1999_v62  ;;  %v2001_v30 = vpop.f32.mrb[243].mxu0 }
 0x2ca   :  { %16237 = vst [vmem:[#allocation76_spill] sm:$0xff] %v14139_v17  ;;  %v3698_v14 = vmul.f32 0.2, %v3186_v57  ;;  %v3188_v29 = vadd.f32 %v14002_v15, %v2639_v54  ;;  %v2641_v18 = vpop.f32.mrb[243].mxu1  ;;  %v3443_v48 = vmul.f32 0.2, %v2931_v34  ;;  %v2933_v12 = vadd.f32 %v14009_v42, %v2001_v30 }
 0x2cb   :  { %v3699_v31 = vmul.f32 0.2, %v3187_v60  ;;  %v3189_v3 = vadd.f32 %v14009_v42, %v2641_v18  ;;  %v3444_v61 = vmul.f32 0.2, %v2932_v58  ;;  %7262 = vmatmul.mubr.bf16.gmra.mrb[92].mxu0 %v16238_v40  ;;  %v3954_v15 = vmax.f32 %v2930_v38, %v3442_v41 }
 0x2cc   :  { %v3700_v16 = vmul.f32 0.2, %v3188_v29  ;;  %4927 = vmatmul.mubr.bf16.gmra.mrb[92].mxu1 %v16238_v40  ;;  %v3445_v24 = vmul.f32 0.2, %v2933_v12  ;;  %7271 = vmatprep.mubr.bf16.mxu0 %v16239_v44  ;;  %v4210_v1 = vmax.f32 %v3186_v57, %v3698_v14  ;;  %v3955_v2 = vmax.f32 %v2931_v34, %v3443_v48 }
 0x2cd   :  { %v3701_v28 = vmul.f32 0.2, %v3189_v3  ;;  %4934 = vmatprep.mubr.bf16.mxu1 %v16239_v44  ;;  %v3956_v39 = vmax.f32 %v2932_v58, %v3444_v61  ;;  %v4211_v32 = vmax.f32 %v3187_v60, %v3699_v31 }
 0x2ce   :  { %v4212_v13 = vmax.f32 %v3188_v29, %v3700_v16  ;;  %v3957_v33 = vmax.f32 %v2933_v12, %v3445_v24  ;;  %v2005_v25 = vpop.f32.mrb[244].mxu0 }
 0x2cf   :  { %v4213_v42 = vmax.f32 %v3189_v3, %v3701_v28  ;;  %v2645_v62 = vpop.f32.mrb[244].mxu1  ;;  %v14157_v54 = vpack.c.bf16 %v3956_v39, %v3954_v15  ;;  %v2934_v18 = vadd.f32 %v14024_v20, %v2005_v25  ;;  %v2007_v17 = vpop.f32.mrb[245].mxu0  ;;  %v16240_v28 = vld [vmem:[#allocation84_spill] sm:$0xff]  ;;  %v16241_v39 = vld [vmem:[#allocation90_spill] sm:$0xff] }
 0x2d0   :  { %v14159_v30 = vpack.c.bf16 %v4212_v13, %v4210_v1  ;;  %v3190_v40 = vadd.f32 %v14024_v20, %v2645_v62  ;;  %v2647_v44 = vpop.f32.mrb[245].mxu1  ;;  %v2935_v38 = vadd.f32 %v14031_v63, %v2007_v17  ;;  %v2009_v34 = vpop.f32.mrb[246].mxu0  ;;  %v14165_v41 = vpack.c.bf16 %v3957_v33, %v3955_v2 }
 0x2d1   :  { %v3191_v57 = vadd.f32 %v14031_v63, %v2647_v44  ;;  %v2649_v60 = vpop.f32.mrb[246].mxu1  ;;  %v14167_v14 = vpack.c.bf16 %v4213_v42, %v4211_v32  ;;  %v3446_v58 = vmul.f32 0.2, %v2934_v18  ;;  %v2936_v48 = vadd.f32 %v14042_v8, %v2009_v34  ;;  %v2011_v12 = vpop.f32.mrb[247].mxu0 }
 0x2d2   :  { %v3702_v29 = vmul.f32 0.2, %v3190_v40  ;;  %v3192_v31 = vadd.f32 %v14042_v8, %v2649_v60  ;;  %v2651_v20 = vpop.f32.mrb[247].mxu1  ;;  %v3447_v3 = vmul.f32 0.2, %v2935_v38  ;;  %v2937_v17 = vadd.f32 %v14049_v5, %v2011_v12 }
 0x2d3   :  { %v3703_v61 = vmul.f32 0.2, %v3191_v57  ;;  %v3193_v63 = vadd.f32 %v14049_v5, %v2651_v20  ;;  %v3448_v16 = vmul.f32 0.2, %v2936_v48  ;;  %7272 = vmatmul.mubr.bf16.gmra.mrb[96].mxu0 %v16240_v28  ;;  %v3958_v8 = vmax.f32 %v2934_v18, %v3446_v58 }
 0x2d4   :  { %v3704_v24 = vmul.f32 0.2, %v3192_v31  ;;  %4935 = vmatmul.mubr.bf16.gmra.mrb[96].mxu1 %v16240_v28  ;;  %v3449_v15 = vmul.f32 0.2, %v2937_v17  ;;  %7279 = vmatprep.mubr.bf16.mxu0 %v16241_v39  ;;  %v4214_v13 = vmax.f32 %v3190_v40, %v3702_v29  ;;  %v3959_v33 = vmax.f32 %v2935_v38, %v3447_v3 }
 0x2d5   :  { %v3705_v1 = vmul.f32 0.2, %v3193_v63  ;;  %4944 = vmatprep.mubr.bf16.mxu1 %v16241_v39  ;;  %v3960_v2 = vmax.f32 %v2936_v48, %v3448_v16  ;;  %v4215_v42 = vmax.f32 %v3191_v57, %v3703_v61 }
 0x2d6   :  { %v4216_v32 = vmax.f32 %v3192_v31, %v3704_v24  ;;  %v3961_v25 = vmax.f32 %v2937_v17, %v3449_v15  ;;  %v2015_v62 = vpop.f32.mrb[248].mxu0 }
 0x2d7   :  { %v4217_v5 = vmax.f32 %v3193_v63, %v3705_v1  ;;  %v2655_v44 = vpop.f32.mrb[248].mxu1  ;;  %v14177_v34 = vpack.c.bf16 %v3960_v2, %v3958_v8  ;;  %v2938_v12 = vadd.f32 %v14064_v7, %v2015_v62  ;;  %v2017_v28 = vpop.f32.mrb[249].mxu0  ;;  %v16244_v8 = vld [vmem:[#allocation88_spill] sm:$0xff] }
 0x2d8   :  { %v14179_v60 = vpack.c.bf16 %v4216_v32, %v4214_v13  ;;  %v3194_v20 = vadd.f32 %v14064_v7, %v2655_v44  ;;  %v2657_v39 = vpop.f32.mrb[249].mxu1  ;;  %v2939_v18 = vadd.f32 %v14071_v50, %v2017_v28  ;;  %v2019_v40 = vpop.f32.mrb[250].mxu0  ;;  %v14184_v38 = vpack.c.bf16 %v3961_v25, %v3959_v33  ;;  %v16245_v32 = vld [vmem:[#allocation94_spill] sm:$0xff] }
 0x2d9   :  { %v2659_v58 = vpop.f32.mrb[250].mxu1  ;;  %v14186_v57 = vpack.c.bf16 %v4217_v5, %v4215_v42  ;;  %v3450_v29 = vmul.f32 0.2, %v2938_v12  ;;  %v2940_v31 = vadd.f32 %v14081_v36, %v2019_v40  ;;  %v2021_v61 = vpop.f32.mrb[251].mxu0  ;;  %v3195_v7 = vadd.f32 %v14071_v50, %v2657_v39 }
 0x2da   :  { %16242 = vst [vmem:[#allocation82_spill] sm:$0xff] %v14179_v60  ;;  %v3706_v48 = vmul.f32 0.2, %v3194_v20  ;;  %v3196_v3 = vadd.f32 %v14081_v36, %v2659_v58  ;;  %v2661_v17 = vpop.f32.mrb[251].mxu1  ;;  %v3451_v63 = vmul.f32 0.2, %v2939_v18  ;;  %v2941_v16 = vadd.f32 %v14089_v22, %v2021_v61 }
 0x2db   :  { %16243 = vst [vmem:[#allocation80_spill] sm:$0xff] %v14186_v57  ;;  %v3197_v24 = vadd.f32 %v14089_v22, %v2661_v17  ;;  %v3452_v15 = vmul.f32 0.2, %v2940_v31  ;;  %7280 = vmatmul.mubr.bf16.gmra.mrb[100].mxu0 %v16244_v8  ;;  %v3962_v36 = vmax.f32 %v2938_v12, %v3450_v29  ;;  %v3707_v5 = vmul.f32 0.2, %v3195_v7 }
 0x2dc   :  { %v3708_v1 = vmul.f32 0.2, %v3196_v3  ;;  %4945 = vmatmul.mubr.bf16.gmra.mrb[100].mxu1 %v16244_v8  ;;  %v3453_v13 = vmul.f32 0.2, %v2941_v16  ;;  %7289 = vmatprep.mubr.bf16.mxu0 %v16245_v32  ;;  %v4218_v33 = vmax.f32 %v3194_v20, %v3706_v48  ;;  %v3963_v25 = vmax.f32 %v2939_v18, %v3451_v63 }
 0x2dd   :  { %v3709_v2 = vmul.f32 0.2, %v3197_v24  ;;  %4954 = vmatprep.mubr.bf16.mxu1 %v16245_v32  ;;  %v3964_v42 = vmax.f32 %v2940_v31, %v3452_v15  ;;  %v4219_v32 = vmax.f32 %v3195_v7, %v3707_v5 }
 0x2de   :  { %v4220_v50 = vmax.f32 %v3196_v3, %v3708_v1  ;;  %v3965_v62 = vmax.f32 %v2941_v16, %v3453_v13  ;;  %v2025_v22 = vpop.f32.mrb[252].mxu0 }
 0x2df   :  { %v2665_v44 = vpop.f32.mrb[252].mxu1  ;;  %v14197_v28 = vpack.c.bf16 %v3964_v42, %v3962_v36  ;;  %v2942_v40 = vadd.f32 %v14104_v56, %v2025_v22  ;;  %v2027_v61 = vpop.f32.mrb[253].mxu0  ;;  %v4221_v8 = vmax.f32 %v3197_v24, %v3709_v2 }
 0x2e0   :  { %v14199_v39 = vpack.c.bf16 %v4220_v50, %v4218_v33  ;;  %v3198_v58 = vadd.f32 %v14104_v56, %v2665_v44  ;;  %v2667_v17 = vpop.f32.mrb[253].mxu1  ;;  %v2943_v12 = vadd.f32 %v14111_v10, %v2027_v61  ;;  %v2029_v18 = vpop.f32.mrb[254].mxu0  ;;  %v14205_v48 = vpack.c.bf16 %v3965_v62, %v3963_v25  ;;  %v16247_v33 = vld [vmem:[#allocation92_spill] sm:$0xff]  ;;  %v16248_v62 = vld [vmem:[#allocation98_spill] sm:$0xff] }
 0x2e1   :  { %v3199_v20 = vadd.f32 %v14111_v10, %v2667_v17  ;;  %v2669_v29 = vpop.f32.mrb[254].mxu1  ;;  %v3454_v31 = vmul.f32 0.2, %v2942_v40  ;;  %v2944_v63 = vadd.f32 %v14120_v35, %v2029_v18  ;;  %v2031_v15 = vpop.f32.mrb[255].mxu0  ;;  %v14215_v61 = vpack.c.bf16 %v4221_v8, %v4219_v32  ;;  %v14232_v32 = vld [vmem:[%s15783_s5] ss:$0 sm:$0xff] }
 0x2e2   :  { %16246 = vst [vmem:[#allocation86_spill] sm:$0xff] %v14199_v39  ;;  %v3710_v3 = vmul.f32 0.2, %v3198_v58  ;;  %v3200_v16 = vadd.f32 %v14120_v35, %v2669_v29  ;;  %v2671_v1 = vpop.f32.mrb[255].mxu1  ;;  %v3455_v56 = vmul.f32 0.2, %v2943_v12  ;;  %v2945_v24 = vadd.f32 %v14127_v27, %v2031_v15 }
 0x2e3   :  { %v3711_v13 = vmul.f32 0.2, %v3199_v20  ;;  %v3201_v2 = vadd.f32 %v14127_v27, %v2671_v1  ;;  %v3456_v10 = vmul.f32 0.2, %v2944_v63  ;;  %7290 = vmatmul.mubr.bf16.gmra.mrb[104].mxu0 %v16247_v33  ;;  %v3966_v42 = vmax.f32 %v2942_v40, %v3454_v31  ;;  %16249 = vst [vmem:[#allocation84_spill] sm:$0xff] %v14215_v61 }
 0x2e4   :  { %v3712_v36 = vmul.f32 0.2, %v3200_v16  ;;  %4955 = vmatmul.mubr.bf16.gmra.mrb[104].mxu1 %v16247_v33  ;;  %v3457_v50 = vmul.f32 0.2, %v2945_v24  ;;  %7299 = vmatprep.mubr.bf16.mxu0 %v16248_v62  ;;  %v4222_v35 = vmax.f32 %v3198_v58, %v3710_v3  ;;  %v3967_v27 = vmax.f32 %v2943_v12, %v3455_v56 }
 0x2e5   :  { %v3713_v25 = vmul.f32 0.2, %v3201_v2  ;;  %4964 = vmatprep.mubr.bf16.mxu1 %v16248_v62  ;;  %v3968_v22 = vmax.f32 %v2944_v63, %v3456_v10  ;;  %v4223_v7 = vmax.f32 %v3199_v20, %v3711_v13 }
 0x2e6   :  { %v4224_v44 = vmax.f32 %v3200_v16, %v3712_v36  ;;  %v3969_v5 = vmax.f32 %v2945_v24, %v3457_v50  ;;  %v7045_v29 = vpop.f32.mrb[0].mxu0  ;;  %v16252_v16 = vld [vmem:[#allocation96_spill] sm:$0xff]  ;;  %v16253_v24 = vld [vmem:[#allocation102_spill] sm:$0xff] }
 0x2e7   :  { %v4225_v17 = vmax.f32 %v3201_v2, %v3713_v25  ;;  %v4708_v18 = vpop.f32.mrb[0].mxu1  ;;  %v14217_v15 = vpack.c.bf16 %v3968_v22, %v3966_v42  ;;  %v7046_v1 = vpop.f32.mrb[1].mxu0 }
 0x2e8   :  { %v14219_v40 = vpack.c.bf16 %v4224_v44, %v4222_v35  ;;  %v4710_v31 = vpop.f32.mrb[1].mxu1  ;;  %v7047_v62 = vpop.f32.mrb[2].mxu0  ;;  %v14221_v58 = vpack.c.bf16 %v3969_v5, %v3967_v27 }
 0x2e9   :  { %v6147_v33 = vrot.slane %v4710_v31, 1  ;;  %v4712_v39 = vpop.f32.mrb[2].mxu1  ;;  %v14223_v3 = vpack.c.bf16 %v4225_v17, %v4223_v7  ;;  %v7049_v12 = vpop.f32.mrb[3].mxu0 }
 0x2ea   :  { %16250 = vst [vmem:[#allocation90_spill] sm:$0xff] %v14219_v40  ;;  %v4714_v8 = vpop.f32.mrb[3].mxu1  ;;  %v8708_v13 = vrot.slane %v7049_v12, 1 }
 0x2eb   :  { %16251 = vst [vmem:[#allocation88_spill] sm:$0xff] %v14223_v3  ;;  %v6595_v20 = vadd.f32 %v6147_v33, %v4708_v18  ;;  %v6148_v63 = vrot.slane %v4714_v8, 1  ;;  %7300 = vmatmul.mubr.bf16.gmra.mrb[108].mxu0 %v16252_v16  ;;  %v16254_v33 = vld [vmem:[#allocation100_spill] sm:$0xff]  ;;  %v14240_v8 = vld [vmem:[%s15784_s6] sm:$0x7f] }
 0x2ec   :  { %4965 = vmatmul.mubr.bf16.gmra.mrb[108].mxu1 %v16252_v16  ;;  %7309 = vmatprep.mubr.bf16.mxu0 %v16253_v24  ;;  %v16255_v16 = vld [vmem:[#allocation106_spill] sm:$0xff] }
 0x2ed   :  { %v8260_v56 = vadd.f32 %v7047_v62, %v6595_v20  ;;  %4972 = vmatprep.mubr.bf16.mxu1 %v16253_v24  ;;  %v6596_v2 = vadd.f32 %v6148_v63, %v4712_v39 }
 0x2ee   :  { %v7053_v42 = vpop.f32.mrb[4].mxu0 }
 0x2ef   :  { %v9156_v10 = vadd.f32 %v8708_v13, %v8260_v56  ;;  %v4718_v36 = vpop.f32.mrb[4].mxu1  ;;  %v8261_v50 = vadd.f32 %v7053_v42, %v6596_v2  ;;  %v7055_v35 = vpop.f32.mrb[5].mxu0  ;;  %v14249_v42 = vld [vmem:[%s15784_s6 + $0x8] sm:$0x7f] }
 0x2f0   :  { %v4720_v25 = vpop.f32.mrb[5].mxu1  ;;  %v8709_v27 = vrot.slane %v7055_v35, 1  ;;  %v7057_v5 = vpop.f32.mrb[6].mxu0 }
 0x2f1   :  { %v9387_v22 = vadd.f32 %v14232_v32, %v9156_v10  ;;  %v6149_v44 = vrot.slane %v4720_v25, 1  ;;  %v4722_v7 = vpop.f32.mrb[6].mxu1  ;;  %v7059_v18 = vpop.f32.mrb[7].mxu0 }
 0x2f2   :  { %v4724_v17 = vpop.f32.mrb[7].mxu1  ;;  %v9157_v29 = vadd.f32 %v8709_v27, %v8261_v50  ;;  %v8710_v63 = vrot.slane %v7059_v18, 1 }
 0x2f3   :  { %v9611_v39 = vmul.f32 0.2, %v9387_v22  ;;  %v6597_v31 = vadd.f32 %v6149_v44, %v4718_v36  ;;  %v6150_v1 = vrot.slane %v4724_v17, 1  ;;  %7310 = vmatmul.mubr.bf16.gmra.mrb[112].mxu0 %v16254_v33 }
 0x2f4   :  { %4973 = vmatmul.mubr.bf16.gmra.mrb[112].mxu1 %v16254_v33  ;;  %v9388_v12 = vadd.f32 %v14232_v32, %v9157_v29  ;;  %7317 = vmatprep.mubr.bf16.mxu0 %v16255_v16 }
 0x2f5   :  { %v9835_v62 = vmax.f32 %v9387_v22, %v9611_v39  ;;  %v8262_v20 = vadd.f32 %v7057_v5, %v6597_v31  ;;  %4982 = vmatprep.mubr.bf16.mxu1 %v16255_v16  ;;  %v6598_v56 = vadd.f32 %v6150_v1, %v4722_v7  ;;  %v16256_v16 = vld [vmem:[#allocation104_spill] sm:$0xff] }
 0x2f6   :  { %v9612_v13 = vmul.f32 0.2, %v9388_v12  ;;  %v7063_v10 = vpop.f32.mrb[8].mxu0 }
 0x2f7   :  { %v9158_v24 = vadd.f32 %v8710_v63, %v8262_v20  ;;  %v4728_v2 = vpop.f32.mrb[8].mxu1  ;;  %v10066_v36 = vmul.f32 %v14240_v8, %v9835_v62  ;;  %v8263_v50 = vadd.f32 %v7063_v10, %v6598_v56  ;;  %v7065_v35 = vpop.f32.mrb[9].mxu0  ;;  %v14257_v20 = vld [vmem:[%s15784_s6 + $0x10] sm:$0x7f]  ;;  %v16257_v10 = vld [vmem:[#allocation110_spill] sm:$0xff] }
 0x2f8   :  { %v4730_v25 = vpop.f32.mrb[9].mxu1  ;;  %v9836_v22 = vmax.f32 %v9388_v12, %v9612_v13  ;;  %v7067_v5 = vpop.f32.mrb[10].mxu0  ;;  %v8711_v17 = vrot.slane %v7065_v35, 1 }
 0x2f9   :  { %v9389_v44 = vadd.f32 %v14232_v32, %v9158_v24  ;;  %v6151_v27 = vrot.slane %v4730_v25, 1  ;;  %v4732_v7 = vpop.f32.mrb[10].mxu1  ;;  %v7069_v39 = vpop.f32.mrb[11].mxu0  ;;  %v10291_v62 = vsel %vm10290_vm1, %v10066_v36, 0.0 }
 0x2fa   :  { %v4734_v18 = vpop.f32.mrb[11].mxu1  ;;  %v10067_v29 = vmul.f32 %v14249_v42, %v9836_v22  ;;  %v9159_v12 = vadd.f32 %v8711_v17, %v8263_v50  ;;  %v8712_v63 = vrot.slane %v7069_v39, 1 }
 0x2fb   :  { %v9613_v31 = vmul.f32 0.2, %v9389_v44  ;;  %v6599_v1 = vadd.f32 %v6151_v27, %v4728_v2  ;;  %v6152_v33 = vrot.slane %v4734_v18, 1  ;;  %7318 = vmatmul.mubr.bf16.gmra.mrb[116].mxu0 %v16256_v16  ;;  %v14269_v18 = vld [vmem:[%s15784_s6 + $0x18] sm:$0x7f] }
 0x2fc   :  { %4983 = vmatmul.mubr.bf16.gmra.mrb[116].mxu1 %v16256_v16  ;;  %v10292_v56 = vsel %vm10290_vm1, %v10067_v29, 0.0  ;;  %7327 = vmatprep.mubr.bf16.mxu0 %v16257_v10  ;;  %v9390_v25 = vadd.f32 %v14232_v32, %v9159_v12 }
 0x2fd   :  { %v9837_v13 = vmax.f32 %v9389_v44, %v9613_v31  ;;  %v8264_v24 = vadd.f32 %v7067_v5, %v6599_v1  ;;  %4992 = vmatprep.mubr.bf16.mxu1 %v16257_v10  ;;  %v6600_v2 = vadd.f32 %v6152_v33, %v4732_v7  ;;  %v10293_v36 = vadd.f32 %v10292_v56, %v10291_v62 }
 0x2fe   :  { %v7073_v27 = vpop.f32.mrb[12].mxu0  ;;  %v9614_v17 = vmul.f32 0.2, %v9390_v25 }
 0x2ff   :  { %v10068_v35 = vmul.f32 %v14257_v20, %v9837_v13  ;;  %v9160_v50 = vadd.f32 %v8712_v63, %v8264_v24  ;;  %v4738_v22 = vpop.f32.mrb[12].mxu1  ;;  %v8265_v44 = vadd.f32 %v7073_v27, %v6600_v2  ;;  %v7075_v39 = vpop.f32.mrb[13].mxu0  ;;  %v14277_v2 = vld [vmem:[%s15784_s6 + $0x20] sm:$0x7f] }
 0x300   :  { %v4740_v5 = vpop.f32.mrb[13].mxu1  ;;  %v8713_v1 = vrot.slane %v7075_v39, 1  ;;  %v7077_v62 = vpop.f32.mrb[14].mxu0  ;;  %v9838_v63 = vmax.f32 %v9390_v25, %v9614_v17  ;;  %v16259_v17 = vld [vmem:[#allocation114_spill] sm:$0xff] }
 0x301   :  { %v10294_v29 = vsel %vm10290_vm1, %v10068_v35, 0.0  ;;  %v9391_v7 = vadd.f32 %v14232_v32, %v9160_v50  ;;  %v6153_v31 = vrot.slane %v4740_v5, 1  ;;  %v4742_v33 = vpop.f32.mrb[14].mxu1  ;;  %v7079_v56 = vpop.f32.mrb[15].mxu0  ;;  %v16258_v35 = vld [vmem:[#allocation108_spill] sm:$0xff] }
 0x302   :  { %v10295_v12 = vadd.f32 %v10294_v29, %v10293_v36  ;;  %v4743_v16 = vpop.f32.mrb[15].mxu1  ;;  %v9161_v24 = vadd.f32 %v8713_v1, %v8265_v44  ;;  %v10069_v40 = vmul.f32 %v14269_v18, %v9838_v63  ;;  %v8714_v27 = vrot.slane %v7079_v56, 1 }
 0x303   :  { %v9615_v13 = vmul.f32 0.2, %v9391_v7  ;;  %v6601_v10 = vadd.f32 %v6153_v31, %v4738_v22  ;;  %7328 = vmatmul.mubr.bf16.gmra.mrb[120].mxu0 %v16258_v35 }
 0x304   :  { %4993 = vmatmul.mubr.bf16.gmra.mrb[120].mxu1 %v16258_v35  ;;  %v9392_v36 = vadd.f32 %v14232_v32, %v9161_v24  ;;  %7337 = vmatprep.mubr.bf16.mxu0 %v16259_v17  ;;  %v10296_v22 = vsel %vm10290_vm1, %v10069_v40, 0.0 }
 0x305   :  { %v9839_v50 = vmax.f32 %v9391_v7, %v9615_v13  ;;  %v8266_v25 = vadd.f32 %v7077_v62, %v6601_v10  ;;  %5002 = vmatprep.mubr.bf16.mxu1 %v16259_v17  ;;  %v10297_v44 = vadd.f32 %v10296_v22, %v10295_v12  ;;  %v14289_v7 = vld [vmem:[%s15784_s6 + $0x28] sm:$0x7f]  ;;  %v14297_v22 = vld [vmem:[%s15784_s6 + $0x30] sm:$0x7f] }
 0x306   :  { %v9616_v39 = vmul.f32 0.2, %v9392_v36  ;;  %v7083_v1 = vpop.f32.mrb[16].mxu0 }
 0x307   :  { %v10070_v5 = vmul.f32 %v14277_v2, %v9839_v50  ;;  %v9162_v29 = vadd.f32 %v8714_v27, %v8266_v25  ;;  %v4746_v31 = vpop.f32.mrb[16].mxu1  ;;  %v7084_v62 = vpop.f32.mrb[17].mxu0  ;;  %v16261_v1 = vld [vmem:[#allocation118_spill] sm:$0xff] }
 0x308   :  { %v4748_v33 = vpop.f32.mrb[17].mxu1  ;;  %v9840_v16 = vmax.f32 %v9392_v36, %v9616_v39  ;;  %v7085_v13 = vpop.f32.mrb[18].mxu0  ;;  %v16260_v36 = vld [vmem:[#allocation112_spill] sm:$0xff] }
 0x309   :  { %v10298_v63 = vsel %vm10290_vm1, %v10070_v5, 0.0  ;;  %v9393_v56 = vadd.f32 %v14232_v32, %v9162_v29  ;;  %v6154_v40 = vrot.slane %v4748_v33, 1  ;;  %v4750_v12 = vpop.f32.mrb[18].mxu1  ;;  %v7087_v35 = vpop.f32.mrb[19].mxu0 }
 0x30a   :  { %v10299_v24 = vadd.f32 %v10298_v63, %v10297_v44  ;;  %v4752_v10 = vpop.f32.mrb[19].mxu1  ;;  %v10071_v50 = vmul.f32 %v14289_v7, %v9840_v16  ;;  %v8715_v5 = vrot.slane %v7087_v35, 1 }
 0x30b   :  { %v9617_v25 = vmul.f32 0.2, %v9393_v56  ;;  %v6602_v27 = vadd.f32 %v6154_v40, %v4746_v31  ;;  %v6155_v17 = vrot.slane %v4752_v10, 1  ;;  %7338 = vmatmul.mubr.bf16.gmra.mrb[124].mxu0 %v16260_v36 }
 0x30c   :  { %5003 = vmatmul.mubr.bf16.gmra.mrb[124].mxu1 %v16260_v36  ;;  %v10300_v39 = vsel %vm10290_vm1, %v10071_v50, 0.0  ;;  %7347 = vmatprep.mubr.bf16.mxu0 %v16261_v1 }
 0x30d   :  { %v9841_v44 = vmax.f32 %v9393_v56, %v9617_v25  ;;  %v8267_v29 = vadd.f32 %v7085_v13, %v6602_v27  ;;  %5010 = vmatprep.mubr.bf16.mxu1 %v16261_v1  ;;  %v6603_v31 = vadd.f32 %v6155_v17, %v4750_v12  ;;  %v10301_v33 = vadd.f32 %v10300_v39, %v10299_v24 }
 0x30e   :  { %v7091_v40 = vpop.f32.mrb[20].mxu0 }
 0x30f   :  { %v10072_v62 = vmul.f32 %v14297_v22, %v9841_v44  ;;  %v9163_v63 = vadd.f32 %v8715_v5, %v8267_v29  ;;  %v4756_v16 = vpop.f32.mrb[20].mxu1  ;;  %v8268_v10 = vadd.f32 %v7091_v40, %v6603_v31  ;;  %v7093_v3 = vpop.f32.mrb[21].mxu0  ;;  %v16262_v29 = vld [vmem:[#allocation116_spill] sm:$0xff] }
 0x310   :  { %v4758_v35 = vpop.f32.mrb[21].mxu1  ;;  %v8716_v13 = vrot.slane %v7093_v3, 1  ;;  %v7095_v27 = vpop.f32.mrb[22].mxu0  ;;  %v16263_v3 = vld [vmem:[#allocation122_spill] sm:$0xff] }
 0x311   :  { %v10302_v36 = vsel %vm10290_vm1, %v10072_v62, 0.0  ;;  %v9394_v50 = vadd.f32 %v14232_v32, %v9163_v63  ;;  %v6156_v56 = vrot.slane %v4758_v35, 1  ;;  %v4760_v25 = vpop.f32.mrb[22].mxu1  ;;  %v7097_v24 = vpop.f32.mrb[23].mxu0 }
 0x312   :  { %v14307_v61 = vadd.f32 %v10302_v36, %v10301_v33  ;;  %v4762_v12 = vpop.f32.mrb[23].mxu1  ;;  %v9164_v39 = vadd.f32 %v8716_v13, %v8268_v10  ;;  %v8717_v63 = vrot.slane %v7097_v24, 1 }
 0x313   :  { %v9618_v17 = vmul.f32 0.2, %v9394_v50  ;;  %v6604_v5 = vadd.f32 %v6156_v56, %v4756_v16  ;;  %v6157_v44 = vrot.slane %v4762_v12, 1  ;;  %7348 = vmatmul.mubr.bf16.gmra.mrb[128].mxu0 %v16262_v29 }
 0x314   :  { %5011 = vmatmul.mubr.bf16.gmra.mrb[128].mxu1 %v16262_v29  ;;  %v9395_v31 = vadd.f32 %v14232_v32, %v9164_v39  ;;  %7355 = vmatprep.mubr.bf16.mxu0 %v16263_v3 }
 0x315   :  { %v9842_v1 = vmax.f32 %v9394_v50, %v9618_v17  ;;  %v8269_v62 = vadd.f32 %v7095_v27, %v6604_v5  ;;  %5020 = vmatprep.mubr.bf16.mxu1 %v16263_v3  ;;  %v6605_v33 = vadd.f32 %v6157_v44, %v4760_v25 }
 0x316   :  { %v9619_v40 = vmul.f32 0.2, %v9395_v31  ;;  %v7101_v10 = vpop.f32.mrb[24].mxu0 }
 0x317   :  { %v9165_v35 = vadd.f32 %v8717_v63, %v8269_v62  ;;  %v4766_v36 = vpop.f32.mrb[24].mxu1  ;;  %v8270_v16 = vadd.f32 %v7101_v10, %v6605_v33  ;;  %v7103_v13 = vpop.f32.mrb[25].mxu0  ;;  %v10073_v12 = vmul.f32 %v14240_v8, %v9842_v1  ;;  %v16264_v33 = vld [vmem:[#allocation120_spill] sm:$0xff] }
 0x318   :  { %v4768_v56 = vpop.f32.mrb[25].mxu1  ;;  %v9843_v29 = vmax.f32 %v9395_v31, %v9619_v40  ;;  %v7105_v27 = vpop.f32.mrb[26].mxu0  ;;  %v8718_v39 = vrot.slane %v7103_v13, 1 }
 0x319   :  { %v9396_v50 = vadd.f32 %v14232_v32, %v9165_v35  ;;  %v4770_v17 = vpop.f32.mrb[26].mxu1  ;;  %v6158_v24 = vrot.slane %v4768_v56, 1  ;;  %v7107_v60 = vpop.f32.mrb[27].mxu0  ;;  %v10304_v1 = vsel %vm10290_vm1, %v10073_v12, 0.0 }
 0x31a   :  { %v4772_v5 = vpop.f32.mrb[27].mxu1  ;;  %v10074_v25 = vmul.f32 %v14249_v42, %v9843_v29  ;;  %v9166_v63 = vadd.f32 %v8718_v39, %v8270_v16  ;;  %v8719_v16 = vrot.slane %v7107_v60, 1 }
 0x31b   :  { %v9620_v44 = vmul.f32 0.2, %v9396_v50  ;;  %v6159_v62 = vrot.slane %v4772_v5, 1  ;;  %v6606_v3 = vadd.f32 %v6158_v24, %v4766_v36  ;;  %7356 = vmatmul.mubr.bf16.gmra.mrb[132].mxu0 %v16264_v33 }
 0x31c   :  { %5021 = vmatmul.mubr.bf16.gmra.mrb[132].mxu1 %v16264_v33  ;;  %v10305_v31 = vsel %vm10290_vm1, %v10074_v25, 0.0  ;;  %7365 = vmatprep.mubr.bf16.mxu0 %v13479_v59  ;;  %v9397_v56 = vadd.f32 %v14232_v32, %v9166_v63 }
 0x31d   :  { %v9844_v40 = vmax.f32 %v9396_v50, %v9620_v44  ;;  %5030 = vmatprep.mubr.bf16.mxu1 %v13479_v59  ;;  %v6607_v35 = vadd.f32 %v6159_v62, %v4770_v17  ;;  %v10306_v10 = vadd.f32 %v10305_v31, %v10304_v1  ;;  %v8271_v13 = vadd.f32 %v7105_v27, %v6606_v3 }
 0x31e   :  { %v7111_v24 = vpop.f32.mrb[28].mxu0  ;;  %v9621_v39 = vmul.f32 0.2, %v9397_v56 }
 0x31f   :  { %v10075_v36 = vmul.f32 %v14257_v20, %v9844_v40  ;;  %v4776_v29 = vpop.f32.mrb[28].mxu1  ;;  %v9167_v5 = vadd.f32 %v8719_v16, %v8271_v13  ;;  %v8272_v12 = vadd.f32 %v7111_v24, %v6607_v35  ;;  %v7113_v25 = vpop.f32.mrb[29].mxu0  ;;  %v16265_v35 = vld [vmem:[#allocation124_spill] sm:$0xff] }
 0x320   :  { %v4778_v33 = vpop.f32.mrb[29].mxu1  ;;  %v8720_v57 = vrot.slane %v7113_v25, 1  ;;  %v7115_v17 = vpop.f32.mrb[30].mxu0  ;;  %v9845_v1 = vmax.f32 %v9397_v56, %v9621_v39 }
 0x321   :  { %v10307_v50 = vsel %vm10290_vm1, %v10075_v36, 0.0  ;;  %v6160_v44 = vrot.slane %v4778_v33, 1  ;;  %v4780_v59 = vpop.f32.mrb[30].mxu1  ;;  %v9398_v27 = vadd.f32 %v14232_v32, %v9167_v5  ;;  %v7117_v63 = vpop.f32.mrb[31].mxu0 }
 0x322   :  { %v10308_v62 = vadd.f32 %v10307_v50, %v10306_v10  ;;  %v4781_v60 = vpop.f32.mrb[31].mxu1  ;;  %v9168_v3 = vadd.f32 %v8720_v57, %v8272_v12  ;;  %v10076_v40 = vmul.f32 %v14269_v18, %v9845_v1  ;;  %v8721_v24 = vrot.slane %v7117_v63, 1 }
 0x323   :  { %v6608_v31 = vadd.f32 %v6160_v44, %v4776_v29  ;;  %v9622_v13 = vmul.f32 0.2, %v9398_v27  ;;  %7366 = vmatmul.mubr.bf16.gmra.mrb[136].mxu0 %v16265_v35  ;;  %v10707_v57 = vsel %vm10290_vm1, %v14307_v61, 0.0 }
 0x324   :  { %5031 = vmatmul.mubr.bf16.gmra.mrb[136].mxu1 %v16265_v35  ;;  %v9399_v16 = vadd.f32 %v14232_v32, %v9168_v3  ;;  %7375 = vmatprep.mubr.bf16.mxu0 %v13505_v52  ;;  %v10309_v10 = vsel %vm10290_vm1, %v10076_v40, 0.0  ;;  %v10708_v63 = vrot.slane %v10707_v57, 4 }
 0x325   :  { %v8273_v36 = vadd.f32 %v7115_v17, %v6608_v31  ;;  %5040 = vmatprep.mubr.bf16.mxu1 %v13505_v52  ;;  %v9846_v56 = vmax.f32 %v9398_v27, %v9622_v13  ;;  %v10310_v29 = vadd.f32 %v10309_v10, %v10308_v62 }
 0x326   :  { %v9623_v39 = vmul.f32 0.2, %v9399_v16  ;;  %v7121_v33 = vpop.f32.mrb[32].mxu0 }
 0x327   :  { %v9169_v5 = vadd.f32 %v8721_v24, %v8273_v36  ;;  %v4784_v12 = vpop.f32.mrb[32].mxu1  ;;  %v10077_v25 = vmul.f32 %v14277_v2, %v9846_v56  ;;  %v7122_v44 = vpop.f32.mrb[33].mxu0  ;;  %v10709_v56 = vadd.f32 %v10708_v63, %v10707_v57 }
 0x328   :  { %v4786_v50 = vpop.f32.mrb[33].mxu1  ;;  %v9847_v59 = vmax.f32 %v9399_v16, %v9623_v39  ;;  %v7123_v60 = vpop.f32.mrb[34].mxu0 }
 0x329   :  { %v9400_v17 = vadd.f32 %v14232_v32, %v9169_v5  ;;  %v6161_v1 = vrot.slane %v4786_v50, 1  ;;  %v4788_v52 = vpop.f32.mrb[34].mxu1  ;;  %v10311_v27 = vsel %vm10290_vm1, %v10077_v25, 0.0  ;;  %v7125_v61 = vpop.f32.mrb[35].mxu0 }
 0x32a   :  { %v4790_v3 = vpop.f32.mrb[35].mxu1  ;;  %v10312_v62 = vadd.f32 %v10311_v27, %v10310_v29  ;;  %v10078_v31 = vmul.f32 %v14289_v7, %v9847_v59  ;;  %v8722_v10 = vrot.slane %v7125_v61, 1 }
 0x32b   :  { %v9624_v40 = vmul.f32 0.2, %v9400_v17  ;;  %v6609_v13 = vadd.f32 %v6161_v1, %v4784_v12  ;;  %v6162_v35 = vrot.slane %v4790_v3, 1  ;;  %7376 = vmatmul.mubr.bf16.gmra.mrb[140].mxu0 %v13491_v47 }
 0x32c   :  { %5041 = vmatmul.mubr.bf16.gmra.mrb[140].mxu1 %v13491_v47  ;;  %v10313_v16 = vsel %vm10290_vm1, %v10078_v31, 0.0  ;;  %7385 = vmatprep.mubr.bf16.mxu0 %v13525_v21 }
 0x32d   :  { %v9848_v36 = vmax.f32 %v9400_v17, %v9624_v40  ;;  %v8274_v24 = vadd.f32 %v7123_v60, %v6609_v13  ;;  %5048 = vmatprep.mubr.bf16.mxu1 %v13525_v21  ;;  %v10314_v29 = vadd.f32 %v10313_v16, %v10312_v62  ;;  %v6610_v39 = vadd.f32 %v6162_v35, %v4788_v52 }
 0x32e   :  { %v7129_v25 = vpop.f32.mrb[36].mxu0  ;;  %v10710_v21 = vrot.slane %v10709_v56, 2 }
 0x32f   :  { %v10079_v5 = vmul.f32 %v14297_v22, %v9848_v36  ;;  %v9170_v12 = vadd.f32 %v8722_v10, %v8274_v24  ;;  %v4794_v33 = vpop.f32.mrb[36].mxu1  ;;  %v8275_v50 = vadd.f32 %v7129_v25, %v6610_v39  ;;  %v7131_v47 = vpop.f32.mrb[37].mxu0 }
 0x330   :  { %v4796_v44 = vpop.f32.mrb[37].mxu1  ;;  %v8723_v60 = vrot.slane %v7131_v47, 1  ;;  %v7133_v3 = vpop.f32.mrb[38].mxu0 }
 0x331   :  { %v10315_v59 = vsel %vm10290_vm1, %v10079_v5, 0.0  ;;  %v9401_v17 = vadd.f32 %v14232_v32, %v9170_v12  ;;  %v6163_v1 = vrot.slane %v4796_v44, 1  ;;  %v4798_v27 = vpop.f32.mrb[38].mxu1  ;;  %v7135_v52 = vpop.f32.mrb[39].mxu0 }
 0x332   :  { %v10316_v57 = vadd.f32 %v10315_v59, %v10314_v29  ;;  %v4800_v63 = vpop.f32.mrb[39].mxu1  ;;  %v9171_v62 = vadd.f32 %v8723_v60, %v8275_v50  ;;  %v8724_v35 = vrot.slane %v7135_v52, 1  ;;  %v10711_v29 = vadd.f32 %v10710_v21, %v10709_v56 }
 0x333   :  { %v9625_v61 = vmul.f32 0.2, %v9401_v17  ;;  %v6611_v31 = vadd.f32 %v6163_v1, %v4794_v33  ;;  %v6164_v40 = vrot.slane %v4800_v63, 1  ;;  %7386 = vmatmul.mubr.bf16.gmra.mrb[144].mxu0 %v13517_v55 }
 0x334   :  { %v10714_v13 = vsel %vm10290_vm1, %v10316_v57, 0.0  ;;  %5049 = vmatmul.mubr.bf16.gmra.mrb[144].mxu1 %v13517_v55  ;;  %v9402_v24 = vadd.f32 %v14232_v32, %v9171_v62  ;;  %7393 = vmatprep.mubr.bf16.mxu0 %v13545_v43  ;;  %v10712_v21 = vrot.slane %v10711_v29, 1 }
 0x335   :  { %v10715_v16 = vrot.slane %v10714_v13, 4  ;;  %v9849_v36 = vmax.f32 %v9401_v17, %v9625_v61  ;;  %v8276_v10 = vadd.f32 %v7133_v3, %v6611_v31  ;;  %5058 = vmatprep.mubr.bf16.mxu1 %v13545_v43  ;;  %v6612_v39 = vadd.f32 %v6164_v40, %v4798_v27 }
 0x336   :  { %v9626_v12 = vmul.f32 0.2, %v9402_v24  ;;  %v7139_v50 = vpop.f32.mrb[40].mxu0 }
 0x337   :  { %v10716_v5 = vadd.f32 %v10715_v16, %v10714_v13  ;;  %v9172_v33 = vadd.f32 %v8724_v35, %v8276_v10  ;;  %v4804_v25 = vpop.f32.mrb[40].mxu1  ;;  %v10080_v44 = vmul.f32 %v14240_v8, %v9849_v36  ;;  %v8277_v47 = vadd.f32 %v7139_v50, %v6612_v39  ;;  %v7141_v59 = vpop.f32.mrb[41].mxu0 }
 0x338   :  { %v4806_v55 = vpop.f32.mrb[41].mxu1  ;;  %v9850_v1 = vmax.f32 %v9402_v24, %v9626_v12  ;;  %v7143_v57 = vpop.f32.mrb[42].mxu0  ;;  %v8725_v43 = vrot.slane %v7141_v59, 1 }
 0x339   :  { %v10717_v17 = vrot.slane %v10716_v5, 2  ;;  %v9403_v60 = vadd.f32 %v14232_v32, %v9172_v33  ;;  %v4808_v3 = vpop.f32.mrb[42].mxu1  ;;  %v6165_v63 = vrot.slane %v4806_v55, 1  ;;  %v7145_v27 = vpop.f32.mrb[43].mxu0  ;;  %v10317_v40 = vsel %vm10290_vm1, %v10080_v44, 0.0 }
 0x33a   :  { %v4810_v56 = vpop.f32.mrb[43].mxu1  ;;  %v10081_v61 = vmul.f32 %v14249_v42, %v9850_v1  ;;  %v9173_v13 = vadd.f32 %v8725_v43, %v8277_v47  ;;  %v8726_v33 = vrot.slane %v7145_v27, 1 }
 0x33b   :  { %v10718_v52 = vadd.f32 %v10717_v17, %v10716_v5  ;;  %v9627_v62 = vmul.f32 0.2, %v9403_v60  ;;  %v6166_v31 = vrot.slane %v4810_v56, 1  ;;  %v6613_v35 = vadd.f32 %v6165_v63, %v4804_v25  ;;  %7394 = vmatmul.mubr.bf16.gmra.mrb[148].mxu0 %v13537_v0 }
 0x33c   :  { %5059 = vmatmul.mubr.bf16.gmra.mrb[148].mxu1 %v13537_v0  ;;  %v10318_v16 = vsel %vm10290_vm1, %v10081_v61, 0.0  ;;  %7403 = vmatprep.mubr.bf16.mxu0 %v13565_v45  ;;  %v9404_v5 = vadd.f32 %v14232_v32, %v9173_v13  ;;  %v10713_v0 = vadd.f32 %v10712_v21, %v10711_v29 }
 0x33d   :  { %v9851_v36 = vmax.f32 %v9403_v60, %v9627_v62  ;;  %5068 = vmatprep.mubr.bf16.mxu1 %v13565_v45  ;;  %v6614_v24 = vadd.f32 %v6166_v31, %v4808_v3  ;;  %v10719_v10 = vrot.slane %v10718_v52, 1  ;;  %v10319_v39 = vadd.f32 %v10318_v16, %v10317_v40 }
 0x33e   :  { %v8278_v12 = vadd.f32 %v7143_v57, %v6613_v35  ;;  %v7149_v44 = vpop.f32.mrb[44].mxu0  ;;  %v9628_v55 = vmul.f32 0.2, %v9404_v5 }
 0x33f   :  { %v10082_v25 = vmul.f32 %v14257_v20, %v9851_v36  ;;  %v4814_v50 = vpop.f32.mrb[44].mxu1  ;;  %v10720_v47 = vadd.f32 %v10719_v10, %v10718_v52  ;;  %v8279_v17 = vadd.f32 %v7149_v44, %v6614_v24  ;;  %v7151_v60 = vpop.f32.mrb[45].mxu0 }
 0x340   :  { %v9174_v59 = vadd.f32 %v8726_v33, %v8278_v12  ;;  %v4816_v1 = vpop.f32.mrb[45].mxu1  ;;  %v8727_v63 = vrot.slane %v7151_v60, 1  ;;  %v7153_v56 = vpop.f32.mrb[46].mxu0  ;;  %v9852_v61 = vmax.f32 %v9404_v5, %v9628_v55 }
 0x341   :  { %v10320_v45 = vsel %vm10290_vm1, %v10082_v25, 0.0  ;;  %v6167_v3 = vrot.slane %v4816_v1, 1  ;;  %v4818_v43 = vpop.f32.mrb[46].mxu1  ;;  %v14367_v57 = vsel %vm10963_vm2, %v10720_v47, %v10713_v0  ;;  %v7155_v21 = vpop.f32.mrb[47].mxu0 }
 0x342   :  { %v10321_v27 = vadd.f32 %v10320_v45, %v10319_v39  ;;  %v9405_v62 = vadd.f32 %v14232_v32, %v9174_v59  ;;  %v4819_v29 = vpop.f32.mrb[47].mxu1  ;;  %v9175_v52 = vadd.f32 %v8727_v63, %v8279_v17  ;;  %v10083_v40 = vmul.f32 %v14269_v18, %v9852_v61 }
 0x343   :  { %v6615_v31 = vadd.f32 %v6167_v3, %v4814_v50  ;;  %7404 = vmatmul.mubr.bf16.gmra.mrb[152].mxu0 %v13557_v9  ;;  %v8728_v36 = vrot.slane %v7155_v21, 1 }
 0x344   :  { %v9629_v13 = vmul.f32 0.2, %v9405_v62  ;;  %5069 = vmatmul.mubr.bf16.gmra.mrb[152].mxu1 %v13557_v9  ;;  %v9406_v35 = vadd.f32 %v14232_v32, %v9175_v52  ;;  %7413 = vmatprep.mubr.bf16.mxu0 %v13595_v37  ;;  %v10322_v24 = vsel %vm10290_vm1, %v10083_v40, 0.0 }
 0x345   :  { %v8280_v16 = vadd.f32 %v7153_v56, %v6615_v31  ;;  %5078 = vmatprep.mubr.bf16.mxu1 %v13595_v37  ;;  %v10323_v39 = vadd.f32 %v10322_v24, %v10321_v27 }
 0x346   :  { %v9853_v10 = vmax.f32 %v9405_v62, %v9629_v13  ;;  %v9630_v5 = vmul.f32 0.2, %v9406_v35  ;;  %v7159_v25 = vpop.f32.mrb[48].mxu0 }
 0x347   :  { %v9176_v12 = vadd.f32 %v8728_v36, %v8280_v16  ;;  %v4822_v33 = vpop.f32.mrb[48].mxu1  ;;  %v7160_v9 = vpop.f32.mrb[49].mxu0 }
 0x348   :  { %v10084_v50 = vmul.f32 %v14277_v2, %v9853_v10  ;;  %v4824_v44 = vpop.f32.mrb[49].mxu1  ;;  %v9854_v0 = vmax.f32 %v9406_v35, %v9630_v5  ;;  %v7161_v17 = vpop.f32.mrb[50].mxu0 }
 0x349   :  { %v9407_v47 = vadd.f32 %v14232_v32, %v9176_v12  ;;  %v6168_v55 = vrot.slane %v4824_v44, 1  ;;  %v4826_v59 = vpop.f32.mrb[50].mxu1  ;;  %v7163_v60 = vpop.f32.mrb[51].mxu0 }
 0x34a   :  { %v10324_v37 = vsel %vm10290_vm1, %v10084_v50, 0.0  ;;  %v4828_v1 = vpop.f32.mrb[51].mxu1  ;;  %v10085_v3 = vmul.f32 %v14289_v7, %v9854_v0  ;;  %v8729_v29 = vrot.slane %v7163_v60, 1 }
 0x34b   :  { %v10325_v45 = vadd.f32 %v10324_v37, %v10323_v39  ;;  %v9631_v63 = vmul.f32 0.2, %v9407_v47  ;;  %v6616_v43 = vadd.f32 %v6168_v55, %v4822_v33  ;;  %v6169_v56 = vrot.slane %v4828_v1, 1  ;;  %7414 = vmatmul.mubr.bf16.gmra.mrb[156].mxu0 %v13577_v6 }
 0x34c   :  { %5079 = vmatmul.mubr.bf16.gmra.mrb[156].mxu1 %v13577_v6  ;;  %v10326_v27 = vsel %vm10290_vm1, %v10085_v3, 0.0  ;;  %7423 = vmatprep.mubr.bf16.mxu0 %v13635_v53 }
 0x34d   :  { %v9855_v61 = vmax.f32 %v9407_v47, %v9631_v63  ;;  %v8281_v62 = vadd.f32 %v7161_v17, %v6616_v43  ;;  %5086 = vmatprep.mubr.bf16.mxu1 %v13635_v53  ;;  %v10327_v21 = vadd.f32 %v10326_v27, %v10325_v45  ;;  %v6617_v52 = vadd.f32 %v6169_v56, %v4826_v59 }
 0x34e   :  { %v7167_v35 = vpop.f32.mrb[52].mxu0 }
 0x34f   :  { %v10086_v31 = vmul.f32 %v14297_v22, %v9855_v61  ;;  %v9177_v40 = vadd.f32 %v8729_v29, %v8281_v62  ;;  %v4832_v13 = vpop.f32.mrb[52].mxu1  ;;  %v8282_v16 = vadd.f32 %v7167_v35, %v6617_v52  ;;  %v7169_v24 = vpop.f32.mrb[53].mxu0 }
 0x350   :  { %v4834_v36 = vpop.f32.mrb[53].mxu1  ;;  %v8730_v5 = vrot.slane %v7169_v24, 1  ;;  %v7171_v33 = vpop.f32.mrb[54].mxu0 }
 0x351   :  { %v10328_v6 = vsel %vm10290_vm1, %v10086_v31, 0.0  ;;  %v9408_v10 = vadd.f32 %v14232_v32, %v9177_v40  ;;  %v6170_v39 = vrot.slane %v4834_v36, 1  ;;  %v4836_v12 = vpop.f32.mrb[54].mxu1  ;;  %v7173_v50 = vpop.f32.mrb[55].mxu0 }
 0x352   :  { %v10329_v25 = vadd.f32 %v10328_v6, %v10327_v21  ;;  %v4838_v53 = vpop.f32.mrb[55].mxu1  ;;  %v9178_v9 = vadd.f32 %v8730_v5, %v8282_v16  ;;  %v8731_v59 = vrot.slane %v7173_v50, 1 }
 0x353   :  { %v9632_v44 = vmul.f32 0.2, %v9408_v10  ;;  %v6618_v0 = vadd.f32 %v6170_v39, %v4832_v13  ;;  %v6171_v47 = vrot.slane %v4838_v53, 1  ;;  %7424 = vmatmul.mubr.bf16.gmra.mrb[160].mxu0 %v13617_v23 }
 0x354   :  { %v10721_v55 = vsel %vm10290_vm1, %v10329_v25, 0.0  ;;  %5087 = vmatmul.mubr.bf16.gmra.mrb[160].mxu1 %v13617_v23  ;;  %v9409_v1 = vadd.f32 %v14232_v32, %v9178_v9  ;;  %7431 = vmatprep.mubr.bf16.mxu0 %v13675_v11 }
 0x355   :  { %v10722_v17 = vrot.slane %v10721_v55, 4  ;;  %v9856_v37 = vmax.f32 %v9408_v10, %v9632_v44  ;;  %v8283_v60 = vadd.f32 %v7171_v33, %v6618_v0  ;;  %5096 = vmatprep.mubr.bf16.mxu1 %v13675_v11  ;;  %v6619_v45 = vadd.f32 %v6171_v47, %v4836_v12 }
 0x356   :  { %v9633_v63 = vmul.f32 0.2, %v9409_v1  ;;  %v7177_v27 = vpop.f32.mrb[56].mxu0 }
 0x357   :  { %v10723_v3 = vadd.f32 %v10722_v17, %v10721_v55  ;;  %v9179_v43 = vadd.f32 %v8731_v59, %v8283_v60  ;;  %v4842_v56 = vpop.f32.mrb[56].mxu1  ;;  %v10087_v61 = vmul.f32 %v14240_v8, %v9856_v37  ;;  %v8284_v62 = vadd.f32 %v7177_v27, %v6619_v45  ;;  %v7179_v23 = vpop.f32.mrb[57].mxu0 }
 0x358   :  { %v4844_v29 = vpop.f32.mrb[57].mxu1  ;;  %v9857_v21 = vmax.f32 %v9409_v1, %v9633_v63  ;;  %v7181_v13 = vpop.f32.mrb[58].mxu0  ;;  %v8732_v35 = vrot.slane %v7179_v23, 1 }
 0x359   :  { %v9410_v52 = vadd.f32 %v14232_v32, %v9179_v43  ;;  %v6172_v31 = vrot.slane %v4844_v29, 1  ;;  %v4846_v40 = vpop.f32.mrb[58].mxu1  ;;  %v7183_v11 = vpop.f32.mrb[59].mxu0  ;;  %v10724_v36 = vrot.slane %v10723_v3, 2  ;;  %v10330_v8 = vsel %vm10290_vm1, %v10087_v61, 0.0 }
 0x35a   :  { %v4848_v16 = vpop.f32.mrb[59].mxu1  ;;  %v10088_v24 = vmul.f32 %v14249_v42, %v9857_v21  ;;  %v9180_v5 = vadd.f32 %v8732_v35, %v8284_v62  ;;  %v8733_v12 = vrot.slane %v7183_v11, 1 }
 0x35b   :  { %v9634_v6 = vmul.f32 0.2, %v9410_v52  ;;  %v6620_v10 = vadd.f32 %v6172_v31, %v4842_v56  ;;  %v6173_v39 = vrot.slane %v4848_v16, 1  ;;  %7432 = vmatmul.mubr.bf16.gmra.mrb[164].mxu0 %v13657_v51  ;;  %v10725_v33 = vadd.f32 %v10724_v36, %v10723_v3 }
 0x35c   :  { %5097 = vmatmul.mubr.bf16.gmra.mrb[164].mxu1 %v13657_v51  ;;  %v10331_v25 = vsel %vm10290_vm1, %v10088_v24, 0.0  ;;  %7441 = vmatprep.mubr.bf16.mxu0 %v13715_v4  ;;  %v9411_v9 = vadd.f32 %v14232_v32, %v9180_v5  ;;  %v16267_v24 = vld [vmem:[#allocation146_spill] sm:$0xff] }
 0x35d   :  { %v9858_v53 = vmax.f32 %v9410_v52, %v9634_v6  ;;  %v8285_v50 = vadd.f32 %v7181_v13, %v6620_v10  ;;  %5106 = vmatprep.mubr.bf16.mxu1 %v13715_v4  ;;  %v6621_v42 = vadd.f32 %v6173_v39, %v4846_v40  ;;  %v10332_v44 = vadd.f32 %v10331_v25, %v10330_v8  ;;  %v16266_v13 = vld [vmem:[#allocation141_spill] sm:$0xff] }
 0x35e   :  { %v10726_v0 = vrot.slane %v10725_v33, 1  ;;  %v7187_v17 = vpop.f32.mrb[60].mxu0  ;;  %v9635_v51 = vmul.f32 0.2, %v9411_v9 }
 0x35f   :  { %v10089_v47 = vmul.f32 %v14257_v20, %v9858_v53  ;;  %v9181_v55 = vadd.f32 %v8733_v12, %v8285_v50  ;;  %v4852_v59 = vpop.f32.mrb[60].mxu1  ;;  %v8286_v37 = vadd.f32 %v7187_v17, %v6621_v42  ;;  %v7189_v60 = vpop.f32.mrb[61].mxu0 }
 0x360   :  { %v4854_v1 = vpop.f32.mrb[61].mxu1  ;;  %v10727_v45 = vadd.f32 %v10726_v0, %v10725_v33  ;;  %v8734_v43 = vrot.slane %v7189_v60, 1  ;;  %v7191_v27 = vpop.f32.mrb[62].mxu0  ;;  %v9859_v62 = vmax.f32 %v9411_v9, %v9635_v51 }
 0x361   :  { %v10333_v3 = vsel %vm10290_vm1, %v10089_v47, 0.0  ;;  %v9412_v4 = vadd.f32 %v14232_v32, %v9181_v55  ;;  %v6174_v63 = vrot.slane %v4854_v1, 1  ;;  %v4856_v56 = vpop.f32.mrb[62].mxu1  ;;  %v7193_v29 = vpop.f32.mrb[63].mxu0  ;;  %v16268_v1 = vld [vmem:[#allocation144_spill] sm:$0xff] }
 0x362   :  { %v10334_v61 = vadd.f32 %v10333_v3, %v10332_v44  ;;  %v4857_v20 = vpop.f32.mrb[63].mxu1  ;;  %v14410_v23 = vsel %vm10965_vm3, %v10727_v45, %v14367_v57  ;;  %v9182_v52 = vadd.f32 %v8734_v43, %v8286_v37  ;;  %v10090_v40 = vmul.f32 %v14269_v18, %v9859_v62  ;;  %v16269_v3 = vld [vmem:[#allocation148_spill] sm:$0xff] }
 0x363   :  { %v9636_v21 = vmul.f32 0.2, %v9412_v4  ;;  %v6622_v31 = vadd.f32 %v6174_v63, %v4852_v59  ;;  %7442 = vmatmul.mubr.bf16.gmra.mrb[168].mxu0 %v16266_v13  ;;  %v8735_v36 = vrot.slane %v7193_v29, 1 }
 0x364   :  { %5107 = vmatmul.mubr.bf16.gmra.mrb[168].mxu1 %v16266_v13  ;;  %v9413_v16 = vadd.f32 %v14232_v32, %v9182_v52  ;;  %7451 = vmatprep.mubr.bf16.mxu0 %v16267_v24  ;;  %v10335_v57 = vsel %vm10290_vm1, %v10090_v40, 0.0 }
 0x365   :  { %v9860_v35 = vmax.f32 %v9412_v4, %v9636_v21  ;;  %v8287_v11 = vadd.f32 %v7191_v27, %v6622_v31  ;;  %5116 = vmatprep.mubr.bf16.mxu1 %v16267_v24  ;;  %v10336_v6 = vadd.f32 %v10335_v57, %v10334_v61  ;;  %v14433_v21 = vld [vmem:[%s15783_s5] ss:$0 sm:$0xff] }
 0x366   :  { %v9637_v39 = vmul.f32 0.2, %v9413_v16  ;;  %v7197_v5 = vpop.f32.mrb[64].mxu0 }
 0x367   :  { %v10091_v10 = vmul.f32 %v14277_v2, %v9860_v35  ;;  %v9183_v18 = vadd.f32 %v8735_v36, %v8287_v11  ;;  %v4860_v8 = vpop.f32.mrb[64].mxu1  ;;  %v7198_v33 = vpop.f32.mrb[65].mxu0 }
 0x368   :  { %v4862_v12 = vpop.f32.mrb[65].mxu1  ;;  %v9861_v53 = vmax.f32 %v9413_v16, %v9637_v39  ;;  %v7199_v9 = vpop.f32.mrb[66].mxu0 }
 0x369   :  { %v10337_v25 = vsel %vm10290_vm1, %v10091_v10, 0.0  ;;  %v9414_v50 = vadd.f32 %v14232_v32, %v9183_v18  ;;  %v6175_v42 = vrot.slane %v4862_v12, 1  ;;  %v4864_v44 = vpop.f32.mrb[66].mxu1  ;;  %v7201_v55 = vpop.f32.mrb[67].mxu0  ;;  %v16270_v18 = vld [vmem:[#allocation17_spill] sm:$0xff] }
 0x36a   :  { %v10338_v0 = vadd.f32 %v10337_v25, %v10336_v6  ;;  %v4866_v47 = vpop.f32.mrb[67].mxu1  ;;  %v10092_v59 = vmul.f32 %v14289_v7, %v9861_v53  ;;  %v8736_v37 = vrot.slane %v7201_v55, 1  ;;  %v16271_v25 = vld [vmem:[#allocation150_spill] sm:$0xff] }
 0x36b   :  { %v9638_v2 = vmul.f32 0.2, %v9414_v50  ;;  %v6623_v17 = vadd.f32 %v6175_v42, %v4860_v8  ;;  %v6176_v51 = vrot.slane %v4866_v47, 1  ;;  %7452 = vmatmul.mubr.bf16.gmra.mrb[172].mxu0 %v16268_v1  ;;  %v14445_v47 = vld [vmem:[%s15784_s6] sm:$0x7f] }
 0x36c   :  { %5117 = vmatmul.mubr.bf16.gmra.mrb[172].mxu1 %v16268_v1  ;;  %v10339_v60 = vsel %vm10290_vm1, %v10092_v59, 0.0  ;;  %7461 = vmatprep.mubr.bf16.mxu0 %v16269_v3 }
 0x36d   :  { %v9862_v45 = vmax.f32 %v9414_v50, %v9638_v2  ;;  %v8288_v32 = vadd.f32 %v7199_v9, %v6623_v17  ;;  %5124 = vmatprep.mubr.bf16.mxu1 %v16269_v3  ;;  %v6624_v4 = vadd.f32 %v6176_v51, %v4864_v44  ;;  %v10340_v63 = vadd.f32 %v10339_v60, %v10338_v0 }
 0x36e   :  { %v7205_v27 = vpop.f32.mrb[68].mxu0 }
 0x36f   :  { %v10093_v7 = vmul.f32 %v14297_v22, %v9862_v45  ;;  %v9184_v43 = vadd.f32 %v8736_v37, %v8288_v32  ;;  %v4870_v56 = vpop.f32.mrb[68].mxu1  ;;  %v8289_v61 = vadd.f32 %v7205_v27, %v6624_v4  ;;  %v7207_v20 = vpop.f32.mrb[69].mxu0 }
 0x370   :  { %v4872_v62 = vpop.f32.mrb[69].mxu1  ;;  %v8737_v40 = vrot.slane %v7207_v20, 1  ;;  %v7209_v35 = vpop.f32.mrb[70].mxu0 }
 0x371   :  { %v10341_v29 = vsel %vm10290_vm1, %v10093_v7, 0.0  ;;  %v9415_v52 = vadd.f32 %v14433_v21, %v9184_v43  ;;  %v6177_v31 = vrot.slane %v4872_v62, 1  ;;  %v4874_v13 = vpop.f32.mrb[70].mxu1  ;;  %v7211_v11 = vpop.f32.mrb[71].mxu0  ;;  %v14452_v7 = vld [vmem:[%s15784_s6 + $0x8] sm:$0x7f] }
 0x372   :  { %v10342_v22 = vadd.f32 %v10341_v29, %v10340_v63  ;;  %v4876_v16 = vpop.f32.mrb[71].mxu1  ;;  %v9185_v24 = vadd.f32 %v8737_v40, %v8289_v61  ;;  %v8738_v39 = vrot.slane %v7211_v11, 1 }
 0x373   :  { %v9639_v36 = vmul.f32 0.2, %v9415_v52  ;;  %v6625_v57 = vadd.f32 %v6177_v31, %v4870_v56  ;;  %v6178_v6 = vrot.slane %v4876_v16, 1  ;;  %7462 = vmatmul.mubr.bf16.gmra.mrb[176].mxu0 %v16270_v18 }
 0x374   :  { %v10728_v10 = vsel %vm10290_vm1, %v10342_v22, 0.0  ;;  %5125 = vmatmul.mubr.bf16.gmra.mrb[176].mxu1 %v16270_v18  ;;  %v9416_v12 = vadd.f32 %v14433_v21, %v9185_v24  ;;  %7469 = vmatprep.mubr.bf16.mxu0 %v16271_v25  ;;  %v16273_v22 = vld [vmem:[#allocation152_spill] sm:$0xff] }
 0x375   :  { %v10729_v8 = vrot.slane %v10728_v10, 4  ;;  %v9863_v5 = vmax.f32 %v9415_v52, %v9639_v36  ;;  %v8290_v33 = vadd.f32 %v7209_v35, %v6625_v57  ;;  %5134 = vmatprep.mubr.bf16.mxu1 %v16271_v25  ;;  %v6626_v53 = vadd.f32 %v6178_v6, %v4874_v13  ;;  %v16272_v52 = vld [vmem:[#allocation20_spill] sm:$0xff] }
 0x376   :  { %v9640_v50 = vmul.f32 0.2, %v9416_v12  ;;  %v7215_v9 = vpop.f32.mrb[72].mxu0  ;;  %v14465_v57 = vld [vmem:[%s15784_s6 + $0x10] sm:$0x7f] }
 0x377   :  { %v9186_v42 = vadd.f32 %v8738_v39, %v8290_v33  ;;  %v4880_v44 = vpop.f32.mrb[72].mxu1  ;;  %v10730_v0 = vadd.f32 %v10729_v8, %v10728_v10  ;;  %v10094_v55 = vmul.f32 %v14445_v47, %v9863_v5  ;;  %v8291_v59 = vadd.f32 %v7215_v9, %v6626_v53  ;;  %v7217_v17 = vpop.f32.mrb[73].mxu0 }
 0x378   :  { %v4882_v2 = vpop.f32.mrb[73].mxu1  ;;  %v9864_v51 = vmax.f32 %v9416_v12, %v9640_v50  ;;  %v7219_v45 = vpop.f32.mrb[74].mxu0  ;;  %v8739_v32 = vrot.slane %v7217_v17, 1 }
 0x379   :  { %v9417_v37 = vadd.f32 %v14433_v21, %v9186_v42  ;;  %v6179_v1 = vrot.slane %v4882_v2, 1  ;;  %v4884_v60 = vpop.f32.mrb[74].mxu1  ;;  %v7221_v4 = vpop.f32.mrb[75].mxu0  ;;  %v10731_v63 = vrot.slane %v10730_v0, 2  ;;  %v10343_v62 = vsel %vm10290_vm1, %v10094_v55, 0.0 }
 0x37a   :  { %v4886_v3 = vpop.f32.mrb[75].mxu1  ;;  %v10095_v43 = vmul.f32 %v14452_v7, %v9864_v51  ;;  %v9187_v20 = vadd.f32 %v8739_v32, %v8291_v59  ;;  %v8740_v29 = vrot.slane %v7221_v4, 1 }
 0x37b   :  { %v9641_v56 = vmul.f32 0.2, %v9417_v37  ;;  %v6627_v27 = vadd.f32 %v6179_v1, %v4880_v44  ;;  %v6180_v61 = vrot.slane %v4886_v3, 1  ;;  %7470 = vmatmul.mubr.bf16.gmra.mrb[180].mxu0 %v16272_v52  ;;  %v10732_v31 = vadd.f32 %v10731_v63, %v10730_v0  ;;  %v16274_v3 = vld [vmem:[#allocation24_spill] sm:$0xff] }
 0x37c   :  { %5135 = vmatmul.mubr.bf16.gmra.mrb[180].mxu1 %v16272_v52  ;;  %v10344_v40 = vsel %vm10290_vm1, %v10095_v43, 0.0  ;;  %7479 = vmatprep.mubr.bf16.mxu0 %v16273_v22  ;;  %v9418_v36 = vadd.f32 %v14433_v21, %v9187_v20 }
 0x37d   :  { %v9865_v13 = vmax.f32 %v9417_v37, %v9641_v56  ;;  %v8292_v35 = vadd.f32 %v7219_v45, %v6627_v27  ;;  %5144 = vmatprep.mubr.bf16.mxu1 %v16273_v22  ;;  %v6628_v16 = vadd.f32 %v6180_v61, %v4884_v60  ;;  %v10345_v11 = vadd.f32 %v10344_v40, %v10343_v62  ;;  %v14477_v45 = vld [vmem:[%s15784_s6 + $0x18] sm:$0x7f]  ;;  %v14489_v62 = vld [vmem:[%s15784_s6 + $0x20] sm:$0x7f] }
 0x37e   :  { %v10733_v24 = vrot.slane %v10732_v31, 1  ;;  %v7225_v18 = vpop.f32.mrb[76].mxu0  ;;  %v9642_v8 = vmul.f32 0.2, %v9418_v36  ;;  %v16275_v56 = vld [vmem:[#allocation154_spill] sm:$0xff] }
 0x37f   :  { %v10096_v6 = vmul.f32 %v14465_v57, %v9865_v13  ;;  %v9188_v10 = vadd.f32 %v8740_v29, %v8292_v35  ;;  %v4890_v39 = vpop.f32.mrb[76].mxu1  ;;  %v8293_v5 = vadd.f32 %v7225_v18, %v6628_v16  ;;  %v7227_v33 = vpop.f32.mrb[77].mxu0 }
 0x380   :  { %v4892_v12 = vpop.f32.mrb[77].mxu1  ;;  %v10734_v25 = vadd.f32 %v10733_v24, %v10732_v31  ;;  %v8741_v44 = vrot.slane %v7227_v33, 1  ;;  %v7229_v0 = vpop.f32.mrb[78].mxu0  ;;  %v9866_v59 = vmax.f32 %v9418_v36, %v9642_v8  ;;  %v14497_v8 = vld [vmem:[%s15784_s6 + $0x28] sm:$0x7f] }
 0x381   :  { %v10346_v53 = vsel %vm10290_vm1, %v10096_v6, 0.0  ;;  %v9419_v50 = vadd.f32 %v14433_v21, %v9188_v10  ;;  %v6181_v42 = vrot.slane %v4892_v12, 1  ;;  %v4894_v9 = vpop.f32.mrb[78].mxu1  ;;  %v7231_v17 = vpop.f32.mrb[79].mxu0 }
 0x382   :  { %v10347_v55 = vadd.f32 %v10346_v53, %v10345_v11  ;;  %v4895_v2 = vpop.f32.mrb[79].mxu1  ;;  %v14472_v51 = vsel %vm10967_vm4, %v10734_v25, %v14410_v23  ;;  %v9189_v1 = vadd.f32 %v8741_v44, %v8293_v5  ;;  %v10097_v32 = vmul.f32 %v14477_v45, %v9866_v59 }
 0x383   :  { %v9643_v37 = vmul.f32 0.2, %v9419_v50  ;;  %v6629_v60 = vadd.f32 %v6181_v42, %v4890_v39  ;;  %7480 = vmatmul.mubr.bf16.gmra.mrb[184].mxu0 %v16274_v3  ;;  %v8742_v23 = vrot.slane %v7231_v17, 1  ;;  %v14508_v2 = vld [vmem:[%s15784_s6 + $0x30] sm:$0x7f] }
 0x384   :  { %5145 = vmatmul.mubr.bf16.gmra.mrb[184].mxu1 %v16274_v3  ;;  %v9420_v63 = vadd.f32 %v14433_v21, %v9189_v1  ;;  %7489 = vmatprep.mubr.bf16.mxu0 %v16275_v56  ;;  %v10348_v27 = vsel %vm10290_vm1, %v10097_v32, 0.0 }
 0x385   :  { %v9867_v4 = vmax.f32 %v9419_v50, %v9643_v37  ;;  %v8294_v43 = vadd.f32 %v7229_v0, %v6629_v60  ;;  %5154 = vmatprep.mubr.bf16.mxu1 %v16275_v56  ;;  %v10349_v61 = vadd.f32 %v10348_v27, %v10347_v55  ;;  %v16276_v50 = vld [vmem:[#allocation28_spill] sm:$0xff] }
 0x386   :  { %v9644_v29 = vmul.f32 0.2, %v9420_v63  ;;  %v7235_v40 = vpop.f32.mrb[80].mxu0  ;;  %v16277_v0 = vld [vmem:[#allocation156_spill] sm:$0xff] }
 0x387   :  { %v10098_v20 = vmul.f32 %v14489_v62, %v9867_v4  ;;  %v9190_v52 = vadd.f32 %v8742_v23, %v8294_v43  ;;  %v4898_v31 = vpop.f32.mrb[80].mxu1  ;;  %v7236_v35 = vpop.f32.mrb[81].mxu0 }
 0x388   :  { %v4900_v13 = vpop.f32.mrb[81].mxu1  ;;  %v9868_v16 = vmax.f32 %v9420_v63, %v9644_v29  ;;  %v7237_v6 = vpop.f32.mrb[82].mxu0 }
 0x389   :  { %v10350_v22 = vsel %vm10290_vm1, %v10098_v20, 0.0  ;;  %v9421_v11 = vadd.f32 %v14433_v21, %v9190_v52  ;;  %v6182_v36 = vrot.slane %v4900_v13, 1  ;;  %v4902_v24 = vpop.f32.mrb[82].mxu1  ;;  %v7239_v18 = vpop.f32.mrb[83].mxu0 }
 0x38a   :  { %v10351_v10 = vadd.f32 %v10350_v22, %v10349_v61  ;;  %v4904_v39 = vpop.f32.mrb[83].mxu1  ;;  %v10099_v5 = vmul.f32 %v14497_v8, %v9868_v16  ;;  %v8743_v53 = vrot.slane %v7239_v18, 1  ;;  %v16278_v16 = vld [vmem:[#allocation32_spill] sm:$0xff] }
 0x38b   :  { %v9645_v12 = vmul.f32 0.2, %v9421_v11  ;;  %v6630_v33 = vadd.f32 %v6182_v36, %v4898_v31  ;;  %v6183_v25 = vrot.slane %v4904_v39, 1  ;;  %7490 = vmatmul.mubr.bf16.gmra.mrb[188].mxu0 %v16276_v50 }
 0x38c   :  { %5155 = vmatmul.mubr.bf16.gmra.mrb[188].mxu1 %v16276_v50  ;;  %v10352_v42 = vsel %vm10290_vm1, %v10099_v5, 0.0  ;;  %7499 = vmatprep.mubr.bf16.mxu0 %v16277_v0 }
 0x38d   :  { %v9869_v44 = vmax.f32 %v9421_v11, %v9645_v12  ;;  %v8295_v9 = vadd.f32 %v7237_v6, %v6630_v33  ;;  %5162 = vmatprep.mubr.bf16.mxu1 %v16277_v0  ;;  %v6631_v55 = vadd.f32 %v6183_v25, %v4902_v24  ;;  %v10353_v59 = vadd.f32 %v10352_v42, %v10351_v10  ;;  %v16279_v10 = vld [vmem:[#allocation158_spill] sm:$0xff] }
 0x38e   :  { %v7243_v60 = vpop.f32.mrb[84].mxu0 }
 0x38f   :  { %v10100_v17 = vmul.f32 %v14508_v2, %v9869_v44  ;;  %v9191_v37 = vadd.f32 %v8743_v53, %v8295_v9  ;;  %v4908_v1 = vpop.f32.mrb[84].mxu1  ;;  %v8296_v32 = vadd.f32 %v7243_v60, %v6631_v55  ;;  %v7245_v4 = vpop.f32.mrb[85].mxu0 }
 0x390   :  { %v4910_v3 = vpop.f32.mrb[85].mxu1  ;;  %v8744_v56 = vrot.slane %v7245_v4, 1  ;;  %v7247_v61 = vpop.f32.mrb[86].mxu0 }
 0x391   :  { %v10354_v63 = vsel %vm10290_vm1, %v10100_v17, 0.0  ;;  %v9422_v43 = vadd.f32 %v14433_v21, %v9191_v37  ;;  %v6184_v23 = vrot.slane %v4910_v3, 1  ;;  %v4912_v27 = vpop.f32.mrb[86].mxu1  ;;  %v7249_v52 = vpop.f32.mrb[87].mxu0 }
 0x392   :  { %v10355_v20 = vadd.f32 %v10354_v63, %v10353_v59  ;;  %v4914_v29 = vpop.f32.mrb[87].mxu1  ;;  %v9192_v40 = vadd.f32 %v8744_v56, %v8296_v32  ;;  %v8745_v22 = vrot.slane %v7249_v52, 1 }
 0x393   :  { %v9646_v31 = vmul.f32 0.2, %v9422_v43  ;;  %v6632_v13 = vadd.f32 %v6184_v23, %v4908_v1  ;;  %v6185_v35 = vrot.slane %v4914_v29, 1  ;;  %7500 = vmatmul.mubr.bf16.gmra.mrb[192].mxu0 %v16278_v16 }
 0x394   :  { %5163 = vmatmul.mubr.bf16.gmra.mrb[192].mxu1 %v16278_v16  ;;  %v10735_v11 = vsel %vm10290_vm1, %v10355_v20, 0.0  ;;  %v9423_v24 = vadd.f32 %v14433_v21, %v9192_v40  ;;  %7507 = vmatprep.mubr.bf16.mxu0 %v16279_v10  ;;  %v16280_v20 = vld [vmem:[#allocation36_spill] sm:$0xff] }
 0x395   :  { %v9870_v36 = vmax.f32 %v9422_v43, %v9646_v31  ;;  %v8297_v6 = vadd.f32 %v7247_v61, %v6632_v13  ;;  %5172 = vmatprep.mubr.bf16.mxu1 %v16279_v10  ;;  %v10736_v39 = vrot.slane %v10735_v11, 4  ;;  %v6633_v18 = vadd.f32 %v6185_v35, %v4912_v27  ;;  %v16281_v13 = vld [vmem:[#allocation160_spill] sm:$0xff] }
 0x396   :  { %v9647_v5 = vmul.f32 0.2, %v9423_v24  ;;  %v7253_v25 = vpop.f32.mrb[88].mxu0 }
 0x397   :  { %v9193_v12 = vadd.f32 %v8745_v22, %v8297_v6  ;;  %v4918_v33 = vpop.f32.mrb[88].mxu1  ;;  %v10737_v53 = vadd.f32 %v10736_v39, %v10735_v11  ;;  %v10101_v50 = vmul.f32 %v14445_v47, %v9870_v36  ;;  %v8298_v42 = vadd.f32 %v7253_v25, %v6633_v18  ;;  %v7255_v9 = vpop.f32.mrb[89].mxu0 }
 0x398   :  { %v4920_v44 = vpop.f32.mrb[89].mxu1  ;;  %v9871_v0 = vmax.f32 %v9423_v24, %v9647_v5  ;;  %v7257_v37 = vpop.f32.mrb[90].mxu0  ;;  %v8746_v1 = vrot.slane %v7255_v9, 1 }
 0x399   :  { %v9424_v55 = vadd.f32 %v14433_v21, %v9193_v12  ;;  %v6186_v59 = vrot.slane %v4920_v44, 1  ;;  %v4922_v17 = vpop.f32.mrb[90].mxu1  ;;  %v7259_v32 = vpop.f32.mrb[91].mxu0  ;;  %v10738_v3 = vrot.slane %v10737_v53, 2  ;;  %v10356_v56 = vsel %vm10290_vm1, %v10101_v50, 0.0 }
 0x39a   :  { %v4924_v60 = vpop.f32.mrb[91].mxu1  ;;  %v10102_v4 = vmul.f32 %v14452_v7, %v9871_v0  ;;  %v9194_v27 = vadd.f32 %v8746_v1, %v8298_v42  ;;  %v8747_v61 = vrot.slane %v7259_v32, 1 }
 0x39b   :  { %v9648_v63 = vmul.f32 0.2, %v9424_v55  ;;  %v6634_v43 = vadd.f32 %v6186_v59, %v4918_v33  ;;  %v6187_v23 = vrot.slane %v4924_v60, 1  ;;  %7508 = vmatmul.mubr.bf16.gmra.mrb[196].mxu0 %v16280_v20  ;;  %v10739_v29 = vadd.f32 %v10738_v3, %v10737_v53 }
 0x39c   :  { %5173 = vmatmul.mubr.bf16.gmra.mrb[196].mxu1 %v16280_v20  ;;  %v10357_v52 = vsel %vm10290_vm1, %v10102_v4, 0.0  ;;  %7517 = vmatprep.mubr.bf16.mxu0 %v16281_v13  ;;  %v9425_v16 = vadd.f32 %v14433_v21, %v9194_v27  ;;  %v16282_v4 = vld [vmem:[#allocation40_spill] sm:$0xff]  ;;  %v16283_v27 = vld [vmem:[#allocation162_spill] sm:$0xff] }
 0x39d   :  { %v9872_v31 = vmax.f32 %v9424_v55, %v9648_v63  ;;  %v8299_v40 = vadd.f32 %v7257_v37, %v6634_v43  ;;  %5182 = vmatprep.mubr.bf16.mxu1 %v16281_v13  ;;  %v6635_v35 = vadd.f32 %v6187_v23, %v4922_v17  ;;  %v10358_v22 = vadd.f32 %v10357_v52, %v10356_v56 }
 0x39e   :  { %v10740_v11 = vrot.slane %v10739_v29, 1  ;;  %v7263_v10 = vpop.f32.mrb[92].mxu0  ;;  %v9649_v39 = vmul.f32 0.2, %v9425_v16 }
 0x39f   :  { %v10103_v36 = vmul.f32 %v14465_v57, %v9872_v31  ;;  %v9195_v24 = vadd.f32 %v8747_v61, %v8299_v40  ;;  %v4928_v6 = vpop.f32.mrb[92].mxu1  ;;  %v8300_v18 = vadd.f32 %v7263_v10, %v6635_v35  ;;  %v7265_v12 = vpop.f32.mrb[93].mxu0 }
 0x3a0   :  { %v4930_v5 = vpop.f32.mrb[93].mxu1  ;;  %v10741_v33 = vadd.f32 %v10740_v11, %v10739_v29  ;;  %v8748_v42 = vrot.slane %v7265_v12, 1  ;;  %v7267_v9 = vpop.f32.mrb[94].mxu0  ;;  %v9873_v55 = vmax.f32 %v9425_v16, %v9649_v39 }
 0x3a1   :  { %v10359_v25 = vsel %vm10290_vm1, %v10103_v36, 0.0  ;;  %v9426_v53 = vadd.f32 %v14433_v21, %v9195_v24  ;;  %v6188_v50 = vrot.slane %v4930_v5, 1  ;;  %v4932_v44 = vpop.f32.mrb[94].mxu1  ;;  %v7269_v17 = vpop.f32.mrb[95].mxu0 }
 0x3a2   :  { %v10360_v0 = vadd.f32 %v10359_v25, %v10358_v22  ;;  %v4933_v59 = vpop.f32.mrb[95].mxu1  ;;  %v14534_v37 = vsel %vm10969_vm5, %v10741_v33, %v14472_v51  ;;  %v9196_v60 = vadd.f32 %v8748_v42, %v8300_v18  ;;  %v10104_v3 = vmul.f32 %v14477_v45, %v9873_v55 }
 0x3a3   :  { %v9650_v1 = vmul.f32 0.2, %v9426_v53  ;;  %v6636_v32 = vadd.f32 %v6188_v50, %v4928_v6  ;;  %7518 = vmatmul.mubr.bf16.gmra.mrb[200].mxu0 %v16282_v4  ;;  %v8749_v56 = vrot.slane %v7269_v17, 1  ;;  %v16284_v50 = vld [vmem:[#allocation44_spill] sm:$0xff] }
 0x3a4   :  { %5183 = vmatmul.mubr.bf16.gmra.mrb[200].mxu1 %v16282_v4  ;;  %v9427_v43 = vadd.f32 %v14433_v21, %v9196_v60  ;;  %7527 = vmatprep.mubr.bf16.mxu0 %v16283_v27  ;;  %v10361_v51 = vsel %vm10290_vm1, %v10104_v3, 0.0 }
 0x3a5   :  { %v9874_v63 = vmax.f32 %v9426_v53, %v9650_v1  ;;  %v8301_v23 = vadd.f32 %v7267_v9, %v6636_v32  ;;  %5192 = vmatprep.mubr.bf16.mxu1 %v16283_v27  ;;  %v10362_v61 = vadd.f32 %v10361_v51, %v10360_v0  ;;  %v16285_v0 = vld [vmem:[#allocation164_spill] sm:$0xff] }
 0x3a6   :  { %v9651_v29 = vmul.f32 0.2, %v9427_v43  ;;  %v7273_v40 = vpop.f32.mrb[96].mxu0 }
 0x3a7   :  { %v10105_v20 = vmul.f32 %v14489_v62, %v9874_v63  ;;  %v9197_v52 = vadd.f32 %v8749_v56, %v8301_v23  ;;  %v4936_v31 = vpop.f32.mrb[96].mxu1  ;;  %v7274_v35 = vpop.f32.mrb[97].mxu0 }
 0x3a8   :  { %v4938_v13 = vpop.f32.mrb[97].mxu1  ;;  %v9875_v16 = vmax.f32 %v9427_v43, %v9651_v29  ;;  %v7275_v6 = vpop.f32.mrb[98].mxu0 }
 0x3a9   :  { %v10363_v22 = vsel %vm10290_vm1, %v10105_v20, 0.0  ;;  %v9428_v11 = vadd.f32 %v14433_v21, %v9197_v52  ;;  %v6189_v36 = vrot.slane %v4938_v13, 1  ;;  %v4940_v24 = vpop.f32.mrb[98].mxu1  ;;  %v7277_v18 = vpop.f32.mrb[99].mxu0 }
 0x3aa   :  { %v10364_v10 = vadd.f32 %v10363_v22, %v10362_v61  ;;  %v4942_v39 = vpop.f32.mrb[99].mxu1  ;;  %v10106_v5 = vmul.f32 %v14497_v8, %v9875_v16  ;;  %v8750_v53 = vrot.slane %v7277_v18, 1  ;;  %v16286_v16 = vld [vmem:[#allocation48_spill] sm:$0xff] }
 0x3ab   :  { %v9652_v12 = vmul.f32 0.2, %v9428_v11  ;;  %v6637_v33 = vadd.f32 %v6189_v36, %v4936_v31  ;;  %v6190_v25 = vrot.slane %v4942_v39, 1  ;;  %7528 = vmatmul.mubr.bf16.gmra.mrb[204].mxu0 %v16284_v50 }
 0x3ac   :  { %5193 = vmatmul.mubr.bf16.gmra.mrb[204].mxu1 %v16284_v50  ;;  %v10365_v42 = vsel %vm10290_vm1, %v10106_v5, 0.0  ;;  %7537 = vmatprep.mubr.bf16.mxu0 %v16285_v0 }
 0x3ad   :  { %v9876_v44 = vmax.f32 %v9428_v11, %v9652_v12  ;;  %v8302_v9 = vadd.f32 %v7275_v6, %v6637_v33  ;;  %5200 = vmatprep.mubr.bf16.mxu1 %v16285_v0  ;;  %v6638_v55 = vadd.f32 %v6190_v25, %v4940_v24  ;;  %v10366_v59 = vadd.f32 %v10365_v42, %v10364_v10  ;;  %v16287_v10 = vld [vmem:[#allocation166_spill] sm:$0xff] }
 0x3ae   :  { %v7281_v32 = vpop.f32.mrb[100].mxu0 }
 0x3af   :  { %v10107_v17 = vmul.f32 %v14508_v2, %v9876_v44  ;;  %v9198_v1 = vadd.f32 %v8750_v53, %v8302_v9  ;;  %v4946_v60 = vpop.f32.mrb[100].mxu1  ;;  %v8303_v3 = vadd.f32 %v7281_v32, %v6638_v55  ;;  %v7283_v63 = vpop.f32.mrb[101].mxu0 }
 0x3b0   :  { %v4948_v4 = vpop.f32.mrb[101].mxu1  ;;  %v8751_v27 = vrot.slane %v7283_v63, 1  ;;  %v7285_v61 = vpop.f32.mrb[102].mxu0 }
 0x3b1   :  { %v10367_v43 = vsel %vm10290_vm1, %v10107_v17, 0.0  ;;  %v9429_v23 = vadd.f32 %v14433_v21, %v9198_v1  ;;  %v6191_v56 = vrot.slane %v4948_v4, 1  ;;  %v4950_v51 = vpop.f32.mrb[102].mxu1  ;;  %v7287_v52 = vpop.f32.mrb[103].mxu0 }
 0x3b2   :  { %v10368_v20 = vadd.f32 %v10367_v43, %v10366_v59  ;;  %v4952_v29 = vpop.f32.mrb[103].mxu1  ;;  %v9199_v40 = vadd.f32 %v8751_v27, %v8303_v3  ;;  %v8752_v22 = vrot.slane %v7287_v52, 1 }
 0x3b3   :  { %v9653_v31 = vmul.f32 0.2, %v9429_v23  ;;  %v6639_v13 = vadd.f32 %v6191_v56, %v4946_v60  ;;  %v6192_v35 = vrot.slane %v4952_v29, 1  ;;  %7538 = vmatmul.mubr.bf16.gmra.mrb[208].mxu0 %v16286_v16 }
 0x3b4   :  { %5201 = vmatmul.mubr.bf16.gmra.mrb[208].mxu1 %v16286_v16  ;;  %v10742_v11 = vsel %vm10290_vm1, %v10368_v20, 0.0  ;;  %v9430_v24 = vadd.f32 %v14433_v21, %v9199_v40  ;;  %7545 = vmatprep.mubr.bf16.mxu0 %v16287_v10  ;;  %v16288_v20 = vld [vmem:[#allocation52_spill] sm:$0xff] }
 0x3b5   :  { %v9877_v36 = vmax.f32 %v9429_v23, %v9653_v31  ;;  %v8304_v6 = vadd.f32 %v7285_v61, %v6639_v13  ;;  %5210 = vmatprep.mubr.bf16.mxu1 %v16287_v10  ;;  %v10743_v39 = vrot.slane %v10742_v11, 4  ;;  %v6640_v18 = vadd.f32 %v6192_v35, %v4950_v51  ;;  %v16289_v13 = vld [vmem:[#allocation168_spill] sm:$0xff] }
 0x3b6   :  { %v9654_v5 = vmul.f32 0.2, %v9430_v24  ;;  %v7291_v25 = vpop.f32.mrb[104].mxu0 }
 0x3b7   :  { %v9200_v12 = vadd.f32 %v8752_v22, %v8304_v6  ;;  %v4956_v33 = vpop.f32.mrb[104].mxu1  ;;  %v10744_v53 = vadd.f32 %v10743_v39, %v10742_v11  ;;  %v10108_v50 = vmul.f32 %v14445_v47, %v9877_v36  ;;  %v8305_v42 = vadd.f32 %v7291_v25, %v6640_v18  ;;  %v7293_v9 = vpop.f32.mrb[105].mxu0 }
 0x3b8   :  { %v4958_v44 = vpop.f32.mrb[105].mxu1  ;;  %v9878_v0 = vmax.f32 %v9430_v24, %v9654_v5  ;;  %v7295_v1 = vpop.f32.mrb[106].mxu0  ;;  %v8753_v60 = vrot.slane %v7293_v9, 1 }
 0x3b9   :  { %v9431_v55 = vadd.f32 %v14433_v21, %v9200_v12  ;;  %v6193_v59 = vrot.slane %v4958_v44, 1  ;;  %v4960_v17 = vpop.f32.mrb[106].mxu1  ;;  %v7297_v3 = vpop.f32.mrb[107].mxu0  ;;  %v10745_v4 = vrot.slane %v10744_v53, 2  ;;  %v10369_v27 = vsel %vm10290_vm1, %v10108_v50, 0.0 }
 0x3ba   :  { %v4962_v32 = vpop.f32.mrb[107].mxu1  ;;  %v10109_v63 = vmul.f32 %v14452_v7, %v9878_v0  ;;  %v9201_v51 = vadd.f32 %v8753_v60, %v8305_v42  ;;  %v8754_v61 = vrot.slane %v7297_v3, 1 }
 0x3bb   :  { %v9655_v43 = vmul.f32 0.2, %v9431_v55  ;;  %v6641_v23 = vadd.f32 %v6193_v59, %v4956_v33  ;;  %v6194_v56 = vrot.slane %v4962_v32, 1  ;;  %7546 = vmatmul.mubr.bf16.gmra.mrb[212].mxu0 %v16288_v20  ;;  %v10746_v29 = vadd.f32 %v10745_v4, %v10744_v53 }
 0x3bc   :  { %5211 = vmatmul.mubr.bf16.gmra.mrb[212].mxu1 %v16288_v20  ;;  %v10370_v52 = vsel %vm10290_vm1, %v10109_v63, 0.0  ;;  %7555 = vmatprep.mubr.bf16.mxu0 %v16289_v13  ;;  %v9432_v16 = vadd.f32 %v14433_v21, %v9201_v51  ;;  %v16290_v63 = vld [vmem:[#allocation56_spill] sm:$0xff]  ;;  %v16291_v51 = vld [vmem:[#allocation170_spill] sm:$0xff] }
 0x3bd   :  { %v9879_v31 = vmax.f32 %v9431_v55, %v9655_v43  ;;  %v8306_v40 = vadd.f32 %v7295_v1, %v6641_v23  ;;  %5220 = vmatprep.mubr.bf16.mxu1 %v16289_v13  ;;  %v6642_v35 = vadd.f32 %v6194_v56, %v4960_v17  ;;  %v10371_v22 = vadd.f32 %v10370_v52, %v10369_v27 }
 0x3be   :  { %v10747_v11 = vrot.slane %v10746_v29, 1  ;;  %v7301_v10 = vpop.f32.mrb[108].mxu0  ;;  %v9656_v39 = vmul.f32 0.2, %v9432_v16 }
 0x3bf   :  { %v10110_v36 = vmul.f32 %v14465_v57, %v9879_v31  ;;  %v9202_v24 = vadd.f32 %v8754_v61, %v8306_v40  ;;  %v4966_v6 = vpop.f32.mrb[108].mxu1  ;;  %v8307_v18 = vadd.f32 %v7301_v10, %v6642_v35  ;;  %v7303_v12 = vpop.f32.mrb[109].mxu0 }
 0x3c0   :  { %v4968_v5 = vpop.f32.mrb[109].mxu1  ;;  %v10748_v33 = vadd.f32 %v10747_v11, %v10746_v29  ;;  %v8755_v42 = vrot.slane %v7303_v12, 1  ;;  %v7305_v9 = vpop.f32.mrb[110].mxu0  ;;  %v9880_v55 = vmax.f32 %v9432_v16, %v9656_v39 }
 0x3c1   :  { %v10372_v25 = vsel %vm10290_vm1, %v10110_v36, 0.0  ;;  %v9433_v53 = vadd.f32 %v14433_v21, %v9202_v24  ;;  %v6195_v50 = vrot.slane %v4968_v5, 1  ;;  %v4970_v44 = vpop.f32.mrb[110].mxu1  ;;  %v7307_v17 = vpop.f32.mrb[111].mxu0 }
 0x3c2   :  { %v10373_v0 = vadd.f32 %v10372_v25, %v10371_v22  ;;  %v4971_v59 = vpop.f32.mrb[111].mxu1  ;;  %v14576_v1 = vsel %vm10971_vm6, %v10748_v33, %v14534_v37  ;;  %v9203_v32 = vadd.f32 %v8755_v42, %v8307_v18  ;;  %v10111_v4 = vmul.f32 %v14477_v45, %v9880_v55 }
 0x3c3   :  { %v9657_v60 = vmul.f32 0.2, %v9433_v53  ;;  %v6643_v3 = vadd.f32 %v6195_v50, %v4966_v6  ;;  %7556 = vmatmul.mubr.bf16.gmra.mrb[216].mxu0 %v16290_v63  ;;  %v8756_v27 = vrot.slane %v7307_v17, 1  ;;  %v16292_v50 = vld [vmem:[#allocation60_spill] sm:$0xff] }
 0x3c4   :  { %5221 = vmatmul.mubr.bf16.gmra.mrb[216].mxu1 %v16290_v63  ;;  %v9434_v23 = vadd.f32 %v14433_v21, %v9203_v32  ;;  %7565 = vmatprep.mubr.bf16.mxu0 %v16291_v51  ;;  %v10374_v37 = vsel %vm10290_vm1, %v10111_v4, 0.0 }
 0x3c5   :  { %v9881_v43 = vmax.f32 %v9433_v53, %v9657_v60  ;;  %v8308_v56 = vadd.f32 %v7305_v9, %v6643_v3  ;;  %5230 = vmatprep.mubr.bf16.mxu1 %v16291_v51  ;;  %v10375_v61 = vadd.f32 %v10374_v37, %v10373_v0  ;;  %v16293_v0 = vld [vmem:[#allocation172_spill] sm:$0xff] }
 0x3c6   :  { %v9658_v29 = vmul.f32 0.2, %v9434_v23  ;;  %v7311_v40 = vpop.f32.mrb[112].mxu0 }
 0x3c7   :  { %v10112_v20 = vmul.f32 %v14489_v62, %v9881_v43  ;;  %v9204_v52 = vadd.f32 %v8756_v27, %v8308_v56  ;;  %v4974_v31 = vpop.f32.mrb[112].mxu1  ;;  %v7312_v35 = vpop.f32.mrb[113].mxu0 }
 0x3c8   :  { %v4976_v13 = vpop.f32.mrb[113].mxu1  ;;  %v9882_v16 = vmax.f32 %v9434_v23, %v9658_v29  ;;  %v7313_v6 = vpop.f32.mrb[114].mxu0 }
 0x3c9   :  { %v10376_v22 = vsel %vm10290_vm1, %v10112_v20, 0.0  ;;  %v9435_v11 = vadd.f32 %v14433_v21, %v9204_v52  ;;  %v6196_v36 = vrot.slane %v4976_v13, 1  ;;  %v4978_v24 = vpop.f32.mrb[114].mxu1  ;;  %v7315_v18 = vpop.f32.mrb[115].mxu0 }
 0x3ca   :  { %v10377_v10 = vadd.f32 %v10376_v22, %v10375_v61  ;;  %v4980_v39 = vpop.f32.mrb[115].mxu1  ;;  %v10113_v5 = vmul.f32 %v14497_v8, %v9882_v16  ;;  %v8757_v53 = vrot.slane %v7315_v18, 1  ;;  %v16294_v16 = vld [vmem:[#allocation64_spill] sm:$0xff] }
 0x3cb   :  { %v9659_v12 = vmul.f32 0.2, %v9435_v11  ;;  %v6644_v33 = vadd.f32 %v6196_v36, %v4974_v31  ;;  %v6197_v25 = vrot.slane %v4980_v39, 1  ;;  %7566 = vmatmul.mubr.bf16.gmra.mrb[220].mxu0 %v16292_v50 }
 0x3cc   :  { %5231 = vmatmul.mubr.bf16.gmra.mrb[220].mxu1 %v16292_v50  ;;  %v10378_v42 = vsel %vm10290_vm1, %v10113_v5, 0.0  ;;  %7575 = vmatprep.mubr.bf16.mxu0 %v16293_v0 }
 0x3cd   :  { %v9883_v44 = vmax.f32 %v9435_v11, %v9659_v12  ;;  %v8309_v9 = vadd.f32 %v7313_v6, %v6644_v33  ;;  %5238 = vmatprep.mubr.bf16.mxu1 %v16293_v0  ;;  %v6645_v55 = vadd.f32 %v6197_v25, %v4978_v24  ;;  %v10379_v59 = vadd.f32 %v10378_v42, %v10377_v10  ;;  %v16295_v10 = vld [vmem:[#allocation174_spill] sm:$0xff] }
 0x3ce   :  { %v7319_v3 = vpop.f32.mrb[116].mxu0 }
 0x3cf   :  { %v10114_v17 = vmul.f32 %v14508_v2, %v9883_v44  ;;  %v9205_v60 = vadd.f32 %v8757_v53, %v8309_v9  ;;  %v4984_v32 = vpop.f32.mrb[116].mxu1  ;;  %v8310_v4 = vadd.f32 %v7319_v3, %v6645_v55  ;;  %v7321_v43 = vpop.f32.mrb[117].mxu0 }
 0x3d0   :  { %v4986_v63 = vpop.f32.mrb[117].mxu1  ;;  %v8758_v51 = vrot.slane %v7321_v43, 1  ;;  %v7323_v61 = vpop.f32.mrb[118].mxu0 }
 0x3d1   :  { %v10380_v23 = vsel %vm10290_vm1, %v10114_v17, 0.0  ;;  %v9436_v56 = vadd.f32 %v14433_v21, %v9205_v60  ;;  %v6198_v27 = vrot.slane %v4986_v63, 1  ;;  %v4988_v37 = vpop.f32.mrb[118].mxu1  ;;  %v7325_v29 = vpop.f32.mrb[119].mxu0 }
 0x3d2   :  { %v4990_v20 = vpop.f32.mrb[119].mxu1  ;;  %v10381_v52 = vadd.f32 %v10380_v23, %v10379_v59  ;;  %v9206_v40 = vadd.f32 %v8758_v51, %v8310_v4  ;;  %v8759_v22 = vrot.slane %v7325_v29, 1 }
 0x3d3   :  { %v9660_v31 = vmul.f32 0.2, %v9436_v56  ;;  %v6646_v13 = vadd.f32 %v6198_v27, %v4984_v32  ;;  %v6199_v35 = vrot.slane %v4990_v20, 1  ;;  %7576 = vmatmul.mubr.bf16.gmra.mrb[224].mxu0 %v16294_v16 }
 0x3d4   :  { %5239 = vmatmul.mubr.bf16.gmra.mrb[224].mxu1 %v16294_v16  ;;  %v10749_v11 = vsel %vm10290_vm1, %v10381_v52, 0.0  ;;  %v9437_v24 = vadd.f32 %v14433_v21, %v9206_v40  ;;  %7583 = vmatprep.mubr.bf16.mxu0 %v16295_v10  ;;  %v16297_v40 = vld [vmem:[#allocation176_spill] sm:$0xff] }
 0x3d5   :  { %v9884_v36 = vmax.f32 %v9436_v56, %v9660_v31  ;;  %v8311_v6 = vadd.f32 %v7323_v61, %v6646_v13  ;;  %5248 = vmatprep.mubr.bf16.mxu1 %v16295_v10  ;;  %v10750_v39 = vrot.slane %v10749_v11, 4  ;;  %v6647_v18 = vadd.f32 %v6199_v35, %v4988_v37  ;;  %v16296_v61 = vld [vmem:[#allocation68_spill] sm:$0xff] }
 0x3d6   :  { %v9661_v5 = vmul.f32 0.2, %v9437_v24  ;;  %v7329_v25 = vpop.f32.mrb[120].mxu0 }
 0x3d7   :  { %v9207_v12 = vadd.f32 %v8759_v22, %v8311_v6  ;;  %v4994_v33 = vpop.f32.mrb[120].mxu1  ;;  %v10751_v53 = vadd.f32 %v10750_v39, %v10749_v11  ;;  %v10115_v50 = vmul.f32 %v14445_v47, %v9884_v36  ;;  %v8312_v42 = vadd.f32 %v7329_v25, %v6647_v18  ;;  %v7331_v9 = vpop.f32.mrb[121].mxu0 }
 0x3d8   :  { %v4996_v44 = vpop.f32.mrb[121].mxu1  ;;  %v9885_v0 = vmax.f32 %v9437_v24, %v9661_v5  ;;  %v7333_v60 = vpop.f32.mrb[122].mxu0  ;;  %v8760_v32 = vrot.slane %v7331_v9, 1 }
 0x3d9   :  { %v9438_v55 = vadd.f32 %v14433_v21, %v9207_v12  ;;  %v6200_v59 = vrot.slane %v4996_v44, 1  ;;  %v4998_v17 = vpop.f32.mrb[122].mxu1  ;;  %v7335_v4 = vpop.f32.mrb[123].mxu0  ;;  %v10752_v63 = vrot.slane %v10751_v53, 2  ;;  %v10382_v47 = vsel %vm10290_vm1, %v10115_v50, 0.0 }
 0x3da   :  { %v5000_v3 = vpop.f32.mrb[123].mxu1  ;;  %v10116_v43 = vmul.f32 %v14452_v7, %v9885_v0  ;;  %v9208_v51 = vadd.f32 %v8760_v32, %v8312_v42  ;;  %v8761_v37 = vrot.slane %v7335_v4, 1 }
 0x3db   :  { %v9662_v23 = vmul.f32 0.2, %v9438_v55  ;;  %v6648_v56 = vadd.f32 %v6200_v59, %v4994_v33  ;;  %v6201_v27 = vrot.slane %v5000_v3, 1  ;;  %7584 = vmatmul.mubr.bf16.gmra.mrb[228].mxu0 %v16296_v61  ;;  %v10753_v20 = vadd.f32 %v10752_v63, %v10751_v53  ;;  %v16298_v3 = vld [vmem:[#allocation72_spill] sm:$0xff] }
 0x3dc   :  { %5249 = vmatmul.mubr.bf16.gmra.mrb[228].mxu1 %v16296_v61  ;;  %v10383_v29 = vsel %vm10290_vm1, %v10116_v43, 0.0  ;;  %7593 = vmatprep.mubr.bf16.mxu0 %v16297_v40  ;;  %v9439_v35 = vadd.f32 %v14433_v21, %v9208_v51 }
 0x3dd   :  { %v9886_v52 = vmax.f32 %v9438_v55, %v9662_v23  ;;  %v8313_v31 = vadd.f32 %v7333_v60, %v6648_v56  ;;  %5258 = vmatprep.mubr.bf16.mxu1 %v16297_v40  ;;  %v6649_v7 = vadd.f32 %v6201_v27, %v4998_v17  ;;  %v10384_v13 = vadd.f32 %v10383_v29, %v10382_v47 }
 0x3de   :  { %v10754_v22 = vrot.slane %v10753_v20, 1  ;;  %v7339_v24 = vpop.f32.mrb[124].mxu0  ;;  %v9663_v6 = vmul.f32 0.2, %v9439_v35 }
 0x3df   :  { %v10117_v16 = vmul.f32 %v14465_v57, %v9886_v52  ;;  %v9209_v11 = vadd.f32 %v8761_v37, %v8313_v31  ;;  %v5004_v36 = vpop.f32.mrb[124].mxu1  ;;  %v8314_v10 = vadd.f32 %v7339_v24, %v6649_v7  ;;  %v7341_v18 = vpop.f32.mrb[125].mxu0 }
 0x3e0   :  { %v5006_v39 = vpop.f32.mrb[125].mxu1  ;;  %v10755_v5 = vadd.f32 %v10754_v22, %v10753_v20  ;;  %v8762_v53 = vrot.slane %v7341_v18, 1  ;;  %v7343_v42 = vpop.f32.mrb[126].mxu0  ;;  %v9887_v9 = vmax.f32 %v9439_v35, %v9663_v6 }
 0x3e1   :  { %v10385_v12 = vsel %vm10290_vm1, %v10117_v16, 0.0  ;;  %v9440_v33 = vadd.f32 %v14433_v21, %v9209_v11  ;;  %v6202_v25 = vrot.slane %v5006_v39, 1  ;;  %v5008_v50 = vpop.f32.mrb[126].mxu1  ;;  %v7345_v0 = vpop.f32.mrb[127].mxu0 }
 0x3e2   :  { %v10386_v44 = vadd.f32 %v10385_v12, %v10384_v13  ;;  %v5009_v57 = vpop.f32.mrb[127].mxu1  ;;  %v14618_v55 = vsel %vm10973_vm7, %v10755_v5, %v14576_v1  ;;  %v9210_v17 = vadd.f32 %v8762_v53, %v8314_v10  ;;  %v10118_v32 = vmul.f32 %v14477_v45, %v9887_v9 }
 0x3e3   :  { %v9664_v59 = vmul.f32 0.2, %v9440_v33  ;;  %v6650_v60 = vadd.f32 %v6202_v25, %v5004_v36  ;;  %7594 = vmatmul.mubr.bf16.gmra.mrb[232].mxu0 %v16298_v3  ;;  %v8763_v23 = vrot.slane %v7345_v0, 1 }
 0x3e4   :  { %5259 = vmatmul.mubr.bf16.gmra.mrb[232].mxu1 %v16298_v3  ;;  %v9441_v63 = vadd.f32 %v14433_v21, %v9210_v17  ;;  %7603 = vmatprep.mubr.bf16.mxu0 %v14145_v26  ;;  %v10387_v1 = vsel %vm10290_vm1, %v10118_v32, 0.0 }
 0x3e5   :  { %v9888_v4 = vmax.f32 %v9440_v33, %v9664_v59  ;;  %v8315_v43 = vadd.f32 %v7343_v42, %v6650_v60  ;;  %5268 = vmatprep.mubr.bf16.mxu1 %v14145_v26  ;;  %v10388_v56 = vadd.f32 %v10387_v1, %v10386_v44 }
 0x3e6   :  { %v9665_v47 = vmul.f32 0.2, %v9441_v63  ;;  %v7349_v37 = vpop.f32.mrb[128].mxu0 }
 0x3e7   :  { %v10119_v27 = vmul.f32 %v14489_v62, %v9888_v4  ;;  %v9211_v45 = vadd.f32 %v8763_v23, %v8315_v43  ;;  %v5012_v51 = vpop.f32.mrb[128].mxu1  ;;  %v7350_v20 = vpop.f32.mrb[129].mxu0 }
 0x3e8   :  { %v5014_v61 = vpop.f32.mrb[129].mxu1  ;;  %v9889_v52 = vmax.f32 %v9441_v63, %v9665_v47  ;;  %v7351_v13 = vpop.f32.mrb[130].mxu0 }
 0x3e9   :  { %v10389_v29 = vsel %vm10290_vm1, %v10119_v27, 0.0  ;;  %v9442_v31 = vadd.f32 %v14433_v21, %v9211_v45  ;;  %v6203_v40 = vrot.slane %v5014_v61, 1  ;;  %v5016_v7 = vpop.f32.mrb[130].mxu1  ;;  %v7353_v22 = vpop.f32.mrb[131].mxu0 }
 0x3ea   :  { %v10390_v26 = vadd.f32 %v10389_v29, %v10388_v56  ;;  %v5018_v35 = vpop.f32.mrb[131].mxu1  ;;  %v10120_v16 = vmul.f32 %v14497_v8, %v9889_v52  ;;  %v8764_v24 = vrot.slane %v7353_v22, 1 }
 0x3eb   :  { %v9666_v62 = vmul.f32 0.2, %v9442_v31  ;;  %v6651_v11 = vadd.f32 %v6203_v40, %v5012_v51  ;;  %v6204_v36 = vrot.slane %v5018_v35, 1  ;;  %7604 = vmatmul.mubr.bf16.gmra.mrb[236].mxu0 %v14137_v19 }
 0x3ec   :  { %5269 = vmatmul.mubr.bf16.gmra.mrb[236].mxu1 %v14137_v19  ;;  %v10391_v6 = vsel %vm10290_vm1, %v10120_v16, 0.0  ;;  %7613 = vmatprep.mubr.bf16.mxu0 %v14165_v41  ;;  %v14640_v19 = vld [vmem:[%s15783_s5] ss:$0 sm:$0xff] }
 0x3ed   :  { %v9890_v10 = vmax.f32 %v9442_v31, %v9666_v62  ;;  %v8316_v21 = vadd.f32 %v7351_v13, %v6651_v11  ;;  %5276 = vmatprep.mubr.bf16.mxu1 %v14165_v41  ;;  %v6652_v39 = vadd.f32 %v6204_v36, %v5016_v7  ;;  %v10392_v18 = vadd.f32 %v10391_v6, %v10390_v26  ;;  %v14660_v36 = vld [vmem:[%s15784_s6 + $0x8] sm:$0x7f] }
 0x3ee   :  { %v7357_v33 = vpop.f32.mrb[132].mxu0 }
 0x3ef   :  { %v10121_v8 = vmul.f32 %v14508_v2, %v9890_v10  ;;  %v9212_v5 = vadd.f32 %v8764_v24, %v8316_v21  ;;  %v5022_v12 = vpop.f32.mrb[132].mxu1  ;;  %v8317_v25 = vadd.f32 %v7357_v33, %v6652_v39  ;;  %v7359_v50 = vpop.f32.mrb[133].mxu0 }
 0x3f0   :  { %v5024_v53 = vpop.f32.mrb[133].mxu1  ;;  %v8765_v9 = vrot.slane %v7359_v50, 1  ;;  %v7361_v57 = vpop.f32.mrb[134].mxu0 }
 0x3f1   :  { %v9443_v42 = vadd.f32 %v14640_v19, %v9212_v5  ;;  %v6205_v44 = vrot.slane %v5024_v53, 1  ;;  %v5026_v41 = vpop.f32.mrb[134].mxu1  ;;  %v10393_v0 = vsel %vm10290_vm1, %v10121_v8, 0.0  ;;  %v7363_v59 = vpop.f32.mrb[135].mxu0 }
 0x3f2   :  { %v5028_v2 = vpop.f32.mrb[135].mxu1  ;;  %v10394_v17 = vadd.f32 %v10393_v0, %v10392_v18  ;;  %v9213_v32 = vadd.f32 %v8765_v9, %v8317_v25  ;;  %v8766_v63 = vrot.slane %v7363_v59, 1  ;;  %v14673_v9 = vld [vmem:[%s15784_s6 + $0x10] sm:$0x7f] }
 0x3f3   :  { %v9667_v60 = vmul.f32 0.2, %v9443_v42  ;;  %v6653_v3 = vadd.f32 %v6205_v44, %v5022_v12  ;;  %v6206_v4 = vrot.slane %v5028_v2, 1  ;;  %7614 = vmatmul.mubr.bf16.gmra.mrb[240].mxu0 %v14157_v54 }
 0x3f4   :  { %5277 = vmatmul.mubr.bf16.gmra.mrb[240].mxu1 %v14157_v54  ;;  %v10756_v43 = vsel %vm10290_vm1, %v10394_v17, 0.0  ;;  %v9444_v1 = vadd.f32 %v14640_v19, %v9213_v32  ;;  %7621 = vmatprep.mubr.bf16.mxu0 %v14184_v38  ;;  %v14653_v54 = vld [vmem:[%s15784_s6] sm:$0x7f] }
 0x3f5   :  { %v9891_v23 = vmax.f32 %v9443_v42, %v9667_v60  ;;  %v8318_v56 = vadd.f32 %v7361_v57, %v6653_v3  ;;  %5286 = vmatprep.mubr.bf16.mxu1 %v14184_v38  ;;  %v10757_v27 = vrot.slane %v10756_v43, 4  ;;  %v6654_v47 = vadd.f32 %v6206_v4, %v5026_v41 }
 0x3f6   :  { %v9668_v45 = vmul.f32 0.2, %v9444_v1  ;;  %v7367_v61 = vpop.f32.mrb[136].mxu0 }
 0x3f7   :  { %v9214_v51 = vadd.f32 %v8766_v63, %v8318_v56  ;;  %v5032_v37 = vpop.f32.mrb[136].mxu1  ;;  %v10758_v20 = vadd.f32 %v10757_v27, %v10756_v43  ;;  %v10122_v29 = vmul.f32 %v14653_v54, %v9891_v23  ;;  %v8319_v52 = vadd.f32 %v7367_v61, %v6654_v47  ;;  %v7369_v40 = vpop.f32.mrb[137].mxu0 }
 0x3f8   :  { %v5034_v31 = vpop.f32.mrb[137].mxu1  ;;  %v9892_v7 = vmax.f32 %v9444_v1, %v9668_v45  ;;  %v7371_v35 = vpop.f32.mrb[138].mxu0  ;;  %v8767_v22 = vrot.slane %v7369_v40, 1 }
 0x3f9   :  { %v9445_v38 = vadd.f32 %v14640_v19, %v9214_v51  ;;  %v6207_v13 = vrot.slane %v5034_v31, 1  ;;  %v5036_v26 = vpop.f32.mrb[138].mxu1  ;;  %v7373_v62 = vpop.f32.mrb[139].mxu0  ;;  %v10759_v11 = vrot.slane %v10758_v20, 2  ;;  %v10395_v39 = vsel %vm10290_vm1, %v10122_v29, 0.0 }
 0x3fa   :  { %v5038_v16 = vpop.f32.mrb[139].mxu1  ;;  %v10123_v24 = vmul.f32 %v14660_v36, %v9892_v7  ;;  %v9215_v18 = vadd.f32 %v8767_v22, %v8319_v52  ;;  %v8768_v8 = vrot.slane %v7373_v62, 1 }
 0x3fb   :  { %v9669_v6 = vmul.f32 0.2, %v9445_v38  ;;  %v6655_v10 = vadd.f32 %v6207_v13, %v5032_v37  ;;  %v6208_v21 = vrot.slane %v5038_v16, 1  ;;  %7622 = vmatmul.mubr.bf16.gmra.mrb[244].mxu0 %v14177_v34  ;;  %v10760_v5 = vadd.f32 %v10759_v11, %v10758_v20  ;;  %v14683_v20 = vld [vmem:[%s15784_s6 + $0x18] sm:$0x7f] }
 0x3fc   :  { %5287 = vmatmul.mubr.bf16.gmra.mrb[244].mxu1 %v14177_v34  ;;  %v10396_v12 = vsel %vm10290_vm1, %v10123_v24, 0.0  ;;  %7631 = vmatprep.mubr.bf16.mxu0 %v14205_v48  ;;  %v9446_v42 = vadd.f32 %v14640_v19, %v9215_v18  ;;  %v14695_v13 = vld [vmem:[%s15784_s6 + $0x20] sm:$0x7f] }
 0x3fd   :  { %v9893_v33 = vmax.f32 %v9445_v38, %v9669_v6  ;;  %v8320_v25 = vadd.f32 %v7371_v35, %v6655_v10  ;;  %5296 = vmatprep.mubr.bf16.mxu1 %v14205_v48  ;;  %v6656_v53 = vadd.f32 %v6208_v21, %v5036_v26  ;;  %v10397_v50 = vadd.f32 %v10396_v12, %v10395_v39 }
 0x3fe   :  { %v10761_v44 = vrot.slane %v10760_v5, 1  ;;  %v7377_v0 = vpop.f32.mrb[140].mxu0  ;;  %v9670_v2 = vmul.f32 0.2, %v9446_v42 }
 0x3ff   :  { %v10124_v34 = vmul.f32 %v14673_v9, %v9893_v33  ;;  %v9216_v41 = vadd.f32 %v8768_v8, %v8320_v25  ;;  %v5042_v57 = vpop.f32.mrb[140].mxu1  ;;  %v8321_v59 = vadd.f32 %v7377_v0, %v6656_v53  ;;  %v7379_v48 = vpop.f32.mrb[141].mxu0  ;;  %v14706_v33 = vld [vmem:[%s15784_s6 + $0x28] sm:$0x7f] }
 0x400   :  { %v5044_v17 = vpop.f32.mrb[141].mxu1  ;;  %v10762_v60 = vadd.f32 %v10761_v44, %v10760_v5  ;;  %v8769_v63 = vrot.slane %v7379_v48, 1  ;;  %v7381_v23 = vpop.f32.mrb[142].mxu0  ;;  %v9894_v56 = vmax.f32 %v9446_v42, %v9670_v2  ;;  %v16299_v0 = vld [vmem:[#allocation4_spill] sm:$0xff] }
 0x401   :  { %v10398_v32 = vsel %vm10290_vm1, %v10124_v34, 0.0  ;;  %v9447_v3 = vadd.f32 %v14640_v19, %v9216_v41  ;;  %v6209_v4 = vrot.slane %v5044_v17, 1  ;;  %v5046_v43 = vpop.f32.mrb[142].mxu1  ;;  %v7383_v45 = vpop.f32.mrb[143].mxu0  ;;  %v14717_v17 = vld [vmem:[%s15784_s6 + $0x30] sm:$0x7f] }
 0x402   :  { %v10399_v1 = vadd.f32 %v10398_v32, %v10397_v50  ;;  %v5047_v27 = vpop.f32.mrb[143].mxu1  ;;  %v10976_v47 = vsel %vm10975_vm8, %v10762_v60, %v14618_v55  ;;  %v9217_v37 = vadd.f32 %v8769_v63, %v8321_v59  ;;  %v10125_v29 = vmul.f32 %v14683_v20, %v9894_v56 }
 0x403   :  { %v9671_v51 = vmul.f32 0.2, %v9447_v3  ;;  %v6657_v61 = vadd.f32 %v6209_v4, %v5042_v57  ;;  %11002 = vadd.xlane.f32.xlu0 %v10976_v47  ;;  %7632 = vmatmul.mubr.bf16.gmra.mrb[248].mxu0 %v14197_v28  ;;  %v8770_v40 = vrot.slane %v7383_v45, 1 }
 0x404   :  { %5297 = vmatmul.mubr.bf16.gmra.mrb[248].mxu1 %v14197_v28  ;;  %v9448_v31 = vadd.f32 %v14640_v19, %v9217_v37  ;;  %7641 = vmatprep.mubr.bf16.mxu0 %v14221_v58  ;;  %v10400_v7 = vsel %vm10290_vm1, %v10125_v29, 0.0 }
 0x405   :  { %v9895_v52 = vmax.f32 %v9447_v3, %v9671_v51  ;;  %v8322_v55 = vadd.f32 %v7381_v23, %v6657_v61  ;;  %5306 = vmatprep.mubr.bf16.mxu1 %v14221_v58  ;;  %v10401_v38 = vadd.f32 %v10400_v7, %v10399_v1  ;;  %v13_v58 = vstv %s15785_s7 }
 0x406   :  { %v9672_v28 = vmul.f32 0.2, %v9448_v31  ;;  %v7387_v16 = vpop.f32.mrb[144].mxu0  ;;  %14 = vst [vmem:[#allocation2] sm:$0x1] %v13_v58 }
 0x407   :  { %v10126_v26 = vmul.f32 %v14695_v13, %v9895_v52  ;;  %v9218_v35 = vadd.f32 %v8770_v40, %v8322_v55  ;;  %v5050_v22 = vpop.f32.mrb[144].mxu1  ;;  %v7388_v11 = vpop.f32.mrb[145].mxu0  ;;  %v16300_v55 = vld [vmem:[#allocation3_spill] sm:$0xff] }
 0x408   :  { %v5052_v62 = vpop.f32.mrb[145].mxu1  ;;  %v9896_v6 = vmax.f32 %v9448_v31, %v9672_v28  ;;  %v7389_v18 = vpop.f32.mrb[146].mxu0  ;;  %v16301_v28 = vld [vmem:[#allocation6_spill] sm:$0xff] }
 0x409   :  { %v10402_v24 = vsel %vm10290_vm1, %v10126_v26, 0.0  ;;  %v9449_v10 = vadd.f32 %v14640_v19, %v9218_v35  ;;  %v6210_v21 = vrot.slane %v5052_v62, 1  ;;  %v5054_v39 = vpop.f32.mrb[146].mxu1  ;;  %v7391_v12 = vpop.f32.mrb[147].mxu0 }
 0x40a   :  { %v10403_v8 = vadd.f32 %v10402_v24, %v10401_v38  ;;  %v5056_v5 = vpop.f32.mrb[147].mxu1  ;;  %v10127_v25 = vmul.f32 %v14706_v33, %v9896_v6  ;;  %v8771_v44 = vrot.slane %v7391_v12, 1 }
 0x40b   :  { %v9673_v53 = vmul.f32 0.2, %v9449_v10  ;;  %v6658_v50 = vadd.f32 %v6210_v21, %v5050_v22  ;;  %v6211_v42 = vrot.slane %v5056_v5, 1  ;;  %7642 = vmatmul.mubr.bf16.gmra.mrb[252].mxu0 %v14217_v15 }
 0x40c   :  { %5307 = vmatmul.mubr.bf16.gmra.mrb[252].mxu1 %v14217_v15  ;;  %v10404_v34 = vsel %vm10290_vm1, %v10127_v25, 0.0  ;;  %7651 = vmatprep.mubr.bf16.mxu0 %v16299_v0 }
 0x40d   :  { %v9897_v41 = vmax.f32 %v9449_v10, %v9673_v53  ;;  %v8323_v57 = vadd.f32 %v7389_v18, %v6658_v50  ;;  %5314 = vmatprep.mubr.bf16.mxu1 %v16299_v0  ;;  %v6659_v2 = vadd.f32 %v6211_v42, %v5054_v39  ;;  %v10405_v59 = vadd.f32 %v10404_v34, %v10403_v8 }
 0x40e   :  { %v7395_v15 = vpop.f32.mrb[148].mxu0 }
 0x40f   :  { %v10128_v48 = vmul.f32 %v14717_v17, %v9897_v41  ;;  %v9219_v60 = vadd.f32 %v8771_v44, %v8323_v57  ;;  %v5060_v32 = vpop.f32.mrb[148].mxu1  ;;  %v8324_v3 = vadd.f32 %v7395_v15, %v6659_v2  ;;  %v7397_v63 = vpop.f32.mrb[149].mxu0  ;;  %v16302_v57 = vld [vmem:[#allocation5_spill] sm:$0xff] }
 0x410   :  { %v5062_v4 = vpop.f32.mrb[149].mxu1  ;;  %v8772_v56 = vrot.slane %v7397_v63, 1  ;;  %v7399_v47 = vpop.f32.mrb[150].mxu0 }
 0x411   :  { %v10406_v43 = vsel %vm10290_vm1, %v10128_v48, 0.0  ;;  %v9450_v23 = vadd.f32 %v14640_v19, %v9219_v60  ;;  %v6212_v1 = vrot.slane %v5062_v4, 1  ;;  %v5064_v27 = vpop.f32.mrb[150].mxu1  ;;  %v7401_v37 = vpop.f32.mrb[151].mxu0  ;;  %v16303_v48 = vld [vmem:[#allocation8_spill] sm:$0xff] }
 0x412   :  { %v14722_v45 = vadd.f32 %v10406_v43, %v10405_v59  ;;  %v5066_v51 = vpop.f32.mrb[151].mxu1  ;;  %v9220_v29 = vadd.f32 %v8772_v56, %v8324_v3  ;;  %v8773_v26 = vrot.slane %v7401_v37, 1 }
 0x413   :  { %v9674_v61 = vmul.f32 0.2, %v9450_v23  ;;  %v6660_v52 = vadd.f32 %v6212_v1, %v5060_v32  ;;  %v6213_v31 = vrot.slane %v5066_v51, 1  ;;  %7652 = vmatmul.mubr.bf16.gmra.mrb[0].mxu0 %v16300_v55 }
 0x414   :  { %5315 = vmatmul.mubr.bf16.gmra.mrb[0].mxu1 %v16300_v55  ;;  %v9451_v7 = vadd.f32 %v14640_v19, %v9220_v29  ;;  %7659 = vmatprep.mubr.bf16.mxu0 %v16301_v28 }
 0x415   :  { %v9898_v40 = vmax.f32 %v9450_v23, %v9674_v61  ;;  %v8325_v38 = vadd.f32 %v7399_v47, %v6660_v52  ;;  %5324 = vmatprep.mubr.bf16.mxu1 %v16301_v28  ;;  %v6661_v35 = vadd.f32 %v6213_v31, %v5064_v27 }
 0x416   :  { %v9675_v22 = vmul.f32 0.2, %v9451_v7  ;;  %v7405_v11 = vpop.f32.mrb[152].mxu0 }
 0x417   :  { %v9221_v16 = vadd.f32 %v8773_v26, %v8325_v38  ;;  %v5070_v62 = vpop.f32.mrb[152].mxu1  ;;  %v8326_v58 = vadd.f32 %v7405_v11, %v6661_v35  ;;  %v7407_v6 = vpop.f32.mrb[153].mxu0  ;;  %v10129_v10 = vmul.f32 %v14653_v54, %v9898_v40 }
 0x418   :  { %v5072_v24 = vpop.f32.mrb[153].mxu1  ;;  %v9899_v21 = vmax.f32 %v9451_v7, %v9675_v22  ;;  %v7409_v8 = vpop.f32.mrb[154].mxu0  ;;  %v8774_v12 = vrot.slane %v7407_v6, 1  ;;  %v16305_v6 = vld [vmem:[#allocation10_spill] sm:$0xff] }
 0x419   :  { %v9452_v39 = vadd.f32 %v14640_v19, %v9221_v16  ;;  %v5074_v18 = vpop.f32.mrb[154].mxu1  ;;  %v6214_v5 = vrot.slane %v5072_v24, 1  ;;  %v7411_v53 = vpop.f32.mrb[155].mxu0  ;;  %v10408_v0 = vsel %vm10290_vm1, %v10129_v10, 0.0 }
 0x41a   :  { %v5076_v25 = vpop.f32.mrb[155].mxu1  ;;  %v10130_v50 = vmul.f32 %v14660_v36, %v9899_v21  ;;  %v9222_v34 = vadd.f32 %v8774_v12, %v8326_v58  ;;  %v8775_v4 = vrot.slane %v7411_v53, 1 }
 0x41b   :  { %v9676_v42 = vmul.f32 0.2, %v9452_v39  ;;  %v6215_v44 = vrot.slane %v5076_v25, 1  ;;  %v6662_v41 = vadd.f32 %v6214_v5, %v5070_v62  ;;  %7660 = vmatmul.mubr.bf16.gmra.mrb[4].mxu0 %v16302_v57  ;;  %v16304_v62 = vld [vmem:[#allocation7_spill] sm:$0xff] }
 0x41c   :  { %5325 = vmatmul.mubr.bf16.gmra.mrb[4].mxu1 %v16302_v57  ;;  %v10409_v2 = vsel %vm10290_vm1, %v10130_v50, 0.0  ;;  %7669 = vmatprep.mubr.bf16.mxu0 %v16303_v48  ;;  %v9453_v15 = vadd.f32 %v14640_v19, %v9222_v34 }
 0x41d   :  { %v9900_v59 = vmax.f32 %v9452_v39, %v9676_v42  ;;  %5334 = vmatprep.mubr.bf16.mxu1 %v16303_v48  ;;  %v6663_v60 = vadd.f32 %v6215_v44, %v5074_v18  ;;  %v10410_v32 = vadd.f32 %v10409_v2, %v10408_v0  ;;  %v8327_v3 = vadd.f32 %v7409_v8, %v6662_v41 }
 0x41e   :  { %v7415_v23 = vpop.f32.mrb[156].mxu0  ;;  %v9677_v1 = vmul.f32 0.2, %v9453_v15  ;;  %v10763_v39 = vsel %vm10290_vm1, %v14722_v45, 0.0 }
 0x41f   :  { %v10131_v63 = vmul.f32 %v14673_v9, %v9900_v59  ;;  %v5080_v43 = vpop.f32.mrb[156].mxu1  ;;  %v9223_v56 = vadd.f32 %v8775_v4, %v8327_v3  ;;  %v8328_v27 = vadd.f32 %v7415_v23, %v6663_v60  ;;  %v7417_v51 = vpop.f32.mrb[157].mxu0  ;;  %v10764_v2 = vrot.slane %v10763_v39, 4 }
 0x420   :  { %v5082_v47 = vpop.f32.mrb[157].mxu1  ;;  %v8776_v29 = vrot.slane %v7417_v51, 1  ;;  %v7419_v31 = vpop.f32.mrb[158].mxu0  ;;  %v9901_v40 = vmax.f32 %v9453_v15, %v9677_v1 }
 0x421   :  { %v10411_v37 = vsel %vm10290_vm1, %v10131_v63, 0.0  ;;  %v6216_v61 = vrot.slane %v5082_v47, 1  ;;  %v5084_v52 = vpop.f32.mrb[158].mxu1  ;;  %v9454_v7 = vadd.f32 %v14640_v19, %v9223_v56  ;;  %v7421_v26 = vpop.f32.mrb[159].mxu0  ;;  %v16306_v63 = vld [vmem:[#allocation9_spill] sm:$0xff]  ;;  %v10765_v47 = vadd.f32 %v10764_v2, %v10763_v39 }
 0x422   :  { %v10412_v55 = vadd.f32 %v10411_v37, %v10410_v32  ;;  %v5085_v38 = vpop.f32.mrb[159].mxu1  ;;  %v9224_v28 = vadd.f32 %v8776_v29, %v8328_v27  ;;  %v10132_v22 = vmul.f32 %v14683_v20, %v9901_v40  ;;  %v8777_v24 = vrot.slane %v7421_v26, 1  ;;  %v16307_v27 = vld [vmem:[#allocation12_spill] sm:$0xff] }
 0x423   :  { %v6664_v35 = vadd.f32 %v6216_v61, %v5080_v43  ;;  %v9678_v16 = vmul.f32 0.2, %v9454_v7  ;;  %7670 = vmatmul.mubr.bf16.gmra.mrb[8].mxu0 %v16304_v62 }
 0x424   :  { %5335 = vmatmul.mubr.bf16.gmra.mrb[8].mxu1 %v16304_v62  ;;  %v9455_v11 = vadd.f32 %v14640_v19, %v9224_v28  ;;  %7679 = vmatprep.mubr.bf16.mxu0 %v16305_v6  ;;  %v10413_v10 = vsel %vm10290_vm1, %v10132_v22, 0.0  ;;  %v10766_v62 = vrot.slane %v10765_v47, 2 }
 0x425   :  { %v8329_v58 = vadd.f32 %v7419_v31, %v6664_v35  ;;  %5344 = vmatprep.mubr.bf16.mxu1 %v16305_v6  ;;  %v9902_v21 = vmax.f32 %v9454_v7, %v9678_v16  ;;  %v10414_v18 = vadd.f32 %v10413_v10, %v10412_v55 }
 0x426   :  { %v9679_v8 = vmul.f32 0.2, %v9455_v11  ;;  %v7425_v25 = vpop.f32.mrb[160].mxu0 }
 0x427   :  { %v9225_v5 = vadd.f32 %v8777_v24, %v8329_v58  ;;  %v5088_v12 = vpop.f32.mrb[160].mxu1  ;;  %v10133_v53 = vmul.f32 %v14695_v13, %v9902_v21  ;;  %v7426_v42 = vpop.f32.mrb[161].mxu0 }
 0x428   :  { %v5090_v50 = vpop.f32.mrb[161].mxu1  ;;  %v9903_v44 = vmax.f32 %v9455_v11, %v9679_v8  ;;  %v7427_v0 = vpop.f32.mrb[162].mxu0  ;;  %v16309_v42 = vld [vmem:[#allocation14_spill] sm:$0xff] }
 0x429   :  { %v9456_v34 = vadd.f32 %v14640_v19, %v9225_v5  ;;  %v6217_v41 = vrot.slane %v5090_v50, 1  ;;  %v5092_v57 = vpop.f32.mrb[162].mxu1  ;;  %v10415_v59 = vsel %vm10290_vm1, %v10133_v53, 0.0  ;;  %v7429_v45 = vpop.f32.mrb[163].mxu0  ;;  %v16308_v5 = vld [vmem:[#allocation11_spill] sm:$0xff] }
 0x42a   :  { %v5094_v48 = vpop.f32.mrb[163].mxu1  ;;  %v10416_v60 = vadd.f32 %v10415_v59, %v10414_v18  ;;  %v10134_v32 = vmul.f32 %v14706_v33, %v9903_v44  ;;  %v8778_v56 = vrot.slane %v7429_v45, 1  ;;  %v10767_v44 = vadd.f32 %v10766_v62, %v10765_v47 }
 0x42b   :  { %v9680_v15 = vmul.f32 0.2, %v9456_v34  ;;  %v6665_v3 = vadd.f32 %v6217_v41, %v5088_v12  ;;  %v6218_v4 = vrot.slane %v5094_v48, 1  ;;  %7680 = vmatmul.mubr.bf16.gmra.mrb[12].mxu0 %v16306_v63 }
 0x42c   :  { %5345 = vmatmul.mubr.bf16.gmra.mrb[12].mxu1 %v16306_v63  ;;  %v10417_v43 = vsel %vm10290_vm1, %v10134_v32, 0.0  ;;  %7689 = vmatprep.mubr.bf16.mxu0 %v16307_v27  ;;  %v10768_v47 = vrot.slane %v10767_v44, 1 }
 0x42d   :  { %v9904_v23 = vmax.f32 %v9456_v34, %v9680_v15  ;;  %v8330_v1 = vadd.f32 %v7427_v0, %v6665_v3  ;;  %5352 = vmatprep.mubr.bf16.mxu1 %v16307_v27  ;;  %v10418_v51 = vadd.f32 %v10417_v43, %v10416_v60  ;;  %v6666_v37 = vadd.f32 %v6218_v4, %v5092_v57 }
 0x42e   :  { %v7433_v31 = vpop.f32.mrb[164].mxu0 }
 0x42f   :  { %v10135_v61 = vmul.f32 %v14717_v17, %v9904_v23  ;;  %v9226_v29 = vadd.f32 %v8778_v56, %v8330_v1  ;;  %v5098_v52 = vpop.f32.mrb[164].mxu1  ;;  %v8331_v55 = vadd.f32 %v7433_v31, %v6666_v37  ;;  %v7435_v7 = vpop.f32.mrb[165].mxu0 }
 0x430   :  { %v5100_v40 = vpop.f32.mrb[165].mxu1  ;;  %v8779_v35 = vrot.slane %v7435_v7, 1  ;;  %v7437_v16 = vpop.f32.mrb[166].mxu0 }
 0x431   :  { %v10419_v38 = vsel %vm10290_vm1, %v10135_v61, 0.0  ;;  %v9457_v26 = vadd.f32 %v14640_v19, %v9226_v29  ;;  %v6219_v28 = vrot.slane %v5100_v40, 1  ;;  %v5102_v22 = vpop.f32.mrb[166].mxu1  ;;  %v7439_v24 = vpop.f32.mrb[167].mxu0  ;;  %v16310_v40 = vld [vmem:[#allocation13_spill] sm:$0xff] }
 0x432   :  { %v10420_v11 = vadd.f32 %v10419_v38, %v10418_v51  ;;  %v5104_v58 = vpop.f32.mrb[167].mxu1  ;;  %v9227_v10 = vadd.f32 %v8779_v35, %v8331_v55  ;;  %v8780_v8 = vrot.slane %v7439_v24, 1 }
 0x433   :  { %v9681_v6 = vmul.f32 0.2, %v9457_v26  ;;  %v6667_v21 = vadd.f32 %v6219_v28, %v5098_v52  ;;  %v6220_v39 = vrot.slane %v5104_v58, 1  ;;  %7690 = vmatmul.mubr.bf16.gmra.mrb[16].mxu0 %v16308_v5 }
 0x434   :  { %v10770_v18 = vsel %vm10290_vm1, %v10420_v11, 0.0  ;;  %5353 = vmatmul.mubr.bf16.gmra.mrb[16].mxu1 %v16308_v5  ;;  %v9458_v53 = vadd.f32 %v14640_v19, %v9227_v10  ;;  %7697 = vmatprep.mubr.bf16.mxu0 %v16309_v42  ;;  %v10769_v10 = vadd.f32 %v10768_v47, %v10767_v44 }
 0x435   :  { %v10771_v12 = vrot.slane %v10770_v18, 4  ;;  %v9905_v25 = vmax.f32 %v9457_v26, %v9681_v6  ;;  %v8332_v50 = vadd.f32 %v7437_v16, %v6667_v21  ;;  %5362 = vmatprep.mubr.bf16.mxu1 %v16309_v42  ;;  %v6668_v34 = vadd.f32 %v6220_v39, %v5102_v22  ;;  %v16311_v26 = vld [vmem:[#allocation16_spill] sm:$0xff] }
 0x436   :  { %v9682_v57 = vmul.f32 0.2, %v9458_v53  ;;  %v7443_v59 = vpop.f32.mrb[168].mxu0 }
 0x437   :  { %v10772_v41 = vadd.f32 %v10771_v12, %v10770_v18  ;;  %v9228_v0 = vadd.f32 %v8780_v8, %v8332_v50  ;;  %v5108_v2 = vpop.f32.mrb[168].mxu1  ;;  %v10136_v48 = vmul.f32 %v14653_v54, %v9905_v25  ;;  %v8333_v45 = vadd.f32 %v7443_v59, %v6668_v34  ;;  %v7445_v32 = vpop.f32.mrb[169].mxu0 }
 0x438   :  { %v5110_v60 = vpop.f32.mrb[169].mxu1  ;;  %v9906_v3 = vmax.f32 %v9458_v53, %v9682_v57  ;;  %v7447_v43 = vpop.f32.mrb[170].mxu0  ;;  %v8781_v1 = vrot.slane %v7445_v32, 1 }
 0x439   :  { %v10773_v15 = vrot.slane %v10772_v41, 2  ;;  %v9459_v4 = vadd.f32 %v14640_v19, %v9228_v0  ;;  %v5112_v63 = vpop.f32.mrb[170].mxu1  ;;  %v6221_v23 = vrot.slane %v5110_v60, 1  ;;  %v7449_v27 = vpop.f32.mrb[171].mxu0  ;;  %v10421_v52 = vsel %vm10290_vm1, %v10136_v48, 0.0 }
 0x43a   :  { %v5114_v56 = vpop.f32.mrb[171].mxu1  ;;  %v10137_v37 = vmul.f32 %v14660_v36, %v9906_v3  ;;  %v9229_v31 = vadd.f32 %v8781_v1, %v8333_v45  ;;  %v8782_v11 = vrot.slane %v7449_v27, 1 }
 0x43b   :  { %v10774_v51 = vadd.f32 %v10773_v15, %v10772_v41  ;;  %v9683_v61 = vmul.f32 0.2, %v9459_v4  ;;  %v6222_v29 = vrot.slane %v5114_v56, 1  ;;  %v6669_v55 = vadd.f32 %v6221_v23, %v5108_v2  ;;  %7698 = vmatmul.mubr.bf16.gmra.mrb[20].mxu0 %v16310_v40  ;;  %v16312_v15 = vld [vmem:[#allocation15_spill] sm:$0xff] }
 0x43c   :  { %5363 = vmatmul.mubr.bf16.gmra.mrb[20].mxu1 %v16310_v40  ;;  %v10422_v7 = vsel %vm10290_vm1, %v10137_v37, 0.0  ;;  %7707 = vmatprep.mubr.bf16.mxu0 %v16311_v26  ;;  %v9460_v16 = vadd.f32 %v14640_v19, %v9229_v31 }
 0x43d   :  { %v9907_v38 = vmax.f32 %v9459_v4, %v9683_v61  ;;  %5372 = vmatprep.mubr.bf16.mxu1 %v16311_v26  ;;  %v6670_v28 = vadd.f32 %v6222_v29, %v5112_v63  ;;  %v10775_v35 = vrot.slane %v10774_v51, 1  ;;  %v10423_v22 = vadd.f32 %v10422_v7, %v10421_v52 }
 0x43e   :  { %v8334_v62 = vadd.f32 %v7447_v43, %v6669_v55  ;;  %v7453_v6 = vpop.f32.mrb[172].mxu0  ;;  %v9684_v39 = vmul.f32 0.2, %v9460_v16  ;;  %v16313_v43 = vld [vmem:[#allocation19_spill] sm:$0xff] }
 0x43f   :  { %v10138_v58 = vmul.f32 %v14673_v9, %v9907_v38  ;;  %v5118_v24 = vpop.f32.mrb[172].mxu1  ;;  %v10776_v21 = vadd.f32 %v10775_v35, %v10774_v51  ;;  %v8335_v8 = vadd.f32 %v7453_v6, %v6670_v28  ;;  %v7455_v12 = vpop.f32.mrb[173].mxu0 }
 0x440   :  { %v9230_v18 = vadd.f32 %v8782_v11, %v8334_v62  ;;  %v5120_v5 = vpop.f32.mrb[173].mxu1  ;;  %v8783_v50 = vrot.slane %v7455_v12, 1  ;;  %v7457_v34 = vpop.f32.mrb[174].mxu0  ;;  %v9908_v0 = vmax.f32 %v9460_v16, %v9684_v39 }
 0x441   :  { %v10424_v25 = vsel %vm10290_vm1, %v10138_v58, 0.0  ;;  %v6223_v53 = vrot.slane %v5120_v5, 1  ;;  %v5122_v42 = vpop.f32.mrb[174].mxu1  ;;  %v14782_v41 = vsel %vm10963_vm2, %v10776_v21, %v10769_v10  ;;  %v7459_v59 = vpop.f32.mrb[175].mxu0 }
 0x442   :  { %v10425_v57 = vadd.f32 %v10424_v25, %v10423_v22  ;;  %v9461_v2 = vadd.f32 %v14640_v19, %v9230_v18  ;;  %v5123_v44 = vpop.f32.mrb[175].mxu1  ;;  %v9231_v48 = vadd.f32 %v8783_v50, %v8335_v8  ;;  %v10139_v60 = vmul.f32 %v14683_v20, %v9908_v0  ;;  %v16315_v18 = vld [vmem:[#allocation23_spill] sm:$0xff] }
 0x443   :  { %v6671_v45 = vadd.f32 %v6223_v53, %v5118_v24  ;;  %7708 = vmatmul.mubr.bf16.gmra.mrb[24].mxu0 %v16312_v15  ;;  %v8784_v63 = vrot.slane %v7459_v59, 1  ;;  %v16314_v24 = vld [vmem:[#allocation18_spill] sm:$0xff] }
 0x444   :  { %v9685_v32 = vmul.f32 0.2, %v9461_v2  ;;  %5373 = vmatmul.mubr.bf16.gmra.mrb[24].mxu1 %v16312_v15  ;;  %v9462_v3 = vadd.f32 %v14640_v19, %v9231_v48  ;;  %7717 = vmatprep.mubr.bf16.mxu0 %v16313_v43  ;;  %v10426_v23 = vsel %vm10290_vm1, %v10139_v60, 0.0 }
 0x445   :  { %v8336_v4 = vadd.f32 %v7457_v34, %v6671_v45  ;;  %5382 = vmatprep.mubr.bf16.mxu1 %v16313_v43  ;;  %v10427_v56 = vadd.f32 %v10426_v23, %v10425_v57 }
 0x446   :  { %v9909_v1 = vmax.f32 %v9461_v2, %v9685_v32  ;;  %v9686_v27 = vmul.f32 0.2, %v9462_v3  ;;  %v7463_v37 = vpop.f32.mrb[176].mxu0 }
 0x447   :  { %v9232_v47 = vadd.f32 %v8784_v63, %v8336_v4  ;;  %v5126_v51 = vpop.f32.mrb[176].mxu1  ;;  %v7464_v52 = vpop.f32.mrb[177].mxu0 }
 0x448   :  { %v10140_v61 = vmul.f32 %v14695_v13, %v9909_v1  ;;  %v5128_v29 = vpop.f32.mrb[177].mxu1  ;;  %v9910_v31 = vmax.f32 %v9462_v3, %v9686_v27  ;;  %v7465_v38 = vpop.f32.mrb[178].mxu0 }
 0x449   :  { %v9463_v55 = vadd.f32 %v14640_v19, %v9232_v47  ;;  %v6224_v40 = vrot.slane %v5128_v29, 1  ;;  %v5130_v7 = vpop.f32.mrb[178].mxu1  ;;  %v7467_v35 = vpop.f32.mrb[179].mxu0 }
 0x44a   :  { %v10428_v26 = vsel %vm10290_vm1, %v10140_v61, 0.0  ;;  %v5132_v28 = vpop.f32.mrb[179].mxu1  ;;  %v10141_v16 = vmul.f32 %v14706_v33, %v9910_v31  ;;  %v8785_v39 = vrot.slane %v7467_v35, 1  ;;  %v16317_v61 = vld [vmem:[#allocation27_spill] sm:$0xff] }
 0x44b   :  { %v10429_v22 = vadd.f32 %v10428_v26, %v10427_v56  ;;  %v9687_v62 = vmul.f32 0.2, %v9463_v55  ;;  %v6672_v11 = vadd.f32 %v6224_v40, %v5126_v51  ;;  %v6225_v58 = vrot.slane %v5132_v28, 1  ;;  %7718 = vmatmul.mubr.bf16.gmra.mrb[28].mxu0 %v16314_v24  ;;  %v16316_v56 = vld [vmem:[#allocation21_spill] sm:$0xff] }
 0x44c   :  { %5383 = vmatmul.mubr.bf16.gmra.mrb[28].mxu1 %v16314_v24  ;;  %v10430_v6 = vsel %vm10290_vm1, %v10141_v16, 0.0  ;;  %7727 = vmatprep.mubr.bf16.mxu0 %v16315_v18 }
 0x44d   :  { %v9911_v10 = vmax.f32 %v9463_v55, %v9687_v62  ;;  %v8337_v21 = vadd.f32 %v7465_v38, %v6672_v11  ;;  %5390 = vmatprep.mubr.bf16.mxu1 %v16315_v18  ;;  %v10431_v8 = vadd.f32 %v10430_v6, %v10429_v22  ;;  %v6673_v5 = vadd.f32 %v6225_v58, %v5130_v7 }
 0x44e   :  { %v7471_v50 = vpop.f32.mrb[180].mxu0 }
 0x44f   :  { %v10142_v12 = vmul.f32 %v14717_v17, %v9911_v10  ;;  %v9233_v25 = vadd.f32 %v8785_v39, %v8337_v21  ;;  %v5136_v53 = vpop.f32.mrb[180].mxu1  ;;  %v8338_v42 = vadd.f32 %v7471_v50, %v6673_v5  ;;  %v7473_v57 = vpop.f32.mrb[181].mxu0 }
 0x450   :  { %v5138_v34 = vpop.f32.mrb[181].mxu1  ;;  %v8786_v59 = vrot.slane %v7473_v57, 1  ;;  %v7475_v45 = vpop.f32.mrb[182].mxu0  ;;  %v16319_v57 = vld [vmem:[#allocation31_spill] sm:$0xff] }
 0x451   :  { %v10432_v0 = vsel %vm10290_vm1, %v10142_v12, 0.0  ;;  %v9464_v2 = vadd.f32 %v14640_v19, %v9233_v25  ;;  %v6226_v44 = vrot.slane %v5138_v34, 1  ;;  %v5140_v48 = vpop.f32.mrb[182].mxu1  ;;  %v7477_v15 = vpop.f32.mrb[183].mxu0  ;;  %v16318_v25 = vld [vmem:[#allocation25_spill] sm:$0xff] }
 0x452   :  { %v10433_v60 = vadd.f32 %v10432_v0, %v10431_v8  ;;  %v5142_v32 = vpop.f32.mrb[183].mxu1  ;;  %v9234_v4 = vadd.f32 %v8786_v59, %v8338_v42  ;;  %v8787_v1 = vrot.slane %v7477_v15, 1 }
 0x453   :  { %v9688_v3 = vmul.f32 0.2, %v9464_v2  ;;  %v6674_v63 = vadd.f32 %v6226_v44, %v5136_v53  ;;  %v6227_v43 = vrot.slane %v5142_v32, 1  ;;  %7728 = vmatmul.mubr.bf16.gmra.mrb[32].mxu0 %v16316_v56 }
 0x454   :  { %v10777_v23 = vsel %vm10290_vm1, %v10433_v60, 0.0  ;;  %5391 = vmatmul.mubr.bf16.gmra.mrb[32].mxu1 %v16316_v56  ;;  %v9465_v51 = vadd.f32 %v14640_v19, %v9234_v4  ;;  %7735 = vmatprep.mubr.bf16.mxu0 %v16317_v61 }
 0x455   :  { %v10778_v27 = vrot.slane %v10777_v23, 4  ;;  %v9912_v47 = vmax.f32 %v9464_v2, %v9688_v3  ;;  %v8339_v37 = vadd.f32 %v7475_v45, %v6674_v63  ;;  %5400 = vmatprep.mubr.bf16.mxu1 %v16317_v61  ;;  %v6675_v29 = vadd.f32 %v6227_v43, %v5140_v48 }
 0x456   :  { %v9689_v31 = vmul.f32 0.2, %v9465_v51  ;;  %v7481_v7 = vpop.f32.mrb[184].mxu0 }
 0x457   :  { %v10779_v52 = vadd.f32 %v10778_v27, %v10777_v23  ;;  %v9235_v55 = vadd.f32 %v8787_v1, %v8339_v37  ;;  %v5146_v40 = vpop.f32.mrb[184].mxu1  ;;  %v10143_v38 = vmul.f32 %v14653_v54, %v9912_v47  ;;  %v8340_v26 = vadd.f32 %v7481_v7, %v6675_v29  ;;  %v7483_v35 = vpop.f32.mrb[185].mxu0 }
 0x458   :  { %v5148_v28 = vpop.f32.mrb[185].mxu1  ;;  %v9913_v16 = vmax.f32 %v9465_v51, %v9689_v31  ;;  %v7485_v58 = vpop.f32.mrb[186].mxu0  ;;  %v8788_v6 = vrot.slane %v7483_v35, 1 }
 0x459   :  { %v10780_v22 = vrot.slane %v10779_v52, 2  ;;  %v9466_v62 = vadd.f32 %v14640_v19, %v9235_v55  ;;  %v5150_v11 = vpop.f32.mrb[186].mxu1  ;;  %v6228_v24 = vrot.slane %v5148_v28, 1  ;;  %v7487_v21 = vpop.f32.mrb[187].mxu0  ;;  %v10434_v5 = vsel %vm10290_vm1, %v10143_v38, 0.0  ;;  %v16320_v38 = vld [vmem:[#allocation29_spill] sm:$0xff] }
 0x45a   :  { %v5152_v10 = vpop.f32.mrb[187].mxu1  ;;  %v10144_v39 = vmul.f32 %v14660_v36, %v9913_v16  ;;  %v9236_v54 = vadd.f32 %v8788_v6, %v8340_v26  ;;  %v8789_v34 = vrot.slane %v7487_v21, 1 }
 0x45b   :  { %v9690_v18 = vmul.f32 0.2, %v9466_v62  ;;  %v6229_v8 = vrot.slane %v5152_v10, 1  ;;  %v6676_v12 = vadd.f32 %v6228_v24, %v5146_v40  ;;  %7736 = vmatmul.mubr.bf16.gmra.mrb[36].mxu0 %v16318_v25  ;;  %v10781_v53 = vadd.f32 %v10780_v22, %v10779_v52  ;;  %v16321_v22 = vld [vmem:[#allocation35_spill] sm:$0xff] }
 0x45c   :  { %5401 = vmatmul.mubr.bf16.gmra.mrb[36].mxu1 %v16318_v25  ;;  %v10435_v50 = vsel %vm10290_vm1, %v10144_v39, 0.0  ;;  %7745 = vmatprep.mubr.bf16.mxu0 %v16319_v57  ;;  %v9467_v2 = vadd.f32 %v14640_v19, %v9236_v54 }
 0x45d   :  { %v9914_v42 = vmax.f32 %v9466_v62, %v9690_v18  ;;  %5410 = vmatprep.mubr.bf16.mxu1 %v16319_v57  ;;  %v6677_v36 = vadd.f32 %v6229_v8, %v5150_v11  ;;  %v10436_v0 = vadd.f32 %v10435_v50, %v10434_v5  ;;  %v8341_v44 = vadd.f32 %v7485_v58, %v6676_v12 }
 0x45e   :  { %v10782_v59 = vrot.slane %v10781_v53, 1  ;;  %v7491_v60 = vpop.f32.mrb[188].mxu0  ;;  %v9691_v32 = vmul.f32 0.2, %v9467_v2 }
 0x45f   :  { %v10145_v48 = vmul.f32 %v14673_v9, %v9914_v42  ;;  %v5156_v45 = vpop.f32.mrb[188].mxu1  ;;  %v9237_v15 = vadd.f32 %v8789_v34, %v8341_v44  ;;  %v8342_v3 = vadd.f32 %v7491_v60, %v6677_v36  ;;  %v7493_v63 = vpop.f32.mrb[189].mxu0 }
 0x460   :  { %v5158_v4 = vpop.f32.mrb[189].mxu1  ;;  %v10783_v43 = vadd.f32 %v10782_v59, %v10781_v53  ;;  %v8790_v56 = vrot.slane %v7493_v63, 1  ;;  %v7495_v47 = vpop.f32.mrb[190].mxu0  ;;  %v9915_v37 = vmax.f32 %v9467_v2, %v9691_v32  ;;  %v16323_v59 = vld [vmem:[#allocation39_spill] sm:$0xff] }
 0x461   :  { %v10437_v23 = vsel %vm10290_vm1, %v10145_v48, 0.0  ;;  %v6230_v1 = vrot.slane %v5158_v4, 1  ;;  %v5160_v27 = vpop.f32.mrb[190].mxu1  ;;  %v9468_v61 = vadd.f32 %v14640_v19, %v9237_v15  ;;  %v7497_v9 = vpop.f32.mrb[191].mxu0 }
 0x462   :  { %v10438_v51 = vadd.f32 %v10437_v23, %v10436_v0  ;;  %v5161_v29 = vpop.f32.mrb[191].mxu1  ;;  %v14825_v52 = vsel %vm10965_vm3, %v10783_v43, %v14782_v41  ;;  %v9238_v31 = vadd.f32 %v8790_v56, %v8342_v3  ;;  %v10146_v40 = vmul.f32 %v14683_v20, %v9915_v37  ;;  %v16322_v0 = vld [vmem:[#allocation33_spill] sm:$0xff]  ;;  %v14848_v23 = vld [vmem:[%s15783_s5] ss:$0 sm:$0xff] }
 0x463   :  { %v6678_v55 = vadd.f32 %v6230_v1, %v5156_v45  ;;  %v9692_v7 = vmul.f32 0.2, %v9468_v61  ;;  %7746 = vmatmul.mubr.bf16.gmra.mrb[40].mxu0 %v16320_v38  ;;  %v8791_v35 = vrot.slane %v7497_v9, 1 }
 0x464   :  { %5411 = vmatmul.mubr.bf16.gmra.mrb[40].mxu1 %v16320_v38  ;;  %v9469_v26 = vadd.f32 %v14640_v19, %v9238_v31  ;;  %7755 = vmatprep.mubr.bf16.mxu0 %v16321_v22  ;;  %v10439_v41 = vsel %vm10290_vm1, %v10146_v40, 0.0  ;;  %v16324_v38 = vld [vmem:[#allocation37_spill] sm:$0xff] }
 0x465   :  { %v8343_v28 = vadd.f32 %v7495_v47, %v6678_v55  ;;  %5420 = vmatprep.mubr.bf16.mxu1 %v16321_v22  ;;  %v9916_v16 = vmax.f32 %v9468_v61, %v9692_v7  ;;  %v10440_v62 = vadd.f32 %v10439_v41, %v10438_v51  ;;  %v16325_v41 = vld [vmem:[#allocation43_spill] sm:$0xff] }
 0x466   :  { %v9693_v11 = vmul.f32 0.2, %v9469_v26  ;;  %v7501_v24 = vpop.f32.mrb[192].mxu0 }
 0x467   :  { %v9239_v58 = vadd.f32 %v8791_v35, %v8343_v28  ;;  %v5164_v20 = vpop.f32.mrb[192].mxu1  ;;  %v10147_v6 = vmul.f32 %v14695_v13, %v9916_v16  ;;  %v7502_v21 = vpop.f32.mrb[193].mxu0 }
 0x468   :  { %v5166_v10 = vpop.f32.mrb[193].mxu1  ;;  %v9917_v39 = vmax.f32 %v9469_v26, %v9693_v11  ;;  %v7503_v54 = vpop.f32.mrb[194].mxu0 }
 0x469   :  { %v9470_v18 = vadd.f32 %v14640_v19, %v9239_v58  ;;  %v6231_v8 = vrot.slane %v5166_v10, 1  ;;  %v5168_v5 = vpop.f32.mrb[194].mxu1  ;;  %v10441_v12 = vsel %vm10290_vm1, %v10147_v6, 0.0  ;;  %v7505_v53 = vpop.f32.mrb[195].mxu0  ;;  %v14860_v6 = vld [vmem:[%s15784_s6] sm:$0x7f] }
 0x46a   :  { %v5170_v25 = vpop.f32.mrb[195].mxu1  ;;  %v10442_v50 = vadd.f32 %v10441_v12, %v10440_v62  ;;  %v10148_v42 = vmul.f32 %v14706_v33, %v9917_v39  ;;  %v8792_v44 = vrot.slane %v7505_v53, 1 }
 0x46b   :  { %v9694_v34 = vmul.f32 0.2, %v9470_v18  ;;  %v6679_v57 = vadd.f32 %v6231_v8, %v5164_v20  ;;  %v6232_v36 = vrot.slane %v5170_v25, 1  ;;  %7756 = vmatmul.mubr.bf16.gmra.mrb[44].mxu0 %v16322_v0 }
 0x46c   :  { %5421 = vmatmul.mubr.bf16.gmra.mrb[44].mxu1 %v16322_v0  ;;  %v10443_v13 = vsel %vm10290_vm1, %v10148_v42, 0.0  ;;  %7765 = vmatprep.mubr.bf16.mxu0 %v16323_v59 }
 0x46d   :  { %v9918_v19 = vmax.f32 %v9470_v18, %v9694_v34  ;;  %v8344_v2 = vadd.f32 %v7503_v54, %v6679_v57  ;;  %5428 = vmatprep.mubr.bf16.mxu1 %v16323_v59  ;;  %v10444_v48 = vadd.f32 %v10443_v13, %v10442_v50  ;;  %v6680_v45 = vadd.f32 %v6232_v36, %v5168_v5  ;;  %v14867_v57 = vld [vmem:[%s15784_s6 + $0x8] sm:$0x7f] }
 0x46e   :  { %v7509_v15 = vpop.f32.mrb[196].mxu0 }
 0x46f   :  { %v10149_v33 = vmul.f32 %v14717_v17, %v9918_v19  ;;  %v9240_v60 = vadd.f32 %v8792_v44, %v8344_v2  ;;  %v5174_v32 = vpop.f32.mrb[196].mxu1  ;;  %v8345_v3 = vadd.f32 %v7509_v15, %v6680_v45  ;;  %v7511_v63 = vpop.f32.mrb[197].mxu0  ;;  %v16327_v15 = vld [vmem:[#allocation47_spill] sm:$0xff] }
 0x470   :  { %v5176_v4 = vpop.f32.mrb[197].mxu1  ;;  %v8793_v27 = vrot.slane %v7511_v63, 1  ;;  %v7513_v51 = vpop.f32.mrb[198].mxu0 }
 0x471   :  { %v10445_v43 = vsel %vm10290_vm1, %v10149_v33, 0.0  ;;  %v9471_v1 = vadd.f32 %v14848_v23, %v9240_v60  ;;  %v6233_v56 = vrot.slane %v5176_v4, 1  ;;  %v5178_v47 = vpop.f32.mrb[198].mxu1  ;;  %v7515_v61 = vpop.f32.mrb[199].mxu0 }
 0x472   :  { %v10446_v17 = vadd.f32 %v10445_v43, %v10444_v48  ;;  %v5180_v37 = vpop.f32.mrb[199].mxu1  ;;  %v9241_v9 = vadd.f32 %v8793_v27, %v8345_v3  ;;  %v8794_v7 = vrot.slane %v7515_v61, 1  ;;  %v16326_v48 = vld [vmem:[#allocation41_spill] sm:$0xff] }
 0x473   :  { %v9695_v29 = vmul.f32 0.2, %v9471_v1  ;;  %v6681_v31 = vadd.f32 %v6233_v56, %v5174_v32  ;;  %v6234_v55 = vrot.slane %v5180_v37, 1  ;;  %7766 = vmatmul.mubr.bf16.gmra.mrb[48].mxu0 %v16324_v38 }
 0x474   :  { %v10784_v40 = vsel %vm10290_vm1, %v10446_v17, 0.0  ;;  %5429 = vmatmul.mubr.bf16.gmra.mrb[48].mxu1 %v16324_v38  ;;  %v9472_v35 = vadd.f32 %v14848_v23, %v9241_v9  ;;  %7773 = vmatprep.mubr.bf16.mxu0 %v16325_v41 }
 0x475   :  { %v10785_v26 = vrot.slane %v10784_v40, 4  ;;  %v9919_v28 = vmax.f32 %v9471_v1, %v9695_v29  ;;  %v8346_v22 = vadd.f32 %v7513_v51, %v6681_v31  ;;  %5438 = vmatprep.mubr.bf16.mxu1 %v16325_v41  ;;  %v6682_v16 = vadd.f32 %v6234_v55, %v5178_v47  ;;  %v14880_v1 = vld [vmem:[%s15784_s6 + $0x10] sm:$0x7f] }
 0x476   :  { %v9696_v11 = vmul.f32 0.2, %v9472_v35  ;;  %v7519_v24 = vpop.f32.mrb[200].mxu0 }
 0x477   :  { %v10786_v62 = vadd.f32 %v10785_v26, %v10784_v40  ;;  %v9242_v58 = vadd.f32 %v8794_v7, %v8346_v22  ;;  %v5184_v20 = vpop.f32.mrb[200].mxu1  ;;  %v10150_v10 = vmul.f32 %v14860_v6, %v9919_v28  ;;  %v8347_v21 = vadd.f32 %v7519_v24, %v6682_v16  ;;  %v7521_v18 = vpop.f32.mrb[201].mxu0 }
 0x478   :  { %v5186_v39 = vpop.f32.mrb[201].mxu1  ;;  %v9920_v8 = vmax.f32 %v9472_v35, %v9696_v11  ;;  %v7523_v25 = vpop.f32.mrb[202].mxu0  ;;  %v8795_v53 = vrot.slane %v7521_v18, 1 }
 0x479   :  { %v9473_v5 = vadd.f32 %v14848_v23, %v9242_v58  ;;  %v6235_v54 = vrot.slane %v5186_v39, 1  ;;  %v5188_v12 = vpop.f32.mrb[202].mxu1  ;;  %v7525_v42 = vpop.f32.mrb[203].mxu0  ;;  %v10787_v34 = vrot.slane %v10786_v62, 2  ;;  %v10447_v2 = vsel %vm10290_vm1, %v10150_v10, 0.0  ;;  %v16328_v10 = vld [vmem:[#allocation45_spill] sm:$0xff] }
 0x47a   :  { %v5190_v50 = vpop.f32.mrb[203].mxu1  ;;  %v10151_v36 = vmul.f32 %v14867_v57, %v9920_v8  ;;  %v9243_v44 = vadd.f32 %v8795_v53, %v8347_v21  ;;  %v8796_v59 = vrot.slane %v7525_v42, 1  ;;  %v16329_v8 = vld [vmem:[#allocation51_spill] sm:$0xff] }
 0x47b   :  { %v9697_v0 = vmul.f32 0.2, %v9473_v5  ;;  %v6683_v13 = vadd.f32 %v6235_v54, %v5184_v20  ;;  %v6236_v19 = vrot.slane %v5190_v50, 1  ;;  %7774 = vmatmul.mubr.bf16.gmra.mrb[52].mxu0 %v16326_v48  ;;  %v10788_v45 = vadd.f32 %v10787_v34, %v10786_v62  ;;  %v14892_v20 = vld [vmem:[%s15784_s6 + $0x18] sm:$0x7f] }
 0x47c   :  { %5439 = vmatmul.mubr.bf16.gmra.mrb[52].mxu1 %v16326_v48  ;;  %v10448_v33 = vsel %vm10290_vm1, %v10151_v36, 0.0  ;;  %7783 = vmatprep.mubr.bf16.mxu0 %v16327_v15  ;;  %v9474_v63 = vadd.f32 %v14848_v23, %v9243_v44 }
 0x47d   :  { %v9921_v60 = vmax.f32 %v9473_v5, %v9697_v0  ;;  %v8348_v32 = vadd.f32 %v7523_v25, %v6683_v13  ;;  %5448 = vmatprep.mubr.bf16.mxu1 %v16327_v15  ;;  %v6684_v3 = vadd.f32 %v6236_v19, %v5188_v12  ;;  %v10449_v4 = vadd.f32 %v10448_v33, %v10447_v2  ;;  %v14904_v12 = vld [vmem:[%s15784_s6 + $0x20] sm:$0x7f] }
 0x47e   :  { %v10789_v43 = vrot.slane %v10788_v45, 1  ;;  %v7529_v51 = vpop.f32.mrb[204].mxu0  ;;  %v9698_v17 = vmul.f32 0.2, %v9474_v63 }
 0x47f   :  { %v10152_v56 = vmul.f32 %v14880_v1, %v9921_v60  ;;  %v9244_v27 = vadd.f32 %v8796_v59, %v8348_v32  ;;  %v5194_v47 = vpop.f32.mrb[204].mxu1  ;;  %v8349_v37 = vadd.f32 %v7529_v51, %v6684_v3  ;;  %v7531_v29 = vpop.f32.mrb[205].mxu0  ;;  %v14912_v32 = vld [vmem:[%s15784_s6 + $0x28] sm:$0x7f] }
 0x480   :  { %v5196_v61 = vpop.f32.mrb[205].mxu1  ;;  %v10790_v9 = vadd.f32 %v10789_v43, %v10788_v45  ;;  %v8797_v7 = vrot.slane %v7531_v29, 1  ;;  %v7533_v26 = vpop.f32.mrb[206].mxu0  ;;  %v9922_v35 = vmax.f32 %v9474_v63, %v9698_v17  ;;  %v16331_v17 = vld [vmem:[#allocation55_spill] sm:$0xff]  ;;  %v14923_v29 = vld [vmem:[%s15784_s6 + $0x30] sm:$0x7f] }
 0x481   :  { %v10450_v31 = vsel %vm10290_vm1, %v10152_v56, 0.0  ;;  %v9475_v55 = vadd.f32 %v14848_v23, %v9244_v27  ;;  %v6237_v40 = vrot.slane %v5196_v61, 1  ;;  %v5198_v38 = vpop.f32.mrb[206].mxu1  ;;  %v7535_v41 = vpop.f32.mrb[207].mxu0  ;;  %v16330_v56 = vld [vmem:[#allocation49_spill] sm:$0xff] }
 0x482   :  { %v10451_v28 = vadd.f32 %v10450_v31, %v10449_v4  ;;  %v5199_v22 = vpop.f32.mrb[207].mxu1  ;;  %v14887_v16 = vsel %vm10967_vm4, %v10790_v9, %v14825_v52  ;;  %v9245_v11 = vadd.f32 %v8797_v7, %v8349_v37  ;;  %v10153_v24 = vmul.f32 %v14892_v20, %v9922_v35 }
 0x483   :  { %v9699_v62 = vmul.f32 0.2, %v9475_v55  ;;  %v6685_v58 = vadd.f32 %v6237_v40, %v5194_v47  ;;  %7784 = vmatmul.mubr.bf16.gmra.mrb[56].mxu0 %v16328_v10  ;;  %v8798_v52 = vrot.slane %v7535_v41, 1 }
 0x484   :  { %5449 = vmatmul.mubr.bf16.gmra.mrb[56].mxu1 %v16328_v10  ;;  %v9476_v39 = vadd.f32 %v14848_v23, %v9245_v11  ;;  %7793 = vmatprep.mubr.bf16.mxu0 %v16329_v8  ;;  %v10452_v5 = vsel %vm10290_vm1, %v10153_v24, 0.0 }
 0x485   :  { %v9923_v21 = vmax.f32 %v9475_v55, %v9699_v62  ;;  %v8350_v18 = vadd.f32 %v7533_v26, %v6685_v58  ;;  %5458 = vmatprep.mubr.bf16.mxu1 %v16329_v8  ;;  %v10453_v54 = vadd.f32 %v10452_v5, %v10451_v28  ;;  %v16332_v5 = vld [vmem:[#allocation53_spill] sm:$0xff] }
 0x486   :  { %v9700_v53 = vmul.f32 0.2, %v9476_v39  ;;  %v7539_v34 = vpop.f32.mrb[208].mxu0 }
 0x487   :  { %v10154_v25 = vmul.f32 %v14904_v12, %v9923_v21  ;;  %v9246_v50 = vadd.f32 %v8798_v52, %v8350_v18  ;;  %v5202_v42 = vpop.f32.mrb[208].mxu1  ;;  %v7540_v0 = vpop.f32.mrb[209].mxu0 }
 0x488   :  { %v5204_v36 = vpop.f32.mrb[209].mxu1  ;;  %v9924_v19 = vmax.f32 %v9476_v39, %v9700_v53  ;;  %v7541_v48 = vpop.f32.mrb[210].mxu0 }
 0x489   :  { %v10454_v13 = vsel %vm10290_vm1, %v10154_v25, 0.0  ;;  %v9477_v2 = vadd.f32 %v14848_v23, %v9246_v50  ;;  %v6238_v44 = vrot.slane %v5204_v36, 1  ;;  %v5206_v59 = vpop.f32.mrb[210].mxu1  ;;  %v7543_v60 = vpop.f32.mrb[211].mxu0  ;;  %v16333_v50 = vld [vmem:[#allocation59_spill] sm:$0xff] }
 0x48a   :  { %v10455_v45 = vadd.f32 %v10454_v13, %v10453_v54  ;;  %v5208_v33 = vpop.f32.mrb[211].mxu1  ;;  %v10155_v15 = vmul.f32 %v14912_v32, %v9924_v19  ;;  %v8799_v43 = vrot.slane %v7543_v60, 1 }
 0x48b   :  { %v9701_v3 = vmul.f32 0.2, %v9477_v2  ;;  %v6686_v4 = vadd.f32 %v6238_v44, %v5202_v42  ;;  %v6239_v63 = vrot.slane %v5208_v33, 1  ;;  %7794 = vmatmul.mubr.bf16.gmra.mrb[60].mxu0 %v16330_v56 }
 0x48c   :  { %5459 = vmatmul.mubr.bf16.gmra.mrb[60].mxu1 %v16330_v56  ;;  %v10456_v27 = vsel %vm10290_vm1, %v10155_v15, 0.0  ;;  %7803 = vmatprep.mubr.bf16.mxu0 %v16331_v17 }
 0x48d   :  { %v9925_v47 = vmax.f32 %v9477_v2, %v9701_v3  ;;  %v8351_v51 = vadd.f32 %v7541_v48, %v6686_v4  ;;  %5466 = vmatprep.mubr.bf16.mxu1 %v16331_v17  ;;  %v6687_v37 = vadd.f32 %v6239_v63, %v5206_v59  ;;  %v10457_v61 = vadd.f32 %v10456_v27, %v10455_v45 }
 0x48e   :  { %v7547_v40 = vpop.f32.mrb[212].mxu0 }
 0x48f   :  { %v10156_v9 = vmul.f32 %v14923_v29, %v9925_v47  ;;  %v9247_v31 = vadd.f32 %v8799_v43, %v8351_v51  ;;  %v5212_v55 = vpop.f32.mrb[212].mxu1  ;;  %v8352_v7 = vadd.f32 %v7547_v40, %v6687_v37  ;;  %v7549_v22 = vpop.f32.mrb[213].mxu0 }
 0x490   :  { %v5214_v38 = vpop.f32.mrb[213].mxu1  ;;  %v8800_v11 = vrot.slane %v7549_v22, 1  ;;  %v7551_v58 = vpop.f32.mrb[214].mxu0 }
 0x491   :  { %v10458_v26 = vsel %vm10290_vm1, %v10156_v9, 0.0  ;;  %v9478_v28 = vadd.f32 %v14848_v23, %v9247_v31  ;;  %v6240_v35 = vrot.slane %v5214_v38, 1  ;;  %v5216_v41 = vpop.f32.mrb[214].mxu1  ;;  %v7553_v18 = vpop.f32.mrb[215].mxu0  ;;  %v16334_v31 = vld [vmem:[#allocation57_spill] sm:$0xff] }
 0x492   :  { %v10459_v62 = vadd.f32 %v10458_v26, %v10457_v61  ;;  %v5218_v24 = vpop.f32.mrb[215].mxu1  ;;  %v9248_v8 = vadd.f32 %v8800_v11, %v8352_v7  ;;  %v8801_v53 = vrot.slane %v7553_v18, 1 }
 0x493   :  { %v9702_v10 = vmul.f32 0.2, %v9478_v28  ;;  %v6688_v21 = vadd.f32 %v6240_v35, %v5212_v55  ;;  %v6241_v39 = vrot.slane %v5218_v24, 1  ;;  %7804 = vmatmul.mubr.bf16.gmra.mrb[64].mxu0 %v16332_v5 }
 0x494   :  { %v10791_v52 = vsel %vm10290_vm1, %v10459_v62, 0.0  ;;  %5467 = vmatmul.mubr.bf16.gmra.mrb[64].mxu1 %v16332_v5  ;;  %7811 = vmatprep.mubr.bf16.mxu0 %v16333_v50  ;;  %v9479_v34 = vadd.f32 %v14848_v23, %v9248_v8 }
 0x495   :  { %v10792_v54 = vrot.slane %v10791_v52, 4  ;;  %v8353_v25 = vadd.f32 %v7551_v58, %v6688_v21  ;;  %5476 = vmatprep.mubr.bf16.mxu1 %v16333_v50  ;;  %v9926_v42 = vmax.f32 %v9478_v28, %v9702_v10  ;;  %v6689_v36 = vadd.f32 %v6241_v39, %v5216_v41  ;;  %v16335_v28 = vld [vmem:[#allocation63_spill] sm:$0xff] }
 0x496   :  { %v7557_v19 = vpop.f32.mrb[216].mxu0  ;;  %v9703_v44 = vmul.f32 0.2, %v9479_v34 }
 0x497   :  { %v9249_v0 = vadd.f32 %v8801_v53, %v8353_v25  ;;  %v5222_v13 = vpop.f32.mrb[216].mxu1  ;;  %v10793_v2 = vadd.f32 %v10792_v54, %v10791_v52  ;;  %v8354_v59 = vadd.f32 %v7557_v19, %v6689_v36  ;;  %v7559_v45 = vpop.f32.mrb[217].mxu0  ;;  %v10157_v63 = vmul.f32 %v14860_v6, %v9926_v42 }
 0x498   :  { %v5224_v48 = vpop.f32.mrb[217].mxu1  ;;  %v8802_v15 = vrot.slane %v7559_v45, 1  ;;  %v7561_v4 = vpop.f32.mrb[218].mxu0  ;;  %v9927_v43 = vmax.f32 %v9479_v34, %v9703_v44 }
 0x499   :  { %v9480_v33 = vadd.f32 %v14848_v23, %v9249_v0  ;;  %v6242_v60 = vrot.slane %v5224_v48, 1  ;;  %v5226_v3 = vpop.f32.mrb[218].mxu1  ;;  %v7563_v27 = vpop.f32.mrb[219].mxu0  ;;  %v10794_v47 = vrot.slane %v10793_v2, 2  ;;  %v10460_v35 = vsel %vm10290_vm1, %v10157_v63, 0.0  ;;  %v16337_v63 = vld [vmem:[#allocation67_spill] sm:$0xff] }
 0x49a   :  { %v5228_v56 = vpop.f32.mrb[219].mxu1  ;;  %v9250_v17 = vadd.f32 %v8802_v15, %v8354_v59  ;;  %v10158_v9 = vmul.f32 %v14867_v57, %v9927_v43  ;;  %v8803_v26 = vrot.slane %v7563_v27, 1 }
 0x49b   :  { %v9704_v51 = vmul.f32 0.2, %v9480_v33  ;;  %v6690_v37 = vadd.f32 %v6242_v60, %v5222_v13  ;;  %v6243_v61 = vrot.slane %v5228_v56, 1  ;;  %7812 = vmatmul.mubr.bf16.gmra.mrb[68].mxu0 %v16334_v31  ;;  %v10795_v55 = vadd.f32 %v10794_v47, %v10793_v2 }
 0x49c   :  { %5477 = vmatmul.mubr.bf16.gmra.mrb[68].mxu1 %v16334_v31  ;;  %v9481_v7 = vadd.f32 %v14848_v23, %v9250_v17  ;;  %7821 = vmatprep.mubr.bf16.mxu0 %v16335_v28  ;;  %v10461_v22 = vsel %vm10290_vm1, %v10158_v9, 0.0 }
 0x49d   :  { %v9928_v40 = vmax.f32 %v9480_v33, %v9704_v51  ;;  %v8355_v38 = vadd.f32 %v7561_v4, %v6690_v37  ;;  %5486 = vmatprep.mubr.bf16.mxu1 %v16335_v28  ;;  %v6691_v41 = vadd.f32 %v6243_v61, %v5226_v3  ;;  %v10796_v62 = vrot.slane %v10795_v55, 1  ;;  %v16336_v33 = vld [vmem:[#allocation61_spill] sm:$0xff] }
 0x49e   :  { %v10462_v11 = vadd.f32 %v10461_v22, %v10460_v35  ;;  %v9705_v24 = vmul.f32 0.2, %v9481_v7  ;;  %v7567_v39 = vpop.f32.mrb[220].mxu0 }
 0x49f   :  { %v10159_v58 = vmul.f32 %v14880_v1, %v9928_v40  ;;  %v9251_v10 = vadd.f32 %v8803_v26, %v8355_v38  ;;  %v5232_v21 = vpop.f32.mrb[220].mxu1  ;;  %v8356_v18 = vadd.f32 %v7567_v39, %v6691_v41  ;;  %v7569_v8 = vpop.f32.mrb[221].mxu0  ;;  %v10797_v5 = vadd.f32 %v10796_v62, %v10795_v55  ;;  %v16339_v39 = vld [vmem:[#allocation71_spill] sm:$0xff] }
 0x4a0   :  { %v5234_v52 = vpop.f32.mrb[221].mxu1  ;;  %v9929_v25 = vmax.f32 %v9481_v7, %v9705_v24  ;;  %v7571_v34 = vpop.f32.mrb[222].mxu0  ;;  %v8804_v0 = vrot.slane %v7569_v8, 1 }
 0x4a1   :  { %v10463_v54 = vsel %vm10290_vm1, %v10159_v58, 0.0  ;;  %v9482_v53 = vadd.f32 %v14848_v23, %v9251_v10  ;;  %v6244_v50 = vrot.slane %v5234_v52, 1  ;;  %v5236_v42 = vpop.f32.mrb[222].mxu1  ;;  %v7573_v19 = vpop.f32.mrb[223].mxu0  ;;  %v14949_v2 = vsel %vm10969_vm5, %v10797_v5, %v14887_v16  ;;  %v16338_v58 = vld [vmem:[#allocation65_spill] sm:$0xff] }
 0x4a2   :  { %v10464_v36 = vadd.f32 %v10463_v54, %v10462_v11  ;;  %v5237_v13 = vpop.f32.mrb[223].mxu1  ;;  %v10160_v44 = vmul.f32 %v14892_v20, %v9929_v25  ;;  %v9252_v45 = vadd.f32 %v8804_v0, %v8356_v18  ;;  %v8805_v4 = vrot.slane %v7573_v19, 1 }
 0x4a3   :  { %v9706_v59 = vmul.f32 0.2, %v9482_v53  ;;  %v6692_v48 = vadd.f32 %v6244_v50, %v5232_v21  ;;  %7822 = vmatmul.mubr.bf16.gmra.mrb[72].mxu0 %v16336_v33 }
 0x4a4   :  { %5487 = vmatmul.mubr.bf16.gmra.mrb[72].mxu1 %v16336_v33  ;;  %v10465_v60 = vsel %vm10290_vm1, %v10160_v44, 0.0  ;;  %7831 = vmatprep.mubr.bf16.mxu0 %v16337_v63  ;;  %v9483_v43 = vadd.f32 %v14848_v23, %v9252_v45 }
 0x4a5   :  { %v9930_v15 = vmax.f32 %v9482_v53, %v9706_v59  ;;  %v8357_v3 = vadd.f32 %v7571_v34, %v6692_v48  ;;  %5496 = vmatprep.mubr.bf16.mxu1 %v16337_v63  ;;  %v10466_v16 = vadd.f32 %v10465_v60, %v10464_v36 }
 0x4a6   :  { %v7577_v51 = vpop.f32.mrb[224].mxu0  ;;  %v9707_v17 = vmul.f32 0.2, %v9483_v43 }
 0x4a7   :  { %v10161_v56 = vmul.f32 %v14904_v12, %v9930_v15  ;;  %v9253_v27 = vadd.f32 %v8805_v4, %v8357_v3  ;;  %v5240_v47 = vpop.f32.mrb[224].mxu1  ;;  %v7578_v61 = vpop.f32.mrb[225].mxu0  ;;  %v16341_v51 = vld [vmem:[#allocation75_spill] sm:$0xff] }
 0x4a8   :  { %v5242_v37 = vpop.f32.mrb[225].mxu1  ;;  %v7579_v7 = vpop.f32.mrb[226].mxu0  ;;  %v9931_v26 = vmax.f32 %v9483_v43, %v9707_v17 }
 0x4a9   :  { %v10467_v9 = vsel %vm10290_vm1, %v10161_v56, 0.0  ;;  %v9484_v31 = vadd.f32 %v14848_v23, %v9253_v27  ;;  %v6245_v55 = vrot.slane %v5242_v37, 1  ;;  %v5244_v40 = vpop.f32.mrb[226].mxu1  ;;  %v7581_v35 = vpop.f32.mrb[227].mxu0 }
 0x4aa   :  { %v10468_v38 = vadd.f32 %v10467_v9, %v10466_v16  ;;  %v5246_v28 = vpop.f32.mrb[227].mxu1  ;;  %v10162_v11 = vmul.f32 %v14912_v32, %v9931_v26  ;;  %v8806_v21 = vrot.slane %v7581_v35, 1  ;;  %v16340_v16 = vld [vmem:[#allocation69_spill] sm:$0xff] }
 0x4ab   :  { %v9708_v22 = vmul.f32 0.2, %v9484_v31  ;;  %v6693_v41 = vadd.f32 %v6245_v55, %v5240_v47  ;;  %v6246_v62 = vrot.slane %v5246_v28, 1  ;;  %7832 = vmatmul.mubr.bf16.gmra.mrb[76].mxu0 %v16338_v58 }
 0x4ac   :  { %5497 = vmatmul.mubr.bf16.gmra.mrb[76].mxu1 %v16338_v58  ;;  %7841 = vmatprep.mubr.bf16.mxu0 %v16339_v39  ;;  %v10469_v52 = vsel %vm10290_vm1, %v10162_v11, 0.0 }
 0x4ad   :  { %v9932_v24 = vmax.f32 %v9484_v31, %v9708_v22  ;;  %v8358_v10 = vadd.f32 %v7579_v7, %v6693_v41  ;;  %5504 = vmatprep.mubr.bf16.mxu1 %v16339_v39  ;;  %v6694_v18 = vadd.f32 %v6246_v62, %v5244_v40  ;;  %v10470_v8 = vadd.f32 %v10469_v52, %v10468_v38 }
 0x4ae   :  { %v7585_v53 = vpop.f32.mrb[228].mxu0 }
 0x4af   :  { %v10163_v5 = vmul.f32 %v14923_v29, %v9932_v24  ;;  %v9254_v54 = vadd.f32 %v8806_v21, %v8358_v10  ;;  %v5250_v25 = vpop.f32.mrb[228].mxu1  ;;  %v8359_v50 = vadd.f32 %v7585_v53, %v6694_v18  ;;  %v7587_v34 = vpop.f32.mrb[229].mxu0  ;;  %v16342_v53 = vld [vmem:[#allocation73_spill] sm:$0xff] }
 0x4b0   :  { %v5252_v42 = vpop.f32.mrb[229].mxu1  ;;  %v8807_v19 = vrot.slane %v7587_v34, 1  ;;  %v7589_v59 = vpop.f32.mrb[230].mxu0 }
 0x4b1   :  { %v10471_v36 = vsel %vm10290_vm1, %v10163_v5, 0.0  ;;  %v9485_v0 = vadd.f32 %v14848_v23, %v9254_v54  ;;  %v6247_v13 = vrot.slane %v5252_v42, 1  ;;  %v5254_v44 = vpop.f32.mrb[230].mxu1  ;;  %v7591_v33 = vpop.f32.mrb[231].mxu0 }
 0x4b2   :  { %v10472_v48 = vadd.f32 %v10471_v36, %v10470_v8  ;;  %v5256_v45 = vpop.f32.mrb[231].mxu1  ;;  %v9255_v15 = vadd.f32 %v8807_v19, %v8359_v50  ;;  %v8808_v63 = vrot.slane %v7591_v33, 1 }
 0x4b3   :  { %v9709_v60 = vmul.f32 0.2, %v9485_v0  ;;  %v6695_v3 = vadd.f32 %v6247_v13, %v5250_v25  ;;  %v6248_v4 = vrot.slane %v5256_v45, 1  ;;  %7842 = vmatmul.mubr.bf16.gmra.mrb[80].mxu0 %v16340_v16 }
 0x4b4   :  { %5505 = vmatmul.mubr.bf16.gmra.mrb[80].mxu1 %v16340_v16  ;;  %v10798_v43 = vsel %vm10290_vm1, %v10472_v48, 0.0  ;;  %v9486_v27 = vadd.f32 %v14848_v23, %v9255_v15  ;;  %7849 = vmatprep.mubr.bf16.mxu0 %v16341_v51 }
 0x4b5   :  { %v9933_v56 = vmax.f32 %v9485_v0, %v9709_v60  ;;  %v8360_v47 = vadd.f32 %v7589_v59, %v6695_v3  ;;  %5514 = vmatprep.mubr.bf16.mxu1 %v16341_v51  ;;  %v10799_v17 = vrot.slane %v10798_v43, 4  ;;  %v6696_v37 = vadd.f32 %v6248_v4, %v5254_v44  ;;  %v16343_v0 = vld [vmem:[#allocation79_spill] sm:$0xff] }
 0x4b6   :  { %v9710_v61 = vmul.f32 0.2, %v9486_v27  ;;  %v7595_v55 = vpop.f32.mrb[232].mxu0 }
 0x4b7   :  { %v9256_v9 = vadd.f32 %v8808_v63, %v8360_v47  ;;  %v5260_v31 = vpop.f32.mrb[232].mxu1  ;;  %v10800_v40 = vadd.f32 %v10799_v17, %v10798_v43  ;;  %v10164_v7 = vmul.f32 %v14860_v6, %v9933_v56  ;;  %v8361_v38 = vadd.f32 %v7595_v55, %v6696_v37  ;;  %v7597_v28 = vpop.f32.mrb[233].mxu0 }
 0x4b8   :  { %v5262_v26 = vpop.f32.mrb[233].mxu1  ;;  %v9934_v35 = vmax.f32 %v9486_v27, %v9710_v61  ;;  %v7599_v11 = vpop.f32.mrb[234].mxu0  ;;  %v8809_v58 = vrot.slane %v7597_v28, 1  ;;  %v16344_v28 = vld [vmem:[#allocation77_spill] sm:$0xff] }
 0x4b9   :  { %v9487_v22 = vadd.f32 %v14848_v23, %v9256_v9  ;;  %v6249_v41 = vrot.slane %v5262_v26, 1  ;;  %v5264_v62 = vpop.f32.mrb[234].mxu1  ;;  %v7601_v10 = vpop.f32.mrb[235].mxu0  ;;  %v10801_v21 = vrot.slane %v10800_v40, 2  ;;  %v10473_v5 = vsel %vm10290_vm1, %v10164_v7, 0.0 }
 0x4ba   :  { %v5266_v24 = vpop.f32.mrb[235].mxu1  ;;  %v10165_v39 = vmul.f32 %v14867_v57, %v9934_v35  ;;  %v9257_v54 = vadd.f32 %v8809_v58, %v8361_v38  ;;  %v8810_v25 = vrot.slane %v7601_v10, 1 }
 0x4bb   :  { %v9711_v18 = vmul.f32 0.2, %v9487_v22  ;;  %v6697_v52 = vadd.f32 %v6249_v41, %v5260_v31  ;;  %v6250_v8 = vrot.slane %v5266_v24, 1  ;;  %7850 = vmatmul.mubr.bf16.gmra.mrb[84].mxu0 %v16342_v53  ;;  %v10802_v50 = vadd.f32 %v10801_v21, %v10800_v40 }
 0x4bc   :  { %5515 = vmatmul.mubr.bf16.gmra.mrb[84].mxu1 %v16342_v53  ;;  %v10474_v42 = vsel %vm10290_vm1, %v10165_v39, 0.0  ;;  %7859 = vmatprep.mubr.bf16.mxu0 %v16343_v0  ;;  %v9488_v44 = vadd.f32 %v14848_v23, %v9257_v54 }
 0x4bd   :  { %v9935_v34 = vmax.f32 %v9487_v22, %v9711_v18  ;;  %v8362_v36 = vadd.f32 %v7599_v11, %v6697_v52  ;;  %5524 = vmatprep.mubr.bf16.mxu1 %v16343_v0  ;;  %v6698_v13 = vadd.f32 %v6250_v8, %v5264_v62  ;;  %v10475_v19 = vadd.f32 %v10474_v42, %v10473_v5  ;;  %v16345_v11 = vld [vmem:[#allocation83_spill] sm:$0xff] }
 0x4be   :  { %v10803_v59 = vrot.slane %v10802_v50, 1  ;;  %v7605_v60 = vpop.f32.mrb[236].mxu0  ;;  %v9712_v15 = vmul.f32 0.2, %v9488_v44 }
 0x4bf   :  { %v10166_v48 = vmul.f32 %v14880_v1, %v9935_v34  ;;  %v9258_v45 = vadd.f32 %v8810_v25, %v8362_v36  ;;  %v5270_v33 = vpop.f32.mrb[236].mxu1  ;;  %v8363_v3 = vadd.f32 %v7605_v60, %v6698_v13  ;;  %v7607_v63 = vpop.f32.mrb[237].mxu0 }
 0x4c0   :  { %v5272_v4 = vpop.f32.mrb[237].mxu1  ;;  %v10804_v16 = vadd.f32 %v10803_v59, %v10802_v50  ;;  %v8811_v47 = vrot.slane %v7607_v63, 1  ;;  %v7609_v17 = vpop.f32.mrb[238].mxu0  ;;  %v9936_v61 = vmax.f32 %v9488_v44, %v9712_v15 }
 0x4c1   :  { %v10476_v43 = vsel %vm10290_vm1, %v10166_v48, 0.0  ;;  %v9489_v56 = vadd.f32 %v14848_v23, %v9258_v45  ;;  %v6251_v27 = vrot.slane %v5272_v4, 1  ;;  %v5274_v51 = vpop.f32.mrb[238].mxu1  ;;  %v7611_v31 = vpop.f32.mrb[239].mxu0  ;;  %v16346_v45 = vld [vmem:[#allocation81_spill] sm:$0xff] }
 0x4c2   :  { %v10477_v37 = vadd.f32 %v10476_v43, %v10475_v19  ;;  %v5275_v9 = vpop.f32.mrb[239].mxu1  ;;  %v14991_v55 = vsel %vm10971_vm6, %v10804_v16, %v14949_v2  ;;  %v9259_v7 = vadd.f32 %v8811_v47, %v8363_v3  ;;  %v10167_v26 = vmul.f32 %v14892_v20, %v9936_v61  ;;  %v16347_v3 = vld [vmem:[#allocation87_spill] sm:$0xff] }
 0x4c3   :  { %v9713_v40 = vmul.f32 0.2, %v9489_v56  ;;  %v6699_v38 = vadd.f32 %v6251_v27, %v5270_v33  ;;  %7860 = vmatmul.mubr.bf16.gmra.mrb[88].mxu0 %v16344_v28  ;;  %v8812_v62 = vrot.slane %v7611_v31, 1 }
 0x4c4   :  { %5525 = vmatmul.mubr.bf16.gmra.mrb[88].mxu1 %v16344_v28  ;;  %v9490_v22 = vadd.f32 %v14848_v23, %v9259_v7  ;;  %7869 = vmatprep.mubr.bf16.mxu0 %v16345_v11  ;;  %v10478_v2 = vsel %vm10290_vm1, %v10167_v26, 0.0 }
 0x4c5   :  { %v9937_v35 = vmax.f32 %v9489_v56, %v9713_v40  ;;  %v8364_v41 = vadd.f32 %v7609_v17, %v6699_v38  ;;  %5534 = vmatprep.mubr.bf16.mxu1 %v16345_v11  ;;  %v10479_v58 = vadd.f32 %v10478_v2, %v10477_v37  ;;  %v16348_v2 = vld [vmem:[#allocation85_spill] sm:$0xff] }
 0x4c6   :  { %v9714_v10 = vmul.f32 0.2, %v9490_v22  ;;  %v7615_v18 = vpop.f32.mrb[240].mxu0 }
 0x4c7   :  { %v10168_v24 = vmul.f32 %v14904_v12, %v9937_v35  ;;  %v9260_v21 = vadd.f32 %v8812_v62, %v8364_v41  ;;  %v5278_v39 = vpop.f32.mrb[240].mxu1  ;;  %v7616_v8 = vpop.f32.mrb[241].mxu0 }
 0x4c8   :  { %v5280_v52 = vpop.f32.mrb[241].mxu1  ;;  %v9938_v54 = vmax.f32 %v9490_v22, %v9714_v10  ;;  %v7617_v42 = vpop.f32.mrb[242].mxu0 }
 0x4c9   :  { %v10480_v5 = vsel %vm10290_vm1, %v10168_v24, 0.0  ;;  %v9491_v25 = vadd.f32 %v14848_v23, %v9260_v21  ;;  %v6252_v53 = vrot.slane %v5280_v52, 1  ;;  %v5282_v50 = vpop.f32.mrb[242].mxu1  ;;  %v7619_v0 = vpop.f32.mrb[243].mxu0 }
 0x4ca   :  { %v10481_v34 = vadd.f32 %v10480_v5, %v10479_v58  ;;  %v5284_v36 = vpop.f32.mrb[243].mxu1  ;;  %v10169_v13 = vmul.f32 %v14912_v32, %v9938_v54  ;;  %v8813_v48 = vrot.slane %v7619_v0, 1 }
 0x4cb   :  { %v9715_v19 = vmul.f32 0.2, %v9491_v25  ;;  %v6700_v44 = vadd.f32 %v6252_v53, %v5278_v39  ;;  %v6253_v59 = vrot.slane %v5284_v36, 1  ;;  %7870 = vmatmul.mubr.bf16.gmra.mrb[92].mxu0 %v16346_v45  ;;  %v16349_v39 = vld [vmem:[#allocation91_spill] sm:$0xff] }
 0x4cc   :  { %5535 = vmatmul.mubr.bf16.gmra.mrb[92].mxu1 %v16346_v45  ;;  %v10482_v33 = vsel %vm10290_vm1, %v10169_v13, 0.0  ;;  %7879 = vmatprep.mubr.bf16.mxu0 %v16347_v3 }
 0x4cd   :  { %v9939_v60 = vmax.f32 %v9491_v25, %v9715_v19  ;;  %v8365_v15 = vadd.f32 %v7617_v42, %v6700_v44  ;;  %5542 = vmatprep.mubr.bf16.mxu1 %v16347_v3  ;;  %v6701_v4 = vadd.f32 %v6253_v59, %v5282_v50  ;;  %v10483_v63 = vadd.f32 %v10482_v33, %v10481_v34 }
 0x4ce   :  { %v7623_v27 = vpop.f32.mrb[244].mxu0 }
 0x4cf   :  { %v10170_v16 = vmul.f32 %v14923_v29, %v9939_v60  ;;  %v9261_v43 = vadd.f32 %v8813_v48, %v8365_v15  ;;  %v5288_v56 = vpop.f32.mrb[244].mxu1  ;;  %v8366_v47 = vadd.f32 %v7623_v27, %v6701_v4  ;;  %v7625_v17 = vpop.f32.mrb[245].mxu0 }
 0x4d0   :  { %v5290_v51 = vpop.f32.mrb[245].mxu1  ;;  %v8814_v31 = vrot.slane %v7625_v17, 1  ;;  %v7627_v7 = vpop.f32.mrb[246].mxu0 }
 0x4d1   :  { %v10484_v37 = vsel %vm10290_vm1, %v10170_v16, 0.0  ;;  %v9492_v61 = vadd.f32 %v14848_v23, %v9261_v43  ;;  %v6254_v9 = vrot.slane %v5290_v51, 1  ;;  %v5292_v40 = vpop.f32.mrb[246].mxu1  ;;  %v7629_v26 = vpop.f32.mrb[247].mxu0 }
 0x4d2   :  { %v5294_v38 = vpop.f32.mrb[247].mxu1  ;;  %v10485_v28 = vadd.f32 %v10484_v37, %v10483_v63  ;;  %v9262_v22 = vadd.f32 %v8814_v31, %v8366_v47  ;;  %v8815_v11 = vrot.slane %v7629_v26, 1  ;;  %v16351_v37 = vld [vmem:[#allocation95_spill] sm:$0xff] }
 0x4d3   :  { %v9716_v35 = vmul.f32 0.2, %v9492_v61  ;;  %v6702_v41 = vadd.f32 %v6254_v9, %v5288_v56  ;;  %v6255_v62 = vrot.slane %v5294_v38, 1  ;;  %7880 = vmatmul.mubr.bf16.gmra.mrb[96].mxu0 %v16348_v2  ;;  %v16350_v56 = vld [vmem:[#allocation89_spill] sm:$0xff] }
 0x4d4   :  { %5543 = vmatmul.mubr.bf16.gmra.mrb[96].mxu1 %v16348_v2  ;;  %v10805_v58 = vsel %vm10290_vm1, %v10485_v28, 0.0  ;;  %v9493_v10 = vadd.f32 %v14848_v23, %v9262_v22  ;;  %7887 = vmatprep.mubr.bf16.mxu0 %v16349_v39 }
 0x4d5   :  { %v9940_v24 = vmax.f32 %v9492_v61, %v9716_v35  ;;  %v8367_v21 = vadd.f32 %v7627_v7, %v6702_v41  ;;  %5552 = vmatprep.mubr.bf16.mxu1 %v16349_v39  ;;  %v10806_v18 = vrot.slane %v10805_v58, 4  ;;  %v6703_v52 = vadd.f32 %v6255_v62, %v5292_v40 }
 0x4d6   :  { %v9717_v8 = vmul.f32 0.2, %v9493_v10  ;;  %v7633_v25 = vpop.f32.mrb[248].mxu0 }
 0x4d7   :  { %v9263_v5 = vadd.f32 %v8815_v11, %v8367_v21  ;;  %v5298_v54 = vpop.f32.mrb[248].mxu1  ;;  %v10807_v53 = vadd.f32 %v10806_v18, %v10805_v58  ;;  %v10171_v50 = vmul.f32 %v14860_v6, %v9940_v24  ;;  %v8368_v42 = vadd.f32 %v7633_v25, %v6703_v52  ;;  %v7635_v36 = vpop.f32.mrb[249].mxu0 }
 0x4d8   :  { %v5300_v34 = vpop.f32.mrb[249].mxu1  ;;  %v9941_v0 = vmax.f32 %v9493_v10, %v9717_v8  ;;  %v7637_v59 = vpop.f32.mrb[250].mxu0  ;;  %v8816_v48 = vrot.slane %v7635_v36, 1 }
 0x4d9   :  { %v9494_v13 = vadd.f32 %v14848_v23, %v9263_v5  ;;  %v6256_v19 = vrot.slane %v5300_v34, 1  ;;  %v5302_v44 = vpop.f32.mrb[250].mxu1  ;;  %v7639_v33 = vpop.f32.mrb[251].mxu0  ;;  %v10808_v60 = vrot.slane %v10807_v53, 2  ;;  %v10486_v6 = vsel %vm10290_vm1, %v10171_v50, 0.0  ;;  %v16352_v50 = vld [vmem:[#allocation93_spill] sm:$0xff] }
 0x4da   :  { %v5304_v45 = vpop.f32.mrb[251].mxu1  ;;  %v10172_v15 = vmul.f32 %v14867_v57, %v9941_v0  ;;  %v9264_v16 = vadd.f32 %v8816_v48, %v8368_v42  ;;  %v8817_v43 = vrot.slane %v7639_v33, 1 }
 0x4db   :  { %v9718_v3 = vmul.f32 0.2, %v9494_v13  ;;  %v6704_v4 = vadd.f32 %v6256_v19, %v5298_v54  ;;  %v6257_v63 = vrot.slane %v5304_v45, 1  ;;  %7888 = vmatmul.mubr.bf16.gmra.mrb[100].mxu0 %v16350_v56  ;;  %v10809_v27 = vadd.f32 %v10808_v60, %v10807_v53 }
 0x4dc   :  { %5553 = vmatmul.mubr.bf16.gmra.mrb[100].mxu1 %v16350_v56  ;;  %v10487_v47 = vsel %vm10290_vm1, %v10172_v15, 0.0  ;;  %7897 = vmatprep.mubr.bf16.mxu0 %v16351_v37  ;;  %v9495_v9 = vadd.f32 %v14848_v23, %v9264_v16 }
 0x4dd   :  { %v9942_v51 = vmax.f32 %v9494_v13, %v9718_v3  ;;  %v8369_v17 = vadd.f32 %v7637_v59, %v6704_v4  ;;  %5562 = vmatprep.mubr.bf16.mxu1 %v16351_v37  ;;  %v6705_v57 = vadd.f32 %v6257_v63, %v5302_v44  ;;  %v10488_v61 = vadd.f32 %v10487_v47, %v10486_v6  ;;  %v16353_v13 = vld [vmem:[#allocation99_spill] sm:$0xff]  ;;  %v11402_v47 = vld [vmem:[#allocation2] ss:$0 sm:$0xff] }
 0x4de   :  { %v10810_v31 = vrot.slane %v10809_v27, 1  ;;  %v7643_v26 = vpop.f32.mrb[252].mxu0  ;;  %v9719_v28 = vmul.f32 0.2, %v9495_v9 }
 0x4df   :  { %v10173_v40 = vmul.f32 %v14880_v1, %v9942_v51  ;;  %v9265_v7 = vadd.f32 %v8817_v43, %v8369_v17  ;;  %v5308_v38 = vpop.f32.mrb[252].mxu1  ;;  %v8370_v35 = vadd.f32 %v7643_v26, %v6705_v57  ;;  %v7645_v41 = vpop.f32.mrb[253].mxu0 }
 0x4e0   :  { %v5310_v22 = vpop.f32.mrb[253].mxu1  ;;  %v10811_v62 = vadd.f32 %v10810_v31, %v10809_v27  ;;  %v8818_v24 = vrot.slane %v7645_v41, 1  ;;  %v7647_v21 = vpop.f32.mrb[254].mxu0  ;;  %v9943_v18 = vmax.f32 %v9495_v9, %v9719_v28  ;;  %v16354_v9 = vld [vmem:[#allocation97_spill] sm:$0xff] }
 0x4e1   :  { %v10489_v11 = vsel %vm10290_vm1, %v10173_v40, 0.0  ;;  %v9496_v2 = vadd.f32 %v14848_v23, %v9265_v7  ;;  %v6258_v58 = vrot.slane %v5310_v22, 1  ;;  %v5312_v10 = vpop.f32.mrb[254].mxu1  ;;  %v7649_v1 = vpop.f32.mrb[255].mxu0  ;;  %v16355_v7 = vld [vmem:[#allocation103_spill] sm:$0xff] }
 0x4e2   :  { %v10490_v39 = vadd.f32 %v10489_v11, %v10488_v61  ;;  %v5313_v52 = vpop.f32.mrb[255].mxu1  ;;  %v15033_v8 = vsel %vm10973_vm7, %v10811_v62, %v14991_v55  ;;  %v9266_v54 = vadd.f32 %v8818_v24, %v8370_v35  ;;  %v10174_v53 = vmul.f32 %v14892_v20, %v9943_v18  ;;  %v11003_v51 = vpop.xlane.xlu0 %11002 }
 0x4e3   :  { %v9720_v5 = vmul.f32 0.2, %v9496_v2  ;;  %v6706_v25 = vadd.f32 %v6258_v58, %v5308_v38  ;;  %7898 = vmatmul.mubr.bf16.gmra.mrb[104].mxu0 %v16352_v50  ;;  %v8819_v0 = vrot.slane %v7649_v1, 1  ;;  %v11017_v26 = vadd.f32 %v11402_v47, %v11003_v51  ;;  %v15055_v58 = vld [vmem:[%s15783_s5] ss:$0 sm:$0xff] }
 0x4e4   :  { %5563 = vmatmul.mubr.bf16.gmra.mrb[104].mxu1 %v16352_v50  ;;  %v9497_v34 = vadd.f32 %v14848_v23, %v9266_v54  ;;  %7907 = vmatprep.mubr.bf16.mxu0 %v16353_v13  ;;  %v10491_v55 = vsel %vm10290_vm1, %v10174_v53, 0.0 }
 0x4e5   :  { %v9944_v42 = vmax.f32 %v9496_v2, %v9720_v5  ;;  %v8371_v36 = vadd.f32 %v7647_v21, %v6706_v25  ;;  %5572 = vmatprep.mubr.bf16.mxu1 %v16353_v13  ;;  %v10492_v19 = vadd.f32 %v10491_v55, %v10490_v39 }
 0x4e6   :  { %v9721_v59 = vmul.f32 0.2, %v9497_v34  ;;  %v7653_v45 = vpop.f32.mrb[0].mxu0 }
 0x4e7   :  { %v10175_v44 = vmul.f32 %v14904_v12, %v9944_v42  ;;  %v9267_v20 = vadd.f32 %v8819_v0, %v8371_v36  ;;  %v5316_v48 = vpop.f32.mrb[0].mxu1  ;;  %v7654_v60 = vpop.f32.mrb[1].mxu0  ;;  %v16356_v36 = vld [vmem:[#allocation101_spill] sm:$0xff] }
 0x4e8   :  { %v5318_v33 = vpop.f32.mrb[1].mxu1  ;;  %v9945_v3 = vmax.f32 %v9497_v34, %v9721_v59  ;;  %v7655_v16 = vpop.f32.mrb[2].mxu0 }
 0x4e9   :  { %v10493_v15 = vsel %vm10290_vm1, %v10175_v44, 0.0  ;;  %v9498_v4 = vadd.f32 %v14848_v23, %v9267_v20  ;;  %v6259_v63 = vrot.slane %v5318_v33, 1  ;;  %v5320_v6 = vpop.f32.mrb[2].mxu1  ;;  %v7657_v27 = vpop.f32.mrb[3].mxu0  ;;  %v16357_v44 = vld [vmem:[#allocation107_spill] sm:$0xff] }
 0x4ea   :  { %v10494_v43 = vadd.f32 %v10493_v15, %v10492_v19  ;;  %v5322_v56 = vpop.f32.mrb[3].mxu1  ;;  %v10176_v12 = vmul.f32 %v14912_v32, %v9945_v3  ;;  %v8820_v61 = vrot.slane %v7657_v27, 1 }
 0x4eb   :  { %v9722_v17 = vmul.f32 0.2, %v9498_v4  ;;  %v6707_v37 = vadd.f32 %v6259_v63, %v5316_v48  ;;  %v6260_v57 = vrot.slane %v5322_v56, 1  ;;  %7908 = vmatmul.mubr.bf16.gmra.mrb[108].mxu0 %v16354_v9 }
 0x4ec   :  { %5573 = vmatmul.mubr.bf16.gmra.mrb[108].mxu1 %v16354_v9  ;;  %v10495_v23 = vsel %vm10290_vm1, %v10176_v12, 0.0  ;;  %7917 = vmatprep.mubr.bf16.mxu0 %v16355_v7  ;;  %v15075_v9 = vld [vmem:[%s15784_s6 + $0x8] sm:$0x7f] }
 0x4ed   :  { %v9946_v31 = vmax.f32 %v9498_v4, %v9722_v17  ;;  %v8372_v40 = vadd.f32 %v7655_v16, %v6707_v37  ;;  %5580 = vmatprep.mubr.bf16.mxu1 %v16355_v7  ;;  %v6708_v38 = vadd.f32 %v6260_v57, %v5320_v6  ;;  %v10496_v28 = vadd.f32 %v10495_v23, %v10494_v43  ;;  %v15068_v4 = vld [vmem:[%s15784_s6] sm:$0x7f] }
 0x4ee   :  { %v7661_v41 = vpop.f32.mrb[4].mxu0 }
 0x4ef   :  { %v10177_v32 = vmul.f32 %v14923_v29, %v9946_v31  ;;  %v9268_v35 = vadd.f32 %v8820_v61, %v8372_v40  ;;  %v5326_v22 = vpop.f32.mrb[4].mxu1  ;;  %v8373_v62 = vadd.f32 %v7661_v41, %v6708_v38  ;;  %v7663_v2 = vpop.f32.mrb[5].mxu0  ;;  %v11021_v29 = vsub.f32 0.0, %v11017_v26 }
 0x4f0   :  { %v5328_v11 = vpop.f32.mrb[5].mxu1  ;;  %v8821_v21 = vrot.slane %v7663_v2, 1  ;;  %v7665_v18 = vpop.f32.mrb[6].mxu0 }
 0x4f1   :  { %v9499_v24 = vadd.f32 %v15055_v58, %v9268_v35  ;;  %v6261_v10 = vrot.slane %v5328_v11, 1  ;;  %v5330_v39 = vpop.f32.mrb[6].mxu1  ;;  %v10497_v52 = vsel %vm10290_vm1, %v10177_v32, 0.0  ;;  %v7667_v5 = vpop.f32.mrb[7].mxu0  ;;  %v11025_v20 = vmul.f32 1.442695, %v11021_v29 }
 0x4f2   :  { %v5332_v1 = vpop.f32.mrb[7].mxu1  ;;  %v10498_v54 = vadd.f32 %v10497_v52, %v10496_v28  ;;  %v9269_v53 = vadd.f32 %v8821_v21, %v8373_v62  ;;  %v8822_v34 = vrot.slane %v7667_v5, 1  ;;  %v16358_v32 = vld [vmem:[#allocation105_spill] sm:$0xff]  ;;  %v16359_v11 = vld [vmem:[#allocation111_spill] sm:$0xff] }
 0x4f3   :  { %v9723_v25 = vmul.f32 0.2, %v9499_v24  ;;  %v6709_v50 = vadd.f32 %v6261_v10, %v5326_v22  ;;  %v6262_v42 = vrot.slane %v5332_v1, 1  ;;  %7918 = vmatmul.mubr.bf16.gmra.mrb[112].mxu0 %v16356_v36  ;;  %11650 = vpow2.f32 %v11025_v20 }
 0x4f4   :  { %5581 = vmatmul.mubr.bf16.gmra.mrb[112].mxu1 %v16356_v36  ;;  %v10812_v0 = vsel %vm10290_vm1, %v10498_v54, 0.0  ;;  %v9500_v55 = vadd.f32 %v15055_v58, %v9269_v53  ;;  %7925 = vmatprep.mubr.bf16.mxu0 %v16357_v44 }
 0x4f5   :  { %v9947_v13 = vmax.f32 %v9499_v24, %v9723_v25  ;;  %v8374_v19 = vadd.f32 %v7665_v18, %v6709_v50  ;;  %5590 = vmatprep.mubr.bf16.mxu1 %v16357_v44  ;;  %v10813_v59 = vrot.slane %v10812_v0, 4  ;;  %v6710_v48 = vadd.f32 %v6262_v42, %v5330_v39  ;;  %v15088_v39 = vld [vmem:[%s15784_s6 + $0x10] sm:$0x7f] }
 0x4f6   :  { %v9724_v45 = vmul.f32 0.2, %v9500_v55  ;;  %v7671_v15 = vpop.f32.mrb[8].mxu0 }
 0x4f7   :  { %v9270_v33 = vadd.f32 %v8822_v34, %v8374_v19  ;;  %v5336_v60 = vpop.f32.mrb[8].mxu1  ;;  %v10814_v3 = vadd.f32 %v10813_v59, %v10812_v0  ;;  %v10178_v63 = vmul.f32 %v15068_v4, %v9947_v13  ;;  %v8375_v6 = vadd.f32 %v7671_v15, %v6710_v48  ;;  %v7673_v43 = vpop.f32.mrb[9].mxu0 }
 0x4f8   :  { %v5338_v16 = vpop.f32.mrb[9].mxu1  ;;  %v9948_v56 = vmax.f32 %v9500_v55, %v9724_v45  ;;  %v7675_v12 = vpop.f32.mrb[10].mxu0  ;;  %v8823_v17 = vrot.slane %v7673_v43, 1 }
 0x4f9   :  { %v9501_v27 = vadd.f32 %v15055_v58, %v9270_v33  ;;  %v6263_v47 = vrot.slane %v5338_v16, 1  ;;  %v5340_v51 = vpop.f32.mrb[10].mxu1  ;;  %v7677_v57 = vpop.f32.mrb[11].mxu0  ;;  %v10815_v61 = vrot.slane %v10814_v3, 2  ;;  %v10499_v38 = vsel %vm10290_vm1, %v10178_v63, 0.0 }
 0x4fa   :  { %v5342_v37 = vpop.f32.mrb[11].mxu1  ;;  %v10179_v23 = vmul.f32 %v15075_v9, %v9948_v56  ;;  %v9271_v26 = vadd.f32 %v8823_v17, %v8375_v6  ;;  %v8824_v28 = vrot.slane %v7677_v57, 1  ;;  %v16360_v6 = vld [vmem:[#allocation109_spill] sm:$0xff] }
 0x4fb   :  { %v9725_v31 = vmul.f32 0.2, %v9501_v27  ;;  %v6711_v40 = vadd.f32 %v6263_v47, %v5336_v60  ;;  %v6264_v7 = vrot.slane %v5342_v37, 1  ;;  %7926 = vmatmul.mubr.bf16.gmra.mrb[116].mxu0 %v16358_v32  ;;  %v10816_v35 = vadd.f32 %v10815_v61, %v10814_v3  ;;  %v15098_v3 = vld [vmem:[%s15784_s6 + $0x18] sm:$0x7f] }
 0x4fc   :  { %5591 = vmatmul.mubr.bf16.gmra.mrb[116].mxu1 %v16358_v32  ;;  %v10500_v22 = vsel %vm10290_vm1, %v10179_v23, 0.0  ;;  %7935 = vmatprep.mubr.bf16.mxu0 %v16359_v11  ;;  %v9502_v10 = vadd.f32 %v15055_v58, %v9271_v26 }
 0x4fd   :  { %v9949_v41 = vmax.f32 %v9501_v27, %v9725_v31  ;;  %v8376_v62 = vadd.f32 %v7675_v12, %v6711_v40  ;;  %5600 = vmatprep.mubr.bf16.mxu1 %v16359_v11  ;;  %v6712_v2 = vadd.f32 %v6264_v7, %v5340_v51  ;;  %v10501_v24 = vadd.f32 %v10500_v22, %v10499_v38  ;;  %v11651_v15 = vpop.eup %11650  ;;  %v16361_v27 = vld [vmem:[#allocation115_spill] sm:$0xff] }
 0x4fe   :  { %v10817_v21 = vrot.slane %v10816_v35, 1  ;;  %v7681_v1 = vpop.f32.mrb[12].mxu0  ;;  %v9726_v5 = vmul.f32 0.2, %v9502_v10  ;;  %v15110_v12 = vld [vmem:[%s15784_s6 + $0x20] sm:$0x7f] }
 0x4ff   :  { %v10180_v18 = vmul.f32 %v15088_v39, %v9949_v41  ;;  %v9272_v52 = vadd.f32 %v8824_v28, %v8376_v62  ;;  %v5346_v29 = vpop.f32.mrb[12].mxu1  ;;  %v8377_v54 = vadd.f32 %v7681_v1, %v6712_v2  ;;  %v7683_v53 = vpop.f32.mrb[13].mxu0  ;;  %v11033_v22 = vadd.f32 1.0, %v11651_v15  ;;  %v15118_v2 = vld [vmem:[%s15784_s6 + $0x28] sm:$0x7f] }
 0x500   :  { %v5348_v25 = vpop.f32.mrb[13].mxu1  ;;  %v10818_v50 = vadd.f32 %v10817_v21, %v10816_v35  ;;  %v8825_v0 = vrot.slane %v7683_v53, 1  ;;  %v7685_v55 = vpop.f32.mrb[14].mxu0  ;;  %v9950_v44 = vmax.f32 %v9502_v10, %v9726_v5 }
 0x501   :  { %v10502_v42 = vsel %vm10290_vm1, %v10180_v18, 0.0  ;;  %v9503_v34 = vadd.f32 %v15055_v58, %v9272_v52  ;;  %v6265_v36 = vrot.slane %v5348_v25, 1  ;;  %v5350_v13 = vpop.f32.mrb[14].mxu1  ;;  %v7687_v59 = vpop.f32.mrb[15].mxu0  ;;  %v16363_v25 = vld [vmem:[#allocation119_spill] sm:$0xff]  ;;  %11652 = vrcp.f32 %v11033_v22 }
 0x502   :  { %v10503_v19 = vadd.f32 %v10502_v42, %v10501_v24  ;;  %v10983_v20 = vsel %vm10975_vm8, %v10818_v50, %v15033_v8  ;;  %v5351_v48 = vpop.f32.mrb[15].mxu1  ;;  %v9273_v33 = vadd.f32 %v8825_v0, %v8377_v54  ;;  %v10181_v63 = vmul.f32 %v15098_v3, %v9950_v44  ;;  %v15129_v42 = vld [vmem:[%s15784_s6 + $0x30] sm:$0x7f] }
 0x503   :  { %v9727_v45 = vmul.f32 0.2, %v9503_v34  ;;  %v6713_v60 = vadd.f32 %v6265_v36, %v5346_v29  ;;  %11004 = vadd.xlane.f32.xlu0 %v10983_v20  ;;  %7936 = vmatmul.mubr.bf16.gmra.mrb[120].mxu0 %v16360_v6  ;;  %v8826_v56 = vrot.slane %v7687_v59, 1  ;;  %v16362_v29 = vld [vmem:[#allocation113_spill] sm:$0xff] }
 0x504   :  { %5601 = vmatmul.mubr.bf16.gmra.mrb[120].mxu1 %v16360_v6  ;;  %v9504_v8 = vadd.f32 %v15055_v58, %v9273_v33  ;;  %7945 = vmatprep.mubr.bf16.mxu0 %v16361_v27  ;;  %v10504_v47 = vsel %vm10290_vm1, %v10181_v63, 0.0 }
 0x505   :  { %v9951_v16 = vmax.f32 %v9503_v34, %v9727_v45  ;;  %v8378_v43 = vadd.f32 %v7685_v55, %v6713_v60  ;;  %5610 = vmatprep.mubr.bf16.mxu1 %v16361_v27  ;;  %v10505_v51 = vadd.f32 %v10504_v47, %v10503_v19  ;;  %v16364_v27 = vld [vmem:[#allocation117_spill] sm:$0xff] }
 0x506   :  { %v9728_v37 = vmul.f32 0.2, %v9504_v8  ;;  %v7691_v23 = vpop.f32.mrb[16].mxu0 }
 0x507   :  { %v10182_v17 = vmul.f32 %v15110_v12, %v9951_v16  ;;  %v9274_v57 = vadd.f32 %v8826_v56, %v8378_v43  ;;  %v5354_v61 = vpop.f32.mrb[16].mxu1  ;;  %v7692_v40 = vpop.f32.mrb[17].mxu0 }
 0x508   :  { %v5356_v31 = vpop.f32.mrb[17].mxu1  ;;  %v9952_v38 = vmax.f32 %v9504_v8, %v9728_v37  ;;  %v7693_v35 = vpop.f32.mrb[18].mxu0 }
 0x509   :  { %v10506_v7 = vsel %vm10290_vm1, %v10182_v17, 0.0  ;;  %v9505_v26 = vadd.f32 %v15055_v58, %v9274_v57  ;;  %v6266_v28 = vrot.slane %v5356_v31, 1  ;;  %v5358_v32 = vpop.f32.mrb[18].mxu1  ;;  %v7695_v11 = vpop.f32.mrb[19].mxu0  ;;  %v16365_v57 = vld [vmem:[#allocation123_spill] sm:$0xff] }
 0x50a   :  { %v10507_v41 = vadd.f32 %v10506_v7, %v10505_v51  ;;  %v5360_v62 = vpop.f32.mrb[19].mxu1  ;;  %v10183_v24 = vmul.f32 %v15118_v2, %v9952_v38  ;;  %v8827_v52 = vrot.slane %v7695_v11, 1 }
 0x50b   :  { %v9729_v10 = vmul.f32 0.2, %v9505_v26  ;;  %v6714_v21 = vadd.f32 %v6266_v28, %v5354_v61  ;;  %v6267_v18 = vrot.slane %v5360_v62, 1  ;;  %7946 = vmatmul.mubr.bf16.gmra.mrb[124].mxu0 %v16362_v29  ;;  %v11653_v38 = vpop.eup %11652 }
 0x50c   :  { %5611 = vmatmul.mubr.bf16.gmra.mrb[124].mxu1 %v16362_v29  ;;  %v10508_v1 = vsel %vm10290_vm1, %v10183_v24, 0.0  ;;  %7955 = vmatprep.mubr.bf16.mxu0 %v16363_v25 }
 0x50d   :  { %v9953_v5 = vmax.f32 %v9505_v26, %v9729_v10  ;;  %v8379_v54 = vadd.f32 %v7693_v35, %v6714_v21  ;;  %5618 = vmatprep.mubr.bf16.mxu1 %v16363_v25  ;;  %v6715_v53 = vadd.f32 %v6267_v18, %v5358_v32  ;;  %v10509_v50 = vadd.f32 %v10508_v1, %v10507_v41  ;;  %v16366_v25 = vld [vmem:[#allocation121_spill] sm:$0xff] }
 0x50e   :  { %v7699_v13 = vpop.f32.mrb[20].mxu0 }
 0x50f   :  { %v10184_v34 = vmul.f32 %v15129_v42, %v9953_v5  ;;  %v9275_v36 = vadd.f32 %v8827_v52, %v8379_v54  ;;  %v5364_v0 = vpop.f32.mrb[20].mxu1  ;;  %v8380_v55 = vadd.f32 %v7699_v13, %v6715_v53  ;;  %v7701_v44 = vpop.f32.mrb[21].mxu0 }
 0x510   :  { %v5366_v19 = vpop.f32.mrb[21].mxu1  ;;  %v8828_v45 = vrot.slane %v7701_v44, 1  ;;  %v7703_v60 = vpop.f32.mrb[22].mxu0 }
 0x511   :  { %v10510_v59 = vsel %vm10290_vm1, %v10184_v34, 0.0  ;;  %v9506_v20 = vadd.f32 %v15055_v58, %v9275_v36  ;;  %v6268_v48 = vrot.slane %v5366_v19, 1  ;;  %v5368_v33 = vpop.f32.mrb[22].mxu1  ;;  %v7705_v6 = vpop.f32.mrb[23].mxu0  ;;  %v16367_v36 = vld [vmem:[#allocation126_spill] sm:$0xff] }
 0x512   :  { %v15134_v15 = vadd.f32 %v10510_v59, %v10509_v50  ;;  %v5370_v63 = vpop.f32.mrb[23].mxu1  ;;  %v9276_v8 = vadd.f32 %v8828_v45, %v8380_v55  ;;  %v8829_v37 = vrot.slane %v7705_v6, 1 }
 0x513   :  { %v9730_v16 = vmul.f32 0.2, %v9506_v20  ;;  %v6716_v43 = vadd.f32 %v6268_v48, %v5364_v0  ;;  %v6269_v56 = vrot.slane %v5370_v63, 1  ;;  %7956 = vmatmul.mubr.bf16.gmra.mrb[128].mxu0 %v16364_v27 }
 0x514   :  { %5619 = vmatmul.mubr.bf16.gmra.mrb[128].mxu1 %v16364_v27  ;;  %v9507_v51 = vadd.f32 %v15055_v58, %v9276_v8  ;;  %7963 = vmatprep.mubr.bf16.mxu0 %v16365_v57 }
 0x515   :  { %v9954_v47 = vmax.f32 %v9506_v20, %v9730_v16  ;;  %v8381_v17 = vadd.f32 %v7703_v60, %v6716_v43  ;;  %5628 = vmatprep.mubr.bf16.mxu1 %v16365_v57  ;;  %v6717_v61 = vadd.f32 %v6269_v56, %v5368_v33 }
 0x516   :  { %v9731_v23 = vmul.f32 0.2, %v9507_v51  ;;  %v7709_v7 = vpop.f32.mrb[24].mxu0 }
 0x517   :  { %v9277_v31 = vadd.f32 %v8829_v37, %v8381_v17  ;;  %v5374_v40 = vpop.f32.mrb[24].mxu1  ;;  %v8382_v26 = vadd.f32 %v7709_v7, %v6717_v61  ;;  %v7711_v28 = vpop.f32.mrb[25].mxu0  ;;  %v10185_v35 = vmul.f32 %v15068_v4, %v9954_v47  ;;  %v16368_v7 = vld [vmem:[#allocation125_spill] sm:$0xff] }
 0x518   :  { %v5376_v32 = vpop.f32.mrb[25].mxu1  ;;  %v9955_v22 = vmax.f32 %v9507_v51, %v9731_v23  ;;  %v7713_v11 = vpop.f32.mrb[26].mxu0  ;;  %v8830_v24 = vrot.slane %v7711_v28, 1 }
 0x519   :  { %v9508_v41 = vadd.f32 %v15055_v58, %v9277_v31  ;;  %11047 = vperm.xlu0 %11412, %v11653_v38   ;;  %v5378_v62 = vpop.f32.mrb[26].mxu1  ;;  %v6270_v10 = vrot.slane %v5376_v32, 1  ;;  %v7715_v18 = vpop.f32.mrb[27].mxu0  ;;  %v10512_v53 = vsel %vm10290_vm1, %v10185_v35, 0.0  ;;  %v16369_v32 = vld [vmem:[#allocation128_spill] sm:$0xff] }
 0x51a   :  { %v5380_v21 = vpop.f32.mrb[27].mxu1  ;;  %v10186_v52 = vmul.f32 %v15075_v9, %v9955_v22  ;;  %v9278_v5 = vadd.f32 %v8830_v24, %v8382_v26  ;;  %v8831_v44 = vrot.slane %v7715_v18, 1 }
 0x51b   :  { %v9732_v29 = vmul.f32 0.2, %v9508_v41  ;;  %v6271_v1 = vrot.slane %v5380_v21, 1  ;;  %v6718_v54 = vadd.f32 %v6270_v10, %v5374_v40  ;;  %7964 = vmatmul.mubr.bf16.gmra.mrb[132].mxu0 %v16366_v25 }
 0x51c   :  { %5629 = vmatmul.mubr.bf16.gmra.mrb[132].mxu1 %v16366_v25  ;;  %v10513_v50 = vsel %vm10290_vm1, %v10186_v52, 0.0  ;;  %7973 = vmatprep.mubr.bf16.mxu0 %v16367_v36  ;;  %v9509_v55 = vadd.f32 %v15055_v58, %v9278_v5 }
 0x51d   :  { %v9956_v34 = vmax.f32 %v9508_v41, %v9732_v29  ;;  %5638 = vmatprep.mubr.bf16.mxu1 %v16367_v36  ;;  %v6719_v0 = vadd.f32 %v6271_v1, %v5378_v62  ;;  %v10514_v13 = vadd.f32 %v10513_v50, %v10512_v53  ;;  %v8383_v19 = vadd.f32 %v7713_v11, %v6718_v54 }
 0x51e   :  { %v7719_v48 = vpop.f32.mrb[28].mxu0  ;;  %v9733_v45 = vmul.f32 0.2, %v9509_v55  ;;  %v10819_v41 = vsel %vm10290_vm1, %v15134_v15, 0.0 }
 0x51f   :  { %v10187_v59 = vmul.f32 %v15088_v39, %v9956_v34  ;;  %v5384_v20 = vpop.f32.mrb[28].mxu1  ;;  %v9279_v33 = vadd.f32 %v8831_v44, %v8383_v19  ;;  %v8384_v60 = vadd.f32 %v7719_v48, %v6719_v0  ;;  %v7721_v6 = vpop.f32.mrb[29].mxu0  ;;  %v10820_v50 = vrot.slane %v10819_v41, 4 }
 0x520   :  { %v5386_v63 = vpop.f32.mrb[29].mxu1  ;;  %v8832_v43 = vrot.slane %v7721_v6, 1  ;;  %v7723_v27 = vpop.f32.mrb[30].mxu0  ;;  %v9957_v51 = vmax.f32 %v9509_v55, %v9733_v45 }
 0x521   :  { %v10515_v16 = vsel %vm10290_vm1, %v10187_v59, 0.0  ;;  %v6272_v8 = vrot.slane %v5386_v63, 1  ;;  %v5388_v56 = vpop.f32.mrb[30].mxu1  ;;  %v9510_v17 = vadd.f32 %v15055_v58, %v9279_v33  ;;  %v7725_v57 = vpop.f32.mrb[31].mxu0  ;;  %v16370_v59 = vld [vmem:[#allocation127_spill] sm:$0xff]  ;;  %v10821_v63 = vadd.f32 %v10820_v50, %v10819_v41 }
 0x522   :  { %v10516_v47 = vadd.f32 %v10515_v16, %v10514_v13  ;;  %v5389_v37 = vpop.f32.mrb[31].mxu1  ;;  %v9280_v61 = vadd.f32 %v8832_v43, %v8384_v60  ;;  %v10188_v31 = vmul.f32 %v15098_v3, %v9957_v51  ;;  %v8833_v28 = vrot.slane %v7725_v57, 1  ;;  %v16371_v60 = vld [vmem:[#allocation130_spill] sm:$0xff] }
 0x523   :  { %v6720_v23 = vadd.f32 %v6272_v8, %v5384_v20  ;;  %v9734_v40 = vmul.f32 0.2, %v9510_v17  ;;  %7974 = vmatmul.mubr.bf16.gmra.mrb[136].mxu0 %v16368_v7 }
 0x524   :  { %5639 = vmatmul.mubr.bf16.gmra.mrb[136].mxu1 %v16368_v7  ;;  %v9511_v38 = vadd.f32 %v15055_v58, %v9280_v61  ;;  %7983 = vmatprep.mubr.bf16.mxu0 %v16369_v32  ;;  %v10517_v35 = vsel %vm10290_vm1, %v10188_v31, 0.0  ;;  %v10822_v7 = vrot.slane %v10821_v63, 2 }
 0x525   :  { %v8385_v26 = vadd.f32 %v7723_v27, %v6720_v23  ;;  %5648 = vmatprep.mubr.bf16.mxu1 %v16369_v32  ;;  %v9958_v22 = vmax.f32 %v9510_v17, %v9734_v40  ;;  %v10518_v62 = vadd.f32 %v10517_v35, %v10516_v47 }
 0x526   :  { %v9735_v11 = vmul.f32 0.2, %v9511_v38  ;;  %v7729_v21 = vpop.f32.mrb[32].mxu0 }
 0x527   :  { %v9281_v24 = vadd.f32 %v8833_v28, %v8385_v26  ;;  %v5392_v10 = vpop.f32.mrb[32].mxu1  ;;  %v10189_v18 = vmul.f32 %v15110_v12, %v9958_v22  ;;  %v7730_v29 = vpop.f32.mrb[33].mxu0 }
 0x528   :  { %v5394_v52 = vpop.f32.mrb[33].mxu1  ;;  %v9959_v1 = vmax.f32 %v9511_v38, %v9735_v11  ;;  %v7731_v53 = vpop.f32.mrb[34].mxu0  ;;  %v16373_v29 = vld [vmem:[#allocation132_spill] sm:$0xff] }
 0x529   :  { %v9512_v5 = vadd.f32 %v15055_v58, %v9281_v24  ;;  %v6273_v54 = vrot.slane %v5394_v52, 1  ;;  %v5396_v25 = vpop.f32.mrb[34].mxu1  ;;  %v10519_v34 = vsel %vm10290_vm1, %v10189_v18, 0.0  ;;  %v7733_v15 = vpop.f32.mrb[35].mxu0  ;;  %v16372_v24 = vld [vmem:[#allocation129_spill] sm:$0xff] }
 0x52a   :  { %v5398_v36 = vpop.f32.mrb[35].mxu1  ;;  %v10520_v0 = vadd.f32 %v10519_v34, %v10518_v62  ;;  %v10190_v13 = vmul.f32 %v15118_v2, %v9959_v1  ;;  %v8834_v33 = vrot.slane %v7733_v15, 1  ;;  %v10823_v1 = vadd.f32 %v10822_v7, %v10821_v63 }
 0x52b   :  { %v9736_v55 = vmul.f32 0.2, %v9512_v5  ;;  %v6721_v19 = vadd.f32 %v6273_v54, %v5392_v10  ;;  %v6274_v44 = vrot.slane %v5398_v36, 1  ;;  %7984 = vmatmul.mubr.bf16.gmra.mrb[140].mxu0 %v16370_v59 }
 0x52c   :  { %5649 = vmatmul.mubr.bf16.gmra.mrb[140].mxu1 %v16370_v59  ;;  %v10521_v20 = vsel %vm10290_vm1, %v10190_v13, 0.0  ;;  %7993 = vmatprep.mubr.bf16.mxu0 %v16371_v60 }
 0x52d   :  { %v9960_v48 = vmax.f32 %v9512_v5, %v9736_v55  ;;  %v8386_v45 = vadd.f32 %v7731_v53, %v6721_v19  ;;  %5656 = vmatprep.mubr.bf16.mxu1 %v16371_v60  ;;  %v10522_v6 = vadd.f32 %v10521_v20, %v10520_v0  ;;  %v6722_v16 = vadd.f32 %v6274_v44, %v5396_v25 }
 0x52e   :  { %v7737_v27 = vpop.f32.mrb[36].mxu0 }
 0x52f   :  { %v10191_v8 = vmul.f32 %v15129_v42, %v9960_v48  ;;  %v9282_v43 = vadd.f32 %v8834_v33, %v8386_v45  ;;  %v5402_v56 = vpop.f32.mrb[36].mxu1  ;;  %v8387_v47 = vadd.f32 %v7737_v27, %v6722_v16  ;;  %v7739_v17 = vpop.f32.mrb[37].mxu0  ;;  %v10824_v48 = vrot.slane %v10823_v1, 1 }
 0x530   :  { %v5404_v51 = vpop.f32.mrb[37].mxu1  ;;  %v8835_v23 = vrot.slane %v7739_v17, 1  ;;  %v7741_v40 = vpop.f32.mrb[38].mxu0 }
 0x531   :  { %v10523_v37 = vsel %vm10290_vm1, %v10191_v8, 0.0  ;;  %v9513_v57 = vadd.f32 %v15055_v58, %v9282_v43  ;;  %v6275_v61 = vrot.slane %v5404_v51, 1  ;;  %v5406_v31 = vpop.f32.mrb[38].mxu1  ;;  %v7743_v28 = vpop.f32.mrb[39].mxu0  ;;  %v16374_v51 = vld [vmem:[#allocation131_spill] sm:$0xff] }
 0x532   :  { %v10524_v38 = vadd.f32 %v10523_v37, %v10522_v6  ;;  %v5408_v26 = vpop.f32.mrb[39].mxu1  ;;  %v9283_v35 = vadd.f32 %v8835_v23, %v8387_v47  ;;  %v8836_v11 = vrot.slane %v7743_v28, 1 }
 0x533   :  { %v9737_v32 = vmul.f32 0.2, %v9513_v57  ;;  %v6723_v22 = vadd.f32 %v6275_v61, %v5402_v56  ;;  %v6276_v41 = vrot.slane %v5408_v26, 1  ;;  %7994 = vmatmul.mubr.bf16.gmra.mrb[144].mxu0 %v16372_v24  ;;  %v16375_v61 = vld [vmem:[#allocation134_spill] sm:$0xff] }
 0x534   :  { %v10826_v62 = vsel %vm10290_vm1, %v10524_v38, 0.0  ;;  %5657 = vmatmul.mubr.bf16.gmra.mrb[144].mxu1 %v16372_v24  ;;  %v9514_v18 = vadd.f32 %v15055_v58, %v9283_v35  ;;  %8001 = vmatprep.mubr.bf16.mxu0 %v16373_v29  ;;  %v10825_v35 = vadd.f32 %v10824_v48, %v10823_v1 }
 0x535   :  { %v10827_v10 = vrot.slane %v10826_v62, 4  ;;  %v9961_v21 = vmax.f32 %v9513_v57, %v9737_v32  ;;  %v8388_v52 = vadd.f32 %v7741_v40, %v6723_v22  ;;  %5666 = vmatprep.mubr.bf16.mxu1 %v16373_v29  ;;  %v6724_v5 = vadd.f32 %v6276_v41, %v5406_v31 }
 0x536   :  { %v9738_v25 = vmul.f32 0.2, %v9514_v18  ;;  %v7747_v34 = vpop.f32.mrb[40].mxu0 }
 0x537   :  { %v10828_v54 = vadd.f32 %v10827_v10, %v10826_v62  ;;  %v9284_v53 = vadd.f32 %v8836_v11, %v8388_v52  ;;  %v5412_v50 = vpop.f32.mrb[40].mxu1  ;;  %v10192_v36 = vmul.f32 %v15068_v4, %v9961_v21  ;;  %v8389_v15 = vadd.f32 %v7747_v34, %v6724_v5  ;;  %v7749_v13 = vpop.f32.mrb[41].mxu0 }
 0x538   :  { %v5414_v0 = vpop.f32.mrb[41].mxu1  ;;  %v9962_v19 = vmax.f32 %v9514_v18, %v9738_v25  ;;  %v7751_v20 = vpop.f32.mrb[42].mxu0  ;;  %v8837_v33 = vrot.slane %v7749_v13, 1 }
 0x539   :  { %v10829_v55 = vrot.slane %v10828_v54, 2  ;;  %v9515_v44 = vadd.f32 %v15055_v58, %v9284_v53  ;;  %v5416_v59 = vpop.f32.mrb[42].mxu1  ;;  %v6277_v45 = vrot.slane %v5414_v0, 1  ;;  %v7753_v63 = vpop.f32.mrb[43].mxu0  ;;  %v10525_v56 = vsel %vm10290_vm1, %v10192_v36, 0.0 }
 0x53a   :  { %v5418_v60 = vpop.f32.mrb[43].mxu1  ;;  %v10193_v16 = vmul.f32 %v15075_v9, %v9962_v19  ;;  %v9285_v27 = vadd.f32 %v8837_v33, %v8389_v15  ;;  %v8838_v38 = vrot.slane %v7753_v63, 1 }
 0x53b   :  { %v10830_v6 = vadd.f32 %v10829_v55, %v10828_v54  ;;  %v9739_v8 = vmul.f32 0.2, %v9515_v44  ;;  %v6278_v43 = vrot.slane %v5418_v60, 1  ;;  %v6725_v47 = vadd.f32 %v6277_v45, %v5412_v50  ;;  %8002 = vmatmul.mubr.bf16.gmra.mrb[148].mxu0 %v16374_v51  ;;  %v16376_v55 = vld [vmem:[#allocation133_spill] sm:$0xff] }
 0x53c   :  { %5667 = vmatmul.mubr.bf16.gmra.mrb[148].mxu1 %v16374_v51  ;;  %v10526_v37 = vsel %vm10290_vm1, %v10193_v16, 0.0  ;;  %8011 = vmatprep.mubr.bf16.mxu0 %v16375_v61  ;;  %v9516_v40 = vadd.f32 %v15055_v58, %v9285_v27 }
 0x53d   :  { %v10831_v17 = vrot.slane %v10830_v6, 1  ;;  %v9963_v57 = vmax.f32 %v9515_v44, %v9739_v8  ;;  %5676 = vmatprep.mubr.bf16.mxu1 %v16375_v61  ;;  %v6726_v23 = vadd.f32 %v6278_v43, %v5416_v59  ;;  %v10527_v31 = vadd.f32 %v10526_v37, %v10525_v56 }
 0x53e   :  { %v8390_v7 = vadd.f32 %v7751_v20, %v6725_v47  ;;  %v7757_v32 = vpop.f32.mrb[44].mxu0  ;;  %v9740_v41 = vmul.f32 0.2, %v9516_v40  ;;  %v16377_v20 = vld [vmem:[#allocation136_spill] sm:$0xff] }
 0x53f   :  { %v10194_v26 = vmul.f32 %v15088_v39, %v9963_v57  ;;  %v5422_v28 = vpop.f32.mrb[44].mxu1  ;;  %v10832_v22 = vadd.f32 %v10831_v17, %v10830_v6  ;;  %v8391_v11 = vadd.f32 %v7757_v32, %v6726_v23  ;;  %v7759_v10 = vpop.f32.mrb[45].mxu0 }
 0x540   :  { %v9286_v62 = vadd.f32 %v8838_v38, %v8390_v7  ;;  %v5424_v24 = vpop.f32.mrb[45].mxu1  ;;  %v8839_v52 = vrot.slane %v7759_v10, 1  ;;  %v7761_v5 = vpop.f32.mrb[46].mxu0  ;;  %v9964_v53 = vmax.f32 %v9516_v40, %v9740_v41 }
 0x541   :  { %v10528_v21 = vsel %vm10290_vm1, %v10194_v26, 0.0  ;;  %v6279_v18 = vrot.slane %v5424_v24, 1  ;;  %v5426_v29 = vpop.f32.mrb[46].mxu1  ;;  %v15194_v54 = vsel %vm10963_vm2, %v10832_v22, %v10825_v35  ;;  %v7763_v34 = vpop.f32.mrb[47].mxu0 }
 0x542   :  { %v10529_v25 = vadd.f32 %v10528_v21, %v10527_v31  ;;  %v9517_v50 = vadd.f32 %v15055_v58, %v9286_v62  ;;  %v5427_v1 = vpop.f32.mrb[47].mxu1  ;;  %v9287_v36 = vadd.f32 %v8839_v52, %v8391_v11  ;;  %v10195_v0 = vmul.f32 %v15098_v3, %v9964_v53  ;;  %v16379_v62 = vld [vmem:[#allocation138_spill] sm:$0xff] }
 0x543   :  { %v6727_v15 = vadd.f32 %v6279_v18, %v5422_v28  ;;  %8012 = vmatmul.mubr.bf16.gmra.mrb[152].mxu0 %v16376_v55  ;;  %v8840_v59 = vrot.slane %v7763_v34, 1  ;;  %v16378_v28 = vld [vmem:[#allocation135_spill] sm:$0xff] }
 0x544   :  { %v9741_v13 = vmul.f32 0.2, %v9517_v50  ;;  %5677 = vmatmul.mubr.bf16.gmra.mrb[152].mxu1 %v16376_v55  ;;  %v9518_v19 = vadd.f32 %v15055_v58, %v9287_v36  ;;  %8021 = vmatprep.mubr.bf16.mxu0 %v16377_v20  ;;  %v10530_v48 = vsel %vm10290_vm1, %v10195_v0, 0.0 }
 0x545   :  { %v8392_v44 = vadd.f32 %v7761_v5, %v6727_v15  ;;  %5686 = vmatprep.mubr.bf16.mxu1 %v16377_v20  ;;  %v10531_v33 = vadd.f32 %v10530_v48, %v10529_v25 }
 0x546   :  { %v9965_v45 = vmax.f32 %v9517_v50, %v9741_v13  ;;  %v9742_v60 = vmul.f32 0.2, %v9518_v19  ;;  %v7767_v16 = vpop.f32.mrb[48].mxu0 }
 0x547   :  { %v9288_v63 = vadd.f32 %v8840_v59, %v8392_v44  ;;  %v5430_v6 = vpop.f32.mrb[48].mxu1  ;;  %v7768_v56 = vpop.f32.mrb[49].mxu0 }
 0x548   :  { %v10196_v8 = vmul.f32 %v15110_v12, %v9965_v45  ;;  %v5432_v43 = vpop.f32.mrb[49].mxu1  ;;  %v9966_v27 = vmax.f32 %v9518_v19, %v9742_v60  ;;  %v7769_v37 = vpop.f32.mrb[50].mxu0 }
 0x549   :  { %v9519_v47 = vadd.f32 %v15055_v58, %v9288_v63  ;;  %v6280_v51 = vrot.slane %v5432_v43, 1  ;;  %v5434_v17 = vpop.f32.mrb[50].mxu1  ;;  %v7771_v23 = vpop.f32.mrb[51].mxu0 }
 0x54a   :  { %v10532_v57 = vsel %vm10290_vm1, %v10196_v8, 0.0  ;;  %v5436_v61 = vpop.f32.mrb[51].mxu1  ;;  %v10197_v40 = vmul.f32 %v15118_v2, %v9966_v27  ;;  %v8841_v41 = vrot.slane %v7771_v23, 1  ;;  %v16381_v8 = vld [vmem:[#allocation140_spill] sm:$0xff] }
 0x54b   :  { %v10533_v31 = vadd.f32 %v10532_v57, %v10531_v33  ;;  %v9743_v7 = vmul.f32 0.2, %v9519_v47  ;;  %v6728_v38 = vadd.f32 %v6280_v51, %v5430_v6  ;;  %v6281_v26 = vrot.slane %v5436_v61, 1  ;;  %8022 = vmatmul.mubr.bf16.gmra.mrb[156].mxu0 %v16378_v28  ;;  %v16380_v33 = vld [vmem:[#allocation137_spill] sm:$0xff] }
 0x54c   :  { %5687 = vmatmul.mubr.bf16.gmra.mrb[156].mxu1 %v16378_v28  ;;  %v10534_v32 = vsel %vm10290_vm1, %v10197_v40, 0.0  ;;  %8031 = vmatprep.mubr.bf16.mxu0 %v16379_v62 }
 0x54d   :  { %v9967_v35 = vmax.f32 %v9519_v47, %v9743_v7  ;;  %v8393_v22 = vadd.f32 %v7769_v37, %v6728_v38  ;;  %5694 = vmatprep.mubr.bf16.mxu1 %v16379_v62  ;;  %v10535_v11 = vadd.f32 %v10534_v32, %v10533_v31  ;;  %v6729_v24 = vadd.f32 %v6281_v26, %v5434_v17 }
 0x54e   :  { %v7775_v52 = vpop.f32.mrb[52].mxu0 }
 0x54f   :  { %v10198_v10 = vmul.f32 %v15129_v42, %v9967_v35  ;;  %v9289_v21 = vadd.f32 %v8841_v41, %v8393_v22  ;;  %v5440_v18 = vpop.f32.mrb[52].mxu1  ;;  %v8394_v29 = vadd.f32 %v7775_v52, %v6729_v24  ;;  %v7777_v25 = vpop.f32.mrb[53].mxu0 }
 0x550   :  { %v5442_v5 = vpop.f32.mrb[53].mxu1  ;;  %v8842_v34 = vrot.slane %v7777_v25, 1  ;;  %v7779_v15 = vpop.f32.mrb[54].mxu0 }
 0x551   :  { %v10536_v53 = vsel %vm10290_vm1, %v10198_v10, 0.0  ;;  %v9520_v50 = vadd.f32 %v15055_v58, %v9289_v21  ;;  %v6282_v1 = vrot.slane %v5442_v5, 1  ;;  %v5444_v36 = vpop.f32.mrb[54].mxu1  ;;  %v7781_v55 = vpop.f32.mrb[55].mxu0  ;;  %v16383_v5 = vld [vmem:[#allocation143_spill] sm:$0xff] }
 0x552   :  { %v10537_v0 = vadd.f32 %v10536_v53, %v10535_v11  ;;  %v5446_v13 = vpop.f32.mrb[55].mxu1  ;;  %v9290_v44 = vadd.f32 %v8842_v34, %v8394_v29  ;;  %v8843_v45 = vrot.slane %v7781_v55, 1 }
 0x553   :  { %v9744_v19 = vmul.f32 0.2, %v9520_v50  ;;  %v6730_v59 = vadd.f32 %v6282_v1, %v5440_v18  ;;  %v6283_v20 = vrot.slane %v5446_v13, 1  ;;  %8032 = vmatmul.mubr.bf16.gmra.mrb[160].mxu0 %v16380_v33  ;;  %v16382_v18 = vld [vmem:[#allocation139_spill] sm:$0xff] }
 0x554   :  { %v10833_v48 = vsel %vm10290_vm1, %v10537_v0, 0.0  ;;  %5695 = vmatmul.mubr.bf16.gmra.mrb[160].mxu1 %v16380_v33  ;;  %v9521_v6 = vadd.f32 %v15055_v58, %v9290_v44  ;;  %8039 = vmatprep.mubr.bf16.mxu0 %v16381_v8 }
 0x555   :  { %v10834_v60 = vrot.slane %v10833_v48, 4  ;;  %v9968_v63 = vmax.f32 %v9520_v50, %v9744_v19  ;;  %v8395_v16 = vadd.f32 %v7779_v15, %v6730_v59  ;;  %5704 = vmatprep.mubr.bf16.mxu1 %v16381_v8  ;;  %v6731_v43 = vadd.f32 %v6283_v20, %v5444_v36 }
 0x556   :  { %v9745_v27 = vmul.f32 0.2, %v9521_v6  ;;  %v7785_v17 = vpop.f32.mrb[56].mxu0 }
 0x557   :  { %v10835_v56 = vadd.f32 %v10834_v60, %v10833_v48  ;;  %v9291_v47 = vadd.f32 %v8843_v45, %v8395_v16  ;;  %v5450_v51 = vpop.f32.mrb[56].mxu1  ;;  %v10199_v37 = vmul.f32 %v15068_v4, %v9968_v63  ;;  %v8396_v57 = vadd.f32 %v7785_v17, %v6731_v43  ;;  %v7787_v23 = vpop.f32.mrb[57].mxu0 }
 0x558   :  { %v5452_v61 = vpop.f32.mrb[57].mxu1  ;;  %v9969_v40 = vmax.f32 %v9521_v6, %v9745_v27  ;;  %v7789_v26 = vpop.f32.mrb[58].mxu0  ;;  %v8844_v32 = vrot.slane %v7787_v23, 1  ;;  %v16385_v23 = vld [vmem:[#allocation147_spill] sm:$0xff] }
 0x559   :  { %v10836_v31 = vrot.slane %v10835_v56, 2  ;;  %v9522_v7 = vadd.f32 %v15055_v58, %v9291_v47  ;;  %v5454_v38 = vpop.f32.mrb[58].mxu1  ;;  %v6284_v28 = vrot.slane %v5452_v61, 1  ;;  %v7791_v22 = vpop.f32.mrb[59].mxu0  ;;  %v10538_v4 = vsel %vm10290_vm1, %v10199_v37, 0.0  ;;  %v16384_v37 = vld [vmem:[#allocation142_spill] sm:$0xff] }
 0x55a   :  { %v5456_v35 = vpop.f32.mrb[59].mxu1  ;;  %v10200_v62 = vmul.f32 %v15075_v9, %v9969_v40  ;;  %v9292_v10 = vadd.f32 %v8844_v32, %v8396_v57  ;;  %v8845_v34 = vrot.slane %v7791_v22, 1 }
 0x55b   :  { %v10837_v41 = vadd.f32 %v10836_v31, %v10835_v56  ;;  %v9746_v11 = vmul.f32 0.2, %v9522_v7  ;;  %v6285_v24 = vrot.slane %v5456_v35, 1  ;;  %v6732_v21 = vadd.f32 %v6284_v28, %v5450_v51  ;;  %8040 = vmatmul.mubr.bf16.gmra.mrb[164].mxu0 %v16382_v18 }
 0x55c   :  { %5705 = vmatmul.mubr.bf16.gmra.mrb[164].mxu1 %v16382_v18  ;;  %v10539_v52 = vsel %vm10290_vm1, %v10200_v62, 0.0  ;;  %8049 = vmatprep.mubr.bf16.mxu0 %v16383_v5  ;;  %v9523_v50 = vadd.f32 %v15055_v58, %v9292_v10 }
 0x55d   :  { %v9970_v29 = vmax.f32 %v9522_v7, %v9746_v11  ;;  %5714 = vmatprep.mubr.bf16.mxu1 %v16383_v5  ;;  %v6733_v25 = vadd.f32 %v6285_v24, %v5454_v38  ;;  %v10838_v53 = vrot.slane %v10837_v41, 1  ;;  %v10540_v9 = vadd.f32 %v10539_v52, %v10538_v4 }
 0x55e   :  { %v8397_v1 = vadd.f32 %v7789_v26, %v6732_v21  ;;  %v7795_v0 = vpop.f32.mrb[60].mxu0  ;;  %v9747_v55 = vmul.f32 0.2, %v9523_v50 }
 0x55f   :  { %v10201_v36 = vmul.f32 %v15088_v39, %v9970_v29  ;;  %v5460_v15 = vpop.f32.mrb[60].mxu1  ;;  %v10839_v13 = vadd.f32 %v10838_v53, %v10837_v41  ;;  %v8398_v44 = vadd.f32 %v7795_v0, %v6733_v25  ;;  %v7797_v20 = vpop.f32.mrb[61].mxu0 }
 0x560   :  { %v9293_v19 = vadd.f32 %v8845_v34, %v8397_v1  ;;  %v5462_v59 = vpop.f32.mrb[61].mxu1  ;;  %v8846_v33 = vrot.slane %v7797_v20, 1  ;;  %v7799_v63 = vpop.f32.mrb[62].mxu0  ;;  %v9971_v39 = vmax.f32 %v9523_v50, %v9747_v55  ;;  %v16387_v34 = vld [vmem:[#allocation149_spill] sm:$0xff] }
 0x561   :  { %v10541_v48 = vsel %vm10290_vm1, %v10201_v36, 0.0  ;;  %v6286_v45 = vrot.slane %v5462_v59, 1  ;;  %v5464_v60 = vpop.f32.mrb[62].mxu1  ;;  %v15236_v6 = vsel %vm10965_vm3, %v10839_v13, %v15194_v54  ;;  %v7801_v56 = vpop.f32.mrb[63].mxu0 }
 0x562   :  { %v10542_v16 = vadd.f32 %v10541_v48, %v10540_v9  ;;  %v9524_v8 = vadd.f32 %v15055_v58, %v9293_v19  ;;  %v5465_v43 = vpop.f32.mrb[63].mxu1  ;;  %v9294_v27 = vadd.f32 %v8846_v33, %v8398_v44  ;;  %v10202_v51 = vmul.f32 %v15098_v3, %v9971_v39  ;;  %v16386_v9 = vld [vmem:[#allocation145_spill] sm:$0xff]  ;;  %v15260_v48 = vld [vmem:[%s15783_s5] ss:$0 sm:$0xff] }
 0x563   :  { %v6734_v47 = vadd.f32 %v6286_v45, %v5460_v15  ;;  %8050 = vmatmul.mubr.bf16.gmra.mrb[168].mxu0 %v16384_v37  ;;  %v8847_v54 = vrot.slane %v7801_v56, 1 }
 0x564   :  { %v9748_v17 = vmul.f32 0.2, %v9524_v8  ;;  %5715 = vmatmul.mubr.bf16.gmra.mrb[168].mxu1 %v16384_v37  ;;  %v9525_v57 = vadd.f32 %v15055_v58, %v9294_v27  ;;  %8059 = vmatprep.mubr.bf16.mxu0 %v16385_v23  ;;  %v10543_v31 = vsel %vm10290_vm1, %v10202_v51, 0.0  ;;  %v16388_v37 = vld [vmem:[#allocation22_spill] sm:$0xff] }
 0x565   :  { %v8399_v61 = vadd.f32 %v7799_v63, %v6734_v47  ;;  %5724 = vmatprep.mubr.bf16.mxu1 %v16385_v23  ;;  %v10544_v7 = vadd.f32 %v10543_v31, %v10542_v16  ;;  %v16389_v31 = vld [vmem:[#allocation151_spill] sm:$0xff] }
 0x566   :  { %v9972_v40 = vmax.f32 %v9524_v8, %v9748_v17  ;;  %v9749_v38 = vmul.f32 0.2, %v9525_v57  ;;  %v7805_v28 = vpop.f32.mrb[64].mxu0 }
 0x567   :  { %v9295_v26 = vadd.f32 %v8847_v54, %v8399_v61  ;;  %v5468_v3 = vpop.f32.mrb[64].mxu1  ;;  %v7806_v22 = vpop.f32.mrb[65].mxu0 }
 0x568   :  { %v10203_v32 = vmul.f32 %v15110_v12, %v9972_v40  ;;  %v5470_v35 = vpop.f32.mrb[65].mxu1  ;;  %v9973_v41 = vmax.f32 %v9525_v57, %v9749_v38  ;;  %v7807_v4 = vpop.f32.mrb[66].mxu0 }
 0x569   :  { %v9526_v62 = vadd.f32 %v15055_v58, %v9295_v26  ;;  %v6287_v11 = vrot.slane %v5470_v35, 1  ;;  %v5472_v24 = vpop.f32.mrb[66].mxu1  ;;  %v7809_v18 = vpop.f32.mrb[67].mxu0 }
 0x56a   :  { %v10545_v10 = vsel %vm10290_vm1, %v10203_v32, 0.0  ;;  %v5474_v21 = vpop.f32.mrb[67].mxu1  ;;  %v10204_v29 = vmul.f32 %v15118_v2, %v9973_v41  ;;  %v8848_v1 = vrot.slane %v7809_v18, 1  ;;  %v15272_v32 = vld [vmem:[%s15784_s6] sm:$0x7f] }
 0x56b   :  { %v10546_v52 = vadd.f32 %v10545_v10, %v10544_v7  ;;  %v9750_v5 = vmul.f32 0.2, %v9526_v62  ;;  %v6735_v25 = vadd.f32 %v6287_v11, %v5468_v3  ;;  %v6288_v53 = vrot.slane %v5474_v21, 1  ;;  %8060 = vmatmul.mubr.bf16.gmra.mrb[172].mxu0 %v16386_v9 }
 0x56c   :  { %5725 = vmatmul.mubr.bf16.gmra.mrb[172].mxu1 %v16386_v9  ;;  %v10547_v12 = vsel %vm10290_vm1, %v10204_v29, 0.0  ;;  %8069 = vmatprep.mubr.bf16.mxu0 %v16387_v34 }
 0x56d   :  { %v9974_v58 = vmax.f32 %v9526_v62, %v9750_v5  ;;  %v8400_v50 = vadd.f32 %v7807_v4, %v6735_v25  ;;  %5732 = vmatprep.mubr.bf16.mxu1 %v16387_v34  ;;  %v10548_v36 = vadd.f32 %v10547_v12, %v10546_v52  ;;  %v6736_v15 = vadd.f32 %v6288_v53, %v5472_v24  ;;  %v15279_v25 = vld [vmem:[%s15784_s6 + $0x8] sm:$0x7f]  ;;  %v16390_v34 = vld [vmem:[#allocation26_spill] sm:$0xff] }
 0x56e   :  { %v7813_v55 = vpop.f32.mrb[68].mxu0 }
 0x56f   :  { %v10205_v2 = vmul.f32 %v15129_v42, %v9974_v58  ;;  %v9296_v0 = vadd.f32 %v8848_v1, %v8400_v50  ;;  %v5478_v13 = vpop.f32.mrb[68].mxu1  ;;  %v8401_v19 = vadd.f32 %v7813_v55, %v6736_v15  ;;  %v7815_v59 = vpop.f32.mrb[69].mxu0 }
 0x570   :  { %v5480_v44 = vpop.f32.mrb[69].mxu1  ;;  %v8849_v60 = vrot.slane %v7815_v59, 1  ;;  %v7817_v16 = vpop.f32.mrb[70].mxu0 }
 0x571   :  { %v10549_v20 = vsel %vm10290_vm1, %v10205_v2, 0.0  ;;  %v9527_v45 = vadd.f32 %v15260_v48, %v9296_v0  ;;  %v6289_v33 = vrot.slane %v5480_v44, 1  ;;  %v5482_v63 = vpop.f32.mrb[70].mxu1  ;;  %v7819_v8 = vpop.f32.mrb[71].mxu0 }
 0x572   :  { %v10550_v42 = vadd.f32 %v10549_v20, %v10548_v36  ;;  %v5484_v39 = vpop.f32.mrb[71].mxu1  ;;  %v9297_v56 = vadd.f32 %v8849_v60, %v8401_v19  ;;  %v8850_v17 = vrot.slane %v7819_v8, 1 }
 0x573   :  { %v9751_v43 = vmul.f32 0.2, %v9527_v45  ;;  %v6737_v27 = vadd.f32 %v6289_v33, %v5478_v13  ;;  %v6290_v47 = vrot.slane %v5484_v39, 1  ;;  %8070 = vmatmul.mubr.bf16.gmra.mrb[176].mxu0 %v16388_v37  ;;  %v16391_v13 = vld [vmem:[#allocation153_spill] sm:$0xff] }
 0x574   :  { %v10840_v51 = vsel %vm10290_vm1, %v10550_v42, 0.0  ;;  %5733 = vmatmul.mubr.bf16.gmra.mrb[176].mxu1 %v16388_v37  ;;  %v9528_v54 = vadd.f32 %v15260_v48, %v9297_v56  ;;  %8077 = vmatprep.mubr.bf16.mxu0 %v16389_v31 }
 0x575   :  { %v10841_v57 = vrot.slane %v10840_v51, 4  ;;  %v9975_v61 = vmax.f32 %v9527_v45, %v9751_v43  ;;  %v8402_v23 = vadd.f32 %v7817_v16, %v6737_v27  ;;  %5742 = vmatprep.mubr.bf16.mxu1 %v16389_v31  ;;  %v6738_v40 = vadd.f32 %v6290_v47, %v5482_v63  ;;  %v15292_v45 = vld [vmem:[%s15784_s6 + $0x10] sm:$0x7f] }
 0x576   :  { %v9752_v38 = vmul.f32 0.2, %v9528_v54  ;;  %v7823_v28 = vpop.f32.mrb[72].mxu0 }
 0x577   :  { %v10842_v7 = vadd.f32 %v10841_v57, %v10840_v51  ;;  %v9298_v26 = vadd.f32 %v8850_v17, %v8402_v23  ;;  %v5488_v3 = vpop.f32.mrb[72].mxu1  ;;  %v10206_v35 = vmul.f32 %v15272_v32, %v9975_v61  ;;  %v8403_v22 = vadd.f32 %v7823_v28, %v6738_v40  ;;  %v7825_v62 = vpop.f32.mrb[73].mxu0 }
 0x578   :  { %v5490_v41 = vpop.f32.mrb[73].mxu1  ;;  %v9976_v24 = vmax.f32 %v9528_v54, %v9752_v38  ;;  %v7827_v21 = vpop.f32.mrb[74].mxu0  ;;  %v8851_v52 = vrot.slane %v7825_v62, 1 }
 0x579   :  { %v10843_v11 = vrot.slane %v10842_v7, 2  ;;  %v9529_v4 = vadd.f32 %v15260_v48, %v9298_v26  ;;  %v5492_v10 = vpop.f32.mrb[74].mxu1  ;;  %v6291_v18 = vrot.slane %v5490_v41, 1  ;;  %v7829_v5 = vpop.f32.mrb[75].mxu0  ;;  %v10551_v58 = vsel %vm10290_vm1, %v10206_v35, 0.0  ;;  %v16392_v35 = vld [vmem:[#allocation30_spill] sm:$0xff] }
 0x57a   :  { %v5494_v29 = vpop.f32.mrb[75].mxu1  ;;  %v10207_v53 = vmul.f32 %v15279_v25, %v9976_v24  ;;  %v9299_v50 = vadd.f32 %v8851_v52, %v8403_v22  ;;  %v8852_v0 = vrot.slane %v7829_v5, 1  ;;  %v15304_v26 = vld [vmem:[%s15784_s6 + $0x18] sm:$0x7f] }
 0x57b   :  { %v9753_v9 = vmul.f32 0.2, %v9529_v4  ;;  %v6292_v12 = vrot.slane %v5494_v29, 1  ;;  %v6739_v1 = vadd.f32 %v6291_v18, %v5488_v3  ;;  %8078 = vmatmul.mubr.bf16.gmra.mrb[180].mxu0 %v16390_v34  ;;  %v10844_v36 = vadd.f32 %v10843_v11, %v10842_v7  ;;  %v15316_v29 = vld [vmem:[%s15784_s6 + $0x20] sm:$0x7f] }
 0x57c   :  { %5743 = vmatmul.mubr.bf16.gmra.mrb[180].mxu1 %v16390_v34  ;;  %v10552_v15 = vsel %vm10290_vm1, %v10207_v53, 0.0  ;;  %8087 = vmatprep.mubr.bf16.mxu0 %v16391_v13  ;;  %v9530_v44 = vadd.f32 %v15260_v48, %v9299_v50 }
 0x57d   :  { %v9977_v2 = vmax.f32 %v9529_v4, %v9753_v9  ;;  %5752 = vmatprep.mubr.bf16.mxu1 %v16391_v13  ;;  %v6740_v55 = vadd.f32 %v6292_v12, %v5492_v10  ;;  %v10553_v19 = vadd.f32 %v10552_v15, %v10551_v58  ;;  %v8404_v59 = vadd.f32 %v7827_v21, %v6739_v1  ;;  %v15324_v13 = vld [vmem:[%s15784_s6 + $0x28] sm:$0x7f] }
 0x57e   :  { %v10845_v20 = vrot.slane %v10844_v36, 1  ;;  %v7833_v63 = vpop.f32.mrb[76].mxu0  ;;  %v9754_v16 = vmul.f32 0.2, %v9530_v44 }
 0x57f   :  { %v10208_v33 = vmul.f32 %v15292_v45, %v9977_v2  ;;  %v5498_v60 = vpop.f32.mrb[76].mxu1  ;;  %v9300_v42 = vadd.f32 %v8852_v0, %v8404_v59  ;;  %v8405_v39 = vadd.f32 %v7833_v63, %v6740_v55  ;;  %v7835_v43 = vpop.f32.mrb[77].mxu0 }
 0x580   :  { %v5500_v8 = vpop.f32.mrb[77].mxu1  ;;  %v10846_v56 = vadd.f32 %v10845_v20, %v10844_v36  ;;  %v8853_v51 = vrot.slane %v7835_v43, 1  ;;  %v7837_v37 = vpop.f32.mrb[78].mxu0  ;;  %v9978_v61 = vmax.f32 %v9530_v44, %v9754_v16  ;;  %v16394_v20 = vld [vmem:[#allocation34_spill] sm:$0xff]  ;;  %v15335_v43 = vld [vmem:[%s15784_s6 + $0x30] sm:$0x7f] }
 0x581   :  { %v10554_v27 = vsel %vm10290_vm1, %v10208_v33, 0.0  ;;  %v6293_v47 = vrot.slane %v5500_v8, 1  ;;  %v5502_v17 = vpop.f32.mrb[78].mxu1  ;;  %v9531_v54 = vadd.f32 %v15260_v48, %v9300_v42  ;;  %v7839_v31 = vpop.f32.mrb[79].mxu0  ;;  %v16395_v42 = vld [vmem:[#allocation157_spill] sm:$0xff] }
 0x582   :  { %v10555_v57 = vadd.f32 %v10554_v27, %v10553_v19  ;;  %v5503_v23 = vpop.f32.mrb[79].mxu1  ;;  %v15299_v40 = vsel %vm10967_vm4, %v10846_v56, %v15236_v6  ;;  %v9301_v7 = vadd.f32 %v8853_v51, %v8405_v39  ;;  %v10209_v3 = vmul.f32 %v15304_v26, %v9978_v61  ;;  %v16393_v6 = vld [vmem:[#allocation155_spill] sm:$0xff] }
 0x583   :  { %v6741_v38 = vadd.f32 %v6293_v47, %v5498_v60  ;;  %v9755_v28 = vmul.f32 0.2, %v9531_v54  ;;  %8088 = vmatmul.mubr.bf16.gmra.mrb[184].mxu0 %v16392_v35  ;;  %v8854_v62 = vrot.slane %v7839_v31, 1 }
 0x584   :  { %5753 = vmatmul.mubr.bf16.gmra.mrb[184].mxu1 %v16392_v35  ;;  %v9532_v22 = vadd.f32 %v15260_v48, %v9301_v7  ;;  %8097 = vmatprep.mubr.bf16.mxu0 %v16393_v6  ;;  %v10556_v11 = vsel %vm10290_vm1, %v10209_v3, 0.0 }
 0x585   :  { %v8406_v41 = vadd.f32 %v7837_v37, %v6741_v38  ;;  %5762 = vmatprep.mubr.bf16.mxu1 %v16393_v6  ;;  %v9979_v24 = vmax.f32 %v9531_v54, %v9755_v28  ;;  %v10557_v4 = vadd.f32 %v10556_v11, %v10555_v57 }
 0x586   :  { %v9756_v10 = vmul.f32 0.2, %v9532_v22  ;;  %v7843_v52 = vpop.f32.mrb[80].mxu0 }
 0x587   :  { %v9302_v21 = vadd.f32 %v8854_v62, %v8406_v41  ;;  %v5506_v18 = vpop.f32.mrb[80].mxu1  ;;  %v10210_v5 = vmul.f32 %v15316_v29, %v9979_v24  ;;  %v7844_v9 = vpop.f32.mrb[81].mxu0  ;;  %v16397_v52 = vld [vmem:[#allocation159_spill] sm:$0xff] }
 0x588   :  { %v5508_v53 = vpop.f32.mrb[81].mxu1  ;;  %v9980_v12 = vmax.f32 %v9532_v22, %v9756_v10  ;;  %v7845_v34 = vpop.f32.mrb[82].mxu0 }
 0x589   :  { %v9533_v58 = vadd.f32 %v15260_v48, %v9302_v21  ;;  %v6294_v50 = vrot.slane %v5508_v53, 1  ;;  %v5510_v1 = vpop.f32.mrb[82].mxu1  ;;  %v10558_v36 = vsel %vm10290_vm1, %v10210_v5, 0.0  ;;  %v7847_v2 = vpop.f32.mrb[83].mxu0 }
 0x58a   :  { %v5512_v15 = vpop.f32.mrb[83].mxu1  ;;  %v10559_v0 = vadd.f32 %v10558_v36, %v10557_v4  ;;  %v10211_v55 = vmul.f32 %v15324_v13, %v9980_v12  ;;  %v8855_v16 = vrot.slane %v7847_v2, 1  ;;  %v16396_v4 = vld [vmem:[#allocation38_spill] sm:$0xff] }
 0x58b   :  { %v9757_v19 = vmul.f32 0.2, %v9533_v58  ;;  %v6742_v44 = vadd.f32 %v6294_v50, %v5506_v18  ;;  %v6295_v59 = vrot.slane %v5512_v15, 1  ;;  %8098 = vmatmul.mubr.bf16.gmra.mrb[188].mxu0 %v16394_v20 }
 0x58c   :  { %5763 = vmatmul.mubr.bf16.gmra.mrb[188].mxu1 %v16394_v20  ;;  %v10560_v33 = vsel %vm10290_vm1, %v10211_v55, 0.0  ;;  %8107 = vmatprep.mubr.bf16.mxu0 %v16395_v42 }
 0x58d   :  { %v9981_v60 = vmax.f32 %v9533_v58, %v9757_v19  ;;  %v8407_v63 = vadd.f32 %v7845_v34, %v6742_v44  ;;  %5770 = vmatprep.mubr.bf16.mxu1 %v16395_v42  ;;  %v10561_v39 = vadd.f32 %v10560_v33, %v10559_v0  ;;  %v6743_v8 = vadd.f32 %v6295_v59, %v5510_v1 }
 0x58e   :  { %v7851_v47 = vpop.f32.mrb[84].mxu0 }
 0x58f   :  { %v10212_v56 = vmul.f32 %v15335_v43, %v9981_v60  ;;  %v9303_v27 = vadd.f32 %v8855_v16, %v8407_v63  ;;  %v5516_v51 = vpop.f32.mrb[84].mxu1  ;;  %v8408_v17 = vadd.f32 %v7851_v47, %v6743_v8  ;;  %v7853_v23 = vpop.f32.mrb[85].mxu0 }
 0x590   :  { %v5518_v37 = vpop.f32.mrb[85].mxu1  ;;  %v8856_v38 = vrot.slane %v7853_v23, 1  ;;  %v7855_v3 = vpop.f32.mrb[86].mxu0 }
 0x591   :  { %v10562_v57 = vsel %vm10290_vm1, %v10212_v56, 0.0  ;;  %v9534_v61 = vadd.f32 %v15260_v48, %v9303_v27  ;;  %v6296_v54 = vrot.slane %v5518_v37, 1  ;;  %v5520_v31 = vpop.f32.mrb[86].mxu1  ;;  %v7857_v62 = vpop.f32.mrb[87].mxu0  ;;  %v16398_v37 = vld [vmem:[#allocation42_spill] sm:$0xff] }
 0x592   :  { %v10563_v7 = vadd.f32 %v10562_v57, %v10561_v39  ;;  %v5522_v28 = vpop.f32.mrb[87].mxu1  ;;  %v15341_v11 = vpop.xlane.xlu0 %11004  ;;  %v9304_v24 = vadd.f32 %v8856_v38, %v8408_v17  ;;  %v8857_v18 = vrot.slane %v7857_v62, 1 }
 0x593   :  { %v9758_v35 = vmul.f32 0.2, %v9534_v61  ;;  %v6744_v22 = vadd.f32 %v6296_v54, %v5516_v51  ;;  %v6297_v41 = vrot.slane %v5522_v28, 1  ;;  %8108 = vmatmul.mubr.bf16.gmra.mrb[192].mxu0 %v16396_v4  ;;  %v16399_v54 = vld [vmem:[#allocation161_spill] sm:$0xff] }
 0x594   :  { %v10847_v6 = vsel %vm10290_vm1, %v10563_v7, 0.0  ;;  %5771 = vmatmul.mubr.bf16.gmra.mrb[192].mxu1 %v16396_v4  ;;  %8115 = vmatprep.mubr.bf16.mxu0 %v16397_v52  ;;  %v9535_v53 = vadd.f32 %v15260_v48, %v9304_v24 }
 0x595   :  { %v10848_v10 = vrot.slane %v10847_v6, 4  ;;  %v8409_v21 = vadd.f32 %v7855_v3, %v6744_v22  ;;  %5780 = vmatprep.mubr.bf16.mxu1 %v16397_v52  ;;  %v9982_v5 = vmax.f32 %v9534_v61, %v9758_v35  ;;  %v6745_v9 = vadd.f32 %v6297_v41, %v5520_v31 }
 0x596   :  { %v7861_v50 = vpop.f32.mrb[88].mxu0  ;;  %v9759_v34 = vmul.f32 0.2, %v9535_v53 }
 0x597   :  { %v10849_v12 = vadd.f32 %v10848_v10, %v10847_v6  ;;  %v9305_v58 = vadd.f32 %v8857_v18, %v8409_v21  ;;  %v5526_v1 = vpop.f32.mrb[88].mxu1  ;;  %v8410_v36 = vadd.f32 %v7861_v50, %v6745_v9  ;;  %v7863_v19 = vpop.f32.mrb[89].mxu0  ;;  %v10213_v20 = vmul.f32 %v15272_v32, %v9982_v5 }
 0x598   :  { %v11048_v15 = vpop.permute.xlu0 %11047  ;;  %v5528_v2 = vpop.f32.mrb[89].mxu1  ;;  %v9983_v33 = vmax.f32 %v9535_v53, %v9759_v34  ;;  %v8858_v60 = vrot.slane %v7863_v19, 1  ;;  %v16400_v19 = vld [vmem:[#allocation46_spill] sm:$0xff] }
 0x599   :  { %v9536_v0 = vadd.f32 %v15260_v48, %v9305_v58  ;;  %11065 = vst [vmem:[%s15786_s8] sm:$0xff] %v11048_v15  ;;  %v6298_v55 = vrot.slane %v5528_v2, 1  ;;  %v5530_v44 = vpop.f32.mrb[90].mxu1  ;;  %v10850_v59 = vrot.slane %v10849_v12, 2  ;;  %v7865_v63 = vpop.f32.mrb[90].mxu0  ;;  %v10564_v7 = vsel %vm10290_vm1, %v10213_v20, 0.0 }
 0x59a   :  { %v5532_v16 = vpop.f32.mrb[91].mxu1  ;;  %v7867_v56 = vpop.f32.mrb[91].mxu0  ;;  %v10214_v47 = vmul.f32 %v15279_v25, %v9983_v33  ;;  %v9306_v51 = vadd.f32 %v8858_v60, %v8410_v36  ;;  %v16401_v60 = vld [vmem:[#allocation163_spill] sm:$0xff] }
 0x59b   :  { %v9760_v42 = vmul.f32 0.2, %v9536_v0  ;;  %v6746_v39 = vadd.f32 %v6298_v55, %v5526_v1  ;;  %v6299_v8 = vrot.slane %v5532_v16, 1  ;;  %v10851_v27 = vadd.f32 %v10850_v59, %v10849_v12  ;;  %8116 = vmatmul.mubr.bf16.gmra.mrb[196].mxu0 %v16398_v37 }
 0x59c   :  { %v8859_v17 = vrot.slane %v7867_v56, 1  ;;  %5781 = vmatmul.mubr.bf16.gmra.mrb[196].mxu1 %v16398_v37  ;;  %8125 = vmatprep.mubr.bf16.mxu0 %v16399_v54  ;;  %v10565_v38 = vsel %vm10290_vm1, %v10214_v47, 0.0  ;;  %v9537_v3 = vadd.f32 %v15260_v48, %v9306_v51 }
 0x59d   :  { %v9984_v57 = vmax.f32 %v9536_v0, %v9760_v42  ;;  %v8411_v61 = vadd.f32 %v7865_v63, %v6746_v39  ;;  %5790 = vmatprep.mubr.bf16.mxu1 %v16399_v54  ;;  %v6747_v23 = vadd.f32 %v6299_v8, %v5530_v44  ;;  %v10852_v31 = vrot.slane %v10851_v27, 1 }
 0x59e   :  { %v10566_v28 = vadd.f32 %v10565_v38, %v10564_v7  ;;  %v7871_v62 = vpop.f32.mrb[92].mxu0  ;;  %v9761_v24 = vmul.f32 0.2, %v9537_v3 }
 0x59f   :  { %v10215_v35 = vmul.f32 %v15292_v45, %v9984_v57  ;;  %v9307_v22 = vadd.f32 %v8859_v17, %v8411_v61  ;;  %v5536_v41 = vpop.f32.mrb[92].mxu1  ;;  %v10853_v6 = vadd.f32 %v10852_v31, %v10851_v27  ;;  %v8412_v4 = vadd.f32 %v7871_v62, %v6747_v23  ;;  %v7873_v21 = vpop.f32.mrb[93].mxu0 }
 0x5a0   :  { %v5538_v10 = vpop.f32.mrb[93].mxu1  ;;  %v8860_v53 = vrot.slane %v7873_v21, 1  ;;  %v7875_v12 = vpop.f32.mrb[94].mxu0  ;;  %v9985_v50 = vmax.f32 %v9537_v3, %v9761_v24 }
 0x5a1   :  { %v10567_v18 = vsel %vm10290_vm1, %v10215_v35, 0.0  ;;  %v9538_v52 = vadd.f32 %v15260_v48, %v9307_v22  ;;  %v6300_v5 = vrot.slane %v5538_v10, 1  ;;  %v5540_v9 = vpop.f32.mrb[94].mxu1  ;;  %v7877_v34 = vpop.f32.mrb[95].mxu0  ;;  %v15366_v36 = vsel %vm10969_vm5, %v10853_v6, %v15299_v40 }
 0x5a2   :  { %v10568_v58 = vadd.f32 %v10567_v18, %v10566_v28  ;;  %v5541_v1 = vpop.f32.mrb[95].mxu1  ;;  %v9308_v2 = vadd.f32 %v8860_v53, %v8412_v4  ;;  %v10216_v55 = vmul.f32 %v15304_v26, %v9985_v50  ;;  %v8861_v33 = vrot.slane %v7877_v34, 1  ;;  %v16403_v4 = vld [vmem:[#allocation165_spill] sm:$0xff] }
 0x5a3   :  { %v9762_v15 = vmul.f32 0.2, %v9538_v52  ;;  %v6748_v0 = vadd.f32 %v6300_v5, %v5536_v41  ;;  %8126 = vmatmul.mubr.bf16.gmra.mrb[200].mxu0 %v16400_v19  ;;  %v16402_v41 = vld [vmem:[#allocation50_spill] sm:$0xff] }
 0x5a4   :  { %5791 = vmatmul.mubr.bf16.gmra.mrb[200].mxu1 %v16400_v19  ;;  %v9539_v59 = vadd.f32 %v15260_v48, %v9308_v2  ;;  %8135 = vmatprep.mubr.bf16.mxu0 %v16401_v60  ;;  %v10569_v40 = vsel %vm10290_vm1, %v10216_v55, 0.0 }
 0x5a5   :  { %v9986_v44 = vmax.f32 %v9538_v52, %v9762_v15  ;;  %v8413_v20 = vadd.f32 %v7875_v12, %v6748_v0  ;;  %5800 = vmatprep.mubr.bf16.mxu1 %v16401_v60  ;;  %v10570_v63 = vadd.f32 %v10569_v40, %v10568_v58 }
 0x5a6   :  { %v9763_v42 = vmul.f32 0.2, %v9539_v59  ;;  %v7881_v56 = vpop.f32.mrb[96].mxu0 }
 0x5a7   :  { %v10217_v16 = vmul.f32 %v15316_v29, %v9986_v44  ;;  %v9309_v39 = vadd.f32 %v8861_v33, %v8413_v20  ;;  %v5544_v8 = vpop.f32.mrb[96].mxu1  ;;  %v7882_v47 = vpop.f32.mrb[97].mxu0 }
 0x5a8   :  { %v5546_v27 = vpop.f32.mrb[97].mxu1  ;;  %v9987_v17 = vmax.f32 %v9539_v59, %v9763_v42  ;;  %v7883_v54 = vpop.f32.mrb[98].mxu0 }
 0x5a9   :  { %v10571_v51 = vsel %vm10290_vm1, %v10217_v16, 0.0  ;;  %v9540_v37 = vadd.f32 %v15260_v48, %v9309_v39  ;;  %v6301_v57 = vrot.slane %v5546_v27, 1  ;;  %v5548_v61 = vpop.f32.mrb[98].mxu1  ;;  %v7885_v7 = vpop.f32.mrb[99].mxu0  ;;  %v16404_v16 = vld [vmem:[#allocation54_spill] sm:$0xff]  ;;  %v16405_v27 = vld [vmem:[#allocation167_spill] sm:$0xff] }
 0x5aa   :  { %v10572_v23 = vadd.f32 %v10571_v51, %v10570_v63  ;;  %v5550_v31 = vpop.f32.mrb[99].mxu1  ;;  %v10218_v38 = vmul.f32 %v15324_v13, %v9987_v17  ;;  %v8862_v22 = vrot.slane %v7885_v7, 1 }
 0x5ab   :  { %v9764_v3 = vmul.f32 0.2, %v9540_v37  ;;  %v6749_v28 = vadd.f32 %v6301_v57, %v5544_v8  ;;  %v6302_v35 = vrot.slane %v5550_v31, 1  ;;  %8136 = vmatmul.mubr.bf16.gmra.mrb[204].mxu0 %v16402_v41 }
 0x5ac   :  { %5801 = vmatmul.mubr.bf16.gmra.mrb[204].mxu1 %v16402_v41  ;;  %v10573_v62 = vsel %vm10290_vm1, %v10218_v38, 0.0  ;;  %8145 = vmatprep.mubr.bf16.mxu0 %v16403_v4 }
 0x5ad   :  { %v9988_v6 = vmax.f32 %v9540_v37, %v9764_v3  ;;  %v8414_v24 = vadd.f32 %v7883_v54, %v6749_v28  ;;  %5808 = vmatprep.mubr.bf16.mxu1 %v16403_v4  ;;  %v6750_v10 = vadd.f32 %v6302_v35, %v5548_v61  ;;  %v10574_v21 = vadd.f32 %v10573_v62, %v10572_v23 }
 0x5ae   :  { %v7889_v53 = vpop.f32.mrb[100].mxu0 }
 0x5af   :  { %v10219_v18 = vmul.f32 %v15335_v43, %v9988_v6  ;;  %v9310_v52 = vadd.f32 %v8862_v22, %v8414_v24  ;;  %v5554_v5 = vpop.f32.mrb[100].mxu1  ;;  %v8415_v9 = vadd.f32 %v7889_v53, %v6750_v10  ;;  %v7891_v58 = vpop.f32.mrb[101].mxu0 }
 0x5b0   :  { %v5556_v12 = vpop.f32.mrb[101].mxu1  ;;  %v8863_v15 = vrot.slane %v7891_v58, 1  ;;  %v7893_v0 = vpop.f32.mrb[102].mxu0 }
 0x5b1   :  { %v10575_v50 = vsel %vm10290_vm1, %v10219_v18, 0.0  ;;  %v9541_v1 = vadd.f32 %v15260_v48, %v9310_v52  ;;  %v6303_v34 = vrot.slane %v5556_v12, 1  ;;  %v5558_v2 = vpop.f32.mrb[102].mxu1  ;;  %v7895_v44 = vpop.f32.mrb[103].mxu0 }
 0x5b2   :  { %v10576_v55 = vadd.f32 %v10575_v50, %v10574_v21  ;;  %v5560_v19 = vpop.f32.mrb[103].mxu1  ;;  %v9311_v20 = vadd.f32 %v8863_v15, %v8415_v9  ;;  %v8864_v63 = vrot.slane %v7895_v44, 1  ;;  %v16406_v9 = vld [vmem:[#allocation58_spill] sm:$0xff] }
 0x5b3   :  { %v9765_v59 = vmul.f32 0.2, %v9541_v1  ;;  %v6751_v33 = vadd.f32 %v6303_v34, %v5554_v5  ;;  %v6304_v60 = vrot.slane %v5560_v19, 1  ;;  %8146 = vmatmul.mubr.bf16.gmra.mrb[208].mxu0 %v16404_v16  ;;  %v16407_v34 = vld [vmem:[#allocation169_spill] sm:$0xff] }
 0x5b4   :  { %v10854_v40 = vsel %vm10290_vm1, %v10576_v55, 0.0  ;;  %5809 = vmatmul.mubr.bf16.gmra.mrb[208].mxu1 %v16404_v16  ;;  %v9542_v8 = vadd.f32 %v15260_v48, %v9311_v20  ;;  %8153 = vmatprep.mubr.bf16.mxu0 %v16405_v27 }
 0x5b5   :  { %v10855_v42 = vrot.slane %v10854_v40, 4  ;;  %v9989_v39 = vmax.f32 %v9541_v1, %v9765_v59  ;;  %v8416_v56 = vadd.f32 %v7893_v0, %v6751_v33  ;;  %5818 = vmatprep.mubr.bf16.mxu1 %v16405_v27  ;;  %v6752_v47 = vadd.f32 %v6304_v60, %v5558_v2 }
 0x5b6   :  { %v9766_v51 = vmul.f32 0.2, %v9542_v8  ;;  %v7899_v57 = vpop.f32.mrb[104].mxu0 }
 0x5b7   :  { %v9312_v17 = vadd.f32 %v8864_v63, %v8416_v56  ;;  %v5564_v37 = vpop.f32.mrb[104].mxu1  ;;  %v10856_v61 = vadd.f32 %v10855_v42, %v10854_v40  ;;  %v10220_v54 = vmul.f32 %v15272_v32, %v9989_v39  ;;  %v8417_v23 = vadd.f32 %v7899_v57, %v6752_v47  ;;  %v7901_v7 = vpop.f32.mrb[105].mxu0 }
 0x5b8   :  { %v5566_v31 = vpop.f32.mrb[105].mxu1  ;;  %v9990_v38 = vmax.f32 %v9542_v8, %v9766_v51  ;;  %v7903_v22 = vpop.f32.mrb[106].mxu0  ;;  %v8865_v41 = vrot.slane %v7901_v7, 1 }
 0x5b9   :  { %v9543_v3 = vadd.f32 %v15260_v48, %v9312_v17  ;;  %v6305_v28 = vrot.slane %v5566_v31, 1  ;;  %v5568_v35 = vpop.f32.mrb[106].mxu1  ;;  %v7905_v6 = vpop.f32.mrb[107].mxu0  ;;  %v10857_v24 = vrot.slane %v10856_v61, 2  ;;  %v10577_v52 = vsel %vm10290_vm1, %v10220_v54, 0.0 }
 0x5ba   :  { %v5570_v62 = vpop.f32.mrb[107].mxu1  ;;  %v10221_v4 = vmul.f32 %v15279_v25, %v9990_v38  ;;  %v9313_v5 = vadd.f32 %v8865_v41, %v8417_v23  ;;  %v8866_v53 = vrot.slane %v7905_v6, 1  ;;  %v16408_v38 = vld [vmem:[#allocation62_spill] sm:$0xff]  ;;  %v16409_v41 = vld [vmem:[#allocation171_spill] sm:$0xff] }
 0x5bb   :  { %v9767_v10 = vmul.f32 0.2, %v9543_v3  ;;  %v6753_v21 = vadd.f32 %v6305_v28, %v5564_v37  ;;  %v6306_v18 = vrot.slane %v5570_v62, 1  ;;  %8154 = vmatmul.mubr.bf16.gmra.mrb[212].mxu0 %v16406_v9  ;;  %v10858_v12 = vadd.f32 %v10857_v24, %v10856_v61 }
 0x5bc   :  { %5819 = vmatmul.mubr.bf16.gmra.mrb[212].mxu1 %v16406_v9  ;;  %v10578_v58 = vsel %vm10290_vm1, %v10221_v4, 0.0  ;;  %8163 = vmatprep.mubr.bf16.mxu0 %v16407_v34  ;;  %v9544_v0 = vadd.f32 %v15260_v48, %v9313_v5 }
 0x5bd   :  { %v9991_v50 = vmax.f32 %v9543_v3, %v9767_v10  ;;  %v8418_v1 = vadd.f32 %v7903_v22, %v6753_v21  ;;  %5828 = vmatprep.mubr.bf16.mxu1 %v16407_v34  ;;  %v6754_v15 = vadd.f32 %v6306_v18, %v5568_v35  ;;  %v10579_v2 = vadd.f32 %v10578_v58, %v10577_v52 }
 0x5be   :  { %v10859_v55 = vrot.slane %v10858_v12, 1  ;;  %v7909_v20 = vpop.f32.mrb[108].mxu0  ;;  %v9768_v33 = vmul.f32 0.2, %v9544_v0 }
 0x5bf   :  { %v10222_v19 = vmul.f32 %v15292_v45, %v9991_v50  ;;  %v9314_v44 = vadd.f32 %v8866_v53, %v8418_v1  ;;  %v5574_v59 = vpop.f32.mrb[108].mxu1  ;;  %v8419_v60 = vadd.f32 %v7909_v20, %v6754_v15  ;;  %v7911_v63 = vpop.f32.mrb[109].mxu0 }
 0x5c0   :  { %v5576_v40 = vpop.f32.mrb[109].mxu1  ;;  %v10860_v16 = vadd.f32 %v10859_v55, %v10858_v12  ;;  %v8867_v56 = vrot.slane %v7911_v63, 1  ;;  %v7913_v47 = vpop.f32.mrb[110].mxu0  ;;  %v9992_v17 = vmax.f32 %v9544_v0, %v9768_v33 }
 0x5c1   :  { %v10580_v42 = vsel %vm10290_vm1, %v10222_v19, 0.0  ;;  %v9545_v39 = vadd.f32 %v15260_v48, %v9314_v44  ;;  %v6307_v8 = vrot.slane %v5576_v40, 1  ;;  %v5578_v27 = vpop.f32.mrb[110].mxu1  ;;  %v7915_v57 = vpop.f32.mrb[111].mxu0  ;;  %v16411_v40 = vld [vmem:[#allocation173_spill] sm:$0xff] }
 0x5c2   :  { %v10581_v51 = vadd.f32 %v10580_v42, %v10579_v2  ;;  %v5579_v37 = vpop.f32.mrb[111].mxu1  ;;  %v15408_v61 = vsel %vm10971_vm6, %v10860_v16, %v15366_v36  ;;  %v9315_v23 = vadd.f32 %v8867_v56, %v8419_v60  ;;  %v10223_v7 = vmul.f32 %v15304_v26, %v9992_v17 }
 0x5c3   :  { %v9769_v54 = vmul.f32 0.2, %v9545_v39  ;;  %v6755_v31 = vadd.f32 %v6307_v8, %v5574_v59  ;;  %8164 = vmatmul.mubr.bf16.gmra.mrb[216].mxu0 %v16408_v38  ;;  %v8868_v22 = vrot.slane %v7915_v57, 1  ;;  %v16410_v59 = vld [vmem:[#allocation66_spill] sm:$0xff] }
 0x5c4   :  { %5829 = vmatmul.mubr.bf16.gmra.mrb[216].mxu1 %v16408_v38  ;;  %v9546_v28 = vadd.f32 %v15260_v48, %v9315_v23  ;;  %8173 = vmatprep.mubr.bf16.mxu0 %v16409_v41  ;;  %v10582_v36 = vsel %vm10290_vm1, %v10223_v7, 0.0 }
 0x5c5   :  { %v9993_v3 = vmax.f32 %v9545_v39, %v9769_v54  ;;  %v8420_v35 = vadd.f32 %v7913_v47, %v6755_v31  ;;  %5838 = vmatprep.mubr.bf16.mxu1 %v16409_v41  ;;  %v10583_v62 = vadd.f32 %v10582_v36, %v10581_v51 }
 0x5c6   :  { %v9770_v24 = vmul.f32 0.2, %v9546_v28  ;;  %v7919_v21 = vpop.f32.mrb[112].mxu0 }
 0x5c7   :  { %v10224_v6 = vmul.f32 %v15316_v29, %v9993_v3  ;;  %v9316_v4 = vadd.f32 %v8868_v22, %v8420_v35  ;;  %v5582_v10 = vpop.f32.mrb[112].mxu1  ;;  %v7920_v52 = vpop.f32.mrb[113].mxu0  ;;  %v16413_v21 = vld [vmem:[#allocation175_spill] sm:$0xff] }
 0x5c8   :  { %v5584_v18 = vpop.f32.mrb[113].mxu1  ;;  %v9994_v53 = vmax.f32 %v9546_v28, %v9770_v24  ;;  %v7921_v50 = vpop.f32.mrb[114].mxu0 }
 0x5c9   :  { %v10584_v5 = vsel %vm10290_vm1, %v10224_v6, 0.0  ;;  %v9547_v9 = vadd.f32 %v15260_v48, %v9316_v4  ;;  %v6308_v12 = vrot.slane %v5584_v18, 1  ;;  %v5586_v58 = vpop.f32.mrb[114].mxu1  ;;  %v7923_v15 = vpop.f32.mrb[115].mxu0 }
 0x5ca   :  { %v10585_v1 = vadd.f32 %v10584_v5, %v10583_v62  ;;  %v5588_v34 = vpop.f32.mrb[115].mxu1  ;;  %v10225_v2 = vmul.f32 %v15324_v13, %v9994_v53  ;;  %v8869_v44 = vrot.slane %v7923_v15, 1  ;;  %v16412_v62 = vld [vmem:[#allocation70_spill] sm:$0xff] }
 0x5cb   :  { %v9771_v0 = vmul.f32 0.2, %v9547_v9  ;;  %v6756_v55 = vadd.f32 %v6308_v12, %v5582_v10  ;;  %v6309_v19 = vrot.slane %v5588_v34, 1  ;;  %8174 = vmatmul.mubr.bf16.gmra.mrb[220].mxu0 %v16410_v59 }
 0x5cc   :  { %5839 = vmatmul.mubr.bf16.gmra.mrb[220].mxu1 %v16410_v59  ;;  %v10586_v20 = vsel %vm10290_vm1, %v10225_v2, 0.0  ;;  %8183 = vmatprep.mubr.bf16.mxu0 %v16411_v40 }
 0x5cd   :  { %v9995_v33 = vmax.f32 %v9547_v9, %v9771_v0  ;;  %v8421_v60 = vadd.f32 %v7921_v50, %v6756_v55  ;;  %5846 = vmatprep.mubr.bf16.mxu1 %v16411_v40  ;;  %v6757_v63 = vadd.f32 %v6309_v19, %v5586_v58  ;;  %v10587_v16 = vadd.f32 %v10586_v20, %v10585_v1 }
 0x5ce   :  { %v7927_v56 = vpop.f32.mrb[116].mxu0 }
 0x5cf   :  { %v10226_v42 = vmul.f32 %v15335_v43, %v9995_v33  ;;  %v9317_v39 = vadd.f32 %v8869_v44, %v8421_v60  ;;  %v5592_v8 = vpop.f32.mrb[116].mxu1  ;;  %v8422_v27 = vadd.f32 %v7927_v56, %v6757_v63  ;;  %v7929_v51 = vpop.f32.mrb[117].mxu0  ;;  %v16414_v56 = vld [vmem:[#allocation74_spill] sm:$0xff] }
 0x5d0   :  { %v5594_v47 = vpop.f32.mrb[117].mxu1  ;;  %v8870_v54 = vrot.slane %v7929_v51, 1  ;;  %v7931_v31 = vpop.f32.mrb[118].mxu0 }
 0x5d1   :  { %v10588_v17 = vsel %vm10290_vm1, %v10226_v42, 0.0  ;;  %v9548_v37 = vadd.f32 %v15260_v48, %v9317_v39  ;;  %v6310_v57 = vrot.slane %v5594_v47, 1  ;;  %v5596_v23 = vpop.f32.mrb[118].mxu1  ;;  %v7933_v3 = vpop.f32.mrb[119].mxu0 }
 0x5d2   :  { %v10589_v7 = vadd.f32 %v10588_v17, %v10587_v16  ;;  %v5598_v38 = vpop.f32.mrb[119].mxu1  ;;  %v9318_v35 = vadd.f32 %v8870_v54, %v8422_v27  ;;  %v8871_v36 = vrot.slane %v7933_v3, 1 }
 0x5d3   :  { %v9772_v28 = vmul.f32 0.2, %v9548_v37  ;;  %v6758_v22 = vadd.f32 %v6310_v57, %v5592_v8  ;;  %v6311_v41 = vrot.slane %v5598_v38, 1  ;;  %8184 = vmatmul.mubr.bf16.gmra.mrb[224].mxu0 %v16412_v62 }
 0x5d4   :  { %5847 = vmatmul.mubr.bf16.gmra.mrb[224].mxu1 %v16412_v62  ;;  %v10861_v6 = vsel %vm10290_vm1, %v10589_v7, 0.0  ;;  %v9549_v4 = vadd.f32 %v15260_v48, %v9318_v35  ;;  %8191 = vmatprep.mubr.bf16.mxu0 %v16413_v21 }
 0x5d5   :  { %v9996_v24 = vmax.f32 %v9548_v37, %v9772_v28  ;;  %v8423_v10 = vadd.f32 %v7931_v31, %v6758_v22  ;;  %5856 = vmatprep.mubr.bf16.mxu1 %v16413_v21  ;;  %v10862_v18 = vrot.slane %v10861_v6, 4  ;;  %v6759_v52 = vadd.f32 %v6311_v41, %v5596_v23 }
 0x5d6   :  { %v9773_v5 = vmul.f32 0.2, %v9549_v4  ;;  %v7937_v12 = vpop.f32.mrb[120].mxu0 }
 0x5d7   :  { %v9319_v53 = vadd.f32 %v8871_v36, %v8423_v10  ;;  %v5602_v9 = vpop.f32.mrb[120].mxu1  ;;  %v10863_v58 = vadd.f32 %v10862_v18, %v10861_v6  ;;  %v10227_v50 = vmul.f32 %v15272_v32, %v9996_v24  ;;  %v8424_v1 = vadd.f32 %v7937_v12, %v6759_v52  ;;  %v7939_v15 = vpop.f32.mrb[121].mxu0 }
 0x5d8   :  { %v5604_v34 = vpop.f32.mrb[121].mxu1  ;;  %v9997_v2 = vmax.f32 %v9549_v4, %v9773_v5  ;;  %v7941_v44 = vpop.f32.mrb[122].mxu0  ;;  %v8872_v59 = vrot.slane %v7939_v15, 1 }
 0x5d9   :  { %v9550_v0 = vadd.f32 %v15260_v48, %v9319_v53  ;;  %v6312_v55 = vrot.slane %v5604_v34, 1  ;;  %v5606_v19 = vpop.f32.mrb[122].mxu1  ;;  %v7943_v33 = vpop.f32.mrb[123].mxu0  ;;  %v10864_v60 = vrot.slane %v10863_v58, 2  ;;  %v10590_v32 = vsel %vm10290_vm1, %v10227_v50, 0.0 }
 0x5da   :  { %v5608_v20 = vpop.f32.mrb[123].mxu1  ;;  %v10228_v40 = vmul.f32 %v15279_v25, %v9997_v2  ;;  %v9320_v39 = vadd.f32 %v8872_v59, %v8424_v1  ;;  %v8873_v8 = vrot.slane %v7943_v33, 1 }
 0x5db   :  { %v9774_v63 = vmul.f32 0.2, %v9550_v0  ;;  %v6760_v16 = vadd.f32 %v6312_v55, %v5602_v9  ;;  %v6313_v42 = vrot.slane %v5608_v20, 1  ;;  %8192 = vmatmul.mubr.bf16.gmra.mrb[228].mxu0 %v16414_v56  ;;  %v10865_v27 = vadd.f32 %v10864_v60, %v10863_v58  ;;  %v16415_v58 = vld [vmem:[#allocation78_spill] sm:$0xff] }
 0x5dc   :  { %5857 = vmatmul.mubr.bf16.gmra.mrb[228].mxu1 %v16414_v56  ;;  %v10591_v47 = vsel %vm10290_vm1, %v10228_v40, 0.0  ;;  %8201 = vmatprep.mubr.bf16.mxu0 %v14135_v46  ;;  %v9551_v57 = vadd.f32 %v15260_v48, %v9320_v39 }
 0x5dd   :  { %v9998_v51 = vmax.f32 %v9550_v0, %v9774_v63  ;;  %v8425_v17 = vadd.f32 %v7941_v44, %v6760_v16  ;;  %5866 = vmatprep.mubr.bf16.mxu1 %v14135_v46  ;;  %v6761_v25 = vadd.f32 %v6313_v42, %v5606_v19  ;;  %v10592_v37 = vadd.f32 %v10591_v47, %v10590_v32 }
 0x5de   :  { %v10866_v54 = vrot.slane %v10865_v27, 1  ;;  %v7947_v38 = vpop.f32.mrb[124].mxu0  ;;  %v9775_v3 = vmul.f32 0.2, %v9551_v57 }
 0x5df   :  { %v10229_v23 = vmul.f32 %v15292_v45, %v9998_v51  ;;  %v9321_v31 = vadd.f32 %v8873_v8, %v8425_v17  ;;  %v5612_v7 = vpop.f32.mrb[124].mxu1  ;;  %v8426_v28 = vadd.f32 %v7947_v38, %v6761_v25  ;;  %v7949_v22 = vpop.f32.mrb[125].mxu0  ;;  %v16416_v51 = vld [vmem:[#allocation76_spill] sm:$0xff] }
 0x5e0   :  { %v5614_v35 = vpop.f32.mrb[125].mxu1  ;;  %v10867_v41 = vadd.f32 %v10866_v54, %v10865_v27  ;;  %v8874_v6 = vrot.slane %v7949_v22, 1  ;;  %v7951_v4 = vpop.f32.mrb[126].mxu0  ;;  %v9999_v21 = vmax.f32 %v9551_v57, %v9775_v3 }
 0x5e1   :  { %v10593_v36 = vsel %vm10290_vm1, %v10229_v23, 0.0  ;;  %v9552_v62 = vadd.f32 %v15260_v48, %v9321_v31  ;;  %v6314_v46 = vrot.slane %v5614_v35, 1  ;;  %v5616_v24 = vpop.f32.mrb[126].mxu1  ;;  %v7953_v45 = vpop.f32.mrb[127].mxu0  ;;  %v15473_v35 = vld [vmem:[%s15783_s5] ss:$0 sm:$0xff] }
 0x5e2   :  { %v10594_v10 = vadd.f32 %v10593_v36, %v10592_v37  ;;  %v5617_v18 = vpop.f32.mrb[127].mxu1  ;;  %v15450_v52 = vsel %vm10973_vm7, %v10867_v41, %v15408_v61  ;;  %v9322_v53 = vadd.f32 %v8874_v6, %v8426_v28  ;;  %v10230_v12 = vmul.f32 %v15304_v26, %v9999_v21 }
 0x5e3   :  { %v9776_v5 = vmul.f32 0.2, %v9552_v62  ;;  %v6762_v9 = vadd.f32 %v6314_v46, %v5612_v7  ;;  %8202 = vmatmul.mubr.bf16.gmra.mrb[232].mxu0 %v16415_v58  ;;  %v8875_v15 = vrot.slane %v7953_v45, 1 }
 0x5e4   :  { %5867 = vmatmul.mubr.bf16.gmra.mrb[232].mxu1 %v16415_v58  ;;  %v9553_v1 = vadd.f32 %v15260_v48, %v9322_v53  ;;  %8211 = vmatprep.mubr.bf16.mxu0 %v14147_v49  ;;  %v10595_v61 = vsel %vm10290_vm1, %v10230_v12, 0.0  ;;  %v16417_v12 = vld [vmem:[#allocation80_spill] sm:$0xff] }
 0x5e5   :  { %v10000_v50 = vmax.f32 %v9552_v62, %v9776_v5  ;;  %v8427_v34 = vadd.f32 %v7951_v4, %v6762_v9  ;;  %5876 = vmatprep.mubr.bf16.mxu1 %v14147_v49  ;;  %v10596_v2 = vadd.f32 %v10595_v61, %v10594_v10 }
 0x5e6   :  { %v9777_v55 = vmul.f32 0.2, %v9553_v1  ;;  %v7957_v44 = vpop.f32.mrb[128].mxu0 }
 0x5e7   :  { %v10231_v0 = vmul.f32 %v15316_v29, %v10000_v50  ;;  %v9323_v26 = vadd.f32 %v8875_v15, %v8427_v34  ;;  %v5620_v19 = vpop.f32.mrb[128].mxu1  ;;  %v7958_v20 = vpop.f32.mrb[129].mxu0 }
 0x5e8   :  { %v5622_v59 = vpop.f32.mrb[129].mxu1  ;;  %v10001_v60 = vmax.f32 %v9553_v1, %v9777_v55  ;;  %v7959_v42 = vpop.f32.mrb[130].mxu0 }
 0x5e9   :  { %v10597_v33 = vsel %vm10290_vm1, %v10231_v0, 0.0  ;;  %v9554_v40 = vadd.f32 %v15260_v48, %v9323_v26  ;;  %v6315_v63 = vrot.slane %v5622_v59, 1  ;;  %v5624_v16 = vpop.f32.mrb[130].mxu1  ;;  %v7961_v39 = vpop.f32.mrb[131].mxu0 }
 0x5ea   :  { %v10598_v49 = vadd.f32 %v10597_v33, %v10596_v2  ;;  %v5626_v32 = vpop.f32.mrb[131].mxu1  ;;  %v10232_v8 = vmul.f32 %v15324_v13, %v10001_v60  ;;  %v8876_v47 = vrot.slane %v7961_v39, 1 }
 0x5eb   :  { %v9778_v29 = vmul.f32 0.2, %v9554_v40  ;;  %v6763_v56 = vadd.f32 %v6315_v63, %v5620_v19  ;;  %v6316_v27 = vrot.slane %v5626_v32, 1  ;;  %8212 = vmatmul.mubr.bf16.gmra.mrb[236].mxu0 %v16416_v51 }
 0x5ec   :  { %5877 = vmatmul.mubr.bf16.gmra.mrb[236].mxu1 %v16416_v51  ;;  %v10599_v17 = vsel %vm10290_vm1, %v10232_v8, 0.0  ;;  %8221 = vmatprep.mubr.bf16.mxu0 %v14167_v14  ;;  %v16418_v51 = vld [vmem:[#allocation82_spill] sm:$0xff] }
 0x5ed   :  { %v10002_v25 = vmax.f32 %v9554_v40, %v9778_v29  ;;  %v8428_v48 = vadd.f32 %v7959_v42, %v6763_v56  ;;  %5884 = vmatprep.mubr.bf16.mxu1 %v14167_v14  ;;  %v6764_v37 = vadd.f32 %v6316_v27, %v5624_v16  ;;  %v10600_v57 = vadd.f32 %v10599_v17, %v10598_v49  ;;  %v15492_v49 = vld [vmem:[%s15784_s6 + $0x8] sm:$0x7f] }
 0x5ee   :  { %v7965_v31 = vpop.f32.mrb[132].mxu0 }
 0x5ef   :  { %v10233_v13 = vmul.f32 %v15335_v43, %v10002_v25  ;;  %v9324_v54 = vadd.f32 %v8876_v47, %v8428_v48  ;;  %v5630_v23 = vpop.f32.mrb[132].mxu1  ;;  %v8429_v7 = vadd.f32 %v7965_v31, %v6764_v37  ;;  %v7967_v3 = vpop.f32.mrb[133].mxu0 }
 0x5f0   :  { %v5632_v38 = vpop.f32.mrb[133].mxu1  ;;  %v8877_v41 = vrot.slane %v7967_v3, 1  ;;  %v7969_v62 = vpop.f32.mrb[134].mxu0 }
 0x5f1   :  { %v10601_v28 = vsel %vm10290_vm1, %v10233_v13, 0.0  ;;  %v9555_v22 = vadd.f32 %v15473_v35, %v9324_v54  ;;  %v6317_v14 = vrot.slane %v5632_v38, 1  ;;  %v5634_v36 = vpop.f32.mrb[134].mxu1  ;;  %v7971_v46 = vpop.f32.mrb[135].mxu0 }
 0x5f2   :  { %v5636_v43 = vpop.f32.mrb[135].mxu1  ;;  %v10602_v6 = vadd.f32 %v10601_v28, %v10600_v57  ;;  %v9325_v4 = vadd.f32 %v8877_v41, %v8429_v7  ;;  %v8878_v18 = vrot.slane %v7971_v46, 1  ;;  %v16419_v57 = vld [vmem:[#allocation84_spill] sm:$0xff] }
 0x5f3   :  { %v9779_v24 = vmul.f32 0.2, %v9555_v22  ;;  %v6765_v10 = vadd.f32 %v6317_v14, %v5630_v23  ;;  %v6318_v21 = vrot.slane %v5636_v43, 1  ;;  %8222 = vmatmul.mubr.bf16.gmra.mrb[240].mxu0 %v14159_v30  ;;  %v15505_v7 = vld [vmem:[%s15784_s6 + $0x10] sm:$0x7f] }
 0x5f4   :  { %5885 = vmatmul.mubr.bf16.gmra.mrb[240].mxu1 %v14159_v30  ;;  %v10868_v45 = vsel %vm10290_vm1, %v10602_v6, 0.0  ;;  %v9556_v53 = vadd.f32 %v15473_v35, %v9325_v4  ;;  %8229 = vmatprep.mubr.bf16.mxu0 %v16417_v12  ;;  %v15485_v30 = vld [vmem:[%s15784_s6] sm:$0x7f] }
 0x5f5   :  { %v10003_v5 = vmax.f32 %v9555_v22, %v9779_v24  ;;  %v8430_v9 = vadd.f32 %v7969_v62, %v6765_v10  ;;  %5894 = vmatprep.mubr.bf16.mxu1 %v16417_v12  ;;  %v10869_v58 = vrot.slane %v10868_v45, 4  ;;  %v6766_v50 = vadd.f32 %v6318_v21, %v5634_v36 }
 0x5f6   :  { %v9780_v1 = vmul.f32 0.2, %v9556_v53  ;;  %v7975_v61 = vpop.f32.mrb[136].mxu0 }
 0x5f7   :  { %v9326_v34 = vadd.f32 %v8878_v18, %v8430_v9  ;;  %v5640_v15 = vpop.f32.mrb[136].mxu1  ;;  %v10870_v2 = vadd.f32 %v10869_v58, %v10868_v45  ;;  %v10234_v0 = vmul.f32 %v15485_v30, %v10003_v5  ;;  %v8431_v55 = vadd.f32 %v7975_v61, %v6766_v50  ;;  %v7977_v19 = vpop.f32.mrb[137].mxu0 }
 0x5f8   :  { %v5642_v26 = vpop.f32.mrb[137].mxu1  ;;  %v10004_v44 = vmax.f32 %v9556_v53, %v9780_v1  ;;  %v7979_v60 = vpop.f32.mrb[138].mxu0  ;;  %v8879_v40 = vrot.slane %v7977_v19, 1  ;;  %v15515_v1 = vld [vmem:[%s15784_s6 + $0x18] sm:$0x7f] }
 0x5f9   :  { %v9557_v59 = vadd.f32 %v15473_v35, %v9326_v34  ;;  %v6319_v20 = vrot.slane %v5642_v26, 1  ;;  %v5644_v33 = vpop.f32.mrb[138].mxu1  ;;  %v7981_v16 = vpop.f32.mrb[139].mxu0  ;;  %v10871_v42 = vrot.slane %v10870_v2, 2  ;;  %v10603_v56 = vsel %vm10290_vm1, %v10234_v0, 0.0 }
 0x5fa   :  { %v5646_v63 = vpop.f32.mrb[139].mxu1  ;;  %v10235_v32 = vmul.f32 %v15492_v49, %v10004_v44  ;;  %v9327_v27 = vadd.f32 %v8879_v40, %v8431_v55  ;;  %v8880_v47 = vrot.slane %v7981_v16, 1  ;;  %v16421_v55 = vld [vmem:[#allocation88_spill] sm:$0xff]  ;;  %v15527_v44 = vld [vmem:[%s15784_s6 + $0x20] sm:$0x7f] }
 0x5fb   :  { %v9781_v39 = vmul.f32 0.2, %v9557_v59  ;;  %v6767_v8 = vadd.f32 %v6319_v20, %v5640_v15  ;;  %v6320_v29 = vrot.slane %v5646_v63, 1  ;;  %8230 = vmatmul.mubr.bf16.gmra.mrb[244].mxu0 %v16418_v51  ;;  %v10872_v17 = vadd.f32 %v10871_v42, %v10870_v2  ;;  %v16420_v15 = vld [vmem:[#allocation86_spill] sm:$0xff] }
 0x5fc   :  { %5895 = vmatmul.mubr.bf16.gmra.mrb[244].mxu1 %v16418_v51  ;;  %v10604_v25 = vsel %vm10290_vm1, %v10235_v32, 0.0  ;;  %8239 = vmatprep.mubr.bf16.mxu0 %v16419_v57  ;;  %v9558_v23 = vadd.f32 %v15473_v35, %v9327_v27 }
 0x5fd   :  { %v10005_v48 = vmax.f32 %v9557_v59, %v9781_v39  ;;  %v8432_v37 = vadd.f32 %v7979_v60, %v6767_v8  ;;  %5904 = vmatprep.mubr.bf16.mxu1 %v16419_v57  ;;  %v6768_v13 = vadd.f32 %v6320_v29, %v5644_v33  ;;  %v10605_v54 = vadd.f32 %v10604_v25, %v10603_v56 }
 0x5fe   :  { %v10873_v31 = vrot.slane %v10872_v17, 1  ;;  %v7985_v22 = vpop.f32.mrb[140].mxu0  ;;  %v9782_v14 = vmul.f32 0.2, %v9558_v23 }
 0x5ff   :  { %v10236_v38 = vmul.f32 %v15505_v7, %v10005_v48  ;;  %v9328_v3 = vadd.f32 %v8880_v47, %v8432_v37  ;;  %v5650_v28 = vpop.f32.mrb[140].mxu1  ;;  %v8433_v41 = vadd.f32 %v7985_v22, %v6768_v13  ;;  %v7987_v62 = vpop.f32.mrb[141].mxu0  ;;  %v15544_v22 = vld [vmem:[%s15784_s6 + $0x30] sm:$0x7f] }
 0x600   :  { %v5652_v36 = vpop.f32.mrb[141].mxu1  ;;  %v10874_v43 = vadd.f32 %v10873_v31, %v10872_v17  ;;  %v8881_v4 = vrot.slane %v7987_v62, 1  ;;  %v7989_v21 = vpop.f32.mrb[142].mxu0  ;;  %v10006_v45 = vmax.f32 %v9558_v23, %v9782_v14  ;;  %v15535_v17 = vld [vmem:[%s15784_s6 + $0x28] sm:$0x7f] }
 0x601   :  { %v10606_v46 = vsel %vm10290_vm1, %v10236_v38, 0.0  ;;  %v9559_v6 = vadd.f32 %v15473_v35, %v9328_v3  ;;  %v6321_v24 = vrot.slane %v5652_v36, 1  ;;  %v5654_v10 = vpop.f32.mrb[142].mxu1  ;;  %v7991_v5 = vpop.f32.mrb[143].mxu0 }
 0x602   :  { %v10607_v18 = vadd.f32 %v10606_v46, %v10605_v54  ;;  %v10990_v53 = vsel %vm10975_vm8, %v10874_v43, %v15450_v52  ;;  %v5655_v9 = vpop.f32.mrb[143].mxu1  ;;  %v9329_v58 = vadd.f32 %v8881_v4, %v8433_v41  ;;  %v10237_v34 = vmul.f32 %v15515_v1, %v10006_v45  ;;  %v16422_v54 = vld [vmem:[#allocation90_spill] sm:$0xff] }
 0x603   :  { %v9783_v12 = vmul.f32 0.2, %v9559_v6  ;;  %v6769_v50 = vadd.f32 %v6321_v24, %v5650_v28  ;;  %11006 = vadd.xlane.f32.xlu1 %v10990_v53  ;;  %8240 = vmatmul.mubr.bf16.gmra.mrb[248].mxu0 %v16420_v15  ;;  %v8882_v0 = vrot.slane %v7991_v5, 1 }
 0x604   :  { %5905 = vmatmul.mubr.bf16.gmra.mrb[248].mxu1 %v16420_v15  ;;  %v9560_v2 = vadd.f32 %v15473_v35, %v9329_v58  ;;  %8249 = vmatprep.mubr.bf16.mxu0 %v16421_v55  ;;  %v10608_v26 = vsel %vm10290_vm1, %v10237_v34, 0.0 }
 0x605   :  { %v10007_v61 = vmax.f32 %v9559_v6, %v9783_v12  ;;  %v8434_v52 = vadd.f32 %v7989_v21, %v6769_v50  ;;  %5914 = vmatprep.mubr.bf16.mxu1 %v16421_v55  ;;  %v10609_v19 = vadd.f32 %v10608_v26, %v10607_v18 }
 0x606   :  { %v9784_v20 = vmul.f32 0.2, %v9560_v2  ;;  %v7995_v40 = vpop.f32.mrb[144].mxu0 }
 0x607   :  { %v10238_v59 = vmul.f32 %v15527_v44, %v10007_v61  ;;  %v9330_v33 = vadd.f32 %v8882_v0, %v8434_v52  ;;  %v5658_v60 = vpop.f32.mrb[144].mxu1  ;;  %v7996_v16 = vpop.f32.mrb[145].mxu0 }
 0x608   :  { %v5660_v63 = vpop.f32.mrb[145].mxu1  ;;  %v10008_v32 = vmax.f32 %v9560_v2, %v9784_v20  ;;  %v7997_v56 = vpop.f32.mrb[146].mxu0 }
 0x609   :  { %v10610_v42 = vsel %vm10290_vm1, %v10238_v59, 0.0  ;;  %v9561_v39 = vadd.f32 %v15473_v35, %v9330_v33  ;;  %v6322_v8 = vrot.slane %v5660_v63, 1  ;;  %v5662_v29 = vpop.f32.mrb[146].mxu1  ;;  %v7999_v51 = vpop.f32.mrb[147].mxu0 }
 0x60a   :  { %v10611_v27 = vadd.f32 %v10610_v42, %v10609_v19  ;;  %v5664_v47 = vpop.f32.mrb[147].mxu1  ;;  %v10239_v25 = vmul.f32 %v15535_v17, %v10008_v32  ;;  %v8883_v13 = vrot.slane %v7999_v51, 1 }
 0x60b   :  { %v9785_v48 = vmul.f32 0.2, %v9561_v39  ;;  %v6770_v37 = vadd.f32 %v6322_v8, %v5658_v60  ;;  %v6323_v57 = vrot.slane %v5664_v47, 1  ;;  %8250 = vmatmul.mubr.bf16.gmra.mrb[252].mxu0 %v16422_v54 }
 0x60c   :  { %5915 = vmatmul.mubr.bf16.gmra.mrb[252].mxu1 %v16422_v54  ;;  %v10612_v23 = vsel %vm10290_vm1, %v10239_v25, 0.0 }
 0x60d   :  { %v10009_v31 = vmax.f32 %v9561_v39, %v9785_v48  ;;  %v8435_v38 = vadd.f32 %v7997_v56, %v6770_v37  ;;  %v6771_v3 = vadd.f32 %v6323_v57, %v5662_v29  ;;  %v10613_v28 = vadd.f32 %v10612_v23, %v10611_v27 }
 0x60e   :  { %v8003_v62 = vpop.f32.mrb[148].mxu0 }
 0x60f   :  { %v10240_v14 = vmul.f32 %v15544_v22, %v10009_v31  ;;  %v9331_v41 = vadd.f32 %v8883_v13, %v8435_v38  ;;  %v5668_v36 = vpop.f32.mrb[148].mxu1  ;;  %v8436_v43 = vadd.f32 %v8003_v62, %v6771_v3  ;;  %v8005_v6 = vpop.f32.mrb[149].mxu0 }
 0x610   :  { %v5670_v46 = vpop.f32.mrb[149].mxu1  ;;  %v8884_v21 = vrot.slane %v8005_v6, 1  ;;  %v8007_v45 = vpop.f32.mrb[150].mxu0 }
 0x611   :  { %v10614_v24 = vsel %vm10290_vm1, %v10240_v14, 0.0  ;;  %v9562_v4 = vadd.f32 %v15473_v35, %v9331_v41  ;;  %v6324_v10 = vrot.slane %v5670_v46, 1  ;;  %v5672_v18 = vpop.f32.mrb[150].mxu1  ;;  %v8009_v9 = vpop.f32.mrb[151].mxu0 }
 0x612   :  { %v15549_v5 = vadd.f32 %v10614_v24, %v10613_v28  ;;  %v5674_v53 = vpop.f32.mrb[151].mxu1  ;;  %v9332_v58 = vadd.f32 %v8884_v21, %v8436_v43  ;;  %v8885_v52 = vrot.slane %v8009_v9, 1 }
 0x613   :  { %v9786_v12 = vmul.f32 0.2, %v9562_v4  ;;  %v6772_v50 = vadd.f32 %v6324_v10, %v5668_v36  ;;  %v6325_v34 = vrot.slane %v5674_v53, 1 }
 0x614   :  { %v9563_v61 = vadd.f32 %v15473_v35, %v9332_v58 }
 0x615   :  { %v10010_v15 = vmax.f32 %v9562_v4, %v9786_v12  ;;  %v8437_v2 = vadd.f32 %v8007_v45, %v6772_v50  ;;  %v6773_v0 = vadd.f32 %v6325_v34, %v5672_v18 }
 0x616   :  { %v9787_v55 = vmul.f32 0.2, %v9563_v61  ;;  %v8013_v59 = vpop.f32.mrb[152].mxu0 }
 0x617   :  { %v9333_v26 = vadd.f32 %v8885_v52, %v8437_v2  ;;  %v5678_v19 = vpop.f32.mrb[152].mxu1  ;;  %v8438_v20 = vadd.f32 %v8013_v59, %v6773_v0  ;;  %v8015_v60 = vpop.f32.mrb[153].mxu0  ;;  %v10241_v40 = vmul.f32 %v15485_v30, %v10010_v15 }
 0x618   :  { %v5680_v33 = vpop.f32.mrb[153].mxu1  ;;  %v10011_v63 = vmax.f32 %v9563_v61, %v9787_v55  ;;  %v8017_v32 = vpop.f32.mrb[154].mxu0  ;;  %v8886_v8 = vrot.slane %v8015_v60, 1 }
 0x619   :  { %v9564_v16 = vadd.f32 %v15473_v35, %v9333_v26  ;;  %v5682_v42 = vpop.f32.mrb[154].mxu1  ;;  %v6326_v39 = vrot.slane %v5680_v33, 1  ;;  %v8019_v56 = vpop.f32.mrb[155].mxu0  ;;  %v10616_v37 = vsel %vm10290_vm1, %v10241_v40, 0.0 }
 0x61a   :  { %v5684_v29 = vpop.f32.mrb[155].mxu1  ;;  %v10242_v27 = vmul.f32 %v15492_v49, %v10011_v63  ;;  %v9334_v25 = vadd.f32 %v8886_v8, %v8438_v20  ;;  %v8887_v3 = vrot.slane %v8019_v56, 1 }
 0x61b   :  { %v9788_v47 = vmul.f32 0.2, %v9564_v16  ;;  %v6327_v51 = vrot.slane %v5684_v29, 1  ;;  %v6774_v48 = vadd.f32 %v6326_v39, %v5678_v19  ;;  %v10875_v19 = vsel %vm10290_vm1, %v15549_v5, 0.0 }
 0x61c   :  { %v10617_v57 = vsel %vm10290_vm1, %v10242_v27, 0.0  ;;  %v9565_v31 = vadd.f32 %v15473_v35, %v9334_v25  ;;  %v10876_v27 = vrot.slane %v10875_v19, 4 }
 0x61d   :  { %v10012_v13 = vmax.f32 %v9564_v16, %v9788_v47  ;;  %v6775_v54 = vadd.f32 %v6327_v51, %v5682_v42  ;;  %v10618_v23 = vadd.f32 %v10617_v57, %v10616_v37  ;;  %v8439_v38 = vadd.f32 %v8017_v32, %v6774_v48 }
 0x61e   :  { %v8023_v41 = vpop.f32.mrb[156].mxu0  ;;  %v9789_v36 = vmul.f32 0.2, %v9565_v31 }
 0x61f   :  { %v10243_v28 = vmul.f32 %v15505_v7, %v10012_v13  ;;  %v5688_v14 = vpop.f32.mrb[156].mxu1  ;;  %v9335_v62 = vadd.f32 %v8887_v3, %v8439_v38  ;;  %v8440_v43 = vadd.f32 %v8023_v41, %v6775_v54  ;;  %v8025_v6 = vpop.f32.mrb[157].mxu0  ;;  %v10877_v3 = vadd.f32 %v10876_v27, %v10875_v19 }
 0x620   :  { %v5690_v46 = vpop.f32.mrb[157].mxu1  ;;  %v8888_v10 = vrot.slane %v8025_v6, 1  ;;  %v8027_v18 = vpop.f32.mrb[158].mxu0  ;;  %v10013_v53 = vmax.f32 %v9565_v31, %v9789_v36 }
 0x621   :  { %v10619_v24 = vsel %vm10290_vm1, %v10243_v28, 0.0  ;;  %v6328_v4 = vrot.slane %v5690_v46, 1  ;;  %v5692_v21 = vpop.f32.mrb[158].mxu1  ;;  %v9566_v9 = vadd.f32 %v15473_v35, %v9335_v62  ;;  %v8029_v58 = vpop.f32.mrb[159].mxu0 }
 0x622   :  { %v10620_v45 = vadd.f32 %v10619_v24, %v10618_v23  ;;  %v5693_v12 = vpop.f32.mrb[159].mxu1  ;;  %v9336_v50 = vadd.f32 %v8888_v10, %v8440_v43  ;;  %v10244_v15 = vmul.f32 %v15515_v1, %v10013_v53  ;;  %v8889_v0 = vrot.slane %v8029_v58, 1 }
 0x623   :  { %v6776_v34 = vadd.f32 %v6328_v4, %v5688_v14  ;;  %v9790_v61 = vmul.f32 0.2, %v9566_v9 }
 0x624   :  { %v9567_v2 = vadd.f32 %v15473_v35, %v9336_v50  ;;  %v10621_v55 = vsel %vm10290_vm1, %v10244_v15, 0.0 }
 0x625   :  { %v8441_v52 = vadd.f32 %v8027_v18, %v6776_v34  ;;  %v10014_v26 = vmax.f32 %v9566_v9, %v9790_v61  ;;  %v10622_v59 = vadd.f32 %v10621_v55, %v10620_v45  ;;  %v10878_v9 = vrot.slane %v10877_v3, 2 }
 0x626   :  { %v9791_v20 = vmul.f32 0.2, %v9567_v2  ;;  %v8033_v40 = vpop.f32.mrb[160].mxu0 }
 0x627   :  { %v9337_v33 = vadd.f32 %v8889_v0, %v8441_v52  ;;  %v5696_v60 = vpop.f32.mrb[160].mxu1  ;;  %v10245_v63 = vmul.f32 %v15527_v44, %v10014_v26  ;;  %v8034_v42 = vpop.f32.mrb[161].mxu0 }
 0x628   :  { %v5698_v16 = vpop.f32.mrb[161].mxu1  ;;  %v10015_v32 = vmax.f32 %v9567_v2, %v9791_v20  ;;  %v8035_v56 = vpop.f32.mrb[162].mxu0  ;;  %v10879_v20 = vadd.f32 %v10878_v9, %v10877_v3 }
 0x629   :  { %v9568_v39 = vadd.f32 %v15473_v35, %v9337_v33  ;;  %v6329_v8 = vrot.slane %v5698_v16, 1  ;;  %v5700_v29 = vpop.f32.mrb[162].mxu1  ;;  %v10623_v47 = vsel %vm10290_vm1, %v10245_v63, 0.0  ;;  %v8037_v5 = vpop.f32.mrb[163].mxu0 }
 0x62a   :  { %v5702_v51 = vpop.f32.mrb[163].mxu1  ;;  %v10624_v25 = vadd.f32 %v10623_v47, %v10622_v59  ;;  %v10246_v48 = vmul.f32 %v15535_v17, %v10015_v32  ;;  %v8890_v38 = vrot.slane %v8037_v5, 1 }
 0x62b   :  { %v9792_v37 = vmul.f32 0.2, %v9568_v39  ;;  %v6777_v57 = vadd.f32 %v6329_v8, %v5696_v60  ;;  %v6330_v13 = vrot.slane %v5702_v51, 1 }
 0x62c   :  { %v10625_v54 = vsel %vm10290_vm1, %v10246_v48, 0.0 }
 0x62d   :  { %v10016_v23 = vmax.f32 %v9568_v39, %v9792_v37  ;;  %v8442_v31 = vadd.f32 %v8035_v56, %v6777_v57  ;;  %v10626_v28 = vadd.f32 %v10625_v54, %v10624_v25  ;;  %v6778_v14 = vadd.f32 %v6330_v13, %v5700_v29 }
 0x62e   :  { %v8041_v43 = vpop.f32.mrb[164].mxu0  ;;  %v10880_v25 = vrot.slane %v10879_v20, 1 }
 0x62f   :  { %v10247_v41 = vmul.f32 %v15544_v22, %v10016_v23  ;;  %v9338_v36 = vadd.f32 %v8890_v38, %v8442_v31  ;;  %v5706_v62 = vpop.f32.mrb[164].mxu1  ;;  %v8443_v46 = vadd.f32 %v8041_v43, %v6778_v14  ;;  %v8043_v24 = vpop.f32.mrb[165].mxu0 }
 0x630   :  { %v5708_v6 = vpop.f32.mrb[165].mxu1  ;;  %v8891_v18 = vrot.slane %v8043_v24, 1  ;;  %v8045_v53 = vpop.f32.mrb[166].mxu0 }
 0x631   :  { %v10627_v4 = vsel %vm10290_vm1, %v10247_v41, 0.0  ;;  %v9569_v10 = vadd.f32 %v15473_v35, %v9338_v36  ;;  %v6331_v21 = vrot.slane %v5708_v6, 1  ;;  %v5710_v45 = vpop.f32.mrb[166].mxu1  ;;  %v8047_v50 = vpop.f32.mrb[167].mxu0 }
 0x632   :  { %v10628_v12 = vadd.f32 %v10627_v4, %v10626_v28  ;;  %v5712_v58 = vpop.f32.mrb[167].mxu1  ;;  %v9339_v15 = vadd.f32 %v8891_v18, %v8443_v46  ;;  %v8892_v0 = vrot.slane %v8047_v50, 1 }
 0x633   :  { %v9793_v34 = vmul.f32 0.2, %v9569_v10  ;;  %v6779_v61 = vadd.f32 %v6331_v21, %v5706_v62  ;;  %v6332_v2 = vrot.slane %v5712_v58, 1 }
 0x634   :  { %v10882_v52 = vsel %vm10290_vm1, %v10628_v12, 0.0  ;;  %v9570_v19 = vadd.f32 %v15473_v35, %v9339_v15 }
 0x635   :  { %v10883_v55 = vrot.slane %v10882_v52, 4  ;;  %v10017_v26 = vmax.f32 %v9569_v10, %v9793_v34  ;;  %v8444_v59 = vadd.f32 %v8045_v53, %v6779_v61  ;;  %v6780_v33 = vadd.f32 %v6332_v2, %v5710_v45 }
 0x636   :  { %v9794_v40 = vmul.f32 0.2, %v9570_v19  ;;  %v8051_v42 = vpop.f32.mrb[168].mxu0  ;;  %v10881_v45 = vadd.f32 %v10880_v25, %v10879_v20 }
 0x637   :  { %v10884_v60 = vadd.f32 %v10883_v55, %v10882_v52  ;;  %v9340_v63 = vadd.f32 %v8892_v0, %v8444_v59  ;;  %v5716_v16 = vpop.f32.mrb[168].mxu1  ;;  %v10248_v32 = vmul.f32 %v15485_v30, %v10017_v26  ;;  %v8445_v39 = vadd.f32 %v8051_v42, %v6780_v33  ;;  %v8053_v29 = vpop.f32.mrb[169].mxu0 }
 0x638   :  { %v5718_v8 = vpop.f32.mrb[169].mxu1  ;;  %v10018_v27 = vmax.f32 %v9570_v19, %v9794_v40  ;;  %v8055_v5 = vpop.f32.mrb[170].mxu0  ;;  %v8893_v37 = vrot.slane %v8053_v29, 1 }
 0x639   :  { %v10885_v56 = vrot.slane %v10884_v60, 2  ;;  %v9571_v47 = vadd.f32 %v15473_v35, %v9340_v63  ;;  %v5720_v51 = vpop.f32.mrb[170].mxu1  ;;  %v6333_v48 = vrot.slane %v5718_v8, 1  ;;  %v8057_v13 = vpop.f32.mrb[171].mxu0  ;;  %v10629_v3 = vsel %vm10290_vm1, %v10248_v32, 0.0 }
 0x63a   :  { %v5722_v57 = vpop.f32.mrb[171].mxu1  ;;  %v10249_v23 = vmul.f32 %v15492_v49, %v10018_v27  ;;  %v9341_v28 = vadd.f32 %v8893_v37, %v8445_v39  ;;  %v8894_v4 = vrot.slane %v8057_v13, 1 }
 0x63b   :  { %v10886_v54 = vadd.f32 %v10885_v56, %v10884_v60  ;;  %v9795_v31 = vmul.f32 0.2, %v9571_v47  ;;  %v6334_v38 = vrot.slane %v5722_v57, 1  ;;  %v6781_v14 = vadd.f32 %v6333_v48, %v5716_v16 }
 0x63c   :  { %v10630_v36 = vsel %vm10290_vm1, %v10249_v23, 0.0  ;;  %v9572_v6 = vadd.f32 %v15473_v35, %v9341_v28 }
 0x63d   :  { %v10887_v41 = vrot.slane %v10886_v54, 1  ;;  %v10019_v62 = vmax.f32 %v9571_v47, %v9795_v31  ;;  %v6782_v43 = vadd.f32 %v6334_v38, %v5720_v51  ;;  %v10631_v46 = vadd.f32 %v10630_v36, %v10629_v3 }
 0x63e   :  { %v8446_v24 = vadd.f32 %v8055_v5, %v6781_v14  ;;  %v8061_v18 = vpop.f32.mrb[172].mxu0  ;;  %v9796_v9 = vmul.f32 0.2, %v9572_v6 }
 0x63f   :  { %v10250_v10 = vmul.f32 %v15505_v7, %v10019_v62  ;;  %v5726_v21 = vpop.f32.mrb[172].mxu1  ;;  %v10888_v53 = vadd.f32 %v10887_v41, %v10886_v54  ;;  %v8447_v58 = vadd.f32 %v8061_v18, %v6782_v43  ;;  %v8063_v34 = vpop.f32.mrb[173].mxu0 }
 0x640   :  { %v9342_v12 = vadd.f32 %v8894_v4, %v8446_v24  ;;  %v5728_v50 = vpop.f32.mrb[173].mxu1  ;;  %v8895_v2 = vrot.slane %v8063_v34, 1  ;;  %v8065_v0 = vpop.f32.mrb[174].mxu0  ;;  %v10020_v19 = vmax.f32 %v9572_v6, %v9796_v9 }
 0x641   :  { %v10632_v15 = vsel %vm10290_vm1, %v10250_v10, 0.0  ;;  %v6335_v61 = vrot.slane %v5728_v50, 1  ;;  %v5730_v52 = vpop.f32.mrb[174].mxu1  ;;  %v15585_v55 = vsel %vm10963_vm2, %v10888_v53, %v10881_v45  ;;  %v8067_v33 = vpop.f32.mrb[175].mxu0 }
 0x642   :  { %v10633_v26 = vadd.f32 %v10632_v15, %v10631_v46  ;;  %v9573_v59 = vadd.f32 %v15473_v35, %v9342_v12  ;;  %v5731_v20 = vpop.f32.mrb[175].mxu1  ;;  %v9343_v60 = vadd.f32 %v8895_v2, %v8447_v58  ;;  %v10251_v63 = vmul.f32 %v15515_v1, %v10020_v19 }
 0x643   :  { %v6783_v40 = vadd.f32 %v6335_v61, %v5726_v21  ;;  %v8896_v39 = vrot.slane %v8067_v33, 1 }
 0x644   :  { %v9797_v16 = vmul.f32 0.2, %v9573_v59  ;;  %v9574_v42 = vadd.f32 %v15473_v35, %v9343_v60  ;;  %v10634_v8 = vsel %vm10290_vm1, %v10251_v63, 0.0 }
 0x645   :  { %v8448_v32 = vadd.f32 %v8065_v0, %v6783_v40  ;;  %v10635_v56 = vadd.f32 %v10634_v8, %v10633_v26 }
 0x646   :  { %v10021_v29 = vmax.f32 %v9573_v59, %v9797_v16  ;;  %v9798_v27 = vmul.f32 0.2, %v9574_v42  ;;  %v8071_v5 = vpop.f32.mrb[176].mxu0 }
 0x647   :  { %v9344_v47 = vadd.f32 %v8896_v39, %v8448_v32  ;;  %v5734_v51 = vpop.f32.mrb[176].mxu1  ;;  %v8072_v37 = vpop.f32.mrb[177].mxu0 }
 0x648   :  { %v10252_v25 = vmul.f32 %v15527_v44, %v10021_v29  ;;  %v5736_v48 = vpop.f32.mrb[177].mxu1  ;;  %v10022_v57 = vmax.f32 %v9574_v42, %v9798_v27  ;;  %v8073_v31 = vpop.f32.mrb[178].mxu0 }
 0x649   :  { %v9575_v13 = vadd.f32 %v15473_v35, %v9344_v47  ;;  %v6336_v54 = vrot.slane %v5736_v48, 1  ;;  %v5738_v23 = vpop.f32.mrb[178].mxu1  ;;  %v8075_v28 = vpop.f32.mrb[179].mxu0 }
 0x64a   :  { %v10636_v38 = vsel %vm10290_vm1, %v10252_v25, 0.0  ;;  %v5740_v3 = vpop.f32.mrb[179].mxu1  ;;  %v10253_v41 = vmul.f32 %v15535_v17, %v10022_v57  ;;  %v8897_v4 = vrot.slane %v8075_v28, 1 }
 0x64b   :  { %v10637_v14 = vadd.f32 %v10636_v38, %v10635_v56  ;;  %v9799_v36 = vmul.f32 0.2, %v9575_v13  ;;  %v6784_v62 = vadd.f32 %v6336_v54, %v5734_v51  ;;  %v6337_v43 = vrot.slane %v5740_v3, 1 }
 0x64c   :  { %v10638_v46 = vsel %vm10290_vm1, %v10253_v41, 0.0 }
 0x64d   :  { %v10023_v6 = vmax.f32 %v9575_v13, %v9799_v36  ;;  %v8449_v24 = vadd.f32 %v8073_v31, %v6784_v62  ;;  %v10639_v10 = vadd.f32 %v10638_v46, %v10637_v14  ;;  %v6785_v21 = vadd.f32 %v6337_v43, %v5738_v23 }
 0x64e   :  { %v8079_v9 = vpop.f32.mrb[180].mxu0 }
 0x64f   :  { %v10254_v18 = vmul.f32 %v15544_v22, %v10023_v6  ;;  %v9345_v45 = vadd.f32 %v8897_v4, %v8449_v24  ;;  %v5744_v53 = vpop.f32.mrb[180].mxu1  ;;  %v8450_v12 = vadd.f32 %v8079_v9, %v6785_v21  ;;  %v8081_v50 = vpop.f32.mrb[181].mxu0 }
 0x650   :  { %v5746_v58 = vpop.f32.mrb[181].mxu1  ;;  %v8898_v2 = vrot.slane %v8081_v50, 1  ;;  %v8083_v0 = vpop.f32.mrb[182].mxu0 }
 0x651   :  { %v10640_v34 = vsel %vm10290_vm1, %v10254_v18, 0.0  ;;  %v9576_v15 = vadd.f32 %v15473_v35, %v9345_v45  ;;  %v6338_v61 = vrot.slane %v5746_v58, 1  ;;  %v5748_v52 = vpop.f32.mrb[182].mxu1  ;;  %v8085_v59 = vpop.f32.mrb[183].mxu0 }
 0x652   :  { %v10641_v26 = vadd.f32 %v10640_v34, %v10639_v10  ;;  %v5750_v19 = vpop.f32.mrb[183].mxu1  ;;  %v9346_v33 = vadd.f32 %v8898_v2, %v8450_v12  ;;  %v8899_v16 = vrot.slane %v8085_v59, 1 }
 0x653   :  { %v9800_v20 = vmul.f32 0.2, %v9576_v15  ;;  %v6786_v60 = vadd.f32 %v6338_v61, %v5744_v53  ;;  %v6339_v40 = vrot.slane %v5750_v19, 1 }
 0x654   :  { %v10889_v63 = vsel %vm10290_vm1, %v10641_v26, 0.0  ;;  %v9577_v39 = vadd.f32 %v15473_v35, %v9346_v33 }
 0x655   :  { %v10890_v42 = vrot.slane %v10889_v63, 4  ;;  %v10024_v32 = vmax.f32 %v9576_v15, %v9800_v20  ;;  %v8451_v8 = vadd.f32 %v8083_v0, %v6786_v60  ;;  %v6787_v29 = vadd.f32 %v6339_v40, %v5748_v52 }
 0x656   :  { %v9801_v27 = vmul.f32 0.2, %v9577_v39  ;;  %v8089_v5 = vpop.f32.mrb[184].mxu0 }
 0x657   :  { %v10891_v56 = vadd.f32 %v10890_v42, %v10889_v63  ;;  %v9347_v47 = vadd.f32 %v8899_v16, %v8451_v8  ;;  %v5754_v51 = vpop.f32.mrb[184].mxu1  ;;  %v10255_v25 = vmul.f32 %v15485_v30, %v10024_v32  ;;  %v8452_v48 = vadd.f32 %v8089_v5, %v6787_v29  ;;  %v8091_v57 = vpop.f32.mrb[185].mxu0 }
 0x658   :  { %v5756_v37 = vpop.f32.mrb[185].mxu1  ;;  %v10025_v54 = vmax.f32 %v9577_v39, %v9801_v27  ;;  %v8093_v38 = vpop.f32.mrb[186].mxu0  ;;  %v8900_v28 = vrot.slane %v8091_v57, 1 }
 0x659   :  { %v10892_v13 = vrot.slane %v10891_v56, 2  ;;  %v9578_v23 = vadd.f32 %v15473_v35, %v9347_v47  ;;  %v5758_v31 = vpop.f32.mrb[186].mxu1  ;;  %v6340_v3 = vrot.slane %v5756_v37, 1  ;;  %v8095_v41 = vpop.f32.mrb[187].mxu0  ;;  %v10642_v6 = vsel %vm10290_vm1, %v10255_v25, 0.0 }
 0x65a   :  { %v5760_v14 = vpop.f32.mrb[187].mxu1  ;;  %v10256_v62 = vmul.f32 %v15492_v49, %v10025_v54  ;;  %v9348_v24 = vadd.f32 %v8900_v28, %v8452_v48  ;;  %v8901_v58 = vrot.slane %v8095_v41, 1 }
 0x65b   :  { %v10893_v36 = vadd.f32 %v10892_v13, %v10891_v56  ;;  %v9802_v43 = vmul.f32 0.2, %v9578_v23  ;;  %v6341_v46 = vrot.slane %v5760_v14, 1  ;;  %v6788_v4 = vadd.f32 %v6340_v3, %v5754_v51 }
 0x65c   :  { %v10643_v10 = vsel %vm10290_vm1, %v10256_v62, 0.0  ;;  %v9579_v9 = vadd.f32 %v15473_v35, %v9348_v24 }
 0x65d   :  { %v10026_v21 = vmax.f32 %v9578_v23, %v9802_v43  ;;  %v6789_v18 = vadd.f32 %v6341_v46, %v5758_v31  ;;  %v10894_v45 = vrot.slane %v10893_v36, 1  ;;  %v10644_v53 = vadd.f32 %v10643_v10, %v10642_v6 }
 0x65e   :  { %v8453_v12 = vadd.f32 %v8093_v38, %v6788_v4  ;;  %v8099_v15 = vpop.f32.mrb[188].mxu0  ;;  %v9803_v2 = vmul.f32 0.2, %v9579_v9 }
 0x65f   :  { %v10257_v50 = vmul.f32 %v15505_v7, %v10026_v21  ;;  %v5764_v34 = vpop.f32.mrb[188].mxu1  ;;  %v10895_v61 = vadd.f32 %v10894_v45, %v10893_v36  ;;  %v8454_v0 = vadd.f32 %v8099_v15, %v6789_v18  ;;  %v8101_v19 = vpop.f32.mrb[189].mxu0 }
 0x660   :  { %v9349_v52 = vadd.f32 %v8901_v58, %v8453_v12  ;;  %v5766_v26 = vpop.f32.mrb[189].mxu1  ;;  %v8902_v33 = vrot.slane %v8101_v19, 1  ;;  %v8103_v40 = vpop.f32.mrb[190].mxu0  ;;  %v10027_v42 = vmax.f32 %v9579_v9, %v9803_v2 }
 0x661   :  { %v10645_v59 = vsel %vm10290_vm1, %v10257_v50, 0.0  ;;  %v6342_v20 = vrot.slane %v5766_v26, 1  ;;  %v5768_v60 = vpop.f32.mrb[190].mxu1  ;;  %v15611_v63 = vsel %vm10965_vm3, %v10895_v61, %v15585_v55  ;;  %v8105_v8 = vpop.f32.mrb[191].mxu0 }
 0x662   :  { %v10646_v16 = vadd.f32 %v10645_v59, %v10644_v53  ;;  %v9580_v32 = vadd.f32 %v15473_v35, %v9349_v52  ;;  %v5769_v39 = vpop.f32.mrb[191].mxu1  ;;  %v9350_v29 = vadd.f32 %v8902_v33, %v8454_v0  ;;  %v10258_v27 = vmul.f32 %v15515_v1, %v10027_v42 }
 0x663   :  { %v6790_v56 = vadd.f32 %v6342_v20, %v5764_v34  ;;  %v8903_v25 = vrot.slane %v8105_v8, 1 }
 0x664   :  { %v9804_v47 = vmul.f32 0.2, %v9580_v32  ;;  %v9581_v51 = vadd.f32 %v15473_v35, %v9350_v29  ;;  %v10647_v48 = vsel %vm10290_vm1, %v10258_v27, 0.0 }
 0x665   :  { %v8455_v5 = vadd.f32 %v8103_v40, %v6790_v56  ;;  %v10648_v55 = vadd.f32 %v10647_v48, %v10646_v16 }
 0x666   :  { %v10028_v37 = vmax.f32 %v9580_v32, %v9804_v47  ;;  %v9805_v57 = vmul.f32 0.2, %v9581_v51  ;;  %v8109_v23 = vpop.f32.mrb[192].mxu0 }
 0x667   :  { %v9351_v13 = vadd.f32 %v8903_v25, %v8455_v5  ;;  %v5772_v54 = vpop.f32.mrb[192].mxu1  ;;  %v8110_v3 = vpop.f32.mrb[193].mxu0 }
 0x668   :  { %v10259_v31 = vmul.f32 %v15527_v44, %v10028_v37  ;;  %v5774_v38 = vpop.f32.mrb[193].mxu1  ;;  %v10029_v28 = vmax.f32 %v9581_v51, %v9805_v57  ;;  %v8111_v62 = vpop.f32.mrb[194].mxu0 }
 0x669   :  { %v9582_v14 = vadd.f32 %v15473_v35, %v9351_v13  ;;  %v6343_v41 = vrot.slane %v5774_v38, 1  ;;  %v5776_v36 = vpop.f32.mrb[194].mxu1  ;;  %v8113_v6 = vpop.f32.mrb[195].mxu0 }
 0x66a   :  { %v10649_v43 = vsel %vm10290_vm1, %v10259_v31, 0.0  ;;  %v5778_v46 = vpop.f32.mrb[195].mxu1  ;;  %v10260_v4 = vmul.f32 %v15535_v17, %v10029_v28  ;;  %v8904_v12 = vrot.slane %v8113_v6, 1 }
 0x66b   :  { %v10650_v24 = vadd.f32 %v10649_v43, %v10648_v55  ;;  %v9806_v10 = vmul.f32 0.2, %v9582_v14  ;;  %v6791_v21 = vadd.f32 %v6343_v41, %v5772_v54  ;;  %v6344_v18 = vrot.slane %v5778_v46, 1 }
 0x66c   :  { %v10651_v45 = vsel %vm10290_vm1, %v10260_v4, 0.0 }
 0x66d   :  { %v10030_v53 = vmax.f32 %v9582_v14, %v9806_v10  ;;  %v8456_v9 = vadd.f32 %v8111_v62, %v6791_v21  ;;  %v10652_v58 = vadd.f32 %v10651_v45, %v10650_v24  ;;  %v6792_v50 = vadd.f32 %v6344_v18, %v5776_v36 }
 0x66e   :  { %v8117_v2 = vpop.f32.mrb[196].mxu0 }
 0x66f   :  { %v10261_v34 = vmul.f32 %v15544_v22, %v10030_v53  ;;  %v9352_v15 = vadd.f32 %v8904_v12, %v8456_v9  ;;  %v5782_v61 = vpop.f32.mrb[196].mxu1  ;;  %v8457_v52 = vadd.f32 %v8117_v2, %v6792_v50  ;;  %v8119_v26 = vpop.f32.mrb[197].mxu0 }
 0x670   :  { %v5784_v0 = vpop.f32.mrb[197].mxu1  ;;  %v8905_v33 = vrot.slane %v8119_v26, 1  ;;  %v8121_v40 = vpop.f32.mrb[198].mxu0 }
 0x671   :  { %v10653_v19 = vsel %vm10290_vm1, %v10261_v34, 0.0  ;;  %v9583_v59 = vadd.f32 %v15473_v35, %v9352_v15  ;;  %v6345_v20 = vrot.slane %v5784_v0, 1  ;;  %v5786_v60 = vpop.f32.mrb[198].mxu1  ;;  %v8123_v32 = vpop.f32.mrb[199].mxu0  ;;  %v15635_v15 = vld [vmem:[%s15783_s5] ss:$0 sm:$0xff] }
 0x672   :  { %v10654_v16 = vadd.f32 %v10653_v19, %v10652_v58  ;;  %v5788_v42 = vpop.f32.mrb[199].mxu1  ;;  %v9353_v8 = vadd.f32 %v8905_v33, %v8457_v52  ;;  %v8906_v47 = vrot.slane %v8123_v32, 1 }
 0x673   :  { %v9807_v39 = vmul.f32 0.2, %v9583_v59  ;;  %v6793_v29 = vadd.f32 %v6345_v20, %v5782_v61  ;;  %v6346_v56 = vrot.slane %v5788_v42, 1 }
 0x674   :  { %v10896_v27 = vsel %vm10290_vm1, %v10654_v16, 0.0  ;;  %v9584_v25 = vadd.f32 %v15473_v35, %v9353_v8 }
 0x675   :  { %v10897_v51 = vrot.slane %v10896_v27, 4  ;;  %v10031_v5 = vmax.f32 %v9583_v59, %v9807_v39  ;;  %v8458_v48 = vadd.f32 %v8121_v40, %v6793_v29  ;;  %v6794_v37 = vadd.f32 %v6346_v56, %v5786_v60 }
 0x676   :  { %v9808_v57 = vmul.f32 0.2, %v9584_v25  ;;  %v8127_v23 = vpop.f32.mrb[200].mxu0 }
 0x677   :  { %v10898_v55 = vadd.f32 %v10897_v51, %v10896_v27  ;;  %v9354_v13 = vadd.f32 %v8906_v47, %v8458_v48  ;;  %v5792_v54 = vpop.f32.mrb[200].mxu1  ;;  %v10262_v31 = vmul.f32 %v15485_v30, %v10031_v5  ;;  %v8459_v38 = vadd.f32 %v8127_v23, %v6794_v37  ;;  %v8129_v28 = vpop.f32.mrb[201].mxu0 }
 0x678   :  { %v5794_v3 = vpop.f32.mrb[201].mxu1  ;;  %v10032_v41 = vmax.f32 %v9584_v25, %v9808_v57  ;;  %v8131_v43 = vpop.f32.mrb[202].mxu0  ;;  %v8907_v6 = vrot.slane %v8129_v28, 1 }
 0x679   :  { %v10899_v14 = vrot.slane %v10898_v55, 2  ;;  %v9585_v36 = vadd.f32 %v15473_v35, %v9354_v13  ;;  %v5796_v62 = vpop.f32.mrb[202].mxu1  ;;  %v6347_v46 = vrot.slane %v5794_v3, 1  ;;  %v8133_v4 = vpop.f32.mrb[203].mxu0  ;;  %v10655_v45 = vsel %vm10290_vm1, %v10262_v31, 0.0 }
 0x67a   :  { %v5798_v24 = vpop.f32.mrb[203].mxu1  ;;  %v10263_v10 = vmul.f32 %v15492_v49, %v10032_v41  ;;  %v9355_v30 = vadd.f32 %v8907_v6, %v8459_v38  ;;  %v8908_v50 = vrot.slane %v8133_v4, 1 }
 0x67b   :  { %v9809_v21 = vmul.f32 0.2, %v9585_v36  ;;  %v6348_v18 = vrot.slane %v5798_v24, 1  ;;  %v6795_v53 = vadd.f32 %v6347_v46, %v5792_v54  ;;  %v10900_v9 = vadd.f32 %v10899_v14, %v10898_v55 }
 0x67c   :  { %v10656_v12 = vsel %vm10290_vm1, %v10263_v10, 0.0  ;;  %v9586_v49 = vadd.f32 %v15635_v15, %v9355_v30 }
 0x67d   :  { %v10033_v58 = vmax.f32 %v9585_v36, %v9809_v21  ;;  %v6796_v35 = vadd.f32 %v6348_v18, %v5796_v62  ;;  %v10657_v34 = vadd.f32 %v10656_v12, %v10655_v45  ;;  %v8460_v61 = vadd.f32 %v8131_v43, %v6795_v53 }
 0x67e   :  { %v10901_v2 = vrot.slane %v10900_v9, 1  ;;  %v8137_v26 = vpop.f32.mrb[204].mxu0  ;;  %v9810_v19 = vmul.f32 0.2, %v9586_v49 }
 0x67f   :  { %v10264_v52 = vmul.f32 %v15505_v7, %v10033_v58  ;;  %v5802_v0 = vpop.f32.mrb[204].mxu1  ;;  %v9356_v59 = vadd.f32 %v8908_v50, %v8460_v61  ;;  %v8461_v20 = vadd.f32 %v8137_v26, %v6796_v35  ;;  %v8139_v60 = vpop.f32.mrb[205].mxu0 }
 0x680   :  { %v5804_v33 = vpop.f32.mrb[205].mxu1  ;;  %v10902_v40 = vadd.f32 %v10901_v2, %v10900_v9  ;;  %v8909_v32 = vrot.slane %v8139_v60, 1  ;;  %v8141_v8 = vpop.f32.mrb[206].mxu0  ;;  %v10034_v56 = vmax.f32 %v9586_v49, %v9810_v19 }
 0x681   :  { %v10658_v16 = vsel %vm10290_vm1, %v10264_v52, 0.0  ;;  %v6349_v42 = vrot.slane %v5804_v33, 1  ;;  %v5806_v39 = vpop.f32.mrb[206].mxu1  ;;  %v9587_v27 = vadd.f32 %v15635_v15, %v9356_v59  ;;  %v8143_v7 = vpop.f32.mrb[207].mxu0 }
 0x682   :  { %v10659_v29 = vadd.f32 %v10658_v16, %v10657_v34  ;;  %v5807_v47 = vpop.f32.mrb[207].mxu1  ;;  %v15643_v51 = vsel %vm10967_vm4, %v10902_v40, %v15611_v63  ;;  %v9357_v5 = vadd.f32 %v8909_v32, %v8461_v20  ;;  %v10265_v48 = vmul.f32 %v15515_v1, %v10034_v56 }
 0x683   :  { %v6797_v25 = vadd.f32 %v6349_v42, %v5802_v0  ;;  %v9811_v37 = vmul.f32 0.2, %v9587_v27  ;;  %v8910_v13 = vrot.slane %v8143_v7, 1 }
 0x684   :  { %v9588_v55 = vadd.f32 %v15635_v15, %v9357_v5  ;;  %v10660_v54 = vsel %vm10290_vm1, %v10265_v48, 0.0 }
 0x685   :  { %v8462_v57 = vadd.f32 %v8141_v8, %v6797_v25  ;;  %v10035_v23 = vmax.f32 %v9587_v27, %v9811_v37  ;;  %v10661_v31 = vadd.f32 %v10660_v54, %v10659_v29 }
 0x686   :  { %v9812_v38 = vmul.f32 0.2, %v9588_v55  ;;  %v8147_v14 = vpop.f32.mrb[208].mxu0 }
 0x687   :  { %v9358_v3 = vadd.f32 %v8910_v13, %v8462_v57  ;;  %v5810_v28 = vpop.f32.mrb[208].mxu1  ;;  %v10266_v63 = vmul.f32 %v15527_v44, %v10035_v23  ;;  %v8148_v36 = vpop.f32.mrb[209].mxu0 }
 0x688   :  { %v5812_v41 = vpop.f32.mrb[209].mxu1  ;;  %v10036_v62 = vmax.f32 %v9588_v55, %v9812_v38  ;;  %v8149_v6 = vpop.f32.mrb[210].mxu0 }
 0x689   :  { %v9589_v1 = vadd.f32 %v15635_v15, %v9358_v3  ;;  %v6350_v43 = vrot.slane %v5812_v41, 1  ;;  %v5814_v46 = vpop.f32.mrb[210].mxu1  ;;  %v10662_v24 = vsel %vm10290_vm1, %v10266_v63, 0.0  ;;  %v8151_v10 = vpop.f32.mrb[211].mxu0  ;;  %v15662_v41 = vld [vmem:[%s15784_s6] sm:$0x7f] }
 0x68a   :  { %v5816_v4 = vpop.f32.mrb[211].mxu1  ;;  %v10663_v21 = vadd.f32 %v10662_v24, %v10661_v31  ;;  %v10267_v18 = vmul.f32 %v15535_v17, %v10036_v62  ;;  %v8911_v58 = vrot.slane %v8151_v10, 1 }
 0x68b   :  { %v9813_v45 = vmul.f32 0.2, %v9589_v1  ;;  %v6798_v30 = vadd.f32 %v6350_v43, %v5810_v28  ;;  %v6351_v53 = vrot.slane %v5816_v4, 1 }
 0x68c   :  { %v10664_v44 = vsel %vm10290_vm1, %v10267_v18, 0.0 }
 0x68d   :  { %v10037_v9 = vmax.f32 %v9589_v1, %v9813_v45  ;;  %v8463_v12 = vadd.f32 %v8149_v6, %v6798_v30  ;;  %v10665_v50 = vadd.f32 %v10664_v44, %v10663_v21  ;;  %v6799_v35 = vadd.f32 %v6351_v53, %v5814_v46  ;;  %v15668_v21 = vld [vmem:[%s15784_s6 + $0x8] sm:$0x7f] }
 0x68e   :  { %v8155_v61 = vpop.f32.mrb[212].mxu0 }
 0x68f   :  { %v10268_v34 = vmul.f32 %v15544_v22, %v10037_v9  ;;  %v9359_v49 = vadd.f32 %v8911_v58, %v8463_v12  ;;  %v5820_v2 = vpop.f32.mrb[212].mxu1  ;;  %v8464_v52 = vadd.f32 %v8155_v61, %v6799_v35  ;;  %v8157_v59 = vpop.f32.mrb[213].mxu0 }
 0x690   :  { %v5822_v0 = vpop.f32.mrb[213].mxu1  ;;  %v8912_v60 = vrot.slane %v8157_v59, 1  ;;  %v8159_v40 = vpop.f32.mrb[214].mxu0 }
 0x691   :  { %v10666_v26 = vsel %vm10290_vm1, %v10268_v34, 0.0  ;;  %v9590_v17 = vadd.f32 %v15635_v15, %v9359_v49  ;;  %v6352_v19 = vrot.slane %v5822_v0, 1  ;;  %v5824_v20 = vpop.f32.mrb[214].mxu1  ;;  %v8161_v22 = vpop.f32.mrb[215].mxu0  ;;  %v15677_v49 = vld [vmem:[%s15784_s6 + $0x10] sm:$0x7f] }
 0x692   :  { %v10667_v33 = vadd.f32 %v10666_v26, %v10665_v50  ;;  %v5826_v16 = vpop.f32.mrb[215].mxu1  ;;  %v9360_v29 = vadd.f32 %v8912_v60, %v8464_v52  ;;  %v8913_v47 = vrot.slane %v8161_v22, 1 }
 0x693   :  { %v9814_v42 = vmul.f32 0.2, %v9590_v17  ;;  %v6800_v32 = vadd.f32 %v6352_v19, %v5820_v2  ;;  %v6353_v39 = vrot.slane %v5826_v16, 1 }
 0x694   :  { %v10903_v8 = vsel %vm10290_vm1, %v10667_v33, 0.0  ;;  %v9591_v5 = vadd.f32 %v15635_v15, %v9360_v29 }
 0x695   :  { %v10904_v56 = vrot.slane %v10903_v8, 4  ;;  %v8465_v27 = vadd.f32 %v8159_v40, %v6800_v32  ;;  %v10038_v7 = vmax.f32 %v9590_v17, %v9814_v42  ;;  %v6801_v25 = vadd.f32 %v6353_v39, %v5824_v20 }
 0x696   :  { %v8165_v57 = vpop.f32.mrb[216].mxu0  ;;  %v9815_v13 = vmul.f32 0.2, %v9591_v5 }
 0x697   :  { %v10905_v48 = vadd.f32 %v10904_v56, %v10903_v8  ;;  %v9361_v37 = vadd.f32 %v8913_v47, %v8465_v27  ;;  %v5830_v55 = vpop.f32.mrb[216].mxu1  ;;  %v8466_v54 = vadd.f32 %v8165_v57, %v6801_v25  ;;  %v8167_v31 = vpop.f32.mrb[217].mxu0  ;;  %v10269_v36 = vmul.f32 %v15662_v41, %v10038_v7  ;;  %v15689_v27 = vld [vmem:[%s15784_s6 + $0x18] sm:$0x7f] }
 0x698   :  { %v5832_v23 = vpop.f32.mrb[217].mxu1  ;;  %v8914_v28 = vrot.slane %v8167_v31, 1  ;;  %v8169_v63 = vpop.f32.mrb[218].mxu0  ;;  %v10039_v62 = vmax.f32 %v9591_v5, %v9815_v13 }
 0x699   :  { %v9592_v38 = vadd.f32 %v15635_v15, %v9361_v37  ;;  %v6354_v3 = vrot.slane %v5832_v23, 1  ;;  %v5834_v14 = vpop.f32.mrb[218].mxu1  ;;  %v8171_v43 = vpop.f32.mrb[219].mxu0  ;;  %v10906_v46 = vrot.slane %v10905_v48, 2  ;;  %v10668_v58 = vsel %vm10290_vm1, %v10269_v36, 0.0 }
 0x69a   :  { %v5836_v1 = vpop.f32.mrb[219].mxu1  ;;  %v9362_v24 = vadd.f32 %v8914_v28, %v8466_v54  ;;  %v10270_v18 = vmul.f32 %v15668_v21, %v10039_v62  ;;  %v8915_v45 = vrot.slane %v8171_v43, 1 }
 0x69b   :  { %v9816_v6 = vmul.f32 0.2, %v9592_v38  ;;  %v6802_v4 = vadd.f32 %v6354_v3, %v5830_v55  ;;  %v6355_v10 = vrot.slane %v5836_v1, 1  ;;  %v10907_v30 = vadd.f32 %v10906_v46, %v10905_v48 }
 0x69c   :  { %v9593_v44 = vadd.f32 %v15635_v15, %v9362_v24  ;;  %v10669_v50 = vsel %vm10290_vm1, %v10270_v18, 0.0 }
 0x69d   :  { %v10040_v53 = vmax.f32 %v9592_v38, %v9816_v6  ;;  %v8467_v9 = vadd.f32 %v8169_v63, %v6802_v4  ;;  %v6803_v12 = vadd.f32 %v6355_v10, %v5834_v14  ;;  %v10908_v35 = vrot.slane %v10907_v30, 1 }
 0x69e   :  { %v10670_v34 = vadd.f32 %v10669_v50, %v10668_v58  ;;  %v9817_v2 = vmul.f32 0.2, %v9593_v44  ;;  %v8175_v26 = vpop.f32.mrb[220].mxu0 }
 0x69f   :  { %v10271_v61 = vmul.f32 %v15677_v49, %v10040_v53  ;;  %v9363_v52 = vadd.f32 %v8915_v45, %v8467_v9  ;;  %v5840_v0 = vpop.f32.mrb[220].mxu1  ;;  %v8468_v17 = vadd.f32 %v8175_v26, %v6803_v12  ;;  %v8177_v59 = vpop.f32.mrb[221].mxu0  ;;  %v10909_v20 = vadd.f32 %v10908_v35, %v10907_v30  ;;  %v15705_v53 = vld [vmem:[%s15784_s6 + $0x28] sm:$0x7f] }
 0x6a0   :  { %v5842_v19 = vpop.f32.mrb[221].mxu1  ;;  %v10041_v60 = vmax.f32 %v9593_v44, %v9817_v2  ;;  %v8179_v32 = vpop.f32.mrb[222].mxu0  ;;  %v8916_v22 = vrot.slane %v8177_v59, 1 }
 0x6a1   :  { %v10671_v33 = vsel %vm10290_vm1, %v10271_v61, 0.0  ;;  %v9594_v40 = vadd.f32 %v15635_v15, %v9363_v52  ;;  %v6356_v16 = vrot.slane %v5842_v19, 1  ;;  %v5844_v42 = vpop.f32.mrb[222].mxu1  ;;  %v8181_v29 = vpop.f32.mrb[223].mxu0  ;;  %v15684_v56 = vsel %vm10969_vm5, %v10909_v20, %v15643_v51  ;;  %v15697_v51 = vld [vmem:[%s15784_s6 + $0x20] sm:$0x7f] }
 0x6a2   :  { %v10672_v39 = vadd.f32 %v10671_v33, %v10670_v34  ;;  %v5845_v8 = vpop.f32.mrb[223].mxu1  ;;  %v10272_v47 = vmul.f32 %v15689_v27, %v10041_v60  ;;  %v9364_v25 = vadd.f32 %v8916_v22, %v8468_v17  ;;  %v8917_v57 = vrot.slane %v8181_v29, 1  ;;  %v15712_v61 = vld [vmem:[%s15784_s6 + $0x30] sm:$0x7f] }
 0x6a3   :  { %v9818_v7 = vmul.f32 0.2, %v9594_v40  ;;  %v6804_v5 = vadd.f32 %v6356_v16, %v5840_v0 }
 0x6a4   :  { %v10673_v48 = vsel %vm10290_vm1, %v10272_v47, 0.0  ;;  %v9595_v54 = vadd.f32 %v15635_v15, %v9364_v25 }
 0x6a5   :  { %v10042_v37 = vmax.f32 %v9594_v40, %v9818_v7  ;;  %v8469_v55 = vadd.f32 %v8179_v32, %v6804_v5  ;;  %v10674_v13 = vadd.f32 %v10673_v48, %v10672_v39 }
 0x6a6   :  { %v8185_v3 = vpop.f32.mrb[224].mxu0  ;;  %v9819_v28 = vmul.f32 0.2, %v9595_v54 }
 0x6a7   :  { %v10273_v23 = vmul.f32 %v15697_v51, %v10042_v37  ;;  %v9365_v31 = vadd.f32 %v8917_v57, %v8469_v55  ;;  %v5848_v38 = vpop.f32.mrb[224].mxu1  ;;  %v8186_v63 = vpop.f32.mrb[225].mxu0 }
 0x6a8   :  { %v5850_v14 = vpop.f32.mrb[225].mxu1  ;;  %v8187_v46 = vpop.f32.mrb[226].mxu0  ;;  %v10043_v24 = vmax.f32 %v9595_v54, %v9819_v28 }
 0x6a9   :  { %v10675_v36 = vsel %vm10290_vm1, %v10273_v23, 0.0  ;;  %v9596_v62 = vadd.f32 %v15635_v15, %v9365_v31  ;;  %v6357_v1 = vrot.slane %v5850_v14, 1  ;;  %v5852_v43 = vpop.f32.mrb[226].mxu1  ;;  %v8189_v10 = vpop.f32.mrb[227].mxu0 }
 0x6aa   :  { %v10676_v6 = vadd.f32 %v10675_v36, %v10674_v13  ;;  %v5854_v4 = vpop.f32.mrb[227].mxu1  ;;  %v10274_v44 = vmul.f32 %v15705_v53, %v10043_v24  ;;  %v8918_v58 = vrot.slane %v8189_v10, 1 }
 0x6ab   :  { %v9820_v18 = vmul.f32 0.2, %v9596_v62  ;;  %v6805_v45 = vadd.f32 %v6357_v1, %v5848_v38  ;;  %v6358_v30 = vrot.slane %v5854_v4, 1 }
 0x6ac   :  { %v10677_v35 = vsel %vm10290_vm1, %v10274_v44, 0.0 }
 0x6ad   :  { %v10044_v9 = vmax.f32 %v9596_v62, %v9820_v18  ;;  %v8470_v12 = vadd.f32 %v8187_v46, %v6805_v45  ;;  %v6806_v50 = vadd.f32 %v6358_v30, %v5852_v43  ;;  %v10678_v34 = vadd.f32 %v10677_v35, %v10676_v6 }
 0x6ae   :  { %v8193_v26 = vpop.f32.mrb[228].mxu0 }
 0x6af   :  { %v10275_v2 = vmul.f32 %v15712_v61, %v10044_v9  ;;  %v9366_v52 = vadd.f32 %v8918_v58, %v8470_v12  ;;  %v5858_v0 = vpop.f32.mrb[228].mxu1  ;;  %v8471_v17 = vadd.f32 %v8193_v26, %v6806_v50  ;;  %v8195_v59 = vpop.f32.mrb[229].mxu0 }
 0x6b0   :  { %v5860_v19 = vpop.f32.mrb[229].mxu1  ;;  %v8919_v40 = vrot.slane %v8195_v59, 1  ;;  %v8197_v42 = vpop.f32.mrb[230].mxu0 }
 0x6b1   :  { %v10679_v20 = vsel %vm10290_vm1, %v10275_v2, 0.0  ;;  %v9597_v33 = vadd.f32 %v15635_v15, %v9366_v52  ;;  %v6359_v60 = vrot.slane %v5860_v19, 1  ;;  %v5862_v16 = vpop.f32.mrb[230].mxu1  ;;  %v8199_v22 = vpop.f32.mrb[231].mxu0 }
 0x6b2   :  { %v10680_v32 = vadd.f32 %v10679_v20, %v10678_v34  ;;  %v5864_v39 = vpop.f32.mrb[231].mxu1  ;;  %v9367_v29 = vadd.f32 %v8919_v40, %v8471_v17  ;;  %v8920_v25 = vrot.slane %v8199_v22, 1 }
 0x6b3   :  { %v9821_v8 = vmul.f32 0.2, %v9597_v33  ;;  %v6807_v47 = vadd.f32 %v6359_v60, %v5858_v0  ;;  %v6360_v7 = vrot.slane %v5864_v39, 1 }
 0x6b4   :  { %v10910_v5 = vsel %vm10290_vm1, %v10680_v32, 0.0  ;;  %v9598_v55 = vadd.f32 %v15635_v15, %v9367_v29 }
 0x6b5   :  { %v10911_v48 = vrot.slane %v10910_v5, 4  ;;  %v10045_v37 = vmax.f32 %v9597_v33, %v9821_v8  ;;  %v8472_v57 = vadd.f32 %v8197_v42, %v6807_v47  ;;  %v6808_v13 = vadd.f32 %v6360_v7, %v5862_v16 }
 0x6b6   :  { %v9822_v54 = vmul.f32 0.2, %v9598_v55  ;;  %v8203_v38 = vpop.f32.mrb[232].mxu0 }
 0x6b7   :  { %v9368_v23 = vadd.f32 %v8920_v25, %v8472_v57  ;;  %v5868_v31 = vpop.f32.mrb[232].mxu1  ;;  %v10912_v3 = vadd.f32 %v10911_v48, %v10910_v5  ;;  %v10276_v28 = vmul.f32 %v15662_v41, %v10045_v37  ;;  %v8473_v14 = vadd.f32 %v8203_v38, %v6808_v13  ;;  %v8205_v36 = vpop.f32.mrb[233].mxu0 }
 0x6b8   :  { %v5870_v63 = vpop.f32.mrb[233].mxu1  ;;  %v10046_v62 = vmax.f32 %v9598_v55, %v9822_v54  ;;  %v8207_v6 = vpop.f32.mrb[234].mxu0  ;;  %v8921_v24 = vrot.slane %v8205_v36, 1 }
 0x6b9   :  { %v9599_v1 = vadd.f32 %v15635_v15, %v9368_v23  ;;  %v6361_v43 = vrot.slane %v5870_v63, 1  ;;  %v5872_v46 = vpop.f32.mrb[234].mxu1  ;;  %v8209_v10 = vpop.f32.mrb[235].mxu0  ;;  %v10913_v18 = vrot.slane %v10912_v3, 2  ;;  %v10681_v12 = vsel %vm10290_vm1, %v10276_v28, 0.0 }
 0x6ba   :  { %v5874_v4 = vpop.f32.mrb[235].mxu1  ;;  %v10277_v45 = vmul.f32 %v15668_v21, %v10046_v62  ;;  %v9369_v58 = vadd.f32 %v8921_v24, %v8473_v14  ;;  %v8922_v50 = vrot.slane %v8209_v10, 1 }
 0x6bb   :  { %v9823_v30 = vmul.f32 0.2, %v9599_v1  ;;  %v6809_v44 = vadd.f32 %v6361_v43, %v5868_v31  ;;  %v6362_v9 = vrot.slane %v5874_v4, 1  ;;  %v10914_v35 = vadd.f32 %v10913_v18, %v10912_v3 }
 0x6bc   :  { %v10682_v34 = vsel %vm10290_vm1, %v10277_v45, 0.0  ;;  %v9600_v17 = vadd.f32 %v15635_v15, %v9369_v58 }
 0x6bd   :  { %v10047_v2 = vmax.f32 %v9599_v1, %v9823_v30  ;;  %v8474_v52 = vadd.f32 %v8207_v6, %v6809_v44  ;;  %v6810_v0 = vadd.f32 %v6362_v9, %v5872_v46  ;;  %v10683_v26 = vadd.f32 %v10682_v34, %v10681_v12 }
 0x6be   :  { %v10915_v19 = vrot.slane %v10914_v35, 1  ;;  %v8213_v60 = vpop.f32.mrb[236].mxu0  ;;  %v9824_v40 = vmul.f32 0.2, %v9600_v17 }
 0x6bf   :  { %v10278_v59 = vmul.f32 %v15677_v49, %v10047_v2  ;;  %v9370_v20 = vadd.f32 %v8922_v50, %v8474_v52  ;;  %v5878_v33 = vpop.f32.mrb[236].mxu1  ;;  %v8475_v16 = vadd.f32 %v8213_v60, %v6810_v0  ;;  %v8215_v32 = vpop.f32.mrb[237].mxu0 }
 0x6c0   :  { %v5880_v42 = vpop.f32.mrb[237].mxu1  ;;  %v10916_v39 = vadd.f32 %v10915_v19, %v10914_v35  ;;  %v8923_v47 = vrot.slane %v8215_v32, 1  ;;  %v8217_v5 = vpop.f32.mrb[238].mxu0  ;;  %v10048_v48 = vmax.f32 %v9600_v17, %v9824_v40 }
 0x6c1   :  { %v10684_v22 = vsel %vm10290_vm1, %v10278_v59, 0.0  ;;  %v9601_v8 = vadd.f32 %v15635_v15, %v9370_v20  ;;  %v6363_v29 = vrot.slane %v5880_v42, 1  ;;  %v5882_v7 = vpop.f32.mrb[238].mxu1  ;;  %v8219_v55 = vpop.f32.mrb[239].mxu0 }
 0x6c2   :  { %v10685_v25 = vadd.f32 %v10684_v22, %v10683_v26  ;;  %v5883_v37 = vpop.f32.mrb[239].mxu1  ;;  %v15730_v57 = vsel %vm10971_vm6, %v10916_v39, %v15684_v56  ;;  %v9371_v54 = vadd.f32 %v8923_v47, %v8475_v16  ;;  %v10279_v31 = vmul.f32 %v15689_v27, %v10048_v48 }
 0x6c3   :  { %v9825_v13 = vmul.f32 0.2, %v9601_v8  ;;  %v6811_v23 = vadd.f32 %v6363_v29, %v5878_v33  ;;  %v8924_v14 = vrot.slane %v8219_v55, 1 }
 0x6c4   :  { %v9602_v3 = vadd.f32 %v15635_v15, %v9371_v54  ;;  %v10686_v63 = vsel %vm10290_vm1, %v10279_v31, 0.0 }
 0x6c5   :  { %v10049_v38 = vmax.f32 %v9601_v8, %v9825_v13  ;;  %v8476_v28 = vadd.f32 %v8217_v5, %v6811_v23  ;;  %v10687_v36 = vadd.f32 %v10686_v63, %v10685_v25 }
 0x6c6   :  { %v9826_v1 = vmul.f32 0.2, %v9602_v3  ;;  %v8223_v56 = vpop.f32.mrb[240].mxu0 }
 0x6c7   :  { %v10280_v62 = vmul.f32 %v15697_v51, %v10049_v38  ;;  %v9372_v43 = vadd.f32 %v8924_v14, %v8476_v28  ;;  %v5886_v46 = vpop.f32.mrb[240].mxu1  ;;  %v8224_v24 = vpop.f32.mrb[241].mxu0 }
 0x6c8   :  { %v5888_v6 = vpop.f32.mrb[241].mxu1  ;;  %v10050_v10 = vmax.f32 %v9602_v3, %v9826_v1  ;;  %v8225_v44 = vpop.f32.mrb[242].mxu0 }
 0x6c9   :  { %v10688_v4 = vsel %vm10290_vm1, %v10280_v62, 0.0  ;;  %v9603_v18 = vadd.f32 %v15635_v15, %v9372_v43  ;;  %v6364_v45 = vrot.slane %v5888_v6, 1  ;;  %v5890_v30 = vpop.f32.mrb[242].mxu1  ;;  %v8227_v58 = vpop.f32.mrb[243].mxu0 }
 0x6ca   :  { %v10689_v9 = vadd.f32 %v10688_v4, %v10687_v36  ;;  %v5892_v12 = vpop.f32.mrb[243].mxu1  ;;  %v10281_v50 = vmul.f32 %v15705_v53, %v10050_v10  ;;  %v8925_v52 = vrot.slane %v8227_v58, 1 }
 0x6cb   :  { %v9827_v35 = vmul.f32 0.2, %v9603_v18  ;;  %v6812_v34 = vadd.f32 %v6364_v45, %v5886_v46  ;;  %v6365_v2 = vrot.slane %v5892_v12, 1 }
 0x6cc   :  { %v10690_v0 = vsel %vm10290_vm1, %v10281_v50, 0.0 }
 0x6cd   :  { %v10051_v26 = vmax.f32 %v9603_v18, %v9827_v35  ;;  %v8477_v17 = vadd.f32 %v8225_v44, %v6812_v34  ;;  %v6813_v19 = vadd.f32 %v6365_v2, %v5890_v30  ;;  %v10691_v59 = vadd.f32 %v10690_v0, %v10689_v9 }
 0x6ce   :  { %v8231_v40 = vpop.f32.mrb[244].mxu0 }
 0x6cf   :  { %v10282_v20 = vmul.f32 %v15712_v61, %v10051_v26  ;;  %v9373_v33 = vadd.f32 %v8925_v52, %v8477_v17  ;;  %v5896_v60 = vpop.f32.mrb[244].mxu1  ;;  %v8478_v16 = vadd.f32 %v8231_v40, %v6813_v19  ;;  %v8233_v32 = vpop.f32.mrb[245].mxu0 }
 0x6d0   :  { %v5898_v42 = vpop.f32.mrb[245].mxu1  ;;  %v8926_v29 = vrot.slane %v8233_v32, 1  ;;  %v8235_v7 = vpop.f32.mrb[246].mxu0 }
 0x6d1   :  { %v10692_v39 = vsel %vm10290_vm1, %v10282_v20, 0.0  ;;  %v9604_v22 = vadd.f32 %v15635_v15, %v9373_v33  ;;  %v6366_v8 = vrot.slane %v5898_v42, 1  ;;  %v5900_v47 = vpop.f32.mrb[246].mxu1  ;;  %v8237_v48 = vpop.f32.mrb[247].mxu0 }
 0x6d2   :  { %v10693_v5 = vadd.f32 %v10692_v39, %v10691_v59  ;;  %v5902_v25 = vpop.f32.mrb[247].mxu1  ;;  %v9374_v55 = vadd.f32 %v8926_v29, %v8478_v16  ;;  %v8927_v23 = vrot.slane %v8237_v48, 1 }
 0x6d3   :  { %v9828_v37 = vmul.f32 0.2, %v9604_v22  ;;  %v6814_v13 = vadd.f32 %v6366_v8, %v5896_v60  ;;  %v6367_v54 = vrot.slane %v5902_v25, 1 }
 0x6d4   :  { %v10917_v31 = vsel %vm10290_vm1, %v10693_v5, 0.0  ;;  %v9605_v3 = vadd.f32 %v15635_v15, %v9374_v55 }
 0x6d5   :  { %v10052_v38 = vmax.f32 %v9604_v22, %v9828_v37  ;;  %v8479_v28 = vadd.f32 %v8235_v7, %v6814_v13  ;;  %v6815_v14 = vadd.f32 %v6367_v54, %v5900_v47  ;;  %v10918_v63 = vrot.slane %v10917_v31, 4 }
 0x6d6   :  { %v9829_v36 = vmul.f32 0.2, %v9605_v3  ;;  %v8241_v43 = vpop.f32.mrb[248].mxu0 }
 0x6d7   :  { %v9375_v62 = vadd.f32 %v8927_v23, %v8479_v28  ;;  %v5906_v1 = vpop.f32.mrb[248].mxu1  ;;  %v10283_v46 = vmul.f32 %v15662_v41, %v10052_v38  ;;  %v8480_v56 = vadd.f32 %v8241_v43, %v6815_v14  ;;  %v8243_v24 = vpop.f32.mrb[249].mxu0  ;;  %v10919_v4 = vadd.f32 %v10918_v63, %v10917_v31 }
 0x6d8   :  { %v5908_v6 = vpop.f32.mrb[249].mxu1  ;;  %v10053_v10 = vmax.f32 %v9605_v3, %v9829_v36  ;;  %v8245_v44 = vpop.f32.mrb[250].mxu0  ;;  %v8928_v9 = vrot.slane %v8243_v24, 1 }
 0x6d9   :  { %v9606_v18 = vadd.f32 %v15635_v15, %v9375_v62  ;;  %v6368_v45 = vrot.slane %v5908_v6, 1  ;;  %v5910_v30 = vpop.f32.mrb[250].mxu1  ;;  %v8247_v58 = vpop.f32.mrb[251].mxu0  ;;  %v10920_v50 = vrot.slane %v10919_v4, 2  ;;  %v10694_v41 = vsel %vm10290_vm1, %v10283_v46, 0.0 }
 0x6da   :  { %v5912_v12 = vpop.f32.mrb[251].mxu1  ;;  %v10284_v35 = vmul.f32 %v15668_v21, %v10053_v10  ;;  %v9376_v0 = vadd.f32 %v8928_v9, %v8480_v56  ;;  %v8929_v26 = vrot.slane %v8247_v58, 1 }
 0x6db   :  { %v9830_v34 = vmul.f32 0.2, %v9606_v18  ;;  %v6816_v2 = vadd.f32 %v6368_v45, %v5906_v1  ;;  %v6369_v52 = vrot.slane %v5912_v12, 1  ;;  %v10921_v17 = vadd.f32 %v10920_v50, %v10919_v4  ;;  %v11007_v12 = vpop.xlane.xlu1 %11006 }
 0x6dc   :  { %v10695_v19 = vsel %vm10290_vm1, %v10284_v35, 0.0  ;;  %v9607_v40 = vadd.f32 %v15635_v15, %v9376_v0 }
 0x6dd   :  { %v10054_v59 = vmax.f32 %v9606_v18, %v9830_v34  ;;  %v8481_v20 = vadd.f32 %v8245_v44, %v6816_v2  ;;  %v6817_v33 = vadd.f32 %v6369_v52, %v5910_v30  ;;  %v10696_v60 = vadd.f32 %v10695_v19, %v10694_v41  ;;  %v11786_v30 = vld [vmem:[#allocation2] ss:$0 sm:$0xff] }
 0x6de   :  { %v10922_v16 = vrot.slane %v10921_v17, 1  ;;  %v8251_v39 = vpop.f32.mrb[252].mxu0  ;;  %v9831_v22 = vmul.f32 0.2, %v9607_v40  ;;  %v11019_v34 = vadd.f32 %v11786_v30, %v11007_v12 }
 0x6df   :  { %v10285_v42 = vmul.f32 %v15677_v49, %v10054_v59  ;;  %v9377_v21 = vadd.f32 %v8929_v26, %v8481_v20  ;;  %v5916_v32 = vpop.f32.mrb[252].mxu1  ;;  %v8482_v8 = vadd.f32 %v8251_v39, %v6817_v33  ;;  %v8253_v47 = vpop.f32.mrb[253].mxu0 }
 0x6e0   :  { %v5918_v29 = vpop.f32.mrb[253].mxu1  ;;  %v10923_v7 = vadd.f32 %v10922_v16, %v10921_v17  ;;  %v8930_v37 = vrot.slane %v8253_v47, 1  ;;  %v8255_v13 = vpop.f32.mrb[254].mxu0  ;;  %v10055_v23 = vmax.f32 %v9607_v40, %v9831_v22  ;;  %v11023_v0 = vsub.f32 0.0, %v11019_v34 }
 0x6e1   :  { %v10697_v5 = vsel %vm10290_vm1, %v10285_v42, 0.0  ;;  %v9608_v25 = vadd.f32 %v15635_v15, %v9377_v21  ;;  %v6370_v48 = vrot.slane %v5918_v29, 1  ;;  %v5920_v55 = vpop.f32.mrb[254].mxu1  ;;  %v8257_v49 = vpop.f32.mrb[255].mxu0 }
 0x6e2   :  { %v10698_v54 = vadd.f32 %v10697_v5, %v10696_v60  ;;  %v5921_v31 = vpop.f32.mrb[255].mxu1  ;;  %v10996_v38 = vsel %vm10973_vm7, %v10923_v7, %v15730_v57  ;;  %v9378_v28 = vadd.f32 %v8930_v37, %v8482_v8  ;;  %v10286_v63 = vmul.f32 %v15689_v27, %v10055_v23 }
 0x6e3   :  { %v9832_v3 = vmul.f32 0.2, %v9608_v25  ;;  %v6818_v14 = vadd.f32 %v6370_v48, %v5916_v32  ;;  %v8931_v43 = vrot.slane %v8257_v49, 1  ;;  %v11018_v27 = vadd.f32 %v11786_v30, %v15341_v11 }
 0x6e4   :  { %v9609_v62 = vadd.f32 %v15635_v15, %v9378_v28  ;;  %v10699_v46 = vsel %vm10290_vm1, %v10286_v63, 0.0 }
 0x6e5   :  { %v10056_v36 = vmax.f32 %v9608_v25, %v9832_v3  ;;  %v8483_v1 = vadd.f32 %v8255_v13, %v6818_v14  ;;  %v10700_v56 = vadd.f32 %v10699_v46, %v10698_v54 }
 0x6e6   :  { %v9833_v24 = vmul.f32 0.2, %v9609_v62 }
 0x6e7   :  { %v10287_v6 = vmul.f32 %v15697_v51, %v10056_v36  ;;  %v9379_v4 = vadd.f32 %v8931_v43, %v8483_v1  ;;  %v11022_v51 = vsub.f32 0.0, %v11018_v27 }
 0x6e8   :  { %v10057_v57 = vmax.f32 %v9609_v62, %v9833_v24 }
 0x6e9   :  { %v10701_v10 = vsel %vm10290_vm1, %v10287_v6, 0.0  ;;  %v9610_v18 = vadd.f32 %v15635_v15, %v9379_v4  ;;  %v11027_v15 = vmul.f32 1.442695, %v11022_v51 }
 0x6ea   :  { %v10702_v45 = vadd.f32 %v10701_v10, %v10700_v56  ;;  %v10288_v44 = vmul.f32 %v15705_v53, %v10057_v57  ;;  %v11029_v53 = vmul.f32 1.442695, %v11023_v0 }
 0x6eb   :  { %v9834_v9 = vmul.f32 0.2, %v9610_v18  ;;  %11654 = vpow2.f32 %v11027_v15 }
 0x6ec   :  { %v10703_v58 = vsel %vm10290_vm1, %v10288_v44, 0.0  ;;  %11656 = vpow2.f32 %v11029_v53 }
 0x6ed   :  { %v10058_v50 = vmax.f32 %v9610_v18, %v9834_v9  ;;  %v10704_v35 = vadd.f32 %v10703_v58, %v10702_v45 }
 0x6ef   :  { %v10289_v2 = vmul.f32 %v15712_v61, %v10058_v50 }
 0x6f1   :  { %v10705_v52 = vsel %vm10290_vm1, %v10289_v2, 0.0 }
 0x6f2   :  { %v10706_v41 = vadd.f32 %v10705_v52, %v10704_v35 }
 0x6f4   :  { %v10924_v26 = vsel %vm10290_vm1, %v10706_v41, 0.0 }
 0x6f5   :  { %v10925_v11 = vrot.slane %v10924_v26, 4  ;;  %v11655_v60 = vpop.eup %11654 }
 0x6f6   :  { %v11034_v61 = vadd.f32 1.0, %v11655_v60  ;;  %v11657_v16 = vpop.eup %11656 }
 0x6f7   :  { %v10926_v17 = vadd.f32 %v10925_v11, %v10924_v26  ;;  %v11035_v42 = vadd.f32 1.0, %v11657_v16 }
 0x6f8   :  { %11658 = vrcp.f32 %v11034_v61 }
 0x6f9   :  { %v10927_v19 = vrot.slane %v10926_v17, 2  ;;  %11660 = vrcp.f32 %v11035_v42 }
 0x6fb   :  { %v10928_v59 = vadd.f32 %v10927_v19, %v10926_v17 }
 0x6fd   :  { %v10929_v20 = vrot.slane %v10928_v59, 1 }
 0x6ff   :  { %v10930_v33 = vadd.f32 %v10929_v20, %v10928_v59 }
 0x701   :  { %v10997_v40 = vsel %vm10975_vm8, %v10930_v33, %v10996_v38 }
 0x702   :  { %11008 = vadd.xlane.f32.xlu1 %v10997_v40  ;;  %v11659_v21 = vpop.eup %11658 }
 0x703   :  { %v11661_v32 = vpop.eup %11660 }
 0x713   :  { %11052 = vperm.xlu1 %11413, %v11659_v21  }
 0x717   :  { %11057 = vperm.xlu1 %11413, %v11661_v32  }
 0x78f   :  { %v11009_v39 = vpop.xlane.xlu1 %11008 }
 0x790   :  { %v11020_v22 = vadd.f32 %v11786_v30, %v11009_v39 }
 0x792   :  { %v11024_v8 = vsub.f32 0.0, %v11020_v22 }
 0x793   :  { %v11053_v29 = vpop.permute.xlu1 %11052 }
 0x794   :  { %v11031_v47 = vmul.f32 1.442695, %v11024_v8  ;;  %11066 = vst [vmem:[%s15786_s8 + $0x8] sm:$0xff] %v11053_v29 }
 0x796   :  { %11662 = vpow2.f32 %v11031_v47 }
 0x797   :  { %v11058_v7 = vpop.permute.xlu1 %11057 }
 0x798   :  { %11067 = vst [vmem:[%s15786_s8 + $0x10] sm:$0xff] %v11058_v7 }
 0x7a0   :  { %v11663_v5 = vpop.eup %11662 }
 0x7a1   :  { %v11036_v25 = vadd.f32 1.0, %v11663_v5 }
 0x7a3   :  { %11664 = vrcp.f32 %v11036_v25 }
 0x7ad   :  { %v11665_v48 = vpop.eup %11664 }
 0x7ae   :  { %11062 = vperm.xlu1 %11413, %v11665_v48  }
 0x82d   :  { %v11063_v37 = vpop.permute.xlu1 %11062 }
 0x82e   :  { %11068 = vst [vmem:[%s15786_s8 + $0x18] sm:$0xff] %v11063_v37 }

</bundles_post_ra>
